<compile_context>
chip_gen: v7x
topology: tpu7x:2x2x1
jax: 0.10.0
libtpu: 0.0.40
codegen_flags: <defaults>
</compile_context>

<pallas_src>
import functools

import jax
import jax.numpy as jnp
from jax.experimental import pallas as pl
from jax.experimental.pallas import tpu as pltpu


def _round_up(x, m):
    return (x + m - 1) // m * m


def _cdiv(a, b):
    return (a + b - 1) // b


def _pad2(x, rows, cols):
    r, c = x.shape
    if r == rows and c == cols:
        return x
    return jnp.pad(x, ((0, rows - r), (0, cols - c)))


# ----------------------------------------------------------------------------
# Pallas kernel: fused  out = act(A @ B + bias), tiled over rows of A.
# Used for conv1 / conv2 (the only layers big enough to need row tiling).
# ----------------------------------------------------------------------------
def _gemm_bias_act_kernel(a_ref, b_ref, bias_ref, o_ref, *, apply_relu):
    acc = jnp.dot(a_ref[...], b_ref[...], preferred_element_type=jnp.float32)
    acc = acc + bias_ref[...]                  # (1, N) bias broadcasts over rows
    if apply_relu:
        acc = jnp.maximum(acc, 0.0)
    o_ref[...] = acc.astype(o_ref.dtype)


def gemm_bias_act(a, b, bias, apply_relu, out_dtype=jnp.bfloat16, max_tm=1024):
    """a: (M, K) bf16, b: (K, N) bf16, bias: (N,) -> (M, N) in `out_dtype`.

    Only M is tiled; K and N are full-dim blocks so weights/bias stay resident
    in VMEM across the grid.
    """
    M, K = a.shape
    Kb, N = b.shape
    assert K == Kb, (K, Kb)

    a = a.astype(jnp.bfloat16)                 # no-op: callers already pass bf16
    b = b.astype(jnp.bfloat16)
    bias2 = bias.reshape(1, N).astype(jnp.float32)

    # Even grid (>=2 steps) keeps both v7x TensorCores busy and balanced;
    # tm is a multiple of 16 so bf16 sublane tiles are fully packed.
    n_steps = max(2, 2 * _cdiv(_cdiv(M, max_tm), 2))
    tm = _round_up(_cdiv(M, n_steps), 16)
    Mp = tm * n_steps
    if Mp != M:
        a = jnp.pad(a, ((0, Mp - M), (0, 0)))

    out = pl.pallas_call(
        functools.partial(_gemm_bias_act_kernel, apply_relu=apply_relu),
        out_shape=jax.ShapeDtypeStruct((Mp, N), out_dtype),
        grid=(n_steps,),
        in_specs=[
            pl.BlockSpec((tm, K), lambda i: (i, 0)),   # streamed row tiles
            pl.BlockSpec((K, N), lambda i: (0, 0)),    # weights resident
            pl.BlockSpec((1, N), lambda i: (0, 0)),    # bias resident
        ],
        out_specs=pl.BlockSpec((tm, N), lambda i: (i, 0)),
        compiler_params=pltpu.CompilerParams(
            dimension_semantics=("parallel",),
            vmem_limit_bytes=32 * 1024 * 1024),
    )(a, b, bias2)
    return out[:M] if Mp != M else out


# ----------------------------------------------------------------------------
# im2col glue (plain JAX, NHWC, bf16 in -> bf16 out)
# ----------------------------------------------------------------------------
def _im2col_nhwc(x, kh, kw, stride):
    """x: (B, H, W, C) -> patches (B*OH*OW, kh*kw*C) in (kh, kw, C) order."""
    B, H, W, C = x.shape
    OH = (H - kh) // stride + 1
    OW = (W - kw) // stride + 1
    cols = []
    for i in range(kh):
        for j in range(kw):
            cols.append(x[:, i:i + stride * OH:stride,
                          j:j + stride * OW:stride, :])
    p = jnp.concatenate(cols, axis=-1)                 # (B, OH, OW, kh*kw*C)
    return p.reshape(B * OH * OW, kh * kw * C), OH, OW


def conv2d_act_nhwc(x, w, b, stride, apply_relu=True):
    """x: (B,H,W,Cin) NHWC bf16; w: (Cout,Cin,KH,KW) torch layout; b: (Cout,)."""
    B = x.shape[0]
    Cout, Cin, KH, KW = w.shape
    patches, OH, OW = _im2col_nhwc(x, KH, KW, stride)
    w_mat = jnp.transpose(w, (2, 3, 1, 0)).reshape(KH * KW * Cin, Cout)
    w_mat = w_mat.astype(jnp.bfloat16)
    out = gemm_bias_act(patches, w_mat, b, apply_relu)  # (B*OH*OW, Cout)
    return out.reshape(B, OH, OW, Cout)


# ----------------------------------------------------------------------------
# Fused tail: conv3 + conv4 + conv5 + flatten + fc1..fc4 in ONE Pallas launch.
# Grid is (batch,); every activation of the tail lives in VMEM only.
# ----------------------------------------------------------------------------
_H3, _W3 = 5, 22           # conv3 output grid
_H4, _W4 = 3, 20           # conv4 output grid
_W5 = 18                   # conv5 output width (height 1)
_C3, _C4, _C5 = 48, 64, 64
_K3 = 5 * 5 * 36           # conv3 im2col patch length
_FCP = 128                 # every FC width padded to one full lane group
_H4STRIDE = 24             # 8-aligned row stride for the conv4 scratch blocks


def _tail_kernel(p3_ref, w3_ref, b3_ref, w4_ref, b4_ref, w5_ref, b5_ref,
                 w1_ref, b1_ref, w2_ref, b2_ref, wf3_ref, bf3_ref,
                 wf4_ref, bf4_ref, o_ref, h3_scr, h4_scr, h5_scr):
    # conv3: plain GEMM on the pre-built (110, 900) patch matrix.
    h3 = jnp.dot(p3_ref[0], w3_ref[...], preferred_element_type=jnp.float32)
    h3_scr[...] = jnp.maximum(h3 + b3_ref[...], 0.0).astype(jnp.bfloat16)

    # conv4 (3x3, stride 1) on the (5, 22, 48) grid held row-major in h3_scr:
    # shift-and-accumulate matmul per kernel tap (static ref slices only).
    for oh in range(_H4):
        acc = jnp.zeros((_W4, _C4), jnp.float32)
        for i in range(3):
            base = (oh + i) * _W3
            for j in range(3):
                rows = h3_scr[base + j:base + j + _W4, :]          # (20, 48)
                acc = acc + jnp.dot(rows, w4_ref[i * 3 + j],
                                    preferred_element_type=jnp.float32)
        h4_scr[oh * _H4STRIDE:oh * _H4STRIDE + _W4, :] = jnp.maximum(
            acc + b4_ref[...], 0.0).astype(jnp.bfloat16)

    # conv5 (3x3, stride 1) -> (18, 64); rows are the 18 output positions.
    acc5 = jnp.zeros((_W5, _C5), jnp.float32)
    for i in range(3):
        base = i * _H4STRIDE
        for j in range(3):
            rows = h4_scr[base + j:base + j + _W5, :]              # (18, 64)
            acc5 = acc5 + jnp.dot(rows, w5_ref[i * 3 + j],
                                  preferred_element_type=jnp.float32)
    h5_scr[...] = jnp.maximum(acc5 + b5_ref[...], 0.0).astype(jnp.bfloat16)

    # fc1: PyTorch's NCHW flatten (index = c*18 + w) is folded into the
    # (w, c, n)-permuted weight, so no in-kernel reshape/transpose is needed --
    # just contract the 18 spatial rows one small matmul each.
    acc1 = jnp.zeros((1, _FCP), jnp.float32)
    for w in range(_W5):
        acc1 = acc1 + jnp.dot(h5_scr[w:w + 1, :], w1_ref[w],
                              preferred_element_type=jnp.float32)
    h = jnp.maximum(acc1 + b1_ref[...], 0.0).astype(jnp.bfloat16)
    h = jnp.maximum(jnp.dot(h, w2_ref[...], preferred_element_type=jnp.float32)
                    + b2_ref[...], 0.0).astype(jnp.bfloat16)
    h = jnp.maximum(jnp.dot(h, wf3_ref[...], preferred_element_type=jnp.float32)
                    + bf3_ref[...], 0.0).astype(jnp.bfloat16)
    out = jnp.dot(h, wf4_ref[...], preferred_element_type=jnp.float32) + bf4_ref[...]
    o_ref[...] = out.reshape(1, 1, _FCP)      # full 128-lane (unmasked) store


def fused_tail(p3, params):
    """p3: (B, 110, 900) bf16 conv3 patch matrix -> (B, 5) f32 logits."""
    B = p3.shape[0]

    w3 = jnp.transpose(params["conv3_w"], (2, 3, 1, 0)).reshape(_K3, _C3)
    w3 = w3.astype(jnp.bfloat16)
    b3 = params["conv3_b"].reshape(1, _C3).astype(jnp.float32)
    w4 = jnp.transpose(params["conv4_w"], (2, 3, 1, 0)).reshape(9, _C3, _C4)
    w4 = w4.astype(jnp.bfloat16)
    b4 = params["conv4_b"].reshape(1, _C4).astype(jnp.float32)
    w5 = jnp.transpose(params["conv5_w"], (2, 3, 1, 0)).reshape(9, _C4, _C5)
    w5 = w5.astype(jnp.bfloat16)
    b5 = params["conv5_b"].reshape(1, _C5).astype(jnp.float32)

    # fc1: absorb the NCHW flatten order (idx = c*18 + w) into a (w, c, n) weight.
    w1 = params["fc1_w"].reshape(100, _C5, _W5)          # (n, c, w)
    w1 = jnp.transpose(w1, (2, 1, 0))                    # (w, c, n) = (18, 64, 100)
    w1 = jnp.pad(w1, ((0, 0), (0, 0), (0, _FCP - 100))).astype(jnp.bfloat16)
    b1 = _pad2(params["fc1_b"].reshape(1, 100), 1, _FCP).astype(jnp.float32)

    # fc2..fc4: zero-pad to 128 lanes; padded lanes stay 0 through bias+ReLU.
    w2 = _pad2(params["fc2_w"].T, _FCP, _FCP).astype(jnp.bfloat16)
    b2 = _pad2(params["fc2_b"].reshape(1, -1), 1, _FCP).astype(jnp.float32)
    wf3 = _pad2(params["fc3_w"].T, _FCP, _FCP).astype(jnp.bfloat16)
    bf3 = _pad2(params["fc3_b"].reshape(1, -1), 1, _FCP).astype(jnp.float32)
    wf4 = _pad2(params["fc4_w"].T, _FCP, _FCP).astype(jnp.bfloat16)
    bf4 = _pad2(params["fc4_b"].reshape(1, -1), 1, _FCP).astype(jnp.float32)

    res = pl.pallas_call(
        _tail_kernel,
        out_shape=jax.ShapeDtypeStruct((B, 1, _FCP), jnp.float32),
        grid=(B,),
        in_specs=[
            pl.BlockSpec((1, _H3 * _W3, _K3), lambda b: (b, 0, 0)),   # per-batch patches
            pl.BlockSpec((_K3, _C3), lambda b: (0, 0)),               # conv3 W (resident)
            pl.BlockSpec((1, _C3), lambda b: (0, 0)),
            pl.BlockSpec((9, _C3, _C4), lambda b: (0, 0, 0)),         # conv4 W per-tap
            pl.BlockSpec((1, _C4), lambda b: (0, 0)),
            pl.BlockSpec((9, _C4, _C5), lambda b: (0, 0, 0)),         # conv5 W per-tap
            pl.BlockSpec((1, _C5), lambda b: (0, 0)),
            pl.BlockSpec((_W5, _C5, _FCP), lambda b: (0, 0, 0)),      # fc1 W (w,c,n)
            pl.BlockSpec((1, _FCP), lambda b: (0, 0)),
            pl.BlockSpec((_FCP, _FCP), lambda b: (0, 0)),             # fc2
            pl.BlockSpec((1, _FCP), lambda b: (0, 0)),
            pl.BlockSpec((_FCP, _FCP), lambda b: (0, 0)),             # fc3
            pl.BlockSpec((1, _FCP), lambda b: (0, 0)),
            pl.BlockSpec((_FCP, _FCP), lambda b: (0, 0)),             # fc4
            pl.BlockSpec((1, _FCP), lambda b: (0, 0)),
        ],
        out_specs=pl.BlockSpec((1, 1, _FCP), lambda b: (b, 0, 0)),
        scratch_shapes=[
            pltpu.VMEM((_H3 * _W3, _C3), jnp.bfloat16),               # conv3 out
            pltpu.VMEM((_H4 * _H4STRIDE, _C4), jnp.bfloat16),         # conv4 out (padded rows)
            pltpu.VMEM((_W5, _C5), jnp.bfloat16),                     # conv5 out
        ],
        compiler_params=pltpu.CompilerParams(
            dimension_semantics=("parallel",),
            vmem_limit_bytes=32 * 1024 * 1024),
    )(p3, w3, b3, w4, b4, w5, b5, w1, b1, w2, b2, wf3, bf3, wf4, bf4)
    return res[:, 0, :5]


# ----------------------------------------------------------------------------
# Deterministic parameter init (PyTorch-default-style uniform, fan_in based)
# ----------------------------------------------------------------------------
def init_params(key):
    def u(key, shape, fan_in):
        bound = 1.0 / jnp.sqrt(jnp.float32(fan_in))
        return jax.random.uniform(key, shape, jnp.float32, -bound, bound)

    specs = {
        "conv1": ((24, 3, 5, 5), 3 * 5 * 5),
        "conv2": ((36, 24, 5, 5), 24 * 5 * 5),
        "conv3": ((48, 36, 5, 5), 36 * 5 * 5),
        "conv4": ((64, 48, 3, 3), 48 * 3 * 3),
        "conv5": ((64, 64, 3, 3), 64 * 3 * 3),
        "fc1": ((100, 64 * 1 * 18), 64 * 1 * 18),
        "fc2": ((50, 100), 100),
        "fc3": ((10, 50), 50),
        "fc4": ((5, 10), 10),
    }
    params = {}
    keys = jax.random.split(key, 2 * len(specs))
    for idx, (name, (wshape, fan_in)) in enumerate(specs.items()):
        params[name + "_w"] = u(keys[2 * idx], wshape, fan_in)
        params[name + "_b"] = u(keys[2 * idx + 1], (wshape[0],), fan_in)
    return params


# ----------------------------------------------------------------------------
# PilotNet forward: 3 Pallas launches total (conv1, conv2, fused tail).
# ----------------------------------------------------------------------------
def pilotnet_forward(params, x):
    # x: (B, 3, 66, 200) NCHW f32 (66x200 fixed by fc1 = 64*1*18).
    # Single layout change + single bf16 cast at the input; everything
    # downstream stays channels-last bf16.
    x = jnp.transpose(x, (0, 2, 3, 1)).astype(jnp.bfloat16)             # NHWC bf16
    x = conv2d_act_nhwc(x, params["conv1_w"], params["conv1_b"], 2)     # (B,31,98,24)
    x = conv2d_act_nhwc(x, params["conv2_w"], params["conv2_b"], 2)     # (B,14,47,36)
    B = x.shape[0]
    # Small conv3 patch matrix built with XLA glue; conv3..conv5 + flatten +
    # the full FC head then run in ONE fused Pallas launch.
    p3, oh3, ow3 = _im2col_nhwc(x, 5, 5, 2)                             # (B*110, 900)
    p3 = p3.reshape(B, oh3 * ow3, _K3)
    return fused_tail(p3, params)                                       # (B, 5) f32


if __name__ == "__main__":
    key = jax.random.PRNGKey(0)
    pkey, xkey = jax.random.split(key)
    params = init_params(pkey)
    # Batch kept small; spatial dims 66x200 are fixed by the module's fc shape.
    x = jax.random.normal(xkey, (2, 3, 66, 200), dtype=jnp.float32)

    fwd = jax.jit(pilotnet_forward)
    out = jax.block_until_ready(fwd(params, x))
    assert out.shape == (2, 5), out.shape
    print("KERNEL_OK")
</pallas_src>

<mosaic_0001>
module attributes {stable_mosaic.version = 11 : i64} {
  func.func @_gemm_bias_act_kernel(%arg0: i32, %arg1: memref<1024x75xbf16, #tpu.memory_space<vmem>>, %arg2: memref<75x24xbf16, #tpu.memory_space<vmem>>, %arg3: memref<1x24xf32, #tpu.memory_space<vmem>>, %arg4: memref<1024x24xbf16, #tpu.memory_space<vmem>>) attributes {dimension_semantics = [#tpu.dimension_semantics<parallel>], iteration_bounds = array<i64: 6>, scalar_prefetch = 0 : i64, scratch_operands = 0 : i64, tpu.core_type = #tpu.core_type<tc>, window_params = [{transform_indices = @transform_0, window_bounds = array<i64: 1024, 75>}, {pipeline_mode = #tpu.pipeline_mode<synchronous>, transform_indices = @transform_1, window_bounds = array<i64: 75, 24>}, {pipeline_mode = #tpu.pipeline_mode<synchronous>, transform_indices = @transform_2, window_bounds = array<i64: 1, 24>}, {transform_indices = @transform_3, window_bounds = array<i64: 1024, 24>}]} {
    %c0 = arith.constant 0 : index
    %c0_0 = arith.constant 0 : index
    %0 = vector.load %arg1[%c0, %c0_0] : memref<1024x75xbf16, #tpu.memory_space<vmem>>, vector<1024x75xbf16>
    %c0_1 = arith.constant 0 : index
    %c0_2 = arith.constant 0 : index
    %1 = vector.load %arg2[%c0_1, %c0_2] : memref<75x24xbf16, #tpu.memory_space<vmem>>, vector<75x24xbf16>
    %cst = arith.constant dense<0.000000e+00> : vector<1024x24xf32>
    %2 = tpu.matmul %0, %1, %cst {dimension_numbers = #tpu.dot_dimension_numbers<[1], [0], [0], [1], [0, 0, 1, 1], [], []>} : vector<1024x75xbf16>, vector<75x24xbf16>, vector<1024x24xf32> -> vector<1024x24xf32>
    %c0_3 = arith.constant 0 : index
    %c0_4 = arith.constant 0 : index
    %3 = vector.load %arg3[%c0_3, %c0_4] : memref<1x24xf32, #tpu.memory_space<vmem>>, vector<1x24xf32>
    %4 = vector.broadcast %3 : vector<1x24xf32> to vector<1024x24xf32>
    %5 = arith.addf %2, %4 : vector<1024x24xf32>
    %cst_5 = arith.constant 0.000000e+00 : f32
    %6 = vector.broadcast %cst_5 : f32 to vector<1024x24xf32>
    %7 = arith.maximumf %5, %6 : vector<1024x24xf32>
    %8 = arith.truncf %7 : vector<1024x24xf32> to vector<1024x24xbf16>
    %c0_6 = arith.constant 0 : index
    %c0_7 = arith.constant 0 : index
    %9 = vector.load %arg4[%c0_6, %c0_7] : memref<1024x24xbf16, #tpu.memory_space<vmem>>, vector<1024x24xbf16>
    tpu.vector_store %arg4[%c0_6, %c0_7], %8 {strides = array<i32>} : memref<1024x24xbf16, #tpu.memory_space<vmem>>, vector<1024x24xbf16>,
    return
  }
  func.func @transform_0(%arg0: i32) -> (i32, i32) {
    %c0_i32 = arith.constant 0 : i32
    %c0_i32_0 = arith.constant 0 : i32
    return %arg0, %c0_i32 : i32, i32
  }
  func.func @transform_1(%arg0: i32) -> (i32, i32) {
    %c0_i32 = arith.constant 0 : i32
    %c0_i32_0 = arith.constant 0 : i32
    %c0_i32_1 = arith.constant 0 : i32
    return %c0_i32, %c0_i32_0 : i32, i32
  }
  func.func @transform_2(%arg0: i32) -> (i32, i32) {
    %c0_i32 = arith.constant 0 : i32
    %c0_i32_0 = arith.constant 0 : i32
    %c0_i32_1 = arith.constant 0 : i32
    return %c0_i32, %c0_i32_0 : i32, i32
  }
  func.func @transform_3(%arg0: i32) -> (i32, i32) {
    %c0_i32 = arith.constant 0 : i32
    %c0_i32_0 = arith.constant 0 : i32
    return %arg0, %c0_i32 : i32, i32
  }
}

module attributes {stable_mosaic.version = 11 : i64} {
  func.func @_gemm_bias_act_kernel(%arg0: i32, %arg1: memref<672x600xbf16, #tpu.memory_space<vmem>>, %arg2: memref<600x36xbf16, #tpu.memory_space<vmem>>, %arg3: memref<1x36xf32, #tpu.memory_space<vmem>>, %arg4: memref<672x36xbf16, #tpu.memory_space<vmem>>) attributes {dimension_semantics = [#tpu.dimension_semantics<parallel>], iteration_bounds = array<i64: 2>, scalar_prefetch = 0 : i64, scratch_operands = 0 : i64, tpu.core_type = #tpu.core_type<tc>, window_params = [{transform_indices = @transform_0, window_bounds = array<i64: 672, 600>}, {pipeline_mode = #tpu.pipeline_mode<synchronous>, transform_indices = @transform_1, window_bounds = array<i64: 600, 36>}, {pipeline_mode = #tpu.pipeline_mode<synchronous>, transform_indices = @transform_2, window_bounds = array<i64: 1, 36>}, {transform_indices = @transform_3, window_bounds = array<i64: 672, 36>}]} {
    %c0 = arith.constant 0 : index
    %c0_0 = arith.constant 0 : index
    %0 = vector.load %arg1[%c0, %c0_0] : memref<672x600xbf16, #tpu.memory_space<vmem>>, vector<672x600xbf16>
    %c0_1 = arith.constant 0 : index
    %c0_2 = arith.constant 0 : index
    %1 = vector.load %arg2[%c0_1, %c0_2] : memref<600x36xbf16, #tpu.memory_space<vmem>>, vector<600x36xbf16>
    %cst = arith.constant dense<0.000000e+00> : vector<672x36xf32>
    %2 = tpu.matmul %0, %1, %cst {dimension_numbers = #tpu.dot_dimension_numbers<[1], [0], [0], [1], [0, 0, 1, 1], [], []>} : vector<672x600xbf16>, vector<600x36xbf16>, vector<672x36xf32> -> vector<672x36xf32>
    %c0_3 = arith.constant 0 : index
    %c0_4 = arith.constant 0 : index
    %3 = vector.load %arg3[%c0_3, %c0_4] : memref<1x36xf32, #tpu.memory_space<vmem>>, vector<1x36xf32>
    %4 = vector.broadcast %3 : vector<1x36xf32> to vector<672x36xf32>
    %5 = arith.addf %2, %4 : vector<672x36xf32>
    %cst_5 = arith.constant 0.000000e+00 : f32
    %6 = vector.broadcast %cst_5 : f32 to vector<672x36xf32>
    %7 = arith.maximumf %5, %6 : vector<672x36xf32>
    %8 = arith.truncf %7 : vector<672x36xf32> to vector<672x36xbf16>
    %c0_6 = arith.constant 0 : index
    %c0_7 = arith.constant 0 : index
    %9 = vector.load %arg4[%c0_6, %c0_7] : memref<672x36xbf16, #tpu.memory_space<vmem>>, vector<672x36xbf16>
    tpu.vector_store %arg4[%c0_6, %c0_7], %8 {strides = array<i32>} : memref<672x36xbf16, #tpu.memory_space<vmem>>, vector<672x36xbf16>,
    return
  }
  func.func @transform_0(%arg0: i32) -> (i32, i32) {
    %c0_i32 = arith.constant 0 : i32
    %c0_i32_0 = arith.constant 0 : i32
    return %arg0, %c0_i32 : i32, i32
  }
  func.func @transform_1(%arg0: i32) -> (i32, i32) {
    %c0_i32 = arith.constant 0 : i32
    %c0_i32_0 = arith.constant 0 : i32
    %c0_i32_1 = arith.constant 0 : i32
    return %c0_i32, %c0_i32_0 : i32, i32
  }
  func.func @transform_2(%arg0: i32) -> (i32, i32) {
    %c0_i32 = arith.constant 0 : i32
    %c0_i32_0 = arith.constant 0 : i32
    %c0_i32_1 = arith.constant 0 : i32
    return %c0_i32, %c0_i32_0 : i32, i32
  }
  func.func @transform_3(%arg0: i32) -> (i32, i32) {
    %c0_i32 = arith.constant 0 : i32
    %c0_i32_0 = arith.constant 0 : i32
    return %arg0, %c0_i32 : i32, i32
  }
}

module attributes {stable_mosaic.version = 11 : i64} {
  func.func @_tail_kernel(%arg0: i32, %arg1: memref<1x110x900xbf16, #tpu.memory_space<vmem>>, %arg2: memref<900x48xbf16, #tpu.memory_space<vmem>>, %arg3: memref<1x48xf32, #tpu.memory_space<vmem>>, %arg4: memref<9x48x64xbf16, #tpu.memory_space<vmem>>, %arg5: memref<1x64xf32, #tpu.memory_space<vmem>>, %arg6: memref<9x64x64xbf16, #tpu.memory_space<vmem>>, %arg7: memref<1x64xf32, #tpu.memory_space<vmem>>, %arg8: memref<18x64x128xbf16, #tpu.memory_space<vmem>>, %arg9: memref<1x128xf32, #tpu.memory_space<vmem>>, %arg10: memref<128x128xbf16, #tpu.memory_space<vmem>>, %arg11: memref<1x128xf32, #tpu.memory_space<vmem>>, %arg12: memref<128x128xbf16, #tpu.memory_space<vmem>>, %arg13: memref<1x128xf32, #tpu.memory_space<vmem>>, %arg14: memref<128x128xbf16, #tpu.memory_space<vmem>>, %arg15: memref<1x128xf32, #tpu.memory_space<vmem>>, %arg16: memref<1x1x128xf32, #tpu.memory_space<vmem>>, %arg17: memref<110x48xbf16, #tpu.memory_space<vmem>>, %arg18: memref<72x64xbf16, #tpu.memory_space<vmem>>, %arg19: memref<18x64xbf16, #tpu.memory_space<vmem>>) attributes {dimension_semantics = [#tpu.dimension_semantics<parallel>], iteration_bounds = array<i64: 2>, scalar_prefetch = 0 : i64, scratch_operands = 3 : i64, tpu.core_type = #tpu.core_type<tc>, window_params = [{transform_indices = @transform_0, window_bounds = array<i64: 1, 110, 900>}, {pipeline_mode = #tpu.pipeline_mode<synchronous>, transform_indices = @transform_1, window_bounds = array<i64: 900, 48>}, {pipeline_mode = #tpu.pipeline_mode<synchronous>, transform_indices = @transform_2, window_bounds = array<i64: 1, 48>}, {pipeline_mode = #tpu.pipeline_mode<synchronous>, transform_indices = @transform_3, window_bounds = array<i64: 9, 48, 64>}, {pipeline_mode = #tpu.pipeline_mode<synchronous>, transform_indices = @transform_4, window_bounds = array<i64: 1, 64>}, {pipeline_mode = #tpu.pipeline_mode<synchronous>, transform_indices = @transform_5, window_bounds = array<i64: 9, 64, 64>}, {pipeline_mode = #tpu.pipeline_mode<synchronous>, transform_indices = @transform_6, window_bounds = array<i64: 1, 64>}, {pipeline_mode = #tpu.pipeline_mode<synchronous>, transform_indices = @transform_7, window_bounds = array<i64: 18, 64, 128>}, {pipeline_mode = #tpu.pipeline_mode<synchronous>, transform_indices = @transform_8, window_bounds = array<i64: 1, 128>}, {pipeline_mode = #tpu.pipeline_mode<synchronous>, transform_indices = @transform_9, window_bounds = array<i64: 128, 128>}, {pipeline_mode = #tpu.pipeline_mode<synchronous>, transform_indices = @transform_10, window_bounds = array<i64: 1, 128>}, {pipeline_mode = #tpu.pipeline_mode<synchronous>, transform_indices = @transform_11, window_bounds = array<i64: 128, 128>}, {pipeline_mode = #tpu.pipeline_mode<synchronous>, transform_indices = @transform_12, window_bounds = array<i64: 1, 128>}, {pipeline_mode = #tpu.pipeline_mode<synchronous>, transform_indices = @transform_13, window_bounds = array<i64: 128, 128>}, {pipeline_mode = #tpu.pipeline_mode<synchronous>, transform_indices = @transform_14, window_bounds = array<i64: 1, 128>}, {transform_indices = @transform_15, window_bounds = array<i64: 1, 1, 128>}]} {
    %c0 = arith.constant 0 : index
    %c0_0 = arith.constant 0 : index
    %c0_1 = arith.constant 0 : index
    %0 = vector.load %arg1[%c0, %c0_0, %c0_1] : memref<1x110x900xbf16, #tpu.memory_space<vmem>>, vector<1x110x900xbf16>
    %1 = vector.shape_cast %0 : vector<1x110x900xbf16> to vector<110x900xbf16>
    %c0_2 = arith.constant 0 : index
    %c0_3 = arith.constant 0 : index
    %2 = vector.load %arg2[%c0_2, %c0_3] : memref<900x48xbf16, #tpu.memory_space<vmem>>, vector<900x48xbf16>
    %cst = arith.constant dense<0.000000e+00> : vector<110x48xf32>
    %3 = tpu.matmul %1, %2, %cst {dimension_numbers = #tpu.dot_dimension_numbers<[1], [0], [0], [1], [0, 0, 1, 1], [], []>} : vector<110x900xbf16>, vector<900x48xbf16>, vector<110x48xf32> -> vector<110x48xf32>
    %c0_4 = arith.constant 0 : index
    %c0_5 = arith.constant 0 : index
    %4 = vector.load %arg3[%c0_4, %c0_5] : memref<1x48xf32, #tpu.memory_space<vmem>>, vector<1x48xf32>
    %5 = vector.broadcast %4 : vector<1x48xf32> to vector<110x48xf32>
    %6 = arith.addf %3, %5 : vector<110x48xf32>
    %cst_6 = arith.constant 0.000000e+00 : f32
    %7 = vector.broadcast %cst_6 : f32 to vector<110x48xf32>
    %8 = arith.maximumf %6, %7 : vector<110x48xf32>
    %9 = arith.truncf %8 : vector<110x48xf32> to vector<110x48xbf16>
    %c0_7 = arith.constant 0 : index
    %c0_8 = arith.constant 0 : index
    %10 = vector.load %arg17[%c0_7, %c0_8] : memref<110x48xbf16, #tpu.memory_space<vmem>>, vector<110x48xbf16>
    tpu.vector_store %arg17[%c0_7, %c0_8], %9 {strides = array<i32>} : memref<110x48xbf16, #tpu.memory_space<vmem>>, vector<110x48xbf16>,
    %cst_9 = arith.constant 0.000000e+00 : f32
    %11 = vector.broadcast %cst_9 : f32 to vector<20x64xf32>
    %c0_10 = arith.constant 0 : index
    %c0_11 = arith.constant 0 : index
    %12 = vector.load %arg17[%c0_10, %c0_11] : memref<110x48xbf16, #tpu.memory_space<vmem>>, vector<20x48xbf16>
    %c0_12 = arith.constant 0 : index
    %c0_13 = arith.constant 0 : index
    %c0_14 = arith.constant 0 : index
    %13 = vector.load %arg4[%c0_12, %c0_13, %c0_14] : memref<9x48x64xbf16, #tpu.memory_space<vmem>>, vector<1x48x64xbf16>
    %14 = vector.shape_cast %13 : vector<1x48x64xbf16> to vector<48x64xbf16>
    %cst_15 = arith.constant dense<0.000000e+00> : vector<20x64xf32>
    %15 = tpu.matmul %12, %14, %cst_15 {dimension_numbers = #tpu.dot_dimension_numbers<[1], [0], [0], [1], [0, 0, 1, 1], [], []>} : vector<20x48xbf16>, vector<48x64xbf16>, vector<20x64xf32> -> vector<20x64xf32>
    %16 = arith.addf %11, %15 : vector<20x64xf32>
    %c1 = arith.constant 1 : index
    %c0_16 = arith.constant 0 : index
    %17 = vector.load %arg17[%c1, %c0_16] : memref<110x48xbf16, #tpu.memory_space<vmem>>, vector<20x48xbf16>
    %c1_17 = arith.constant 1 : index
    %c0_18 = arith.constant 0 : index
    %c0_19 = arith.constant 0 : index
    %18 = vector.load %arg4[%c1_17, %c0_18, %c0_19] : memref<9x48x64xbf16, #tpu.memory_space<vmem>>, vector<1x48x64xbf16>
    %19 = vector.shape_cast %18 : vector<1x48x64xbf16> to vector<48x64xbf16>
    %cst_20 = arith.constant dense<0.000000e+00> : vector<20x64xf32>
    %20 = tpu.matmul %17, %19, %cst_20 {dimension_numbers = #tpu.dot_dimension_numbers<[1], [0], [0], [1], [0, 0, 1, 1], [], []>} : vector<20x48xbf16>, vector<48x64xbf16>, vector<20x64xf32> -> vector<20x64xf32>
    %21 = arith.addf %16, %20 : vector<20x64xf32>
    %c2 = arith.constant 2 : index
    %c0_21 = arith.constant 0 : index
    %22 = vector.load %arg17[%c2, %c0_21] : memref<110x48xbf16, #tpu.memory_space<vmem>>, vector<20x48xbf16>
    %c2_22 = arith.constant 2 : index
    %c0_23 = arith.constant 0 : index
    %c0_24 = arith.constant 0 : index
    %23 = vector.load %arg4[%c2_22, %c0_23, %c0_24] : memref<9x48x64xbf16, #tpu.memory_space<vmem>>, vector<1x48x64xbf16>
    %24 = vector.shape_cast %23 : vector<1x48x64xbf16> to vector<48x64xbf16>
    %cst_25 = arith.constant dense<0.000000e+00> : vector<20x64xf32>
    %25 = tpu.matmul %22, %24, %cst_25 {dimension_numbers = #tpu.dot_dimension_numbers<[1], [0], [0], [1], [0, 0, 1, 1], [], []>} : vector<20x48xbf16>, vector<48x64xbf16>, vector<20x64xf32> -> vector<20x64xf32>
    %26 = arith.addf %21, %25 : vector<20x64xf32>
    %c22 = arith.constant 22 : index
    %c0_26 = arith.constant 0 : index
    %27 = vector.load %arg17[%c22, %c0_26] : memref<110x48xbf16, #tpu.memory_space<vmem>>, vector<20x48xbf16>
    %c3 = arith.constant 3 : index
    %c0_27 = arith.constant 0 : index
    %c0_28 = arith.constant 0 : index
    %28 = vector.load %arg4[%c3, %c0_27, %c0_28] : memref<9x48x64xbf16, #tpu.memory_space<vmem>>, vector<1x48x64xbf16>
    %29 = vector.shape_cast %28 : vector<1x48x64xbf16> to vector<48x64xbf16>
    %cst_29 = arith.constant dense<0.000000e+00> : vector<20x64xf32>
    %30 = tpu.matmul %27, %29, %cst_29 {dimension_numbers = #tpu.dot_dimension_numbers<[1], [0], [0], [1], [0, 0, 1, 1], [], []>} : vector<20x48xbf16>, vector<48x64xbf16>, vector<20x64xf32> -> vector<20x64xf32>
    %31 = arith.addf %26, %30 : vector<20x64xf32>
    %c23 = arith.constant 23 : index
    %c0_30 = arith.constant 0 : index
    %32 = vector.load %arg17[%c23, %c0_30] : memref<110x48xbf16, #tpu.memory_space<vmem>>, vector<20x48xbf16>
    %c4 = arith.constant 4 : index
    %c0_31 = arith.constant 0 : index
    %c0_32 = arith.constant 0 : index
    %33 = vector.load %arg4[%c4, %c0_31, %c0_32] : memref<9x48x64xbf16, #tpu.memory_space<vmem>>, vector<1x48x64xbf16>
    %34 = vector.shape_cast %33 : vector<1x48x64xbf16> to vector<48x64xbf16>
    %cst_33 = arith.constant dense<0.000000e+00> : vector<20x64xf32>
    %35 = tpu.matmul %32, %34, %cst_33 {dimension_numbers = #tpu.dot_dimension_numbers<[1], [0], [0], [1], [0, 0, 1, 1], [], []>} : vector<20x48xbf16>, vector<48x64xbf16>, vector<20x64xf32> -> vector<20x64xf32>
    %36 = arith.addf %31, %35 : vector<20x64xf32>
    %c24 = arith.constant 24 : index
    %c0_34 = arith.constant 0 : index
    %37 = vector.load %arg17[%c24, %c0_34] : memref<110x48xbf16, #tpu.memory_space<vmem>>, vector<20x48xbf16>
    %c5 = arith.constant 5 : index
    %c0_35 = arith.constant 0 : index
    %c0_36 = arith.constant 0 : index
    %38 = vector.load %arg4[%c5, %c0_35, %c0_36] : memref<9x48x64xbf16, #tpu.memory_space<vmem>>, vector<1x48x64xbf16>
    %39 = vector.shape_cast %38 : vector<1x48x64xbf16> to vector<48x64xbf16>
    %cst_37 = arith.constant dense<0.000000e+00> : vector<20x64xf32>
    %40 = tpu.matmul %37, %39, %cst_37 {dimension_numbers = #tpu.dot_dimension_numbers<[1], [0], [0], [1], [0, 0, 1, 1], [], []>} : vector<20x48xbf16>, vector<48x64xbf16>, vector<20x64xf32> -> vector<20x64xf32>
    %41 = arith.addf %36, %40 : vector<20x64xf32>
    %c44 = arith.constant 44 : index
    %c0_38 = arith.constant 0 : index
    %42 = vector.load %arg17[%c44, %c0_38] : memref<110x48xbf16, #tpu.memory_space<vmem>>, vector<20x48xbf16>
    %c6 = arith.constant 6 : index
    %c0_39 = arith.constant 0 : index
    %c0_40 = arith.constant 0 : index
    %43 = vector.load %arg4[%c6, %c0_39, %c0_40] : memref<9x48x64xbf16, #tpu.memory_space<vmem>>, vector<1x48x64xbf16>
    %44 = vector.shape_cast %43 : vector<1x48x64xbf16> to vector<48x64xbf16>
    %cst_41 = arith.constant dense<0.000000e+00> : vector<20x64xf32>
    %45 = tpu.matmul %42, %44, %cst_41 {dimension_numbers = #tpu.dot_dimension_numbers<[1], [0], [0], [1], [0, 0, 1, 1], [], []>} : vector<20x48xbf16>, vector<48x64xbf16>, vector<20x64xf32> -> vector<20x64xf32>
    %46 = arith.addf %41, %45 : vector<20x64xf32>
    %c45 = arith.constant 45 : index
    %c0_42 = arith.constant 0 : index
    %47 = vector.load %arg17[%c45, %c0_42] : memref<110x48xbf16, #tpu.memory_space<vmem>>, vector<20x48xbf16>
    %c7 = arith.constant 7 : index
    %c0_43 = arith.constant 0 : index
    %c0_44 = arith.constant 0 : index
    %48 = vector.load %arg4[%c7, %c0_43, %c0_44] : memref<9x48x64xbf16, #tpu.memory_space<vmem>>, vector<1x48x64xbf16>
    %49 = vector.shape_cast %48 : vector<1x48x64xbf16> to vector<48x64xbf16>
    %cst_45 = arith.constant dense<0.000000e+00> : vector<20x64xf32>
    %50 = tpu.matmul %47, %49, %cst_45 {dimension_numbers = #tpu.dot_dimension_numbers<[1], [0], [0], [1], [0, 0, 1, 1], [], []>} : vector<20x48xbf16>, vector<48x64xbf16>, vector<20x64xf32> -> vector<20x64xf32>
    %51 = arith.addf %46, %50 : vector<20x64xf32>
    %c46 = arith.constant 46 : index
    %c0_46 = arith.constant 0 : index
    %52 = vector.load %arg17[%c46, %c0_46] : memref<110x48xbf16, #tpu.memory_space<vmem>>, vector<20x48xbf16>
    %c8 = arith.constant 8 : index
    %c0_47 = arith.constant 0 : index
    %c0_48 = arith.constant 0 : index
    %53 = vector.load %arg4[%c8, %c0_47, %c0_48] : memref<9x48x64xbf16, #tpu.memory_space<vmem>>, vector<1x48x64xbf16>
    %54 = vector.shape_cast %53 : vector<1x48x64xbf16> to vector<48x64xbf16>
    %cst_49 = arith.constant dense<0.000000e+00> : vector<20x64xf32>
    %55 = tpu.matmul %52, %54, %cst_49 {dimension_numbers = #tpu.dot_dimension_numbers<[1], [0], [0], [1], [0, 0, 1, 1], [], []>} : vector<20x48xbf16>, vector<48x64xbf16>, vector<20x64xf32> -> vector<20x64xf32>
    %56 = arith.addf %51, %55 : vector<20x64xf32>
    %c0_50 = arith.constant 0 : index
    %c0_51 = arith.constant 0 : index
    %57 = vector.load %arg5[%c0_50, %c0_51] : memref<1x64xf32, #tpu.memory_space<vmem>>, vector<1x64xf32>
    %58 = vector.broadcast %57 : vector<1x64xf32> to vector<20x64xf32>
    %59 = arith.addf %56, %58 : vector<20x64xf32>
    %cst_52 = arith.constant 0.000000e+00 : f32
    %60 = vector.broadcast %cst_52 : f32 to vector<20x64xf32>
    %61 = arith.maximumf %59, %60 : vector<20x64xf32>
    %62 = arith.truncf %61 : vector<20x64xf32> to vector<20x64xbf16>
    %c0_53 = arith.constant 0 : index
    %c0_54 = arith.constant 0 : index
    %63 = vector.load %arg18[%c0_53, %c0_54] : memref<72x64xbf16, #tpu.memory_space<vmem>>, vector<20x64xbf16>
    tpu.vector_store %arg18[%c0_53, %c0_54], %62 {strides = array<i32>} : memref<72x64xbf16, #tpu.memory_space<vmem>>, vector<20x64xbf16>,
    %cst_55 = arith.constant 0.000000e+00 : f32
    %64 = vector.broadcast %cst_55 : f32 to vector<20x64xf32>
    %c22_56 = arith.constant 22 : index
    %c0_57 = arith.constant 0 : index
    %65 = vector.load %arg17[%c22_56, %c0_57] : memref<110x48xbf16, #tpu.memory_space<vmem>>, vector<20x48xbf16>
    %c0_58 = arith.constant 0 : index
    %c0_59 = arith.constant 0 : index
    %c0_60 = arith.constant 0 : index
    %66 = vector.load %arg4[%c0_58, %c0_59, %c0_60] : memref<9x48x64xbf16, #tpu.memory_space<vmem>>, vector<1x48x64xbf16>
    %67 = vector.shape_cast %66 : vector<1x48x64xbf16> to vector<48x64xbf16>
    %cst_61 = arith.constant dense<0.000000e+00> : vector<20x64xf32>
    %68 = tpu.matmul %65, %67, %cst_61 {dimension_numbers = #tpu.dot_dimension_numbers<[1], [0], [0], [1], [0, 0, 1, 1], [], []>} : vector<20x48xbf16>, vector<48x64xbf16>, vector<20x64xf32> -> vector<20x64xf32>
    %69 = arith.addf %64, %68 : vector<20x64xf32>
    %c23_62 = arith.constant 23 : index
    %c0_63 = arith.constant 0 : index
    %70 = vector.load %arg17[%c23_62, %c0_63] : memref<110x48xbf16, #tpu.memory_space<vmem>>, vector<20x48xbf16>
    %c1_64 = arith.constant 1 : index
    %c0_65 = arith.constant 0 : index
    %c0_66 = arith.constant 0 : index
    %71 = vector.load %arg4[%c1_64, %c0_65, %c0_66] : memref<9x48x64xbf16, #tpu.memory_space<vmem>>, vector<1x48x64xbf16>
    %72 = vector.shape_cast %71 : vector<1x48x64xbf16> to vector<48x64xbf16>
    %cst_67 = arith.constant dense<0.000000e+00> : vector<20x64xf32>
    %73 = tpu.matmul %70, %72, %cst_67 {dimension_numbers = #tpu.dot_dimension_numbers<[1], [0], [0], [1], [0, 0, 1, 1], [], []>} : vector<20x48xbf16>, vector<48x64xbf16>, vector<20x64xf32> -> vector<20x64xf32>
    %74 = arith.addf %69, %73 : vector<20x64xf32>
    %c24_68 = arith.constant 24 : index
    %c0_69 = arith.constant 0 : index
    %75 = vector.load %arg17[%c24_68, %c0_69] : memref<110x48xbf16, #tpu.memory_space<vmem>>, vector<20x48xbf16>
    %c2_70 = arith.constant 2 : index
    %c0_71 = arith.constant 0 : index
    %c0_72 = arith.constant 0 : index
    %76 = vector.load %arg4[%c2_70, %c0_71, %c0_72] : memref<9x48x64xbf16, #tpu.memory_space<vmem>>, vector<1x48x64xbf16>
    %77 = vector.shape_cast %76 : vector<1x48x64xbf16> to vector<48x64xbf16>
    %cst_73 = arith.constant dense<0.000000e+00> : vector<20x64xf32>
    %78 = tpu.matmul %75, %77, %cst_73 {dimension_numbers = #tpu.dot_dimension_numbers<[1], [0], [0], [1], [0, 0, 1, 1], [], []>} : vector<20x48xbf16>, vector<48x64xbf16>, vector<20x64xf32> -> vector<20x64xf32>
    %79 = arith.addf %74, %78 : vector<20x64xf32>
    %c44_74 = arith.constant 44 : index
    %c0_75 = arith.constant 0 : index
    %80 = vector.load %arg17[%c44_74, %c0_75] : memref<110x48xbf16, #tpu.memory_space<vmem>>, vector<20x48xbf16>
    %c3_76 = arith.constant 3 : index
    %c0_77 = arith.constant 0 : index
    %c0_78 = arith.constant 0 : index
    %81 = vector.load %arg4[%c3_76, %c0_77, %c0_78] : memref<9x48x64xbf16, #tpu.memory_space<vmem>>, vector<1x48x64xbf16>
    %82 = vector.shape_cast %81 : vector<1x48x64xbf16> to vector<48x64xbf16>
    %cst_79 = arith.constant dense<0.000000e+00> : vector<20x64xf32>
    %83 = tpu.matmul %80, %82, %cst_79 {dimension_numbers = #tpu.dot_dimension_numbers<[1], [0], [0], [1], [0, 0, 1, 1], [], []>} : vector<20x48xbf16>, vector<48x64xbf16>, vector<20x64xf32> -> vector<20x64xf32>
    %84 = arith.addf %79, %83 : vector<20x64xf32>
    %c45_80 = arith.constant 45 : index
    %c0_81 = arith.constant 0 : index
    %85 = vector.load %arg17[%c45_80, %c0_81] : memref<110x48xbf16, #tpu.memory_space<vmem>>, vector<20x48xbf16>
    %c4_82 = arith.constant 4 : index
    %c0_83 = arith.constant 0 : index
    %c0_84 = arith.constant 0 : index
    %86 = vector.load %arg4[%c4_82, %c0_83, %c0_84] : memref<9x48x64xbf16, #tpu.memory_space<vmem>>, vector<1x48x64xbf16>
    %87 = vector.shape_cast %86 : vector<1x48x64xbf16> to vector<48x64xbf16>
    %cst_85 = arith.constant dense<0.000000e+00> : vector<20x64xf32>
    %88 = tpu.matmul %85, %87, %cst_85 {dimension_numbers = #tpu.dot_dimension_numbers<[1], [0], [0], [1], [0, 0, 1, 1], [], []>} : vector<20x48xbf16>, vector<48x64xbf16>, vector<20x64xf32> -> vector<20x64xf32>
    %89 = arith.addf %84, %88 : vector<20x64xf32>
    %c46_86 = arith.constant 46 : index
    %c0_87 = arith.constant 0 : index
    %90 = vector.load %arg17[%c46_86, %c0_87] : memref<110x48xbf16, #tpu.memory_space<vmem>>, vector<20x48xbf16>
    %c5_88 = arith.constant 5 : index
    %c0_89 = arith.constant 0 : index
    %c0_90 = arith.constant 0 : index
    %91 = vector.load %arg4[%c5_88, %c0_89, %c0_90] : memref<9x48x64xbf16, #tpu.memory_space<vmem>>, vector<1x48x64xbf16>
    %92 = vector.shape_cast %91 : vector<1x48x64xbf16> to vector<48x64xbf16>
    %cst_91 = arith.constant dense<0.000000e+00> : vector<20x64xf32>
    %93 = tpu.matmul %90, %92, %cst_91 {dimension_numbers = #tpu.dot_dimension_numbers<[1], [0], [0], [1], [0, 0, 1, 1], [], []>} : vector<20x48xbf16>, vector<48x64xbf16>, vector<20x64xf32> -> vector<20x64xf32>
    %94 = arith.addf %89, %93 : vector<20x64xf32>
    %c66 = arith.constant 66 : index
    %c0_92 = arith.constant 0 : index
    %95 = vector.load %arg17[%c66, %c0_92] : memref<110x48xbf16, #tpu.memory_space<vmem>>, vector<20x48xbf16>
    %c6_93 = arith.constant 6 : index
    %c0_94 = arith.constant 0 : index
    %c0_95 = arith.constant 0 : index
    %96 = vector.load %arg4[%c6_93, %c0_94, %c0_95] : memref<9x48x64xbf16, #tpu.memory_space<vmem>>, vector<1x48x64xbf16>
    %97 = vector.shape_cast %96 : vector<1x48x64xbf16> to vector<48x64xbf16>
    %cst_96 = arith.constant dense<0.000000e+00> : vector<20x64xf32>
    %98 = tpu.matmul %95, %97, %cst_96 {dimension_numbers = #tpu.dot_dimension_numbers<[1], [0], [0], [1], [0, 0, 1, 1], [], []>} : vector<20x48xbf16>, vector<48x64xbf16>, vector<20x64xf32> -> vector<20x64xf32>
    %99 = arith.addf %94, %98 : vector<20x64xf32>
    %c67 = arith.constant 67 : index
    %c0_97 = arith.constant 0 : index
    %100 = vector.load %arg17[%c67, %c0_97] : memref<110x48xbf16, #tpu.memory_space<vmem>>, vector<20x48xbf16>
    %c7_98 = arith.constant 7 : index
    %c0_99 = arith.constant 0 : index
    %c0_100 = arith.constant 0 : index
    %101 = vector.load %arg4[%c7_98, %c0_99, %c0_100] : memref<9x48x64xbf16, #tpu.memory_space<vmem>>, vector<1x48x64xbf16>
    %102 = vector.shape_cast %101 : vector<1x48x64xbf16> to vector<48x64xbf16>
    %cst_101 = arith.constant dense<0.000000e+00> : vector<20x64xf32>
    %103 = tpu.matmul %100, %102, %cst_101 {dimension_numbers = #tpu.dot_dimension_numbers<[1], [0], [0], [1], [0, 0, 1, 1], [], []>} : vector<20x48xbf16>, vector<48x64xbf16>, vector<20x64xf32> -> vector<20x64xf32>
    %104 = arith.addf %99, %103 : vector<20x64xf32>
    %c68 = arith.constant 68 : index
    %c0_102 = arith.constant 0 : index
    %105 = vector.load %arg17[%c68, %c0_102] : memref<110x48xbf16, #tpu.memory_space<vmem>>, vector<20x48xbf16>
    %c8_103 = arith.constant 8 : index
    %c0_104 = arith.constant 0 : index
    %c0_105 = arith.constant 0 : index
    %106 = vector.load %arg4[%c8_103, %c0_104, %c0_105] : memref<9x48x64xbf16, #tpu.memory_space<vmem>>, vector<1x48x64xbf16>
    %107 = vector.shape_cast %106 : vector<1x48x64xbf16> to vector<48x64xbf16>
    %cst_106 = arith.constant dense<0.000000e+00> : vector<20x64xf32>
    %108 = tpu.matmul %105, %107, %cst_106 {dimension_numbers = #tpu.dot_dimension_numbers<[1], [0], [0], [1], [0, 0, 1, 1], [], []>} : vector<20x48xbf16>, vector<48x64xbf16>, vector<20x64xf32> -> vector<20x64xf32>
    %109 = arith.addf %104, %108 : vector<20x64xf32>
    %c0_107 = arith.constant 0 : index
    %c0_108 = arith.constant 0 : index
    %110 = vector.load %arg5[%c0_107, %c0_108] : memref<1x64xf32, #tpu.memory_space<vmem>>, vector<1x64xf32>
    %111 = vector.broadcast %110 : vector<1x64xf32> to vector<20x64xf32>
    %112 = arith.addf %109, %111 : vector<20x64xf32>
    %cst_109 = arith.constant 0.000000e+00 : f32
    %113 = vector.broadcast %cst_109 : f32 to vector<20x64xf32>
    %114 = arith.maximumf %112, %113 : vector<20x64xf32>
    %115 = arith.truncf %114 : vector<20x64xf32> to vector<20x64xbf16>
    %c24_110 = arith.constant 24 : index
    %c0_111 = arith.constant 0 : index
    %116 = vector.load %arg18[%c24_110, %c0_111] : memref<72x64xbf16, #tpu.memory_space<vmem>>, vector<20x64xbf16>
    tpu.vector_store %arg18[%c24_110, %c0_111], %115 {strides = array<i32>} : memref<72x64xbf16, #tpu.memory_space<vmem>>, vector<20x64xbf16>,
    %cst_112 = arith.constant 0.000000e+00 : f32
    %117 = vector.broadcast %cst_112 : f32 to vector<20x64xf32>
    %c44_113 = arith.constant 44 : index
    %c0_114 = arith.constant 0 : index
    %118 = vector.load %arg17[%c44_113, %c0_114] : memref<110x48xbf16, #tpu.memory_space<vmem>>, vector<20x48xbf16>
    %c0_115 = arith.constant 0 : index
    %c0_116 = arith.constant 0 : index
    %c0_117 = arith.constant 0 : index
    %119 = vector.load %arg4[%c0_115, %c0_116, %c0_117] : memref<9x48x64xbf16, #tpu.memory_space<vmem>>, vector<1x48x64xbf16>
    %120 = vector.shape_cast %119 : vector<1x48x64xbf16> to vector<48x64xbf16>
    %cst_118 = arith.constant dense<0.000000e+00> : vector<20x64xf32>
    %121 = tpu.matmul %118, %120, %cst_118 {dimension_numbers = #tpu.dot_dimension_numbers<[1], [0], [0], [1], [0, 0, 1, 1], [], []>} : vector<20x48xbf16>, vector<48x64xbf16>, vector<20x64xf32> -> vector<20x64xf32>
    %122 = arith.addf %117, %121 : vector<20x64xf32>
    %c45_119 = arith.constant 45 : index
    %c0_120 = arith.constant 0 : index
    %123 = vector.load %arg17[%c45_119, %c0_120] : memref<110x48xbf16, #tpu.memory_space<vmem>>, vector<20x48xbf16>
    %c1_121 = arith.constant 1 : index
    %c0_122 = arith.constant 0 : index
    %c0_123 = arith.constant 0 : index
    %124 = vector.load %arg4[%c1_121, %c0_122, %c0_123] : memref<9x48x64xbf16, #tpu.memory_space<vmem>>, vector<1x48x64xbf16>
    %125 = vector.shape_cast %124 : vector<1x48x64xbf16> to vector<48x64xbf16>
    %cst_124 = arith.constant dense<0.000000e+00> : vector<20x64xf32>
    %126 = tpu.matmul %123, %125, %cst_124 {dimension_numbers = #tpu.dot_dimension_numbers<[1], [0], [0], [1], [0, 0, 1, 1], [], []>} : vector<20x48xbf16>, vector<48x64xbf16>, vector<20x64xf32> -> vector<20x64xf32>
    %127 = arith.addf %122, %126 : vector<20x64xf32>
    %c46_125 = arith.constant 46 : index
    %c0_126 = arith.constant 0 : index
    %128 = vector.load %arg17[%c46_125, %c0_126] : memref<110x48xbf16, #tpu.memory_space<vmem>>, vector<20x48xbf16>
    %c2_127 = arith.constant 2 : index
    %c0_128 = arith.constant 0 : index
    %c0_129 = arith.constant 0 : index
    %129 = vector.load %arg4[%c2_127, %c0_128, %c0_129] : memref<9x48x64xbf16, #tpu.memory_space<vmem>>, vector<1x48x64xbf16>
    %130 = vector.shape_cast %129 : vector<1x48x64xbf16> to vector<48x64xbf16>
    %cst_130 = arith.constant dense<0.000000e+00> : vector<20x64xf32>
    %131 = tpu.matmul %128, %130, %cst_130 {dimension_numbers = #tpu.dot_dimension_numbers<[1], [0], [0], [1], [0, 0, 1, 1], [], []>} : vector<20x48xbf16>, vector<48x64xbf16>, vector<20x64xf32> -> vector<20x64xf32>
    %132 = arith.addf %127, %131 : vector<20x64xf32>
    %c66_131 = arith.constant 66 : index
    %c0_132 = arith.constant 0 : index
    %133 = vector.load %arg17[%c66_131, %c0_132] : memref<110x48xbf16, #tpu.memory_space<vmem>>, vector<20x48xbf16>
    %c3_133 = arith.constant 3 : index
    %c0_134 = arith.constant 0 : index
    %c0_135 = arith.constant 0 : index
    %134 = vector.load %arg4[%c3_133, %c0_134, %c0_135] : memref<9x48x64xbf16, #tpu.memory_space<vmem>>, vector<1x48x64xbf16>
    %135 = vector.shape_cast %134 : vector<1x48x64xbf16> to vector<48x64xbf16>
    %cst_136 = arith.constant dense<0.000000e+00> : vector<20x64xf32>
    %136 = tpu.matmul %133, %135, %cst_136 {dimension_numbers = #tpu.dot_dimension_numbers<[1], [0], [0], [1], [0, 0, 1, 1], [], []>} : vector<20x48xbf16>, vector<48x64xbf16>, vector<20x64xf32> -> vector<20x64xf32>
    %137 = arith.addf %132, %136 : vector<20x64xf32>
    %c67_137 = arith.constant 67 : index
    %c0_138 = arith.constant 0 : index
    %138 = vector.load %arg17[%c67_137, %c0_138] : memref<110x48xbf16, #tpu.memory_space<vmem>>, vector<20x48xbf16>
    %c4_139 = arith.constant 4 : index
    %c0_140 = arith.constant 0 : index
    %c0_141 = arith.constant 0 : index
    %139 = vector.load %arg4[%c4_139, %c0_140, %c0_141] : memref<9x48x64xbf16, #tpu.memory_space<vmem>>, vector<1x48x64xbf16>
    %140 = vector.shape_cast %139 : vector<1x48x64xbf16> to vector<48x64xbf16>
    %cst_142 = arith.constant dense<0.000000e+00> : vector<20x64xf32>
    %141 = tpu.matmul %138, %140, %cst_142 {dimension_numbers = #tpu.dot_dimension_numbers<[1], [0], [0], [1], [0, 0, 1, 1], [], []>} : vector<20x48xbf16>, vector<48x64xbf16>, vector<20x64xf32> -> vector<20x64xf32>
    %142 = arith.addf %137, %141 : vector<20x64xf32>
    %c68_143 = arith.constant 68 : index
    %c0_144 = arith.constant 0 : index
    %143 = vector.load %arg17[%c68_143, %c0_144] : memref<110x48xbf16, #tpu.memory_space<vmem>>, vector<20x48xbf16>
    %c5_145 = arith.constant 5 : index
    %c0_146 = arith.constant 0 : index
    %c0_147 = arith.constant 0 : index
    %144 = vector.load %arg4[%c5_145, %c0_146, %c0_147] : memref<9x48x64xbf16, #tpu.memory_space<vmem>>, vector<1x48x64xbf16>
    %145 = vector.shape_cast %144 : vector<1x48x64xbf16> to vector<48x64xbf16>
    %cst_148 = arith.constant dense<0.000000e+00> : vector<20x64xf32>
    %146 = tpu.matmul %143, %145, %cst_148 {dimension_numbers = #tpu.dot_dimension_numbers<[1], [0], [0], [1], [0, 0, 1, 1], [], []>} : vector<20x48xbf16>, vector<48x64xbf16>, vector<20x64xf32> -> vector<20x64xf32>
    %147 = arith.addf %142, %146 : vector<20x64xf32>
    %c88 = arith.constant 88 : index
    %c0_149 = arith.constant 0 : index
    %148 = vector.load %arg17[%c88, %c0_149] : memref<110x48xbf16, #tpu.memory_space<vmem>>, vector<20x48xbf16>
    %c6_150 = arith.constant 6 : index
    %c0_151 = arith.constant 0 : index
    %c0_152 = arith.constant 0 : index
    %149 = vector.load %arg4[%c6_150, %c0_151, %c0_152] : memref<9x48x64xbf16, #tpu.memory_space<vmem>>, vector<1x48x64xbf16>
    %150 = vector.shape_cast %149 : vector<1x48x64xbf16> to vector<48x64xbf16>
    %cst_153 = arith.constant dense<0.000000e+00> : vector<20x64xf32>
    %151 = tpu.matmul %148, %150, %cst_153 {dimension_numbers = #tpu.dot_dimension_numbers<[1], [0], [0], [1], [0, 0, 1, 1], [], []>} : vector<20x48xbf16>, vector<48x64xbf16>, vector<20x64xf32> -> vector<20x64xf32>
    %152 = arith.addf %147, %151 : vector<20x64xf32>
    %c89 = arith.constant 89 : index
    %c0_154 = arith.constant 0 : index
    %153 = vector.load %arg17[%c89, %c0_154] : memref<110x48xbf16, #tpu.memory_space<vmem>>, vector<20x48xbf16>
    %c7_155 = arith.constant 7 : index
    %c0_156 = arith.constant 0 : index
    %c0_157 = arith.constant 0 : index
    %154 = vector.load %arg4[%c7_155, %c0_156, %c0_157] : memref<9x48x64xbf16, #tpu.memory_space<vmem>>, vector<1x48x64xbf16>
    %155 = vector.shape_cast %154 : vector<1x48x64xbf16> to vector<48x64xbf16>
    %cst_158 = arith.constant dense<0.000000e+00> : vector<20x64xf32>
    %156 = tpu.matmul %153, %155, %cst_158 {dimension_numbers = #tpu.dot_dimension_numbers<[1], [0], [0], [1], [0, 0, 1, 1], [], []>} : vector<20x48xbf16>, vector<48x64xbf16>, vector<20x64xf32> -> vector<20x64xf32>
    %157 = arith.addf %152, %156 : vector<20x64xf32>
    %c90 = arith.constant 90 : index
    %c0_159 = arith.constant 0 : index
    %158 = vector.load %arg17[%c90, %c0_159] : memref<110x48xbf16, #tpu.memory_space<vmem>>, vector<20x48xbf16>
    %c8_160 = arith.constant 8 : index
    %c0_161 = arith.constant 0 : index
    %c0_162 = arith.constant 0 : index
    %159 = vector.load %arg4[%c8_160, %c0_161, %c0_162] : memref<9x48x64xbf16, #tpu.memory_space<vmem>>, vector<1x48x64xbf16>
    %160 = vector.shape_cast %159 : vector<1x48x64xbf16> to vector<48x64xbf16>
    %cst_163 = arith.constant dense<0.000000e+00> : vector<20x64xf32>
    %161 = tpu.matmul %158, %160, %cst_163 {dimension_numbers = #tpu.dot_dimension_numbers<[1], [0], [0], [1], [0, 0, 1, 1], [], []>} : vector<20x48xbf16>, vector<48x64xbf16>, vector<20x64xf32> -> vector<20x64xf32>
    %162 = arith.addf %157, %161 : vector<20x64xf32>
    %c0_164 = arith.constant 0 : index
    %c0_165 = arith.constant 0 : index
    %163 = vector.load %arg5[%c0_164, %c0_165] : memref<1x64xf32, #tpu.memory_space<vmem>>, vector<1x64xf32>
    %164 = vector.broadcast %163 : vector<1x64xf32> to vector<20x64xf32>
    %165 = arith.addf %162, %164 : vector<20x64xf32>
    %cst_166 = arith.constant 0.000000e+00 : f32
    %166 = vector.broadcast %cst_166 : f32 to vector<20x64xf32>
    %167 = arith.maximumf %165, %166 : vector<20x64xf32>
    %168 = arith.truncf %167 : vector<20x64xf32> to vector<20x64xbf16>
    %c48 = arith.constant 48 : index
    %c0_167 = arith.constant 0 : index
    %169 = vector.load %arg18[%c48, %c0_167] : memref<72x64xbf16, #tpu.memory_space<vmem>>, vector<20x64xbf16>
    tpu.vector_store %arg18[%c48, %c0_167], %168 {strides = array<i32>} : memref<72x64xbf16, #tpu.memory_space<vmem>>, vector<20x64xbf16>,
    %cst_168 = arith.constant 0.000000e+00 : f32
    %170 = vector.broadcast %cst_168 : f32 to vector<18x64xf32>
    %c0_169 = arith.constant 0 : index
    %c0_170 = arith.constant 0 : index
    %171 = vector.load %arg18[%c0_169, %c0_170] : memref<72x64xbf16, #tpu.memory_space<vmem>>, vector<18x64xbf16>
    %c0_171 = arith.constant 0 : index
    %c0_172 = arith.constant 0 : index
    %c0_173 = arith.constant 0 : index
    %172 = vector.load %arg6[%c0_171, %c0_172, %c0_173] : memref<9x64x64xbf16, #tpu.memory_space<vmem>>, vector<1x64x64xbf16>
    %173 = vector.shape_cast %172 : vector<1x64x64xbf16> to vector<64x64xbf16>
    %cst_174 = arith.constant dense<0.000000e+00> : vector<18x64xf32>
    %174 = tpu.matmul %171, %173, %cst_174 {dimension_numbers = #tpu.dot_dimension_numbers<[1], [0], [0], [1], [0, 0, 1, 1], [], []>} : vector<18x64xbf16>, vector<64x64xbf16>, vector<18x64xf32> -> vector<18x64xf32>
    %175 = arith.addf %170, %174 : vector<18x64xf32>
    %c1_175 = arith.constant 1 : index
    %c0_176 = arith.constant 0 : index
    %176 = vector.load %arg18[%c1_175, %c0_176] : memref<72x64xbf16, #tpu.memory_space<vmem>>, vector<18x64xbf16>
    %c1_177 = arith.constant 1 : index
    %c0_178 = arith.constant 0 : index
    %c0_179 = arith.constant 0 : index
    %177 = vector.load %arg6[%c1_177, %c0_178, %c0_179] : memref<9x64x64xbf16, #tpu.memory_space<vmem>>, vector<1x64x64xbf16>
    %178 = vector.shape_cast %177 : vector<1x64x64xbf16> to vector<64x64xbf16>
    %cst_180 = arith.constant dense<0.000000e+00> : vector<18x64xf32>
    %179 = tpu.matmul %176, %178, %cst_180 {dimension_numbers = #tpu.dot_dimension_numbers<[1], [0], [0], [1], [0, 0, 1, 1], [], []>} : vector<18x64xbf16>, vector<64x64xbf16>, vector<18x64xf32> -> vector<18x64xf32>
    %180 = arith.addf %175, %179 : vector<18x64xf32>
    %c2_181 = arith.constant 2 : index
    %c0_182 = arith.constant 0 : index
    %181 = vector.load %arg18[%c2_181, %c0_182] : memref<72x64xbf16, #tpu.memory_space<vmem>>, vector<18x64xbf16>
    %c2_183 = arith.constant 2 : index
    %c0_184 = arith.constant 0 : index
    %c0_185 = arith.constant 0 : index
    %182 = vector.load %arg6[%c2_183, %c0_184, %c0_185] : memref<9x64x64xbf16, #tpu.memory_space<vmem>>, vector<1x64x64xbf16>
    %183 = vector.shape_cast %182 : vector<1x64x64xbf16> to vector<64x64xbf16>
    %cst_186 = arith.constant dense<0.000000e+00> : vector<18x64xf32>
    %184 = tpu.matmul %181, %183, %cst_186 {dimension_numbers = #tpu.dot_dimension_numbers<[1], [0], [0], [1], [0, 0, 1, 1], [], []>} : vector<18x64xbf16>, vector<64x64xbf16>, vector<18x64xf32> -> vector<18x64xf32>
    %185 = arith.addf %180, %184 : vector<18x64xf32>
    %c24_187 = arith.constant 24 : index
    %c0_188 = arith.constant 0 : index
    %186 = vector.load %arg18[%c24_187, %c0_188] : memref<72x64xbf16, #tpu.memory_space<vmem>>, vector<18x64xbf16>
    %c3_189 = arith.constant 3 : index
    %c0_190 = arith.constant 0 : index
    %c0_191 = arith.constant 0 : index
    %187 = vector.load %arg6[%c3_189, %c0_190, %c0_191] : memref<9x64x64xbf16, #tpu.memory_space<vmem>>, vector<1x64x64xbf16>
    %188 = vector.shape_cast %187 : vector<1x64x64xbf16> to vector<64x64xbf16>
    %cst_192 = arith.constant dense<0.000000e+00> : vector<18x64xf32>
    %189 = tpu.matmul %186, %188, %cst_192 {dimension_numbers = #tpu.dot_dimension_numbers<[1], [0], [0], [1], [0, 0, 1, 1], [], []>} : vector<18x64xbf16>, vector<64x64xbf16>, vector<18x64xf32> -> vector<18x64xf32>
    %190 = arith.addf %185, %189 : vector<18x64xf32>
    %c25 = arith.constant 25 : index
    %c0_193 = arith.constant 0 : index
    %191 = vector.load %arg18[%c25, %c0_193] : memref<72x64xbf16, #tpu.memory_space<vmem>>, vector<18x64xbf16>
    %c4_194 = arith.constant 4 : index
    %c0_195 = arith.constant 0 : index
    %c0_196 = arith.constant 0 : index
    %192 = vector.load %arg6[%c4_194, %c0_195, %c0_196] : memref<9x64x64xbf16, #tpu.memory_space<vmem>>, vector<1x64x64xbf16>
    %193 = vector.shape_cast %192 : vector<1x64x64xbf16> to vector<64x64xbf16>
    %cst_197 = arith.constant dense<0.000000e+00> : vector<18x64xf32>
    %194 = tpu.matmul %191, %193, %cst_197 {dimension_numbers = #tpu.dot_dimension_numbers<[1], [0], [0], [1], [0, 0, 1, 1], [], []>} : vector<18x64xbf16>, vector<64x64xbf16>, vector<18x64xf32> -> vector<18x64xf32>
    %195 = arith.addf %190, %194 : vector<18x64xf32>
    %c26 = arith.constant 26 : index
    %c0_198 = arith.constant 0 : index
    %196 = vector.load %arg18[%c26, %c0_198] : memref<72x64xbf16, #tpu.memory_space<vmem>>, vector<18x64xbf16>
    %c5_199 = arith.constant 5 : index
    %c0_200 = arith.constant 0 : index
    %c0_201 = arith.constant 0 : index
    %197 = vector.load %arg6[%c5_199, %c0_200, %c0_201] : memref<9x64x64xbf16, #tpu.memory_space<vmem>>, vector<1x64x64xbf16>
    %198 = vector.shape_cast %197 : vector<1x64x64xbf16> to vector<64x64xbf16>
    %cst_202 = arith.constant dense<0.000000e+00> : vector<18x64xf32>
    %199 = tpu.matmul %196, %198, %cst_202 {dimension_numbers = #tpu.dot_dimension_numbers<[1], [0], [0], [1], [0, 0, 1, 1], [], []>} : vector<18x64xbf16>, vector<64x64xbf16>, vector<18x64xf32> -> vector<18x64xf32>
    %200 = arith.addf %195, %199 : vector<18x64xf32>
    %c48_203 = arith.constant 48 : index
    %c0_204 = arith.constant 0 : index
    %201 = vector.load %arg18[%c48_203, %c0_204] : memref<72x64xbf16, #tpu.memory_space<vmem>>, vector<18x64xbf16>
    %c6_205 = arith.constant 6 : index
    %c0_206 = arith.constant 0 : index
    %c0_207 = arith.constant 0 : index
    %202 = vector.load %arg6[%c6_205, %c0_206, %c0_207] : memref<9x64x64xbf16, #tpu.memory_space<vmem>>, vector<1x64x64xbf16>
    %203 = vector.shape_cast %202 : vector<1x64x64xbf16> to vector<64x64xbf16>
    %cst_208 = arith.constant dense<0.000000e+00> : vector<18x64xf32>
    %204 = tpu.matmul %201, %203, %cst_208 {dimension_numbers = #tpu.dot_dimension_numbers<[1], [0], [0], [1], [0, 0, 1, 1], [], []>} : vector<18x64xbf16>, vector<64x64xbf16>, vector<18x64xf32> -> vector<18x64xf32>
    %205 = arith.addf %200, %204 : vector<18x64xf32>
    %c49 = arith.constant 49 : index
    %c0_209 = arith.constant 0 : index
    %206 = vector.load %arg18[%c49, %c0_209] : memref<72x64xbf16, #tpu.memory_space<vmem>>, vector<18x64xbf16>
    %c7_210 = arith.constant 7 : index
    %c0_211 = arith.constant 0 : index
    %c0_212 = arith.constant 0 : index
    %207 = vector.load %arg6[%c7_210, %c0_211, %c0_212] : memref<9x64x64xbf16, #tpu.memory_space<vmem>>, vector<1x64x64xbf16>
    %208 = vector.shape_cast %207 : vector<1x64x64xbf16> to vector<64x64xbf16>
    %cst_213 = arith.constant dense<0.000000e+00> : vector<18x64xf32>
    %209 = tpu.matmul %206, %208, %cst_213 {dimension_numbers = #tpu.dot_dimension_numbers<[1], [0], [0], [1], [0, 0, 1, 1], [], []>} : vector<18x64xbf16>, vector<64x64xbf16>, vector<18x64xf32> -> vector<18x64xf32>
    %210 = arith.addf %205, %209 : vector<18x64xf32>
    %c50 = arith.constant 50 : index
    %c0_214 = arith.constant 0 : index
    %211 = vector.load %arg18[%c50, %c0_214] : memref<72x64xbf16, #tpu.memory_space<vmem>>, vector<18x64xbf16>
    %c8_215 = arith.constant 8 : index
    %c0_216 = arith.constant 0 : index
    %c0_217 = arith.constant 0 : index
    %212 = vector.load %arg6[%c8_215, %c0_216, %c0_217] : memref<9x64x64xbf16, #tpu.memory_space<vmem>>, vector<1x64x64xbf16>
    %213 = vector.shape_cast %212 : vector<1x64x64xbf16> to vector<64x64xbf16>
    %cst_218 = arith.constant dense<0.000000e+00> : vector<18x64xf32>
    %214 = tpu.matmul %211, %213, %cst_218 {dimension_numbers = #tpu.dot_dimension_numbers<[1], [0], [0], [1], [0, 0, 1, 1], [], []>} : vector<18x64xbf16>, vector<64x64xbf16>, vector<18x64xf32> -> vector<18x64xf32>
    %215 = arith.addf %210, %214 : vector<18x64xf32>
    %c0_219 = arith.constant 0 : index
    %c0_220 = arith.constant 0 : index
    %216 = vector.load %arg7[%c0_219, %c0_220] : memref<1x64xf32, #tpu.memory_space<vmem>>, vector<1x64xf32>
    %217 = vector.broadcast %216 : vector<1x64xf32> to vector<18x64xf32>
    %218 = arith.addf %215, %217 : vector<18x64xf32>
    %cst_221 = arith.constant 0.000000e+00 : f32
    %219 = vector.broadcast %cst_221 : f32 to vector<18x64xf32>
    %220 = arith.maximumf %218, %219 : vector<18x64xf32>
    %221 = arith.truncf %220 : vector<18x64xf32> to vector<18x64xbf16>
    %c0_222 = arith.constant 0 : index
    %c0_223 = arith.constant 0 : index
    %222 = vector.load %arg19[%c0_222, %c0_223] : memref<18x64xbf16, #tpu.memory_space<vmem>>, vector<18x64xbf16>
    tpu.vector_store %arg19[%c0_222, %c0_223], %221 {strides = array<i32>} : memref<18x64xbf16, #tpu.memory_space<vmem>>, vector<18x64xbf16>,
    %cst_224 = arith.constant 0.000000e+00 : f32
    %223 = vector.broadcast %cst_224 : f32 to vector<1x128xf32>
    %c0_225 = arith.constant 0 : index
    %c0_226 = arith.constant 0 : index
    %224 = vector.load %arg19[%c0_225, %c0_226] : memref<18x64xbf16, #tpu.memory_space<vmem>>, vector<1x64xbf16>
    %c0_227 = arith.constant 0 : index
    %c0_228 = arith.constant 0 : index
    %c0_229 = arith.constant 0 : index
    %225 = vector.load %arg8[%c0_227, %c0_228, %c0_229] : memref<18x64x128xbf16, #tpu.memory_space<vmem>>, vector<1x64x128xbf16>
    %226 = vector.shape_cast %225 : vector<1x64x128xbf16> to vector<64x128xbf16>
    %cst_230 = arith.constant dense<0.000000e+00> : vector<1x128xf32>
    %227 = tpu.matmul %224, %226, %cst_230 {dimension_numbers = #tpu.dot_dimension_numbers<[1], [0], [0], [1], [0, 0, 1, 1], [], []>} : vector<1x64xbf16>, vector<64x128xbf16>, vector<1x128xf32> -> vector<1x128xf32>
    %228 = arith.addf %223, %227 : vector<1x128xf32>
    %c1_231 = arith.constant 1 : index
    %c0_232 = arith.constant 0 : index
    %229 = vector.load %arg19[%c1_231, %c0_232] : memref<18x64xbf16, #tpu.memory_space<vmem>>, vector<1x64xbf16>
    %c1_233 = arith.constant 1 : index
    %c0_234 = arith.constant 0 : index
    %c0_235 = arith.constant 0 : index
    %230 = vector.load %arg8[%c1_233, %c0_234, %c0_235] : memref<18x64x128xbf16, #tpu.memory_space<vmem>>, vector<1x64x128xbf16>
    %231 = vector.shape_cast %230 : vector<1x64x128xbf16> to vector<64x128xbf16>
    %cst_236 = arith.constant dense<0.000000e+00> : vector<1x128xf32>
    %232 = tpu.matmul %229, %231, %cst_236 {dimension_numbers = #tpu.dot_dimension_numbers<[1], [0], [0], [1], [0, 0, 1, 1], [], []>} : vector<1x64xbf16>, vector<64x128xbf16>, vector<1x128xf32> -> vector<1x128xf32>
    %233 = arith.addf %228, %232 : vector<1x128xf32>
    %c2_237 = arith.constant 2 : index
    %c0_238 = arith.constant 0 : index
    %234 = vector.load %arg19[%c2_237, %c0_238] : memref<18x64xbf16, #tpu.memory_space<vmem>>, vector<1x64xbf16>
    %c2_239 = arith.constant 2 : index
    %c0_240 = arith.constant 0 : index
    %c0_241 = arith.constant 0 : index
    %235 = vector.load %arg8[%c2_239, %c0_240, %c0_241] : memref<18x64x128xbf16, #tpu.memory_space<vmem>>, vector<1x64x128xbf16>
    %236 = vector.shape_cast %235 : vector<1x64x128xbf16> to vector<64x128xbf16>
    %cst_242 = arith.constant dense<0.000000e+00> : vector<1x128xf32>
    %237 = tpu.matmul %234, %236, %cst_242 {dimension_numbers = #tpu.dot_dimension_numbers<[1], [0], [0], [1], [0, 0, 1, 1], [], []>} : vector<1x64xbf16>, vector<64x128xbf16>, vector<1x128xf32> -> vector<1x128xf32>
    %238 = arith.addf %233, %237 : vector<1x128xf32>
    %c3_243 = arith.constant 3 : index
    %c0_244 = arith.constant 0 : index
    %239 = vector.load %arg19[%c3_243, %c0_244] : memref<18x64xbf16, #tpu.memory_space<vmem>>, vector<1x64xbf16>
    %c3_245 = arith.constant 3 : index
    %c0_246 = arith.constant 0 : index
    %c0_247 = arith.constant 0 : index
    %240 = vector.load %arg8[%c3_245, %c0_246, %c0_247] : memref<18x64x128xbf16, #tpu.memory_space<vmem>>, vector<1x64x128xbf16>
    %241 = vector.shape_cast %240 : vector<1x64x128xbf16> to vector<64x128xbf16>
    %cst_248 = arith.constant dense<0.000000e+00> : vector<1x128xf32>
    %242 = tpu.matmul %239, %241, %cst_248 {dimension_numbers = #tpu.dot_dimension_numbers<[1], [0], [0], [1], [0, 0, 1, 1], [], []>} : vector<1x64xbf16>, vector<64x128xbf16>, vector<1x128xf32> -> vector<1x128xf32>
    %243 = arith.addf %238, %242 : vector<1x128xf32>
    %c4_249 = arith.constant 4 : index
    %c0_250 = arith.constant 0 : index
    %244 = vector.load %arg19[%c4_249, %c0_250] : memref<18x64xbf16, #tpu.memory_space<vmem>>, vector<1x64xbf16>
    %c4_251 = arith.constant 4 : index
    %c0_252 = arith.constant 0 : index
    %c0_253 = arith.constant 0 : index
    %245 = vector.load %arg8[%c4_251, %c0_252, %c0_253] : memref<18x64x128xbf16, #tpu.memory_space<vmem>>, vector<1x64x128xbf16>
    %246 = vector.shape_cast %245 : vector<1x64x128xbf16> to vector<64x128xbf16>
    %cst_254 = arith.constant dense<0.000000e+00> : vector<1x128xf32>
    %247 = tpu.matmul %244, %246, %cst_254 {dimension_numbers = #tpu.dot_dimension_numbers<[1], [0], [0], [1], [0, 0, 1, 1], [], []>} : vector<1x64xbf16>, vector<64x128xbf16>, vector<1x128xf32> -> vector<1x128xf32>
    %248 = arith.addf %243, %247 : vector<1x128xf32>
    %c5_255 = arith.constant 5 : index
    %c0_256 = arith.constant 0 : index
    %249 = vector.load %arg19[%c5_255, %c0_256] : memref<18x64xbf16, #tpu.memory_space<vmem>>, vector<1x64xbf16>
    %c5_257 = arith.constant 5 : index
    %c0_258 = arith.constant 0 : index
    %c0_259 = arith.constant 0 : index
    %250 = vector.load %arg8[%c5_257, %c0_258, %c0_259] : memref<18x64x128xbf16, #tpu.memory_space<vmem>>, vector<1x64x128xbf16>
    %251 = vector.shape_cast %250 : vector<1x64x128xbf16> to vector<64x128xbf16>
    %cst_260 = arith.constant dense<0.000000e+00> : vector<1x128xf32>
    %252 = tpu.matmul %249, %251, %cst_260 {dimension_numbers = #tpu.dot_dimension_numbers<[1], [0], [0], [1], [0, 0, 1, 1], [], []>} : vector<1x64xbf16>, vector<64x128xbf16>, vector<1x128xf32> -> vector<1x128xf32>
    %253 = arith.addf %248, %252 : vector<1x128xf32>
    %c6_261 = arith.constant 6 : index
    %c0_262 = arith.constant 0 : index
    %254 = vector.load %arg19[%c6_261, %c0_262] : memref<18x64xbf16, #tpu.memory_space<vmem>>, vector<1x64xbf16>
    %c6_263 = arith.constant 6 : index
    %c0_264 = arith.constant 0 : index
    %c0_265 = arith.constant 0 : index
    %255 = vector.load %arg8[%c6_263, %c0_264, %c0_265] : memref<18x64x128xbf16, #tpu.memory_space<vmem>>, vector<1x64x128xbf16>
    %256 = vector.shape_cast %255 : vector<1x64x128xbf16> to vector<64x128xbf16>
    %cst_266 = arith.constant dense<0.000000e+00> : vector<1x128xf32>
    %257 = tpu.matmul %254, %256, %cst_266 {dimension_numbers = #tpu.dot_dimension_numbers<[1], [0], [0], [1], [0, 0, 1, 1], [], []>} : vector<1x64xbf16>, vector<64x128xbf16>, vector<1x128xf32> -> vector<1x128xf32>
    %258 = arith.addf %253, %257 : vector<1x128xf32>
    %c7_267 = arith.constant 7 : index
    %c0_268 = arith.constant 0 : index
    %259 = vector.load %arg19[%c7_267, %c0_268] : memref<18x64xbf16, #tpu.memory_space<vmem>>, vector<1x64xbf16>
    %c7_269 = arith.constant 7 : index
    %c0_270 = arith.constant 0 : index
    %c0_271 = arith.constant 0 : index
    %260 = vector.load %arg8[%c7_269, %c0_270, %c0_271] : memref<18x64x128xbf16, #tpu.memory_space<vmem>>, vector<1x64x128xbf16>
    %261 = vector.shape_cast %260 : vector<1x64x128xbf16> to vector<64x128xbf16>
    %cst_272 = arith.constant dense<0.000000e+00> : vector<1x128xf32>
    %262 = tpu.matmul %259, %261, %cst_272 {dimension_numbers = #tpu.dot_dimension_numbers<[1], [0], [0], [1], [0, 0, 1, 1], [], []>} : vector<1x64xbf16>, vector<64x128xbf16>, vector<1x128xf32> -> vector<1x128xf32>
    %263 = arith.addf %258, %262 : vector<1x128xf32>
    %c8_273 = arith.constant 8 : index
    %c0_274 = arith.constant 0 : index
    %264 = vector.load %arg19[%c8_273, %c0_274] : memref<18x64xbf16, #tpu.memory_space<vmem>>, vector<1x64xbf16>
    %c8_275 = arith.constant 8 : index
    %c0_276 = arith.constant 0 : index
    %c0_277 = arith.constant 0 : index
    %265 = vector.load %arg8[%c8_275, %c0_276, %c0_277] : memref<18x64x128xbf16, #tpu.memory_space<vmem>>, vector<1x64x128xbf16>
    %266 = vector.shape_cast %265 : vector<1x64x128xbf16> to vector<64x128xbf16>
    %cst_278 = arith.constant dense<0.000000e+00> : vector<1x128xf32>
    %267 = tpu.matmul %264, %266, %cst_278 {dimension_numbers = #tpu.dot_dimension_numbers<[1], [0], [0], [1], [0, 0, 1, 1], [], []>} : vector<1x64xbf16>, vector<64x128xbf16>, vector<1x128xf32> -> vector<1x128xf32>
    %268 = arith.addf %263, %267 : vector<1x128xf32>
    %c9 = arith.constant 9 : index
    %c0_279 = arith.constant 0 : index
    %269 = vector.load %arg19[%c9, %c0_279] : memref<18x64xbf16, #tpu.memory_space<vmem>>, vector<1x64xbf16>
    %c9_280 = arith.constant 9 : index
    %c0_281 = arith.constant 0 : index
    %c0_282 = arith.constant 0 : index
    %270 = vector.load %arg8[%c9_280, %c0_281, %c0_282] : memref<18x64x128xbf16, #tpu.memory_space<vmem>>, vector<1x64x128xbf16>
    %271 = vector.shape_cast %270 : vector<1x64x128xbf16> to vector<64x128xbf16>
    %cst_283 = arith.constant dense<0.000000e+00> : vector<1x128xf32>
    %272 = tpu.matmul %269, %271, %cst_283 {dimension_numbers = #tpu.dot_dimension_numbers<[1], [0], [0], [1], [0, 0, 1, 1], [], []>} : vector<1x64xbf16>, vector<64x128xbf16>, vector<1x128xf32> -> vector<1x128xf32>
    %273 = arith.addf %268, %272 : vector<1x128xf32>
    %c10 = arith.constant 10 : index
    %c0_284 = arith.constant 0 : index
    %274 = vector.load %arg19[%c10, %c0_284] : memref<18x64xbf16, #tpu.memory_space<vmem>>, vector<1x64xbf16>
    %c10_285 = arith.constant 10 : index
    %c0_286 = arith.constant 0 : index
    %c0_287 = arith.constant 0 : index
    %275 = vector.load %arg8[%c10_285, %c0_286, %c0_287] : memref<18x64x128xbf16, #tpu.memory_space<vmem>>, vector<1x64x128xbf16>
    %276 = vector.shape_cast %275 : vector<1x64x128xbf16> to vector<64x128xbf16>
    %cst_288 = arith.constant dense<0.000000e+00> : vector<1x128xf32>
    %277 = tpu.matmul %274, %276, %cst_288 {dimension_numbers = #tpu.dot_dimension_numbers<[1], [0], [0], [1], [0, 0, 1, 1], [], []>} : vector<1x64xbf16>, vector<64x128xbf16>, vector<1x128xf32> -> vector<1x128xf32>
    %278 = arith.addf %273, %277 : vector<1x128xf32>
    %c11 = arith.constant 11 : index
    %c0_289 = arith.constant 0 : index
    %279 = vector.load %arg19[%c11, %c0_289] : memref<18x64xbf16, #tpu.memory_space<vmem>>, vector<1x64xbf16>
    %c11_290 = arith.constant 11 : index
    %c0_291 = arith.constant 0 : index
    %c0_292 = arith.constant 0 : index
    %280 = vector.load %arg8[%c11_290, %c0_291, %c0_292] : memref<18x64x128xbf16, #tpu.memory_space<vmem>>, vector<1x64x128xbf16>
    %281 = vector.shape_cast %280 : vector<1x64x128xbf16> to vector<64x128xbf16>
    %cst_293 = arith.constant dense<0.000000e+00> : vector<1x128xf32>
    %282 = tpu.matmul %279, %281, %cst_293 {dimension_numbers = #tpu.dot_dimension_numbers<[1], [0], [0], [1], [0, 0, 1, 1], [], []>} : vector<1x64xbf16>, vector<64x128xbf16>, vector<1x128xf32> -> vector<1x128xf32>
    %283 = arith.addf %278, %282 : vector<1x128xf32>
    %c12 = arith.constant 12 : index
    %c0_294 = arith.constant 0 : index
    %284 = vector.load %arg19[%c12, %c0_294] : memref<18x64xbf16, #tpu.memory_space<vmem>>, vector<1x64xbf16>
    %c12_295 = arith.constant 12 : index
    %c0_296 = arith.constant 0 : index
    %c0_297 = arith.constant 0 : index
    %285 = vector.load %arg8[%c12_295, %c0_296, %c0_297] : memref<18x64x128xbf16, #tpu.memory_space<vmem>>, vector<1x64x128xbf16>
    %286 = vector.shape_cast %285 : vector<1x64x128xbf16> to vector<64x128xbf16>
    %cst_298 = arith.constant dense<0.000000e+00> : vector<1x128xf32>
    %287 = tpu.matmul %284, %286, %cst_298 {dimension_numbers = #tpu.dot_dimension_numbers<[1], [0], [0], [1], [0, 0, 1, 1], [], []>} : vector<1x64xbf16>, vector<64x128xbf16>, vector<1x128xf32> -> vector<1x128xf32>
    %288 = arith.addf %283, %287 : vector<1x128xf32>
    %c13 = arith.constant 13 : index
    %c0_299 = arith.constant 0 : index
    %289 = vector.load %arg19[%c13, %c0_299] : memref<18x64xbf16, #tpu.memory_space<vmem>>, vector<1x64xbf16>
    %c13_300 = arith.constant 13 : index
    %c0_301 = arith.constant 0 : index
    %c0_302 = arith.constant 0 : index
    %290 = vector.load %arg8[%c13_300, %c0_301, %c0_302] : memref<18x64x128xbf16, #tpu.memory_space<vmem>>, vector<1x64x128xbf16>
    %291 = vector.shape_cast %290 : vector<1x64x128xbf16> to vector<64x128xbf16>
    %cst_303 = arith.constant dense<0.000000e+00> : vector<1x128xf32>
    %292 = tpu.matmul %289, %291, %cst_303 {dimension_numbers = #tpu.dot_dimension_numbers<[1], [0], [0], [1], [0, 0, 1, 1], [], []>} : vector<1x64xbf16>, vector<64x128xbf16>, vector<1x128xf32> -> vector<1x128xf32>
    %293 = arith.addf %288, %292 : vector<1x128xf32>
    %c14 = arith.constant 14 : index
    %c0_304 = arith.constant 0 : index
    %294 = vector.load %arg19[%c14, %c0_304] : memref<18x64xbf16, #tpu.memory_space<vmem>>, vector<1x64xbf16>
    %c14_305 = arith.constant 14 : index
    %c0_306 = arith.constant 0 : index
    %c0_307 = arith.constant 0 : index
    %295 = vector.load %arg8[%c14_305, %c0_306, %c0_307] : memref<18x64x128xbf16, #tpu.memory_space<vmem>>, vector<1x64x128xbf16>
    %296 = vector.shape_cast %295 : vector<1x64x128xbf16> to vector<64x128xbf16>
    %cst_308 = arith.constant dense<0.000000e+00> : vector<1x128xf32>
    %297 = tpu.matmul %294, %296, %cst_308 {dimension_numbers = #tpu.dot_dimension_numbers<[1], [0], [0], [1], [0, 0, 1, 1], [], []>} : vector<1x64xbf16>, vector<64x128xbf16>, vector<1x128xf32> -> vector<1x128xf32>
    %298 = arith.addf %293, %297 : vector<1x128xf32>
    %c15 = arith.constant 15 : index
    %c0_309 = arith.constant 0 : index
    %299 = vector.load %arg19[%c15, %c0_309] : memref<18x64xbf16, #tpu.memory_space<vmem>>, vector<1x64xbf16>
    %c15_310 = arith.constant 15 : index
    %c0_311 = arith.constant 0 : index
    %c0_312 = arith.constant 0 : index
    %300 = vector.load %arg8[%c15_310, %c0_311, %c0_312] : memref<18x64x128xbf16, #tpu.memory_space<vmem>>, vector<1x64x128xbf16>
    %301 = vector.shape_cast %300 : vector<1x64x128xbf16> to vector<64x128xbf16>
    %cst_313 = arith.constant dense<0.000000e+00> : vector<1x128xf32>
    %302 = tpu.matmul %299, %301, %cst_313 {dimension_numbers = #tpu.dot_dimension_numbers<[1], [0], [0], [1], [0, 0, 1, 1], [], []>} : vector<1x64xbf16>, vector<64x128xbf16>, vector<1x128xf32> -> vector<1x128xf32>
    %303 = arith.addf %298, %302 : vector<1x128xf32>
    %c16 = arith.constant 16 : index
    %c0_314 = arith.constant 0 : index
    %304 = vector.load %arg19[%c16, %c0_314] : memref<18x64xbf16, #tpu.memory_space<vmem>>, vector<1x64xbf16>
    %c16_315 = arith.constant 16 : index
    %c0_316 = arith.constant 0 : index
    %c0_317 = arith.constant 0 : index
    %305 = vector.load %arg8[%c16_315, %c0_316, %c0_317] : memref<18x64x128xbf16, #tpu.memory_space<vmem>>, vector<1x64x128xbf16>
    %306 = vector.shape_cast %305 : vector<1x64x128xbf16> to vector<64x128xbf16>
    %cst_318 = arith.constant dense<0.000000e+00> : vector<1x128xf32>
    %307 = tpu.matmul %304, %306, %cst_318 {dimension_numbers = #tpu.dot_dimension_numbers<[1], [0], [0], [1], [0, 0, 1, 1], [], []>} : vector<1x64xbf16>, vector<64x128xbf16>, vector<1x128xf32> -> vector<1x128xf32>
    %308 = arith.addf %303, %307 : vector<1x128xf32>
    %c17 = arith.constant 17 : index
    %c0_319 = arith.constant 0 : index
    %309 = vector.load %arg19[%c17, %c0_319] : memref<18x64xbf16, #tpu.memory_space<vmem>>, vector<1x64xbf16>
    %c17_320 = arith.constant 17 : index
    %c0_321 = arith.constant 0 : index
    %c0_322 = arith.constant 0 : index
    %310 = vector.load %arg8[%c17_320, %c0_321, %c0_322] : memref<18x64x128xbf16, #tpu.memory_space<vmem>>, vector<1x64x128xbf16>
    %311 = vector.shape_cast %310 : vector<1x64x128xbf16> to vector<64x128xbf16>
    %cst_323 = arith.constant dense<0.000000e+00> : vector<1x128xf32>
    %312 = tpu.matmul %309, %311, %cst_323 {dimension_numbers = #tpu.dot_dimension_numbers<[1], [0], [0], [1], [0, 0, 1, 1], [], []>} : vector<1x64xbf16>, vector<64x128xbf16>, vector<1x128xf32> -> vector<1x128xf32>
    %313 = arith.addf %308, %312 : vector<1x128xf32>
    %c0_324 = arith.constant 0 : index
    %c0_325 = arith.constant 0 : index
    %314 = vector.load %arg9[%c0_324, %c0_325] : memref<1x128xf32, #tpu.memory_space<vmem>>, vector<1x128xf32>
    %315 = arith.addf %313, %314 : vector<1x128xf32>
    %cst_326 = arith.constant 0.000000e+00 : f32
    %316 = vector.broadcast %cst_326 : f32 to vector<1x128xf32>
    %317 = arith.maximumf %315, %316 : vector<1x128xf32>
    %318 = arith.truncf %317 : vector<1x128xf32> to vector<1x128xbf16>
    %c0_327 = arith.constant 0 : index
    %c0_328 = arith.constant 0 : index
    %319 = vector.load %arg10[%c0_327, %c0_328] : memref<128x128xbf16, #tpu.memory_space<vmem>>, vector<128x128xbf16>
    %cst_329 = arith.constant dense<0.000000e+00> : vector<1x128xf32>
    %320 = tpu.matmul %318, %319, %cst_329 {dimension_numbers = #tpu.dot_dimension_numbers<[1], [0], [0], [1], [0, 0, 1, 1], [], []>} : vector<1x128xbf16>, vector<128x128xbf16>, vector<1x128xf32> -> vector<1x128xf32>
    %c0_330 = arith.constant 0 : index
    %c0_331 = arith.constant 0 : index
    %321 = vector.load %arg11[%c0_330, %c0_331] : memref<1x128xf32, #tpu.memory_space<vmem>>, vector<1x128xf32>
    %322 = arith.addf %320, %321 : vector<1x128xf32>
    %cst_332 = arith.constant 0.000000e+00 : f32
    %323 = vector.broadcast %cst_332 : f32 to vector<1x128xf32>
    %324 = arith.maximumf %322, %323 : vector<1x128xf32>
    %325 = arith.truncf %324 : vector<1x128xf32> to vector<1x128xbf16>
    %c0_333 = arith.constant 0 : index
    %c0_334 = arith.constant 0 : index
    %326 = vector.load %arg12[%c0_333, %c0_334] : memref<128x128xbf16, #tpu.memory_space<vmem>>, vector<128x128xbf16>
    %cst_335 = arith.constant dense<0.000000e+00> : vector<1x128xf32>
    %327 = tpu.matmul %325, %326, %cst_335 {dimension_numbers = #tpu.dot_dimension_numbers<[1], [0], [0], [1], [0, 0, 1, 1], [], []>} : vector<1x128xbf16>, vector<128x128xbf16>, vector<1x128xf32> -> vector<1x128xf32>
    %c0_336 = arith.constant 0 : index
    %c0_337 = arith.constant 0 : index
    %328 = vector.load %arg13[%c0_336, %c0_337] : memref<1x128xf32, #tpu.memory_space<vmem>>, vector<1x128xf32>
    %329 = arith.addf %327, %328 : vector<1x128xf32>
    %cst_338 = arith.constant 0.000000e+00 : f32
    %330 = vector.broadcast %cst_338 : f32 to vector<1x128xf32>
    %331 = arith.maximumf %329, %330 : vector<1x128xf32>
    %332 = arith.truncf %331 : vector<1x128xf32> to vector<1x128xbf16>
    %c0_339 = arith.constant 0 : index
    %c0_340 = arith.constant 0 : index
    %333 = vector.load %arg14[%c0_339, %c0_340] : memref<128x128xbf16, #tpu.memory_space<vmem>>, vector<128x128xbf16>
    %cst_341 = arith.constant dense<0.000000e+00> : vector<1x128xf32>
    %334 = tpu.matmul %332, %333, %cst_341 {dimension_numbers = #tpu.dot_dimension_numbers<[1], [0], [0], [1], [0, 0, 1, 1], [], []>} : vector<1x128xbf16>, vector<128x128xbf16>, vector<1x128xf32> -> vector<1x128xf32>
    %c0_342 = arith.constant 0 : index
    %c0_343 = arith.constant 0 : index
    %335 = vector.load %arg15[%c0_342, %c0_343] : memref<1x128xf32, #tpu.memory_space<vmem>>, vector<1x128xf32>
    %336 = arith.addf %334, %335 : vector<1x128xf32>
    %337 = vector.shape_cast %336 : vector<1x128xf32> to vector<1x1x128xf32>
    %c0_344 = arith.constant 0 : index
    %c0_345 = arith.constant 0 : index
    %c0_346 = arith.constant 0 : index
    %338 = vector.load %arg16[%c0_344, %c0_345, %c0_346] : memref<1x1x128xf32, #tpu.memory_space<vmem>>, vector<1x1x128xf32>
    tpu.vector_store %arg16[%c0_344, %c0_345, %c0_346], %337 {strides = array<i32>} : memref<1x1x128xf32, #tpu.memory_space<vmem>>, vector<1x1x128xf32>,
    return
  }
  func.func @transform_0(%arg0: i32) -> (i32, i32, i32) {
    %c0_i32 = arith.constant 0 : i32
    %c0_i32_0 = arith.constant 0 : i32
    %c0_i32_1 = arith.constant 0 : i32
    return %arg0, %c0_i32, %c0_i32_0 : i32, i32, i32
  }
  func.func @transform_1(%arg0: i32) -> (i32, i32) {
    %c0_i32 = arith.constant 0 : i32
    %c0_i32_0 = arith.constant 0 : i32
    %c0_i32_1 = arith.constant 0 : i32
    return %c0_i32, %c0_i32_0 : i32, i32
  }
  func.func @transform_2(%arg0: i32) -> (i32, i32) {
    %c0_i32 = arith.constant 0 : i32
    %c0_i32_0 = arith.constant 0 : i32
    %c0_i32_1 = arith.constant 0 : i32
    return %c0_i32, %c0_i32_0 : i32, i32
  }
  func.func @transform_3(%arg0: i32) -> (i32, i32, i32) {
    %c0_i32 = arith.constant 0 : i32
    %c0_i32_0 = arith.constant 0 : i32
    %c0_i32_1 = arith.constant 0 : i32
    %c0_i32_2 = arith.constant 0 : i32
    return %c0_i32, %c0_i32_0, %c0_i32_1 : i32, i32, i32
  }
  func.func @transform_4(%arg0: i32) -> (i32, i32) {
    %c0_i32 = arith.constant 0 : i32
    %c0_i32_0 = arith.constant 0 : i32
    %c0_i32_1 = arith.constant 0 : i32
    return %c0_i32, %c0_i32_0 : i32, i32
  }
  func.func @transform_5(%arg0: i32) -> (i32, i32, i32) {
    %c0_i32 = arith.constant 0 : i32
    %c0_i32_0 = arith.constant 0 : i32
    %c0_i32_1 = arith.constant 0 : i32
    %c0_i32_2 = arith.constant 0 : i32
    return %c0_i32, %c0_i32_0, %c0_i32_1 : i32, i32, i32
  }
  func.func @transform_6(%arg0: i32) -> (i32, i32) {
    %c0_i32 = arith.constant 0 : i32
    %c0_i32_0 = arith.constant 0 : i32
    %c0_i32_1 = arith.constant 0 : i32
    return %c0_i32, %c0_i32_0 : i32, i32
  }
  func.func @transform_7(%arg0: i32) -> (i32, i32, i32) {
    %c0_i32 = arith.constant 0 : i32
    %c0_i32_0 = arith.constant 0 : i32
    %c0_i32_1 = arith.constant 0 : i32
    %c0_i32_2 = arith.constant 0 : i32
    return %c0_i32, %c0_i32_0, %c0_i32_1 : i32, i32, i32
  }
  func.func @transform_8(%arg0: i32) -> (i32, i32) {
    %c0_i32 = arith.constant 0 : i32
    %c0_i32_0 = arith.constant 0 : i32
    %c0_i32_1 = arith.constant 0 : i32
    return %c0_i32, %c0_i32_0 : i32, i32
  }
  func.func @transform_9(%arg0: i32) -> (i32, i32) {
    %c0_i32 = arith.constant 0 : i32
    %c0_i32_0 = arith.constant 0 : i32
    %c0_i32_1 = arith.constant 0 : i32
    return %c0_i32, %c0_i32_0 : i32, i32
  }
  func.func @transform_10(%arg0: i32) -> (i32, i32) {
    %c0_i32 = arith.constant 0 : i32
    %c0_i32_0 = arith.constant 0 : i32
    %c0_i32_1 = arith.constant 0 : i32
    return %c0_i32, %c0_i32_0 : i32, i32
  }
  func.func @transform_11(%arg0: i32) -> (i32, i32) {
    %c0_i32 = arith.constant 0 : i32
    %c0_i32_0 = arith.constant 0 : i32
    %c0_i32_1 = arith.constant 0 : i32
    return %c0_i32, %c0_i32_0 : i32, i32
  }
  func.func @transform_12(%arg0: i32) -> (i32, i32) {
    %c0_i32 = arith.constant 0 : i32
    %c0_i32_0 = arith.constant 0 : i32
    %c0_i32_1 = arith.constant 0 : i32
    return %c0_i32, %c0_i32_0 : i32, i32
  }
  func.func @transform_13(%arg0: i32) -> (i32, i32) {
    %c0_i32 = arith.constant 0 : i32
    %c0_i32_0 = arith.constant 0 : i32
    %c0_i32_1 = arith.constant 0 : i32
    return %c0_i32, %c0_i32_0 : i32, i32
  }
  func.func @transform_14(%arg0: i32) -> (i32, i32) {
    %c0_i32 = arith.constant 0 : i32
    %c0_i32_0 = arith.constant 0 : i32
    %c0_i32_1 = arith.constant 0 : i32
    return %c0_i32, %c0_i32_0 : i32, i32
  }
  func.func @transform_15(%arg0: i32) -> (i32, i32, i32) {
    %c0_i32 = arith.constant 0 : i32
    %c0_i32_0 = arith.constant 0 : i32
    %c0_i32_1 = arith.constant 0 : i32
    return %arg0, %c0_i32, %c0_i32_0 : i32, i32, i32
  }
}

</mosaic_0001>

<bundles_post_ra>
// kernel: pilotnet_forward.3
= control target key start
LH: loop header
LB: loop body
LE: loop exit
PB: predicated region body
PF: predicated region fallthrough
CT: control target
= control target key end

     0   :  { %s2965_s12 = smov 0   ;;  %s3530_s0 = inlined_call_operand.vmem [shape: bf16[6144,75], index: 0, kind: input, shape index: {}]   ;;  %s3531_s1 = inlined_call_operand.vmem [shape: bf16[75,24], index: 1, kind: input, shape index: {}]   ;;  %s3532_s2 = inlined_call_operand.vmem [shape: f32[1,24], index: 2, kind: input, shape index: {}]   ;;  %s3533_s3 = inlined_call_operand.vmem [shape: bf16[6144,24], index: 3, kind: output, shape index: {}]  }
   0x1 LB: > { %s2239_s13 = sadd.s32 4294967295, %s2942_s12   ;;  %p2243_p0 = scmp.ge.s32.totalorder %s2942_s12, 1  ;;  %s2942_s12 = sphi %s2965_s12, %s13_s12  }
   0x2   : > { %p138_p1 = scmp.lt.s32.totalorder %s2942_s12, 7 }
   0x4   : > { %p139_p2 = pnand %p2243_p0, %p138_p1 }
   0x5   : > { %v2866_v0 = vld [vmem:[%s3531_s1] sm:$0xff] (!%p139_p2)   ;;  %v2867_v1 = vld [vmem:[%s3531_s1 + $0x8] sm:$0xff] (!%p139_p2)   ;;  %vm862_vm0 = vcmask (!%p139_p2), 1044480   ;;  %v2868_v2 = vld [vmem:[%s3531_s1 + $0x10] sm:$0xff] (!%p139_p2)   ;;  %s2244_s20 = sshll.u32 (!%p139_p2), %s2239_s13, 7  ;;  %vm863_vm1 = vcmask (!%p139_p2), 1045504  }
   0x6   : > { %142 = sbr.rel (%p139_p2) target bundleno = 368 (0x170), region = 32  ;;  %2709 = vmatprep.subr.bf16.mxu0 (!%p139_p2), %v2866_v0  ;;  %2847 = vmatprep.subr.bf16.mxu1 (!%p139_p2), %v2866_v0  ;;  %v2944_v3 = vmov (!%p139_p2), 65535   ;;  %p163_p3 = scmp.lt.s32.totalorder (!%p139_p2), %s2244_s20, 767  ;;  %v2869_v5 = vld [vmem:[%s3531_s1 + $0x18] sm:$0xff] (!%p139_p2)   ;;  %v2870_v6 = vld [vmem:[%s3531_s1 + $0x20] sm:$0x3f] (!%p139_p2)  }
   0x7   : > { %2710 = vmatpush3.bf16.msra.mxu0 (!%p139_p2), %v2866_v0  ;;  %2852 = vmatpush3.bf16.msra.mxu1 (!%p139_p2), %v2866_v0  ;;  %v864_v4 = vsel (!%p139_p2), %vm862_vm0, 4294967295, %v2944_v3  ;;  %vm669_vm2 = vcmask (!%p139_p2), 613376   ;;  %vm2054_vm3 = vcmask (!%p139_p2), 191488  }
   0x8   : > { %2711 = vmatprep.subr.bf16.mxu0 (!%p139_p2), %v2867_v1  ;;  %2848 = vmatprep.subr.bf16.mxu1 (!%p139_p2), %v2867_v1  ;;  %v865_v7 = vsel (!%p139_p2), %vm863_vm1, %v864_v4, 0 }
   0x9   : > { %v867_v8 = vand.u32 (!%p139_p2), %v2870_v6, %v865_v7 }
   0xb   : > { %2712 = vmatpush3.bf16.msra.mxu0 (!%p139_p2), %v2867_v1  ;;  %2853 = vmatpush3.bf16.msra.mxu1 (!%p139_p2), %v2867_v1 }
   0xc   : > { %2713 = vmatprep.subr.bf16.mxu0 (!%p139_p2), %v2868_v2  ;;  %2849 = vmatprep.subr.bf16.mxu1 (!%p139_p2), %v2868_v2 }
   0xd   : > { %s3535_s20 = smov (!%p163_p3, %s2244_s20), 767 }
   0xe   : > { %s2245_s25 = sshll.u32 %s3535_s20, 2 }
   0xf   : > { %2714 = vmatpush3.bf16.msra.mxu0 %v2868_v2  ;;  %2854 = vmatpush3.bf16.msra.mxu1 %v2868_v2  ;;  %s2996_s28 = scalar_lea.vmem %s3530_s0, %s2245_s25  ;;  %s3142_s6 = scalar_lea.vmem %s3533_s3, %s2245_s25 }
  0x10   : > { %2715 = vmatprep.subr.bf16.mxu0 %v2869_v5  ;;  %2850 = vmatprep.subr.bf16.mxu1 %v2869_v5  ;;  %v2871_v9 = vld [vmem:[%s2996_s28] sm:$0xff]   ;;  %v2873_v11 = vld [vmem:[%s2996_s28 + $0x8] sm:$0xff]   ;;  %v2875_v13 = vld [vmem:[%s2996_s28 + $0x10] sm:$0xff]  }
  0x11   : > { %v2872_v10 = vld [vmem:[%s2996_s28 + $0x100] sm:$0xff]   ;;  %2719 = vmatprep.mubr.msk.bf16.mxu0 %vm669_vm2, %v2871_v9  ;;  %v2874_v12 = vld [vmem:[%s2996_s28 + $0x108] sm:$0xff]   ;;  %v2876_v14 = vld [vmem:[%s2996_s28 + $0x110] sm:$0xff]  }
  0x12   : > { %2783 = vmatprep.mubr.msk.bf16.mxu1 %vm669_vm2, %v2872_v10  ;;  %v2877_v15 = vld [vmem:[%s2996_s28 + $0x18] sm:$0xff]   ;;  %v2879_v17 = vld [vmem:[%s2996_s28 + $0x20] sm:$0xff]   ;;  %v2881_v19 = vld [vmem:[%s2996_s28 + $0x28] sm:$0xff]  }
  0x13   : > { %2716 = vmatpush3.bf16.msra.mxu0 %v2869_v5  ;;  %2855 = vmatpush3.bf16.msra.mxu1 %v2869_v5  ;;  %v2878_v16 = vld [vmem:[%s2996_s28 + $0x118] sm:$0xff]   ;;  %v2880_v18 = vld [vmem:[%s2996_s28 + $0x120] sm:$0xff]   ;;  %v2882_v20 = vld [vmem:[%s2996_s28 + $0x128] sm:$0xff]  }
  0x14   : > { %2717 = vmatprep.subr.bf16.mxu0 %v867_v8  ;;  %2851 = vmatprep.subr.bf16.mxu1 %v867_v8  ;;  %v2883_v21 = vld [vmem:[%s2996_s28 + $0x30] sm:$0xff]   ;;  %v2885_v23 = vld [vmem:[%s2996_s28 + $0x38] sm:$0xff]   ;;  %v2887_v25 = vld [vmem:[%s2996_s28 + $0x40] sm:$0xff]  }
  0x15   : > { %v2884_v22 = vld [vmem:[%s2996_s28 + $0x130] sm:$0xff]   ;;  %v2886_v24 = vld [vmem:[%s2996_s28 + $0x138] sm:$0xff]   ;;  %v2888_v26 = vld [vmem:[%s2996_s28 + $0x140] sm:$0xff]  }
  0x16   : > { %v2889_v27 = vld [vmem:[%s2996_s28 + $0x48] sm:$0xff]   ;;  %v2891_v29 = vld [vmem:[%s2996_s28 + $0x50] sm:$0xff]   ;;  %v2893_v31 = vld [vmem:[%s2996_s28 + $0x58] sm:$0xff]  }
  0x17   : > { %2718 = vmatpush3.bf16.msra.mxu0 %v867_v8  ;;  %2856 = vmatpush3.bf16.msra.mxu1 %v867_v8  ;;  %v2890_v28 = vld [vmem:[%s2996_s28 + $0x148] sm:$0xff]   ;;  %v2892_v30 = vld [vmem:[%s2996_s28 + $0x150] sm:$0xff]   ;;  %v2894_v32 = vld [vmem:[%s2996_s28 + $0x158] sm:$0xff]  }
  0x18   : > { %v2895_v33 = vld [vmem:[%s2996_s28 + $0x60] sm:$0xff]   ;;  %v2897_v35 = vld [vmem:[%s2996_s28 + $0x68] sm:$0xff]   ;;  %v2899_v37 = vld [vmem:[%s2996_s28 + $0x70] sm:$0xff]  }
  0x19   : > { %v2896_v34 = vld [vmem:[%s2996_s28 + $0x160] sm:$0xff]   ;;  %v2898_v36 = vld [vmem:[%s2996_s28 + $0x168] sm:$0xff]   ;;  %v2900_v38 = vld [vmem:[%s2996_s28 + $0x170] sm:$0xff]  }
  0x1a   : > { %2720 = vmatmul.mubr.msk.bf16.vlgmr.msra.gmra.mrb[0].mxu0 %vm669_vm2, %v2873_v11  ;;  %2784 = vmatmul.mubr.msk.bf16.vlgmr.msra.gmra.mrb[0].mxu1 %vm669_vm2, %v2874_v12  ;;  %v2901_v39 = vld [vmem:[%s2996_s28 + $0x78] sm:$0xff]   ;;  %v2903_v41 = vld [vmem:[%s2996_s28 + $0x80] sm:$0xff]   ;;  %v2905_v43 = vld [vmem:[%s2996_s28 + $0x88] sm:$0xff]  }
  0x1b   : > { %2723 = vmatprep.mubr.msk.bf16.mxu0 %vm669_vm2, %v2875_v13  ;;  %2787 = vmatprep.mubr.msk.bf16.mxu1 %vm669_vm2, %v2876_v14  ;;  %v2902_v40 = vld [vmem:[%s2996_s28 + $0x178] sm:$0xff]   ;;  %v2904_v42 = vld [vmem:[%s2996_s28 + $0x180] sm:$0xff]   ;;  %v2906_v44 = vld [vmem:[%s2996_s28 + $0x188] sm:$0xff]  }
  0x1c   : > { %v2907_v45 = vld [vmem:[%s2996_s28 + $0x90] sm:$0xff]   ;;  %v2909_v47 = vld [vmem:[%s2996_s28 + $0x98] sm:$0xff]   ;;  %v2911_v49 = vld [vmem:[%s2996_s28 + $0xa0] sm:$0xff]  }
  0x1d   : > { %v2908_v46 = vld [vmem:[%s2996_s28 + $0x190] sm:$0xff]   ;;  %v2910_v48 = vld [vmem:[%s2996_s28 + $0x198] sm:$0xff]   ;;  %v2912_v50 = vld [vmem:[%s2996_s28 + $0x1a0] sm:$0xff]  }
  0x1e   : > { %v2913_v51 = vld [vmem:[%s2996_s28 + $0xa8] sm:$0xff]   ;;  %v2915_v53 = vld [vmem:[%s2996_s28 + $0xb0] sm:$0xff]   ;;  %v2917_v55 = vld [vmem:[%s2996_s28 + $0xb8] sm:$0xff]  }
  0x1f   : > { %v2914_v52 = vld [vmem:[%s2996_s28 + $0x1a8] sm:$0xff]   ;;  %v2916_v54 = vld [vmem:[%s2996_s28 + $0x1b0] sm:$0xff]   ;;  %v2918_v56 = vld [vmem:[%s2996_s28 + $0x1b8] sm:$0xff]  }
  0x20   : > { %v2919_v57 = vld [vmem:[%s2996_s28 + $0xc0] sm:$0xff]   ;;  %v2921_v59 = vld [vmem:[%s2996_s28 + $0xc8] sm:$0xff]   ;;  %v2923_v61 = vld [vmem:[%s2996_s28 + $0xd0] sm:$0xff]  }
  0x21   : > { %v2920_v58 = vld [vmem:[%s2996_s28 + $0x1c0] sm:$0xff]   ;;  %v2922_v60 = vld [vmem:[%s2996_s28 + $0x1c8] sm:$0xff]   ;;  %v2924_v62 = vld [vmem:[%s2996_s28 + $0x1d0] sm:$0xff]  }
  0x22   : > { %2724 = vmatmul.mubr.msk.bf16.gmra.mrb[4].mxu0 %vm669_vm2, %v2877_v15  ;;  %2788 = vmatmul.mubr.msk.bf16.gmra.mrb[4].mxu1 %vm669_vm2, %v2878_v16  ;;  %v2925_v63 = vld [vmem:[%s2996_s28 + $0xd8] sm:$0xff]   ;;  %v2927_v1 = vld [vmem:[%s2996_s28 + $0xe0] sm:$0xff]   ;;  %v2929_v3 = vld [vmem:[%s2996_s28 + $0xe8] sm:$0xff]  }
  0x23   : > { %2727 = vmatprep.mubr.msk.bf16.mxu0 %vm669_vm2, %v2879_v17  ;;  %2791 = vmatprep.mubr.msk.bf16.mxu1 %vm669_vm2, %v2880_v18  ;;  %v2926_v0 = vld [vmem:[%s2996_s28 + $0x1d8] sm:$0xff]   ;;  %v2928_v2 = vld [vmem:[%s2996_s28 + $0x1e0] sm:$0xff]   ;;  %v2930_v4 = vld [vmem:[%s2996_s28 + $0x1e8] sm:$0xff]  }
  0x24   : > { %v2931_v5 = vld [vmem:[%s2996_s28 + $0xf0] sm:$0xff]   ;;  %v2933_v7 = vld [vmem:[%s2996_s28 + $0xf8] sm:$0xff]   ;;  %v3129_v9 = vld [vmem:[%s3532_s2] ss:$0 sm:$0xff] }
  0x25   : > { %v2932_v6 = vld [vmem:[%s2996_s28 + $0x1f0] sm:$0xff]   ;;  %v2934_v8 = vld [vmem:[%s2996_s28 + $0x1f8] sm:$0xff]  }
  0x2a   : > { %2728 = vmatmul.mubr.msk.bf16.gmra.mrb[8].mxu0 %vm669_vm2, %v2881_v19  ;;  %2792 = vmatmul.mubr.msk.bf16.gmra.mrb[8].mxu1 %vm669_vm2, %v2882_v20 }
  0x2b   : > { %2731 = vmatprep.mubr.msk.bf16.mxu0 %vm669_vm2, %v2883_v21  ;;  %2795 = vmatprep.mubr.msk.bf16.mxu1 %vm669_vm2, %v2884_v22 }
  0x32   : > { %2732 = vmatmul.mubr.msk.bf16.gmra.mrb[12].mxu0 %vm669_vm2, %v2885_v23  ;;  %2796 = vmatmul.mubr.msk.bf16.gmra.mrb[12].mxu1 %vm669_vm2, %v2886_v24 }
  0x33   : > { %2735 = vmatprep.mubr.msk.bf16.mxu0 %vm669_vm2, %v2887_v25  ;;  %2799 = vmatprep.mubr.msk.bf16.mxu1 %vm669_vm2, %v2888_v26 }
  0x3a   : > { %2736 = vmatmul.mubr.msk.bf16.gmra.mrb[16].mxu0 %vm669_vm2, %v2889_v27  ;;  %2800 = vmatmul.mubr.msk.bf16.gmra.mrb[16].mxu1 %vm669_vm2, %v2890_v28 }
  0x3b   : > { %2739 = vmatprep.mubr.msk.bf16.mxu0 %vm669_vm2, %v2891_v29  ;;  %2803 = vmatprep.mubr.msk.bf16.mxu1 %vm669_vm2, %v2892_v30 }
  0x42   : > { %2740 = vmatmul.mubr.msk.bf16.gmra.mrb[20].mxu0 %vm669_vm2, %v2893_v31  ;;  %2804 = vmatmul.mubr.msk.bf16.gmra.mrb[20].mxu1 %vm669_vm2, %v2894_v32 }
  0x43   : > { %2743 = vmatprep.mubr.msk.bf16.mxu0 %vm669_vm2, %v2895_v33  ;;  %2807 = vmatprep.mubr.msk.bf16.mxu1 %vm669_vm2, %v2896_v34 }
  0x4a   : > { %2744 = vmatmul.mubr.msk.bf16.gmra.mrb[24].mxu0 %vm669_vm2, %v2897_v35  ;;  %2808 = vmatmul.mubr.msk.bf16.gmra.mrb[24].mxu1 %vm669_vm2, %v2898_v36 }
  0x4b   : > { %2747 = vmatprep.mubr.msk.bf16.mxu0 %vm669_vm2, %v2899_v37  ;;  %2811 = vmatprep.mubr.msk.bf16.mxu1 %vm669_vm2, %v2900_v38 }
  0x52   : > { %2748 = vmatmul.mubr.msk.bf16.gmra.mrb[28].mxu0 %vm669_vm2, %v2901_v39  ;;  %2812 = vmatmul.mubr.msk.bf16.gmra.mrb[28].mxu1 %vm669_vm2, %v2902_v40 }
  0x53   : > { %2751 = vmatprep.mubr.msk.bf16.mxu0 %vm669_vm2, %v2903_v41  ;;  %2815 = vmatprep.mubr.msk.bf16.mxu1 %vm669_vm2, %v2904_v42 }
  0x5a   : > { %2752 = vmatmul.mubr.msk.bf16.gmra.mrb[32].mxu0 %vm669_vm2, %v2905_v43  ;;  %2816 = vmatmul.mubr.msk.bf16.gmra.mrb[32].mxu1 %vm669_vm2, %v2906_v44 }
  0x5b   : > { %2755 = vmatprep.mubr.msk.bf16.mxu0 %vm669_vm2, %v2907_v45  ;;  %2819 = vmatprep.mubr.msk.bf16.mxu1 %vm669_vm2, %v2908_v46 }
  0x62   : > { %2756 = vmatmul.mubr.msk.bf16.gmra.mrb[36].mxu0 %vm669_vm2, %v2909_v47  ;;  %2820 = vmatmul.mubr.msk.bf16.gmra.mrb[36].mxu1 %vm669_vm2, %v2910_v48 }
  0x63   : > { %2759 = vmatprep.mubr.msk.bf16.mxu0 %vm669_vm2, %v2911_v49  ;;  %2823 = vmatprep.mubr.msk.bf16.mxu1 %vm669_vm2, %v2912_v50 }
  0x6a   : > { %2760 = vmatmul.mubr.msk.bf16.gmra.mrb[40].mxu0 %vm669_vm2, %v2913_v51  ;;  %2824 = vmatmul.mubr.msk.bf16.gmra.mrb[40].mxu1 %vm669_vm2, %v2914_v52 }
  0x6b   : > { %2763 = vmatprep.mubr.msk.bf16.mxu0 %vm669_vm2, %v2915_v53  ;;  %2827 = vmatprep.mubr.msk.bf16.mxu1 %vm669_vm2, %v2916_v54 }
  0x72   : > { %2764 = vmatmul.mubr.msk.bf16.gmra.mrb[44].mxu0 %vm669_vm2, %v2917_v55  ;;  %2828 = vmatmul.mubr.msk.bf16.gmra.mrb[44].mxu1 %vm669_vm2, %v2918_v56 }
  0x73   : > { %2767 = vmatprep.mubr.msk.bf16.mxu0 %vm669_vm2, %v2919_v57  ;;  %2831 = vmatprep.mubr.msk.bf16.mxu1 %vm669_vm2, %v2920_v58 }
  0x7a   : > { %2768 = vmatmul.mubr.msk.bf16.gmra.mrb[48].mxu0 %vm669_vm2, %v2921_v59  ;;  %2832 = vmatmul.mubr.msk.bf16.gmra.mrb[48].mxu1 %vm669_vm2, %v2922_v60 }
  0x7b   : > { %2771 = vmatprep.mubr.msk.bf16.mxu0 %vm669_vm2, %v2923_v61  ;;  %2835 = vmatprep.mubr.msk.bf16.mxu1 %vm669_vm2, %v2924_v62 }
  0x82   : > { %2772 = vmatmul.mubr.msk.bf16.gmra.mrb[52].mxu0 %vm669_vm2, %v2925_v63  ;;  %2836 = vmatmul.mubr.msk.bf16.gmra.mrb[52].mxu1 %vm669_vm2, %v2926_v0 }
  0x83   : > { %2775 = vmatprep.mubr.msk.bf16.mxu0 %vm669_vm2, %v2927_v1  ;;  %2839 = vmatprep.mubr.msk.bf16.mxu1 %vm669_vm2, %v2928_v2 }
  0x8a   : > { %2776 = vmatmul.mubr.msk.bf16.gmra.mrb[56].mxu0 %vm669_vm2, %v2929_v3  ;;  %2840 = vmatmul.mubr.msk.bf16.gmra.mrb[56].mxu1 %vm669_vm2, %v2930_v4 }
  0x8b   : > { %2779 = vmatprep.mubr.msk.bf16.mxu0 %vm669_vm2, %v2931_v5  ;;  %2843 = vmatprep.mubr.msk.bf16.mxu1 %vm669_vm2, %v2932_v6 }
  0x92   : > { %2780 = vmatmul.mubr.msk.bf16.gmra.mrb[60].mxu0 %vm669_vm2, %v2933_v7  ;;  %2844 = vmatmul.mubr.msk.bf16.gmra.mrb[60].mxu1 %vm669_vm2, %v2934_v8 }
  0xed   : > { %v2721_v10 = vpop.f32.mrb[0].mxu0  ;;  %v2785_v11 = vpop.f32.mrb[0].mxu1 }
  0xee   : > { %v912_v12 = vadd.f32 %v2721_v10, %v3129_v9  ;;  %v1168_v13 = vadd.f32 %v2785_v11, %v3129_v9  ;;  %v903_v14 = vpop.f32.mrb[1].mxu0  ;;  %v1159_v15 = vpop.f32.mrb[1].mxu1 }
  0xef   : > { %v904_v16 = vadd.f32 %v3129_v9, %v903_v14  ;;  %v1160_v17 = vadd.f32 %v3129_v9, %v1159_v15  ;;  %v2722_v18 = vpop.f32.mrb[2].mxu0  ;;  %v2786_v19 = vpop.f32.mrb[2].mxu1 }
  0xf0   : > { %v1416_v20 = vmax.f32 %v912_v12, 0.0  ;;  %v1480_v21 = vmax.f32 %v1168_v13, 0.0  ;;  %v915_v22 = vadd.f32 %v2722_v18, %v3129_v9  ;;  %v1171_v23 = vadd.f32 %v2786_v19, %v3129_v9  ;;  %v906_v24 = vpop.f32.mrb[3].mxu0  ;;  %v1162_v25 = vpop.f32.mrb[3].mxu1 }
  0xf1   : > { %v1414_v26 = vmax.f32 %v904_v16, 0.0  ;;  %v1478_v27 = vmax.f32 %v1160_v17, 0.0  ;;  %v907_v28 = vadd.f32 %v3129_v9, %v906_v24  ;;  %v1163_v29 = vadd.f32 %v3129_v9, %v1162_v25 }
  0xf2   : > { %v2514_v30 = vpack.c.bf16 %v1416_v20, %v1416_v20  ;;  %v2578_v31 = vpack.c.bf16 %v1480_v21, %v1480_v21  ;;  %v1417_v32 = vmax.f32 %v915_v22, 0.0  ;;  %v1481_v33 = vmax.f32 %v1171_v23, 0.0 }
  0xf3   : > { %v2512_v34 = vpack.c.bf16 %v1414_v26, %v1414_v26  ;;  %v2576_v35 = vpack.c.bf16 %v1478_v27, %v1478_v27  ;;  %v1415_v36 = vmax.f32 %v907_v28, 0.0  ;;  %v1479_v37 = vmax.f32 %v1163_v29, 0.0 }
  0xf4   : > { %2057 = vst.msk [vmem:[%s3142_s6 + $0x8] sm:$0xf] %vm2054_vm3, %v2514_v30  ;;  %2121 = vst.msk [vmem:[%s3142_s6 + $0x108] sm:$0xf] %vm2054_vm3, %v2578_v31  ;;  %v2515_v38 = vpack.c.bf16 %v1417_v32, %v1417_v32  ;;  %v2579_v39 = vpack.c.bf16 %v1481_v33, %v1481_v33 }
  0xf5   : > { %2055 = vst.msk [vmem:[%s3142_s6] sm:$0xf] %vm2054_vm3, %v2512_v34  ;;  %2119 = vst.msk [vmem:[%s3142_s6 + $0x100] sm:$0xf] %vm2054_vm3, %v2576_v35  ;;  %v2513_v40 = vpack.c.bf16 %v1415_v36, %v1415_v36  ;;  %v2577_v41 = vpack.c.bf16 %v1479_v37, %v1479_v37  ;;  %v2725_v42 = vpop.f32.mrb[4].mxu0  ;;  %v2789_v43 = vpop.f32.mrb[4].mxu1 }
  0xf6   : > { %2058 = vst.msk [vmem:[%s3142_s6 + $0xc] sm:$0xf] %vm2054_vm3, %v2515_v38  ;;  %2122 = vst.msk [vmem:[%s3142_s6 + $0x10c] sm:$0xf] %vm2054_vm3, %v2579_v39  ;;  %v928_v44 = vadd.f32 %v2725_v42, %v3129_v9  ;;  %v1184_v45 = vadd.f32 %v2789_v43, %v3129_v9  ;;  %v919_v46 = vpop.f32.mrb[5].mxu0  ;;  %v1175_v47 = vpop.f32.mrb[5].mxu1 }
  0xf7   : > { %2056 = vst.msk [vmem:[%s3142_s6 + $0x4] sm:$0xf] %vm2054_vm3, %v2513_v40  ;;  %2120 = vst.msk [vmem:[%s3142_s6 + $0x104] sm:$0xf] %vm2054_vm3, %v2577_v41  ;;  %v920_v48 = vadd.f32 %v3129_v9, %v919_v46  ;;  %v1176_v49 = vadd.f32 %v3129_v9, %v1175_v47  ;;  %v2726_v50 = vpop.f32.mrb[6].mxu0  ;;  %v2790_v51 = vpop.f32.mrb[6].mxu1 }
  0xf8   : > { %v1420_v52 = vmax.f32 %v928_v44, 0.0  ;;  %v1484_v53 = vmax.f32 %v1184_v45, 0.0  ;;  %v931_v54 = vadd.f32 %v2726_v50, %v3129_v9  ;;  %v1187_v55 = vadd.f32 %v2790_v51, %v3129_v9  ;;  %v922_v56 = vpop.f32.mrb[7].mxu0  ;;  %v1178_v57 = vpop.f32.mrb[7].mxu1 }
  0xf9   : > { %v1418_v58 = vmax.f32 %v920_v48, 0.0  ;;  %v1482_v59 = vmax.f32 %v1176_v49, 0.0  ;;  %v923_v60 = vadd.f32 %v3129_v9, %v922_v56  ;;  %v1179_v61 = vadd.f32 %v3129_v9, %v1178_v57 }
  0xfa   : > { %v2518_v62 = vpack.c.bf16 %v1420_v52, %v1420_v52  ;;  %v2582_v63 = vpack.c.bf16 %v1484_v53, %v1484_v53  ;;  %v1421_v0 = vmax.f32 %v931_v54, 0.0  ;;  %v1485_v1 = vmax.f32 %v1187_v55, 0.0 }
  0xfb   : > { %v2516_v2 = vpack.c.bf16 %v1418_v58, %v1418_v58  ;;  %v2580_v3 = vpack.c.bf16 %v1482_v59, %v1482_v59  ;;  %v1419_v4 = vmax.f32 %v923_v60, 0.0  ;;  %v1483_v5 = vmax.f32 %v1179_v61, 0.0 }
  0xfc   : > { %2061 = vst.msk [vmem:[%s3142_s6 + $0x18] sm:$0xf] %vm2054_vm3, %v2518_v62  ;;  %2125 = vst.msk [vmem:[%s3142_s6 + $0x118] sm:$0xf] %vm2054_vm3, %v2582_v63  ;;  %v2519_v6 = vpack.c.bf16 %v1421_v0, %v1421_v0  ;;  %v2583_v7 = vpack.c.bf16 %v1485_v1, %v1485_v1 }
  0xfd   : > { %2059 = vst.msk [vmem:[%s3142_s6 + $0x10] sm:$0xf] %vm2054_vm3, %v2516_v2  ;;  %2123 = vst.msk [vmem:[%s3142_s6 + $0x110] sm:$0xf] %vm2054_vm3, %v2580_v3  ;;  %v2517_v8 = vpack.c.bf16 %v1419_v4, %v1419_v4  ;;  %v2581_v10 = vpack.c.bf16 %v1483_v5, %v1483_v5  ;;  %v2729_v11 = vpop.f32.mrb[8].mxu0  ;;  %v2793_v12 = vpop.f32.mrb[8].mxu1 }
  0xfe   : > { %2062 = vst.msk [vmem:[%s3142_s6 + $0x1c] sm:$0xf] %vm2054_vm3, %v2519_v6  ;;  %2126 = vst.msk [vmem:[%s3142_s6 + $0x11c] sm:$0xf] %vm2054_vm3, %v2583_v7  ;;  %v944_v13 = vadd.f32 %v2729_v11, %v3129_v9  ;;  %v1200_v14 = vadd.f32 %v2793_v12, %v3129_v9  ;;  %v935_v15 = vpop.f32.mrb[9].mxu0  ;;  %v1191_v16 = vpop.f32.mrb[9].mxu1 }
  0xff   : > { %2060 = vst.msk [vmem:[%s3142_s6 + $0x14] sm:$0xf] %vm2054_vm3, %v2517_v8  ;;  %2124 = vst.msk [vmem:[%s3142_s6 + $0x114] sm:$0xf] %vm2054_vm3, %v2581_v10  ;;  %v936_v17 = vadd.f32 %v3129_v9, %v935_v15  ;;  %v1192_v18 = vadd.f32 %v3129_v9, %v1191_v16  ;;  %v2730_v19 = vpop.f32.mrb[10].mxu0  ;;  %v2794_v20 = vpop.f32.mrb[10].mxu1 }
 0x100   : > { %v1424_v21 = vmax.f32 %v944_v13, 0.0  ;;  %v1488_v22 = vmax.f32 %v1200_v14, 0.0  ;;  %v947_v23 = vadd.f32 %v2730_v19, %v3129_v9  ;;  %v1203_v24 = vadd.f32 %v2794_v20, %v3129_v9  ;;  %v938_v25 = vpop.f32.mrb[11].mxu0  ;;  %v1194_v26 = vpop.f32.mrb[11].mxu1 }
 0x101   : > { %v1422_v27 = vmax.f32 %v936_v17, 0.0  ;;  %v1486_v28 = vmax.f32 %v1192_v18, 0.0  ;;  %v939_v29 = vadd.f32 %v3129_v9, %v938_v25  ;;  %v1195_v30 = vadd.f32 %v3129_v9, %v1194_v26 }
 0x102   : > { %v2522_v31 = vpack.c.bf16 %v1424_v21, %v1424_v21  ;;  %v2586_v32 = vpack.c.bf16 %v1488_v22, %v1488_v22  ;;  %v1425_v33 = vmax.f32 %v947_v23, 0.0  ;;  %v1489_v34 = vmax.f32 %v1203_v24, 0.0 }
 0x103   : > { %v2520_v35 = vpack.c.bf16 %v1422_v27, %v1422_v27  ;;  %v2584_v36 = vpack.c.bf16 %v1486_v28, %v1486_v28  ;;  %v1423_v37 = vmax.f32 %v939_v29, 0.0  ;;  %v1487_v38 = vmax.f32 %v1195_v30, 0.0 }
 0x104   : > { %2065 = vst.msk [vmem:[%s3142_s6 + $0x28] sm:$0xf] %vm2054_vm3, %v2522_v31  ;;  %2129 = vst.msk [vmem:[%s3142_s6 + $0x128] sm:$0xf] %vm2054_vm3, %v2586_v32  ;;  %v2523_v39 = vpack.c.bf16 %v1425_v33, %v1425_v33  ;;  %v2587_v40 = vpack.c.bf16 %v1489_v34, %v1489_v34 }
 0x105   : > { %2063 = vst.msk [vmem:[%s3142_s6 + $0x20] sm:$0xf] %vm2054_vm3, %v2520_v35  ;;  %2127 = vst.msk [vmem:[%s3142_s6 + $0x120] sm:$0xf] %vm2054_vm3, %v2584_v36  ;;  %v2521_v41 = vpack.c.bf16 %v1423_v37, %v1423_v37  ;;  %v2585_v42 = vpack.c.bf16 %v1487_v38, %v1487_v38  ;;  %v2733_v43 = vpop.f32.mrb[12].mxu0  ;;  %v2797_v44 = vpop.f32.mrb[12].mxu1 }
 0x106   : > { %2066 = vst.msk [vmem:[%s3142_s6 + $0x2c] sm:$0xf] %vm2054_vm3, %v2523_v39  ;;  %2130 = vst.msk [vmem:[%s3142_s6 + $0x12c] sm:$0xf] %vm2054_vm3, %v2587_v40  ;;  %v960_v45 = vadd.f32 %v2733_v43, %v3129_v9  ;;  %v1216_v46 = vadd.f32 %v2797_v44, %v3129_v9  ;;  %v951_v47 = vpop.f32.mrb[13].mxu0  ;;  %v1207_v48 = vpop.f32.mrb[13].mxu1 }
 0x107   : > { %2064 = vst.msk [vmem:[%s3142_s6 + $0x24] sm:$0xf] %vm2054_vm3, %v2521_v41  ;;  %2128 = vst.msk [vmem:[%s3142_s6 + $0x124] sm:$0xf] %vm2054_vm3, %v2585_v42  ;;  %v952_v49 = vadd.f32 %v3129_v9, %v951_v47  ;;  %v1208_v50 = vadd.f32 %v3129_v9, %v1207_v48  ;;  %v2734_v51 = vpop.f32.mrb[14].mxu0  ;;  %v2798_v52 = vpop.f32.mrb[14].mxu1 }
 0x108   : > { %v1428_v53 = vmax.f32 %v960_v45, 0.0  ;;  %v1492_v54 = vmax.f32 %v1216_v46, 0.0  ;;  %v963_v55 = vadd.f32 %v2734_v51, %v3129_v9  ;;  %v1219_v56 = vadd.f32 %v2798_v52, %v3129_v9  ;;  %v954_v57 = vpop.f32.mrb[15].mxu0  ;;  %v1210_v58 = vpop.f32.mrb[15].mxu1 }
 0x109   : > { %v1426_v59 = vmax.f32 %v952_v49, 0.0  ;;  %v1490_v60 = vmax.f32 %v1208_v50, 0.0  ;;  %v955_v61 = vadd.f32 %v3129_v9, %v954_v57  ;;  %v1211_v62 = vadd.f32 %v3129_v9, %v1210_v58 }
 0x10a   : > { %v2526_v63 = vpack.c.bf16 %v1428_v53, %v1428_v53  ;;  %v2590_v0 = vpack.c.bf16 %v1492_v54, %v1492_v54  ;;  %v1429_v1 = vmax.f32 %v963_v55, 0.0  ;;  %v1493_v2 = vmax.f32 %v1219_v56, 0.0 }
 0x10b   : > { %v2524_v3 = vpack.c.bf16 %v1426_v59, %v1426_v59  ;;  %v2588_v4 = vpack.c.bf16 %v1490_v60, %v1490_v60  ;;  %v1427_v5 = vmax.f32 %v955_v61, 0.0  ;;  %v1491_v6 = vmax.f32 %v1211_v62, 0.0 }
 0x10c   : > { %2069 = vst.msk [vmem:[%s3142_s6 + $0x38] sm:$0xf] %vm2054_vm3, %v2526_v63  ;;  %2133 = vst.msk [vmem:[%s3142_s6 + $0x138] sm:$0xf] %vm2054_vm3, %v2590_v0  ;;  %v2527_v7 = vpack.c.bf16 %v1429_v1, %v1429_v1  ;;  %v2591_v8 = vpack.c.bf16 %v1493_v2, %v1493_v2 }
 0x10d   : > { %2067 = vst.msk [vmem:[%s3142_s6 + $0x30] sm:$0xf] %vm2054_vm3, %v2524_v3  ;;  %2131 = vst.msk [vmem:[%s3142_s6 + $0x130] sm:$0xf] %vm2054_vm3, %v2588_v4  ;;  %v2525_v10 = vpack.c.bf16 %v1427_v5, %v1427_v5  ;;  %v2589_v11 = vpack.c.bf16 %v1491_v6, %v1491_v6  ;;  %v2737_v12 = vpop.f32.mrb[16].mxu0  ;;  %v2801_v13 = vpop.f32.mrb[16].mxu1 }
 0x10e   : > { %2070 = vst.msk [vmem:[%s3142_s6 + $0x3c] sm:$0xf] %vm2054_vm3, %v2527_v7  ;;  %2134 = vst.msk [vmem:[%s3142_s6 + $0x13c] sm:$0xf] %vm2054_vm3, %v2591_v8  ;;  %v976_v14 = vadd.f32 %v2737_v12, %v3129_v9  ;;  %v1232_v15 = vadd.f32 %v2801_v13, %v3129_v9  ;;  %v967_v16 = vpop.f32.mrb[17].mxu0  ;;  %v1223_v17 = vpop.f32.mrb[17].mxu1 }
 0x10f   : > { %2068 = vst.msk [vmem:[%s3142_s6 + $0x34] sm:$0xf] %vm2054_vm3, %v2525_v10  ;;  %2132 = vst.msk [vmem:[%s3142_s6 + $0x134] sm:$0xf] %vm2054_vm3, %v2589_v11  ;;  %v968_v18 = vadd.f32 %v3129_v9, %v967_v16  ;;  %v1224_v19 = vadd.f32 %v3129_v9, %v1223_v17  ;;  %v2738_v20 = vpop.f32.mrb[18].mxu0  ;;  %v2802_v21 = vpop.f32.mrb[18].mxu1 }
 0x110   : > { %v1432_v22 = vmax.f32 %v976_v14, 0.0  ;;  %v1496_v23 = vmax.f32 %v1232_v15, 0.0  ;;  %v979_v24 = vadd.f32 %v2738_v20, %v3129_v9  ;;  %v1235_v25 = vadd.f32 %v2802_v21, %v3129_v9  ;;  %v970_v26 = vpop.f32.mrb[19].mxu0  ;;  %v1226_v27 = vpop.f32.mrb[19].mxu1 }
 0x111   : > { %v1430_v28 = vmax.f32 %v968_v18, 0.0  ;;  %v1494_v29 = vmax.f32 %v1224_v19, 0.0  ;;  %v971_v30 = vadd.f32 %v3129_v9, %v970_v26  ;;  %v1227_v31 = vadd.f32 %v3129_v9, %v1226_v27 }
 0x112   : > { %v2530_v32 = vpack.c.bf16 %v1432_v22, %v1432_v22  ;;  %v2594_v33 = vpack.c.bf16 %v1496_v23, %v1496_v23  ;;  %v1433_v34 = vmax.f32 %v979_v24, 0.0  ;;  %v1497_v35 = vmax.f32 %v1235_v25, 0.0 }
 0x113   : > { %v2528_v36 = vpack.c.bf16 %v1430_v28, %v1430_v28  ;;  %v2592_v37 = vpack.c.bf16 %v1494_v29, %v1494_v29  ;;  %v1431_v38 = vmax.f32 %v971_v30, 0.0  ;;  %v1495_v39 = vmax.f32 %v1227_v31, 0.0 }
 0x114   : > { %2073 = vst.msk [vmem:[%s3142_s6 + $0x48] sm:$0xf] %vm2054_vm3, %v2530_v32  ;;  %2137 = vst.msk [vmem:[%s3142_s6 + $0x148] sm:$0xf] %vm2054_vm3, %v2594_v33  ;;  %v2531_v40 = vpack.c.bf16 %v1433_v34, %v1433_v34  ;;  %v2595_v41 = vpack.c.bf16 %v1497_v35, %v1497_v35 }
 0x115   : > { %2071 = vst.msk [vmem:[%s3142_s6 + $0x40] sm:$0xf] %vm2054_vm3, %v2528_v36  ;;  %2135 = vst.msk [vmem:[%s3142_s6 + $0x140] sm:$0xf] %vm2054_vm3, %v2592_v37  ;;  %v2529_v42 = vpack.c.bf16 %v1431_v38, %v1431_v38  ;;  %v2593_v43 = vpack.c.bf16 %v1495_v39, %v1495_v39  ;;  %v2741_v44 = vpop.f32.mrb[20].mxu0  ;;  %v2805_v45 = vpop.f32.mrb[20].mxu1 }
 0x116   : > { %2074 = vst.msk [vmem:[%s3142_s6 + $0x4c] sm:$0xf] %vm2054_vm3, %v2531_v40  ;;  %2138 = vst.msk [vmem:[%s3142_s6 + $0x14c] sm:$0xf] %vm2054_vm3, %v2595_v41  ;;  %v992_v46 = vadd.f32 %v2741_v44, %v3129_v9  ;;  %v1248_v47 = vadd.f32 %v2805_v45, %v3129_v9  ;;  %v983_v48 = vpop.f32.mrb[21].mxu0  ;;  %v1239_v49 = vpop.f32.mrb[21].mxu1 }
 0x117   : > { %2072 = vst.msk [vmem:[%s3142_s6 + $0x44] sm:$0xf] %vm2054_vm3, %v2529_v42  ;;  %2136 = vst.msk [vmem:[%s3142_s6 + $0x144] sm:$0xf] %vm2054_vm3, %v2593_v43  ;;  %v984_v50 = vadd.f32 %v3129_v9, %v983_v48  ;;  %v1240_v51 = vadd.f32 %v3129_v9, %v1239_v49  ;;  %v2742_v52 = vpop.f32.mrb[22].mxu0  ;;  %v2806_v53 = vpop.f32.mrb[22].mxu1 }
 0x118   : > { %v1436_v54 = vmax.f32 %v992_v46, 0.0  ;;  %v1500_v55 = vmax.f32 %v1248_v47, 0.0  ;;  %v995_v56 = vadd.f32 %v2742_v52, %v3129_v9  ;;  %v1251_v57 = vadd.f32 %v2806_v53, %v3129_v9  ;;  %v986_v58 = vpop.f32.mrb[23].mxu0  ;;  %v1242_v59 = vpop.f32.mrb[23].mxu1 }
 0x119   : > { %v1434_v60 = vmax.f32 %v984_v50, 0.0  ;;  %v1498_v61 = vmax.f32 %v1240_v51, 0.0  ;;  %v987_v62 = vadd.f32 %v3129_v9, %v986_v58  ;;  %v1243_v63 = vadd.f32 %v3129_v9, %v1242_v59 }
 0x11a   : > { %v2534_v0 = vpack.c.bf16 %v1436_v54, %v1436_v54  ;;  %v2598_v1 = vpack.c.bf16 %v1500_v55, %v1500_v55  ;;  %v1437_v2 = vmax.f32 %v995_v56, 0.0  ;;  %v1501_v3 = vmax.f32 %v1251_v57, 0.0 }
 0x11b   : > { %v2532_v4 = vpack.c.bf16 %v1434_v60, %v1434_v60  ;;  %v2596_v5 = vpack.c.bf16 %v1498_v61, %v1498_v61  ;;  %v1435_v6 = vmax.f32 %v987_v62, 0.0  ;;  %v1499_v7 = vmax.f32 %v1243_v63, 0.0 }
 0x11c   : > { %2077 = vst.msk [vmem:[%s3142_s6 + $0x58] sm:$0xf] %vm2054_vm3, %v2534_v0  ;;  %2141 = vst.msk [vmem:[%s3142_s6 + $0x158] sm:$0xf] %vm2054_vm3, %v2598_v1  ;;  %v2535_v8 = vpack.c.bf16 %v1437_v2, %v1437_v2  ;;  %v2599_v10 = vpack.c.bf16 %v1501_v3, %v1501_v3 }
 0x11d   : > { %2075 = vst.msk [vmem:[%s3142_s6 + $0x50] sm:$0xf] %vm2054_vm3, %v2532_v4  ;;  %2139 = vst.msk [vmem:[%s3142_s6 + $0x150] sm:$0xf] %vm2054_vm3, %v2596_v5  ;;  %v2533_v11 = vpack.c.bf16 %v1435_v6, %v1435_v6  ;;  %v2597_v12 = vpack.c.bf16 %v1499_v7, %v1499_v7  ;;  %v2745_v13 = vpop.f32.mrb[24].mxu0  ;;  %v2809_v14 = vpop.f32.mrb[24].mxu1 }
 0x11e   : > { %2078 = vst.msk [vmem:[%s3142_s6 + $0x5c] sm:$0xf] %vm2054_vm3, %v2535_v8  ;;  %2142 = vst.msk [vmem:[%s3142_s6 + $0x15c] sm:$0xf] %vm2054_vm3, %v2599_v10  ;;  %v1008_v15 = vadd.f32 %v2745_v13, %v3129_v9  ;;  %v1264_v16 = vadd.f32 %v2809_v14, %v3129_v9  ;;  %v999_v17 = vpop.f32.mrb[25].mxu0  ;;  %v1255_v18 = vpop.f32.mrb[25].mxu1 }
 0x11f   : > { %2076 = vst.msk [vmem:[%s3142_s6 + $0x54] sm:$0xf] %vm2054_vm3, %v2533_v11  ;;  %2140 = vst.msk [vmem:[%s3142_s6 + $0x154] sm:$0xf] %vm2054_vm3, %v2597_v12  ;;  %v1000_v19 = vadd.f32 %v3129_v9, %v999_v17  ;;  %v1256_v20 = vadd.f32 %v3129_v9, %v1255_v18  ;;  %v2746_v21 = vpop.f32.mrb[26].mxu0  ;;  %v2810_v22 = vpop.f32.mrb[26].mxu1 }
 0x120   : > { %v1440_v23 = vmax.f32 %v1008_v15, 0.0  ;;  %v1504_v24 = vmax.f32 %v1264_v16, 0.0  ;;  %v1011_v25 = vadd.f32 %v2746_v21, %v3129_v9  ;;  %v1267_v26 = vadd.f32 %v2810_v22, %v3129_v9  ;;  %v1002_v27 = vpop.f32.mrb[27].mxu0  ;;  %v1258_v28 = vpop.f32.mrb[27].mxu1 }
 0x121   : > { %v1438_v29 = vmax.f32 %v1000_v19, 0.0  ;;  %v1502_v30 = vmax.f32 %v1256_v20, 0.0  ;;  %v1003_v31 = vadd.f32 %v3129_v9, %v1002_v27  ;;  %v1259_v32 = vadd.f32 %v3129_v9, %v1258_v28 }
 0x122   : > { %v2538_v33 = vpack.c.bf16 %v1440_v23, %v1440_v23  ;;  %v2602_v34 = vpack.c.bf16 %v1504_v24, %v1504_v24  ;;  %v1441_v35 = vmax.f32 %v1011_v25, 0.0  ;;  %v1505_v36 = vmax.f32 %v1267_v26, 0.0 }
 0x123   : > { %v2536_v37 = vpack.c.bf16 %v1438_v29, %v1438_v29  ;;  %v2600_v38 = vpack.c.bf16 %v1502_v30, %v1502_v30  ;;  %v1439_v39 = vmax.f32 %v1003_v31, 0.0  ;;  %v1503_v40 = vmax.f32 %v1259_v32, 0.0 }
 0x124   : > { %2081 = vst.msk [vmem:[%s3142_s6 + $0x68] sm:$0xf] %vm2054_vm3, %v2538_v33  ;;  %2145 = vst.msk [vmem:[%s3142_s6 + $0x168] sm:$0xf] %vm2054_vm3, %v2602_v34  ;;  %v2539_v41 = vpack.c.bf16 %v1441_v35, %v1441_v35  ;;  %v2603_v42 = vpack.c.bf16 %v1505_v36, %v1505_v36 }
 0x125   : > { %2079 = vst.msk [vmem:[%s3142_s6 + $0x60] sm:$0xf] %vm2054_vm3, %v2536_v37  ;;  %2143 = vst.msk [vmem:[%s3142_s6 + $0x160] sm:$0xf] %vm2054_vm3, %v2600_v38  ;;  %v2537_v43 = vpack.c.bf16 %v1439_v39, %v1439_v39  ;;  %v2601_v44 = vpack.c.bf16 %v1503_v40, %v1503_v40  ;;  %v2749_v45 = vpop.f32.mrb[28].mxu0  ;;  %v2813_v46 = vpop.f32.mrb[28].mxu1 }
 0x126   : > { %2082 = vst.msk [vmem:[%s3142_s6 + $0x6c] sm:$0xf] %vm2054_vm3, %v2539_v41  ;;  %2146 = vst.msk [vmem:[%s3142_s6 + $0x16c] sm:$0xf] %vm2054_vm3, %v2603_v42  ;;  %v1024_v47 = vadd.f32 %v2749_v45, %v3129_v9  ;;  %v1280_v48 = vadd.f32 %v2813_v46, %v3129_v9  ;;  %v1015_v49 = vpop.f32.mrb[29].mxu0  ;;  %v1271_v50 = vpop.f32.mrb[29].mxu1 }
 0x127   : > { %2080 = vst.msk [vmem:[%s3142_s6 + $0x64] sm:$0xf] %vm2054_vm3, %v2537_v43  ;;  %2144 = vst.msk [vmem:[%s3142_s6 + $0x164] sm:$0xf] %vm2054_vm3, %v2601_v44  ;;  %v1016_v51 = vadd.f32 %v3129_v9, %v1015_v49  ;;  %v1272_v52 = vadd.f32 %v3129_v9, %v1271_v50  ;;  %v2750_v53 = vpop.f32.mrb[30].mxu0  ;;  %v2814_v54 = vpop.f32.mrb[30].mxu1 }
 0x128   : > { %v1444_v55 = vmax.f32 %v1024_v47, 0.0  ;;  %v1508_v56 = vmax.f32 %v1280_v48, 0.0  ;;  %v1027_v57 = vadd.f32 %v2750_v53, %v3129_v9  ;;  %v1283_v58 = vadd.f32 %v2814_v54, %v3129_v9  ;;  %v1018_v59 = vpop.f32.mrb[31].mxu0  ;;  %v1274_v60 = vpop.f32.mrb[31].mxu1 }
 0x129   : > { %v1442_v61 = vmax.f32 %v1016_v51, 0.0  ;;  %v1506_v62 = vmax.f32 %v1272_v52, 0.0  ;;  %v1019_v63 = vadd.f32 %v3129_v9, %v1018_v59  ;;  %v1275_v0 = vadd.f32 %v3129_v9, %v1274_v60 }
 0x12a   : > { %v2542_v1 = vpack.c.bf16 %v1444_v55, %v1444_v55  ;;  %v2606_v2 = vpack.c.bf16 %v1508_v56, %v1508_v56  ;;  %v1445_v3 = vmax.f32 %v1027_v57, 0.0  ;;  %v1509_v4 = vmax.f32 %v1283_v58, 0.0 }
 0x12b   : > { %v2540_v5 = vpack.c.bf16 %v1442_v61, %v1442_v61  ;;  %v2604_v6 = vpack.c.bf16 %v1506_v62, %v1506_v62  ;;  %v1443_v7 = vmax.f32 %v1019_v63, 0.0  ;;  %v1507_v8 = vmax.f32 %v1275_v0, 0.0 }
 0x12c   : > { %2085 = vst.msk [vmem:[%s3142_s6 + $0x78] sm:$0xf] %vm2054_vm3, %v2542_v1  ;;  %2149 = vst.msk [vmem:[%s3142_s6 + $0x178] sm:$0xf] %vm2054_vm3, %v2606_v2  ;;  %v2543_v10 = vpack.c.bf16 %v1445_v3, %v1445_v3  ;;  %v2607_v11 = vpack.c.bf16 %v1509_v4, %v1509_v4 }
 0x12d   : > { %2083 = vst.msk [vmem:[%s3142_s6 + $0x70] sm:$0xf] %vm2054_vm3, %v2540_v5  ;;  %2147 = vst.msk [vmem:[%s3142_s6 + $0x170] sm:$0xf] %vm2054_vm3, %v2604_v6  ;;  %v2541_v12 = vpack.c.bf16 %v1443_v7, %v1443_v7  ;;  %v2605_v13 = vpack.c.bf16 %v1507_v8, %v1507_v8  ;;  %v2753_v14 = vpop.f32.mrb[32].mxu0  ;;  %v2817_v15 = vpop.f32.mrb[32].mxu1 }
 0x12e   : > { %2086 = vst.msk [vmem:[%s3142_s6 + $0x7c] sm:$0xf] %vm2054_vm3, %v2543_v10  ;;  %2150 = vst.msk [vmem:[%s3142_s6 + $0x17c] sm:$0xf] %vm2054_vm3, %v2607_v11  ;;  %v1040_v16 = vadd.f32 %v2753_v14, %v3129_v9  ;;  %v1296_v17 = vadd.f32 %v2817_v15, %v3129_v9  ;;  %v1031_v18 = vpop.f32.mrb[33].mxu0  ;;  %v1287_v19 = vpop.f32.mrb[33].mxu1 }
 0x12f   : > { %2084 = vst.msk [vmem:[%s3142_s6 + $0x74] sm:$0xf] %vm2054_vm3, %v2541_v12  ;;  %2148 = vst.msk [vmem:[%s3142_s6 + $0x174] sm:$0xf] %vm2054_vm3, %v2605_v13  ;;  %v1032_v20 = vadd.f32 %v3129_v9, %v1031_v18  ;;  %v1288_v21 = vadd.f32 %v3129_v9, %v1287_v19  ;;  %v2754_v22 = vpop.f32.mrb[34].mxu0  ;;  %v2818_v23 = vpop.f32.mrb[34].mxu1 }
 0x130   : > { %v1448_v24 = vmax.f32 %v1040_v16, 0.0  ;;  %v1512_v25 = vmax.f32 %v1296_v17, 0.0  ;;  %v1043_v26 = vadd.f32 %v2754_v22, %v3129_v9  ;;  %v1299_v27 = vadd.f32 %v2818_v23, %v3129_v9  ;;  %v1034_v28 = vpop.f32.mrb[35].mxu0  ;;  %v1290_v29 = vpop.f32.mrb[35].mxu1 }
 0x131   : > { %v1446_v30 = vmax.f32 %v1032_v20, 0.0  ;;  %v1510_v31 = vmax.f32 %v1288_v21, 0.0  ;;  %v1035_v32 = vadd.f32 %v3129_v9, %v1034_v28  ;;  %v1291_v33 = vadd.f32 %v3129_v9, %v1290_v29 }
 0x132   : > { %v2546_v34 = vpack.c.bf16 %v1448_v24, %v1448_v24  ;;  %v2610_v35 = vpack.c.bf16 %v1512_v25, %v1512_v25  ;;  %v1449_v36 = vmax.f32 %v1043_v26, 0.0  ;;  %v1513_v37 = vmax.f32 %v1299_v27, 0.0 }
 0x133   : > { %v2544_v38 = vpack.c.bf16 %v1446_v30, %v1446_v30  ;;  %v2608_v39 = vpack.c.bf16 %v1510_v31, %v1510_v31  ;;  %v1447_v40 = vmax.f32 %v1035_v32, 0.0  ;;  %v1511_v41 = vmax.f32 %v1291_v33, 0.0 }
 0x134   : > { %2089 = vst.msk [vmem:[%s3142_s6 + $0x88] sm:$0xf] %vm2054_vm3, %v2546_v34  ;;  %2153 = vst.msk [vmem:[%s3142_s6 + $0x188] sm:$0xf] %vm2054_vm3, %v2610_v35  ;;  %v2547_v42 = vpack.c.bf16 %v1449_v36, %v1449_v36  ;;  %v2611_v43 = vpack.c.bf16 %v1513_v37, %v1513_v37 }
 0x135   : > { %2087 = vst.msk [vmem:[%s3142_s6 + $0x80] sm:$0xf] %vm2054_vm3, %v2544_v38  ;;  %2151 = vst.msk [vmem:[%s3142_s6 + $0x180] sm:$0xf] %vm2054_vm3, %v2608_v39  ;;  %v2545_v44 = vpack.c.bf16 %v1447_v40, %v1447_v40  ;;  %v2609_v45 = vpack.c.bf16 %v1511_v41, %v1511_v41  ;;  %v2757_v46 = vpop.f32.mrb[36].mxu0  ;;  %v2821_v47 = vpop.f32.mrb[36].mxu1 }
 0x136   : > { %2090 = vst.msk [vmem:[%s3142_s6 + $0x8c] sm:$0xf] %vm2054_vm3, %v2547_v42  ;;  %2154 = vst.msk [vmem:[%s3142_s6 + $0x18c] sm:$0xf] %vm2054_vm3, %v2611_v43  ;;  %v1056_v48 = vadd.f32 %v2757_v46, %v3129_v9  ;;  %v1312_v49 = vadd.f32 %v2821_v47, %v3129_v9  ;;  %v1047_v50 = vpop.f32.mrb[37].mxu0  ;;  %v1303_v51 = vpop.f32.mrb[37].mxu1 }
 0x137   : > { %2088 = vst.msk [vmem:[%s3142_s6 + $0x84] sm:$0xf] %vm2054_vm3, %v2545_v44  ;;  %2152 = vst.msk [vmem:[%s3142_s6 + $0x184] sm:$0xf] %vm2054_vm3, %v2609_v45  ;;  %v1048_v52 = vadd.f32 %v3129_v9, %v1047_v50  ;;  %v1304_v53 = vadd.f32 %v3129_v9, %v1303_v51  ;;  %v2758_v54 = vpop.f32.mrb[38].mxu0  ;;  %v2822_v55 = vpop.f32.mrb[38].mxu1 }
 0x138   : > { %v1452_v56 = vmax.f32 %v1056_v48, 0.0  ;;  %v1516_v57 = vmax.f32 %v1312_v49, 0.0  ;;  %v1059_v58 = vadd.f32 %v2758_v54, %v3129_v9  ;;  %v1315_v59 = vadd.f32 %v2822_v55, %v3129_v9  ;;  %v1050_v60 = vpop.f32.mrb[39].mxu0  ;;  %v1306_v61 = vpop.f32.mrb[39].mxu1 }
 0x139   : > { %v1450_v62 = vmax.f32 %v1048_v52, 0.0  ;;  %v1514_v63 = vmax.f32 %v1304_v53, 0.0  ;;  %v1051_v0 = vadd.f32 %v3129_v9, %v1050_v60  ;;  %v1307_v1 = vadd.f32 %v3129_v9, %v1306_v61 }
 0x13a   : > { %v2550_v2 = vpack.c.bf16 %v1452_v56, %v1452_v56  ;;  %v2614_v3 = vpack.c.bf16 %v1516_v57, %v1516_v57  ;;  %v1453_v4 = vmax.f32 %v1059_v58, 0.0  ;;  %v1517_v5 = vmax.f32 %v1315_v59, 0.0 }
 0x13b   : > { %v2548_v6 = vpack.c.bf16 %v1450_v62, %v1450_v62  ;;  %v2612_v7 = vpack.c.bf16 %v1514_v63, %v1514_v63  ;;  %v1451_v8 = vmax.f32 %v1051_v0, 0.0  ;;  %v1515_v10 = vmax.f32 %v1307_v1, 0.0 }
 0x13c   : > { %2093 = vst.msk [vmem:[%s3142_s6 + $0x98] sm:$0xf] %vm2054_vm3, %v2550_v2  ;;  %2157 = vst.msk [vmem:[%s3142_s6 + $0x198] sm:$0xf] %vm2054_vm3, %v2614_v3  ;;  %v2551_v11 = vpack.c.bf16 %v1453_v4, %v1453_v4  ;;  %v2615_v12 = vpack.c.bf16 %v1517_v5, %v1517_v5 }
 0x13d   : > { %2091 = vst.msk [vmem:[%s3142_s6 + $0x90] sm:$0xf] %vm2054_vm3, %v2548_v6  ;;  %2155 = vst.msk [vmem:[%s3142_s6 + $0x190] sm:$0xf] %vm2054_vm3, %v2612_v7  ;;  %v2549_v13 = vpack.c.bf16 %v1451_v8, %v1451_v8  ;;  %v2613_v14 = vpack.c.bf16 %v1515_v10, %v1515_v10  ;;  %v2761_v15 = vpop.f32.mrb[40].mxu0  ;;  %v2825_v16 = vpop.f32.mrb[40].mxu1 }
 0x13e   : > { %2094 = vst.msk [vmem:[%s3142_s6 + $0x9c] sm:$0xf] %vm2054_vm3, %v2551_v11  ;;  %2158 = vst.msk [vmem:[%s3142_s6 + $0x19c] sm:$0xf] %vm2054_vm3, %v2615_v12  ;;  %v1072_v17 = vadd.f32 %v2761_v15, %v3129_v9  ;;  %v1328_v18 = vadd.f32 %v2825_v16, %v3129_v9  ;;  %v1063_v19 = vpop.f32.mrb[41].mxu0  ;;  %v1319_v20 = vpop.f32.mrb[41].mxu1 }
 0x13f   : > { %2092 = vst.msk [vmem:[%s3142_s6 + $0x94] sm:$0xf] %vm2054_vm3, %v2549_v13  ;;  %2156 = vst.msk [vmem:[%s3142_s6 + $0x194] sm:$0xf] %vm2054_vm3, %v2613_v14  ;;  %v1064_v21 = vadd.f32 %v3129_v9, %v1063_v19  ;;  %v1320_v22 = vadd.f32 %v3129_v9, %v1319_v20  ;;  %v2762_v23 = vpop.f32.mrb[42].mxu0  ;;  %v2826_v24 = vpop.f32.mrb[42].mxu1 }
 0x140   : > { %v1456_v25 = vmax.f32 %v1072_v17, 0.0  ;;  %v1520_v26 = vmax.f32 %v1328_v18, 0.0  ;;  %v1075_v27 = vadd.f32 %v2762_v23, %v3129_v9  ;;  %v1331_v28 = vadd.f32 %v2826_v24, %v3129_v9  ;;  %v1066_v29 = vpop.f32.mrb[43].mxu0  ;;  %v1322_v30 = vpop.f32.mrb[43].mxu1 }
 0x141   : > { %v1454_v31 = vmax.f32 %v1064_v21, 0.0  ;;  %v1518_v32 = vmax.f32 %v1320_v22, 0.0  ;;  %v1067_v33 = vadd.f32 %v3129_v9, %v1066_v29  ;;  %v1323_v34 = vadd.f32 %v3129_v9, %v1322_v30 }
 0x142   : > { %v2554_v35 = vpack.c.bf16 %v1456_v25, %v1456_v25  ;;  %v2618_v36 = vpack.c.bf16 %v1520_v26, %v1520_v26  ;;  %v1457_v37 = vmax.f32 %v1075_v27, 0.0  ;;  %v1521_v38 = vmax.f32 %v1331_v28, 0.0 }
 0x143   : > { %v2552_v39 = vpack.c.bf16 %v1454_v31, %v1454_v31  ;;  %v2616_v40 = vpack.c.bf16 %v1518_v32, %v1518_v32  ;;  %v1455_v41 = vmax.f32 %v1067_v33, 0.0  ;;  %v1519_v42 = vmax.f32 %v1323_v34, 0.0 }
 0x144   : > { %2097 = vst.msk [vmem:[%s3142_s6 + $0xa8] sm:$0xf] %vm2054_vm3, %v2554_v35  ;;  %2161 = vst.msk [vmem:[%s3142_s6 + $0x1a8] sm:$0xf] %vm2054_vm3, %v2618_v36  ;;  %v2555_v43 = vpack.c.bf16 %v1457_v37, %v1457_v37  ;;  %v2619_v44 = vpack.c.bf16 %v1521_v38, %v1521_v38 }
 0x145   : > { %2095 = vst.msk [vmem:[%s3142_s6 + $0xa0] sm:$0xf] %vm2054_vm3, %v2552_v39  ;;  %2159 = vst.msk [vmem:[%s3142_s6 + $0x1a0] sm:$0xf] %vm2054_vm3, %v2616_v40  ;;  %v2553_v45 = vpack.c.bf16 %v1455_v41, %v1455_v41  ;;  %v2617_v46 = vpack.c.bf16 %v1519_v42, %v1519_v42  ;;  %v2765_v47 = vpop.f32.mrb[44].mxu0  ;;  %v2829_v48 = vpop.f32.mrb[44].mxu1 }
 0x146   : > { %2098 = vst.msk [vmem:[%s3142_s6 + $0xac] sm:$0xf] %vm2054_vm3, %v2555_v43  ;;  %2162 = vst.msk [vmem:[%s3142_s6 + $0x1ac] sm:$0xf] %vm2054_vm3, %v2619_v44  ;;  %v1088_v49 = vadd.f32 %v2765_v47, %v3129_v9  ;;  %v1344_v50 = vadd.f32 %v2829_v48, %v3129_v9  ;;  %v1079_v51 = vpop.f32.mrb[45].mxu0  ;;  %v1335_v52 = vpop.f32.mrb[45].mxu1 }
 0x147   : > { %2096 = vst.msk [vmem:[%s3142_s6 + $0xa4] sm:$0xf] %vm2054_vm3, %v2553_v45  ;;  %2160 = vst.msk [vmem:[%s3142_s6 + $0x1a4] sm:$0xf] %vm2054_vm3, %v2617_v46  ;;  %v1080_v53 = vadd.f32 %v3129_v9, %v1079_v51  ;;  %v1336_v54 = vadd.f32 %v3129_v9, %v1335_v52  ;;  %v2766_v55 = vpop.f32.mrb[46].mxu0  ;;  %v2830_v56 = vpop.f32.mrb[46].mxu1 }
 0x148   : > { %v1460_v57 = vmax.f32 %v1088_v49, 0.0  ;;  %v1524_v58 = vmax.f32 %v1344_v50, 0.0  ;;  %v1091_v59 = vadd.f32 %v2766_v55, %v3129_v9  ;;  %v1347_v60 = vadd.f32 %v2830_v56, %v3129_v9  ;;  %v1082_v61 = vpop.f32.mrb[47].mxu0  ;;  %v1338_v62 = vpop.f32.mrb[47].mxu1  ;;  %v3449_v49 = vld [vmem:[%s3532_s2] ss:$0 sm:$0xff] }
 0x149   : > { %v1458_v63 = vmax.f32 %v1080_v53, 0.0  ;;  %v1522_v0 = vmax.f32 %v1336_v54, 0.0  ;;  %v1083_v1 = vadd.f32 %v3129_v9, %v1082_v61  ;;  %v1339_v2 = vadd.f32 %v3129_v9, %v1338_v62 }
 0x14a   : > { %v2558_v3 = vpack.c.bf16 %v1460_v57, %v1460_v57  ;;  %v2622_v4 = vpack.c.bf16 %v1524_v58, %v1524_v58  ;;  %v1461_v5 = vmax.f32 %v1091_v59, 0.0  ;;  %v1525_v6 = vmax.f32 %v1347_v60, 0.0 }
 0x14b   : > { %v2556_v7 = vpack.c.bf16 %v1458_v63, %v1458_v63  ;;  %v2620_v8 = vpack.c.bf16 %v1522_v0, %v1522_v0  ;;  %v1459_v10 = vmax.f32 %v1083_v1, 0.0  ;;  %v1523_v11 = vmax.f32 %v1339_v2, 0.0 }
 0x14c   : > { %2101 = vst.msk [vmem:[%s3142_s6 + $0xb8] sm:$0xf] %vm2054_vm3, %v2558_v3  ;;  %2165 = vst.msk [vmem:[%s3142_s6 + $0x1b8] sm:$0xf] %vm2054_vm3, %v2622_v4  ;;  %v2559_v12 = vpack.c.bf16 %v1461_v5, %v1461_v5  ;;  %v2623_v13 = vpack.c.bf16 %v1525_v6, %v1525_v6 }
 0x14d   : > { %2099 = vst.msk [vmem:[%s3142_s6 + $0xb0] sm:$0xf] %vm2054_vm3, %v2556_v7  ;;  %2163 = vst.msk [vmem:[%s3142_s6 + $0x1b0] sm:$0xf] %vm2054_vm3, %v2620_v8  ;;  %v2557_v14 = vpack.c.bf16 %v1459_v10, %v1459_v10  ;;  %v2621_v15 = vpack.c.bf16 %v1523_v11, %v1523_v11  ;;  %v2769_v16 = vpop.f32.mrb[48].mxu0  ;;  %v2833_v17 = vpop.f32.mrb[48].mxu1 }
 0x14e   : > { %2102 = vst.msk [vmem:[%s3142_s6 + $0xbc] sm:$0xf] %vm2054_vm3, %v2559_v12  ;;  %2166 = vst.msk [vmem:[%s3142_s6 + $0x1bc] sm:$0xf] %vm2054_vm3, %v2623_v13  ;;  %v1104_v18 = vadd.f32 %v2769_v16, %v3129_v9  ;;  %v1360_v19 = vadd.f32 %v2833_v17, %v3129_v9  ;;  %v1095_v20 = vpop.f32.mrb[49].mxu0  ;;  %v1351_v21 = vpop.f32.mrb[49].mxu1 }
 0x14f   : > { %2100 = vst.msk [vmem:[%s3142_s6 + $0xb4] sm:$0xf] %vm2054_vm3, %v2557_v14  ;;  %2164 = vst.msk [vmem:[%s3142_s6 + $0x1b4] sm:$0xf] %vm2054_vm3, %v2621_v15  ;;  %v1096_v22 = vadd.f32 %v3129_v9, %v1095_v20  ;;  %v1352_v23 = vadd.f32 %v3129_v9, %v1351_v21  ;;  %v2770_v24 = vpop.f32.mrb[50].mxu0  ;;  %v2834_v25 = vpop.f32.mrb[50].mxu1 }
 0x150   : > { %v1464_v26 = vmax.f32 %v1104_v18, 0.0  ;;  %v1528_v27 = vmax.f32 %v1360_v19, 0.0  ;;  %v1107_v28 = vadd.f32 %v2770_v24, %v3129_v9  ;;  %v1363_v29 = vadd.f32 %v2834_v25, %v3129_v9  ;;  %v1098_v30 = vpop.f32.mrb[51].mxu0  ;;  %v1354_v31 = vpop.f32.mrb[51].mxu1 }
 0x151   : > { %v1462_v32 = vmax.f32 %v1096_v22, 0.0  ;;  %v1526_v33 = vmax.f32 %v1352_v23, 0.0  ;;  %v1099_v34 = vadd.f32 %v3129_v9, %v1098_v30  ;;  %v1355_v35 = vadd.f32 %v3129_v9, %v1354_v31 }
 0x152   : > { %v2562_v36 = vpack.c.bf16 %v1464_v26, %v1464_v26  ;;  %v2626_v37 = vpack.c.bf16 %v1528_v27, %v1528_v27  ;;  %v1465_v38 = vmax.f32 %v1107_v28, 0.0  ;;  %v1529_v39 = vmax.f32 %v1363_v29, 0.0 }
 0x153   : > { %v2560_v40 = vpack.c.bf16 %v1462_v32, %v1462_v32  ;;  %v2624_v41 = vpack.c.bf16 %v1526_v33, %v1526_v33  ;;  %v1463_v42 = vmax.f32 %v1099_v34, 0.0  ;;  %v1527_v43 = vmax.f32 %v1355_v35, 0.0 }
 0x154   : > { %2105 = vst.msk [vmem:[%s3142_s6 + $0xc8] sm:$0xf] %vm2054_vm3, %v2562_v36  ;;  %2169 = vst.msk [vmem:[%s3142_s6 + $0x1c8] sm:$0xf] %vm2054_vm3, %v2626_v37  ;;  %v2563_v44 = vpack.c.bf16 %v1465_v38, %v1465_v38  ;;  %v2627_v45 = vpack.c.bf16 %v1529_v39, %v1529_v39 }
 0x155   : > { %2103 = vst.msk [vmem:[%s3142_s6 + $0xc0] sm:$0xf] %vm2054_vm3, %v2560_v40  ;;  %2167 = vst.msk [vmem:[%s3142_s6 + $0x1c0] sm:$0xf] %vm2054_vm3, %v2624_v41  ;;  %v2561_v9 = vpack.c.bf16 %v1463_v42, %v1463_v42  ;;  %v2625_v46 = vpack.c.bf16 %v1527_v43, %v1527_v43  ;;  %v2773_v47 = vpop.f32.mrb[52].mxu0  ;;  %v2837_v48 = vpop.f32.mrb[52].mxu1 }
 0x156   : > { %2106 = vst.msk [vmem:[%s3142_s6 + $0xcc] sm:$0xf] %vm2054_vm3, %v2563_v44  ;;  %2170 = vst.msk [vmem:[%s3142_s6 + $0x1cc] sm:$0xf] %vm2054_vm3, %v2627_v45  ;;  %v1120_v50 = vadd.f32 %v3449_v49, %v2773_v47  ;;  %v1376_v51 = vadd.f32 %v3449_v49, %v2837_v48  ;;  %v1111_v52 = vpop.f32.mrb[53].mxu0  ;;  %v1367_v53 = vpop.f32.mrb[53].mxu1 }
 0x157   : > { %2104 = vst.msk [vmem:[%s3142_s6 + $0xc4] sm:$0xf] %vm2054_vm3, %v2561_v9  ;;  %2168 = vst.msk [vmem:[%s3142_s6 + $0x1c4] sm:$0xf] %vm2054_vm3, %v2625_v46  ;;  %v1112_v54 = vadd.f32 %v3449_v49, %v1111_v52  ;;  %v1368_v55 = vadd.f32 %v3449_v49, %v1367_v53  ;;  %v2774_v56 = vpop.f32.mrb[54].mxu0  ;;  %v2838_v57 = vpop.f32.mrb[54].mxu1 }
 0x158   : > { %v1468_v58 = vmax.f32 %v1120_v50, 0.0  ;;  %v1532_v59 = vmax.f32 %v1376_v51, 0.0  ;;  %v1123_v60 = vadd.f32 %v3449_v49, %v2774_v56  ;;  %v1379_v61 = vadd.f32 %v3449_v49, %v2838_v57  ;;  %v1114_v62 = vpop.f32.mrb[55].mxu0  ;;  %v1370_v63 = vpop.f32.mrb[55].mxu1 }
 0x159   : > { %v1466_v0 = vmax.f32 %v1112_v54, 0.0  ;;  %v1530_v1 = vmax.f32 %v1368_v55, 0.0  ;;  %v1115_v2 = vadd.f32 %v3449_v49, %v1114_v62  ;;  %v1371_v3 = vadd.f32 %v3449_v49, %v1370_v63 }
 0x15a   : > { %v2566_v4 = vpack.c.bf16 %v1468_v58, %v1468_v58  ;;  %v2630_v5 = vpack.c.bf16 %v1532_v59, %v1532_v59  ;;  %v1469_v6 = vmax.f32 %v1123_v60, 0.0  ;;  %v1533_v7 = vmax.f32 %v1379_v61, 0.0 }
 0x15b   : > { %v2564_v8 = vpack.c.bf16 %v1466_v0, %v1466_v0  ;;  %v2628_v10 = vpack.c.bf16 %v1530_v1, %v1530_v1  ;;  %v1467_v11 = vmax.f32 %v1115_v2, 0.0  ;;  %v1531_v12 = vmax.f32 %v1371_v3, 0.0 }
 0x15c   : > { %2109 = vst.msk [vmem:[%s3142_s6 + $0xd8] sm:$0xf] %vm2054_vm3, %v2566_v4  ;;  %2173 = vst.msk [vmem:[%s3142_s6 + $0x1d8] sm:$0xf] %vm2054_vm3, %v2630_v5  ;;  %v2567_v13 = vpack.c.bf16 %v1469_v6, %v1469_v6  ;;  %v2631_v14 = vpack.c.bf16 %v1533_v7, %v1533_v7 }
 0x15d   : > { %2107 = vst.msk [vmem:[%s3142_s6 + $0xd0] sm:$0xf] %vm2054_vm3, %v2564_v8  ;;  %2171 = vst.msk [vmem:[%s3142_s6 + $0x1d0] sm:$0xf] %vm2054_vm3, %v2628_v10  ;;  %v2565_v15 = vpack.c.bf16 %v1467_v11, %v1467_v11  ;;  %v2629_v16 = vpack.c.bf16 %v1531_v12, %v1531_v12  ;;  %v2777_v17 = vpop.f32.mrb[56].mxu0  ;;  %v2841_v18 = vpop.f32.mrb[56].mxu1 }
 0x15e   : > { %2110 = vst.msk [vmem:[%s3142_s6 + $0xdc] sm:$0xf] %vm2054_vm3, %v2567_v13  ;;  %2174 = vst.msk [vmem:[%s3142_s6 + $0x1dc] sm:$0xf] %vm2054_vm3, %v2631_v14  ;;  %v1136_v19 = vadd.f32 %v3449_v49, %v2777_v17  ;;  %v1392_v20 = vadd.f32 %v3449_v49, %v2841_v18  ;;  %v1127_v21 = vpop.f32.mrb[57].mxu0  ;;  %v1383_v22 = vpop.f32.mrb[57].mxu1 }
 0x15f   : > { %2108 = vst.msk [vmem:[%s3142_s6 + $0xd4] sm:$0xf] %vm2054_vm3, %v2565_v15  ;;  %2172 = vst.msk [vmem:[%s3142_s6 + $0x1d4] sm:$0xf] %vm2054_vm3, %v2629_v16  ;;  %v1128_v23 = vadd.f32 %v3449_v49, %v1127_v21  ;;  %v1384_v24 = vadd.f32 %v3449_v49, %v1383_v22  ;;  %v2778_v25 = vpop.f32.mrb[58].mxu0  ;;  %v2842_v26 = vpop.f32.mrb[58].mxu1 }
 0x160   : > { %v1472_v27 = vmax.f32 %v1136_v19, 0.0  ;;  %v1536_v28 = vmax.f32 %v1392_v20, 0.0  ;;  %v1139_v29 = vadd.f32 %v3449_v49, %v2778_v25  ;;  %v1395_v30 = vadd.f32 %v3449_v49, %v2842_v26  ;;  %v1130_v31 = vpop.f32.mrb[59].mxu0  ;;  %v1386_v32 = vpop.f32.mrb[59].mxu1 }
 0x161   : > { %v1470_v33 = vmax.f32 %v1128_v23, 0.0  ;;  %v1534_v34 = vmax.f32 %v1384_v24, 0.0  ;;  %v1131_v35 = vadd.f32 %v3449_v49, %v1130_v31  ;;  %v1387_v36 = vadd.f32 %v3449_v49, %v1386_v32 }
 0x162   : > { %v2570_v37 = vpack.c.bf16 %v1472_v27, %v1472_v27  ;;  %v2634_v38 = vpack.c.bf16 %v1536_v28, %v1536_v28  ;;  %v1473_v39 = vmax.f32 %v1139_v29, 0.0  ;;  %v1537_v40 = vmax.f32 %v1395_v30, 0.0 }
 0x163   : > { %v2568_v41 = vpack.c.bf16 %v1470_v33, %v1470_v33  ;;  %v2632_v42 = vpack.c.bf16 %v1534_v34, %v1534_v34  ;;  %v1471_v43 = vmax.f32 %v1131_v35, 0.0  ;;  %v1535_v44 = vmax.f32 %v1387_v36, 0.0 }
 0x164   : > { %2113 = vst.msk [vmem:[%s3142_s6 + $0xe8] sm:$0xf] %vm2054_vm3, %v2570_v37  ;;  %2177 = vst.msk [vmem:[%s3142_s6 + $0x1e8] sm:$0xf] %vm2054_vm3, %v2634_v38  ;;  %v2571_v45 = vpack.c.bf16 %v1473_v39, %v1473_v39  ;;  %v2635_v9 = vpack.c.bf16 %v1537_v40, %v1537_v40 }
 0x165   : > { %2111 = vst.msk [vmem:[%s3142_s6 + $0xe0] sm:$0xf] %vm2054_vm3, %v2568_v41  ;;  %2175 = vst.msk [vmem:[%s3142_s6 + $0x1e0] sm:$0xf] %vm2054_vm3, %v2632_v42  ;;  %v2569_v46 = vpack.c.bf16 %v1471_v43, %v1471_v43  ;;  %v2633_v47 = vpack.c.bf16 %v1535_v44, %v1535_v44  ;;  %v2781_v48 = vpop.f32.mrb[60].mxu0  ;;  %v2845_v50 = vpop.f32.mrb[60].mxu1 }
 0x166   : > { %2114 = vst.msk [vmem:[%s3142_s6 + $0xec] sm:$0xf] %vm2054_vm3, %v2571_v45  ;;  %2178 = vst.msk [vmem:[%s3142_s6 + $0x1ec] sm:$0xf] %vm2054_vm3, %v2635_v9  ;;  %v1152_v51 = vadd.f32 %v3449_v49, %v2781_v48  ;;  %v1408_v52 = vadd.f32 %v3449_v49, %v2845_v50  ;;  %v1143_v53 = vpop.f32.mrb[61].mxu0  ;;  %v1399_v54 = vpop.f32.mrb[61].mxu1 }
 0x167   : > { %2112 = vst.msk [vmem:[%s3142_s6 + $0xe4] sm:$0xf] %vm2054_vm3, %v2569_v46  ;;  %2176 = vst.msk [vmem:[%s3142_s6 + $0x1e4] sm:$0xf] %vm2054_vm3, %v2633_v47  ;;  %v1144_v55 = vadd.f32 %v3449_v49, %v1143_v53  ;;  %v1400_v56 = vadd.f32 %v3449_v49, %v1399_v54  ;;  %v2782_v57 = vpop.f32.mrb[62].mxu0  ;;  %v2846_v58 = vpop.f32.mrb[62].mxu1 }
 0x168   : > { %v1476_v59 = vmax.f32 %v1152_v51, 0.0  ;;  %v1540_v60 = vmax.f32 %v1408_v52, 0.0  ;;  %v1155_v61 = vadd.f32 %v3449_v49, %v2782_v57  ;;  %v1411_v62 = vadd.f32 %v3449_v49, %v2846_v58  ;;  %v1146_v63 = vpop.f32.mrb[63].mxu0  ;;  %v1402_v0 = vpop.f32.mrb[63].mxu1 }
 0x169   : > { %v1474_v1 = vmax.f32 %v1144_v55, 0.0  ;;  %v1538_v2 = vmax.f32 %v1400_v56, 0.0  ;;  %v1147_v3 = vadd.f32 %v3449_v49, %v1146_v63  ;;  %v1403_v4 = vadd.f32 %v3449_v49, %v1402_v0 }
 0x16a   : > { %v2574_v5 = vpack.c.bf16 %v1476_v59, %v1476_v59  ;;  %v2638_v6 = vpack.c.bf16 %v1540_v60, %v1540_v60  ;;  %v1477_v7 = vmax.f32 %v1155_v61, 0.0  ;;  %v1541_v8 = vmax.f32 %v1411_v62, 0.0 }
 0x16b   : > { %v2572_v10 = vpack.c.bf16 %v1474_v1, %v1474_v1  ;;  %v2636_v11 = vpack.c.bf16 %v1538_v2, %v1538_v2  ;;  %v1475_v12 = vmax.f32 %v1147_v3, 0.0  ;;  %v1539_v13 = vmax.f32 %v1403_v4, 0.0 }
 0x16c   : > { %2117 = vst.msk [vmem:[%s3142_s6 + $0xf8] sm:$0xf] %vm2054_vm3, %v2574_v5  ;;  %2181 = vst.msk [vmem:[%s3142_s6 + $0x1f8] sm:$0xf] %vm2054_vm3, %v2638_v6  ;;  %v2575_v14 = vpack.c.bf16 %v1477_v7, %v1477_v7  ;;  %v2639_v15 = vpack.c.bf16 %v1541_v8, %v1541_v8 }
 0x16d   : > { %2115 = vst.msk [vmem:[%s3142_s6 + $0xf0] sm:$0xf] %vm2054_vm3, %v2572_v10  ;;  %2179 = vst.msk [vmem:[%s3142_s6 + $0x1f0] sm:$0xf] %vm2054_vm3, %v2636_v11  ;;  %v2573_v49 = vpack.c.bf16 %v1475_v12, %v1475_v12  ;;  %v2637_v16 = vpack.c.bf16 %v1539_v13, %v1539_v13 }
 0x16e   : > { %2118 = vst.msk [vmem:[%s3142_s6 + $0xfc] sm:$0xf] %vm2054_vm3, %v2575_v14  ;;  %2182 = vst.msk [vmem:[%s3142_s6 + $0x1fc] sm:$0xf] %vm2054_vm3, %v2639_v15 }
 0x16f   : > { %2116 = vst.msk [vmem:[%s3142_s6 + $0xf4] sm:$0xf] %vm2054_vm3, %v2573_v49  ;;  %2180 = vst.msk [vmem:[%s3142_s6 + $0x1f4] sm:$0xf] %vm2054_vm3, %v2637_v16 }
 0x170 PF: > { %s13_s12 = sadd.s32 1, %s2942_s12  }
 0x171   : > { %p10_p4 = scmp.ge.s32.totalorder %s13_s12, 8  }
 0x173   :  { %12 = sbr.rel (!%p10_p4) target bundleno = 1 (0x1), region = 62 }

// kernel: pilotnet_forward.4
= control target key start
LH: loop header
LB: loop body
LE: loop exit
PB: predicated region body
PF: predicated region fallthrough
CT: control target
= control target key end

     0   :  { %s4793_s12 = smov 0   ;;  %s5890_s0 = inlined_call_operand.vmem [shape: bf16[1344,600], index: 0, kind: input, shape index: {}]   ;;  %s5891_s1 = inlined_call_operand.vmem [shape: bf16[600,36], index: 1, kind: input, shape index: {}]   ;;  %s5892_s2 = inlined_call_operand.vmem [shape: f32[1,36], index: 2, kind: input, shape index: {}]   ;;  %s5893_s3 = inlined_call_operand.vmem [shape: bf16[1344,36], index: 3, kind: output, shape index: {}]  }
   0x1 LB: > { %s3586_s13 = sadd.s32 4294967295, %s4770_s12   ;;  %p3590_p0 = scmp.ge.s32.totalorder %s4770_s12, 1  ;;  %s4770_s12 = sphi %s4793_s12, %s13_s12  }
   0x2   : > { %p139_p1 = scmp.lt.s32.totalorder %s4770_s12, 3 }
   0x4   : > { %p140_p2 = pnand %p3590_p0, %p139_p1 }
   0x6   : > { %143 = sbr.rel (%p140_p2) target bundleno = 717 (0x2cd), region = 32 }
   0xd   : > { %v4431_v0 = vld [vmem:[%s5891_s1] sm:$0xff]   ;;  %v4772_v1 = vmov 0   ;;  %s164_s16 = smul.u32 84, %s3586_s13  ;;  %v4432_v2 = vld [vmem:[%s5891_s1 + $0x8] sm:$0xff]   ;;  %v4433_v3 = vld [vmem:[%s5891_s1 + $0x10] sm:$0xff]   ;;  %vm1914_vm0 = vcmask 1043456  }
   0xe   : > { %1918 = vmatprep.subr.bf16.mxu0 %v4772_v1  ;;  %4198 = vmatprep.subr.bf16.mxu1 %v4772_v1  ;;  %v4434_v4 = vld [vmem:[%s5891_s1 + $0x18] sm:$0xff]   ;;  %v4435_v5 = vld [vmem:[%s5891_s1 + $0x20] sm:$0xff]   ;;  %v4436_v7 = vld [vmem:[%s5891_s1 + $0x28] sm:$0xff]   ;;  %vm1787_vm1 = vcmask 719872   ;;  %vm3445_vm2 = vcmask 289792  }
   0xf   : > { %1919 = vmatpush1.bf16.msra.mxu0 %v4431_v0  ;;  %4214 = vmatpush1.bf16.msra.mxu1 %v4431_v0  ;;  %p165_p3 = scmp.lt.s32.totalorder %s164_s16, 167  ;;  %v4437_v9 = vld [vmem:[%s5891_s1 + $0x30] sm:$0xff]   ;;  %v4438_v10 = vld [vmem:[%s5891_s1 + $0x38] sm:$0xff]   ;;  %v4439_v11 = vld [vmem:[%s5891_s1 + $0x40] sm:$0xff]  }
  0x10   : > { %1920 = vmatprep.subr.bf16.mxu0 %v4772_v1  ;;  %4199 = vmatprep.subr.bf16.mxu1 %v4772_v1  ;;  %v4440_v12 = vld [vmem:[%s5891_s1 + $0x48] sm:$0xff]   ;;  %v4441_v13 = vld [vmem:[%s5891_s1 + $0x50] sm:$0xff]   ;;  %v4442_v14 = vld [vmem:[%s5891_s1 + $0x58] sm:$0xff]  }
  0x11   : > { %s5969_s16 = smov (!%p165_p3, %s164_s16), 167  ;;  %v4443_v15 = vld [vmem:[%s5891_s1 + $0x60] sm:$0xff]   ;;  %v4444_v16 = vld [vmem:[%s5891_s1 + $0x68] sm:$0xff]   ;;  %v4445_v17 = vld [vmem:[%s5891_s1 + $0x70] sm:$0xff]  }
  0x12   : > { %s4421_s23 = smul.u32 20, %s5969_s16  ;;  %v4446_v18 = vld [vmem:[%s5891_s1 + $0x78] sm:$0xff]   ;;  %v4461_v19 = vld [vmem:[%s5891_s1 + $0x100] sm:$0xff]   ;;  %v4500_v25 = vld [vmem:[%s5891_s1 + $0x108] sm:$0xff]  }
  0x13   : > { %1921 = vmatpush1.bf16.msra.mxu0 %v4432_v2  ;;  %4215 = vmatpush1.bf16.msra.mxu1 %v4432_v2  ;;  %v4453_v22 = vld [vmem:[%s5891_s1 + $0x80] sm:$0xff]   ;;  %v4458_v26 = vld [vmem:[%s5891_s1 + $0x88] sm:$0xff]   ;;  %v4462_v29 = vld [vmem:[%s5891_s1 + $0x90] sm:$0xff]  }
  0x14   : > { %1922 = vmatprep.subr.bf16.mxu0 %v4772_v1  ;;  %4200 = vmatprep.subr.bf16.mxu1 %v4772_v1  ;;  %s4830_s28 = scalar_lea.vmem %s5890_s0, %s4421_s23  ;;  %v4537_v32 = vld [vmem:[%s5891_s1 + $0x110] sm:$0xff]   ;;  %v4469_v33 = vld [vmem:[%s5891_s1 + $0x98] sm:$0xff]   ;;  %v4474_v38 = vld [vmem:[%s5891_s1 + $0xa0] sm:$0xff]  }
  0x15   : > { %v4449_v6 = vld [vmem:[%s4830_s28 + $0x4] ss:$20 sps:$4 sm:$0xff]   ;;  %v4452_v8 = vld [vmem:[%s4830_s28 + $0x1bc] ss:$20 sps:$4 sm:$0xff]   ;;  %v4447_v20 = vld [vmem:[%s4830_s28] ss:$20 sps:$4 sm:$0xff]  }
  0x16   : > { %1950 = vmatprep.mubr.bf16.mxu0 %v4449_v6  ;;  %2038 = vmatprep.mubr.bf16.mxu1 %v4452_v8  ;;  %v4450_v21 = vld [vmem:[%s4830_s28 + $0x1b8] ss:$20 sps:$4 sm:$0xff]   ;;  %v4459_v27 = vld [vmem:[%s4830_s28 + $0x28] ss:$20 sps:$4 sm:$0xff]   ;;  %v4460_v28 = vld [vmem:[%s4830_s28 + $0x1e0] ss:$20 sps:$4 sm:$0xff]  }
  0x17   : > { %1923 = vmatpush1.bf16.msra.mxu0 %v4433_v3  ;;  %4216 = vmatpush1.bf16.msra.mxu1 %v4433_v3  ;;  %v4454_v23 = vld [vmem:[%s4830_s28 + $0x2c] ss:$20 sps:$4 sm:$0xff]   ;;  %v4456_v24 = vld [vmem:[%s4830_s28 + $0x1e4] ss:$20 sps:$4 sm:$0xff]   ;;  %v4463_v30 = vld [vmem:[%s4830_s28 + $0x54] ss:$20 sps:$4 sm:$0xff]  }
  0x18   : > { %1924 = vmatprep.subr.bf16.mxu0 %v4772_v1  ;;  %4201 = vmatprep.subr.bf16.mxu1 %v4772_v1  ;;  %v4465_v31 = vld [vmem:[%s4830_s28 + $0x20c] ss:$20 sps:$4 sm:$0xff]   ;;  %v4467_v34 = vld [vmem:[%s4830_s28 + $0x50] ss:$20 sps:$4 sm:$0xff]   ;;  %v4468_v35 = vld [vmem:[%s4830_s28 + $0x208] ss:$20 sps:$4 sm:$0xff]  }
  0x19   : > { %v4470_v36 = vld [vmem:[%s4830_s28 + $0x7c] ss:$20 sps:$4 sm:$0xff]   ;;  %v4472_v37 = vld [vmem:[%s4830_s28 + $0x234] ss:$20 sps:$4 sm:$0xff]   ;;  %v4475_v41 = vld [vmem:[%s4830_s28 + $0x78] ss:$20 sps:$4 sm:$0xff]  }
  0x1a   : > { %v4568_v39 = vld [vmem:[%s5891_s1 + $0x118] sm:$0xff]   ;;  %v4477_v40 = vld [vmem:[%s5891_s1 + $0xa8] sm:$0xff]   ;;  %v4476_v42 = vld [vmem:[%s4830_s28 + $0x230] ss:$20 sps:$4 sm:$0xff]  }
  0x1b   : > { %1925 = vmatpush1.bf16.msra.mxu0 %v4434_v4  ;;  %4217 = vmatpush1.bf16.msra.mxu1 %v4434_v4  ;;  %v4478_v43 = vld [vmem:[%s4830_s28 + $0xa4] ss:$20 sps:$4 sm:$0xff]   ;;  %v4480_v44 = vld [vmem:[%s4830_s28 + $0x25c] ss:$20 sps:$4 sm:$0xff]   ;;  %v4482_v46 = vld [vmem:[%s4830_s28 + $0xa0] ss:$20 sps:$4 sm:$0xff]  }
  0x1c   : > { %1926 = vmatprep.subr.bf16.mxu0 %v4772_v1  ;;  %4202 = vmatprep.subr.bf16.mxu1 %v4772_v1  ;;  %v4484_v45 = vld [vmem:[%s5891_s1 + $0xb0] sm:$0xff]   ;;  %v4483_v47 = vld [vmem:[%s4830_s28 + $0x258] ss:$20 sps:$4 sm:$0xff]   ;;  %v4492_v51 = vld [vmem:[%s5891_s1 + $0xc0] sm:$0xff]  }
  0x1d   : > { %v4491_v48 = vld [vmem:[%s5891_s1 + $0xb8] sm:$0xff]   ;;  %v4485_v49 = vld [vmem:[%s4830_s28 + $0xcc] ss:$20 sps:$4 sm:$0xff]   ;;  %v4493_v55 = vld [vmem:[%s4830_s28 + $0xf4] ss:$20 sps:$4 sm:$0xff]  }
  0x1e   : > { %v4487_v50 = vld [vmem:[%s4830_s28 + $0x284] ss:$20 sps:$4 sm:$0xff]   ;;  %v4499_v52 = vld [vmem:[%s5891_s1 + $0xc8] sm:$0xff]   ;;  %v4490_v54 = vld [vmem:[%s4830_s28 + $0x280] ss:$20 sps:$4 sm:$0xff]  }
  0x1f   : > { %1927 = vmatpush1.bf16.msra.mxu0 %v4435_v5  ;;  %4218 = vmatpush1.bf16.msra.mxu1 %v4435_v5  ;;  %v4489_v53 = vld [vmem:[%s4830_s28 + $0xc8] ss:$20 sps:$4 sm:$0xff]   ;;  %v4495_v56 = vld [vmem:[%s4830_s28 + $0x2ac] ss:$20 sps:$4 sm:$0xff]   ;;  %v4507_v57 = vld [vmem:[%s5891_s1 + $0xd0] sm:$0xff]  }
  0x20   : > { %1928 = vmatprep.subr.bf16.mxu0 %v4772_v1  ;;  %4203 = vmatprep.subr.bf16.mxu1 %v4772_v1  ;;  %v4508_v58 = vld [vmem:[%s5891_s1 + $0xd8] sm:$0xff]   ;;  %v4603_v59 = vld [vmem:[%s5891_s1 + $0x120] sm:$0xff]   ;;  %v4503_v63 = vld [vmem:[%s4830_s28 + $0x2d4] ss:$20 sps:$4 sm:$0xff]  }
  0x21   : > { %v4497_v60 = vld [vmem:[%s4830_s28 + $0xf0] ss:$20 sps:$4 sm:$0xff]   ;;  %v4498_v61 = vld [vmem:[%s4830_s28 + $0x2a8] ss:$20 sps:$4 sm:$0xff]   ;;  %v4505_v3 = vld [vmem:[%s4830_s28 + $0x118] ss:$20 sps:$4 sm:$0xff]  }
  0x22   : > { %v4501_v62 = vld [vmem:[%s4830_s28 + $0x11c] ss:$20 sps:$4 sm:$0xff]   ;;  %v4515_v0 = vld [vmem:[%s5891_s1 + $0xe0] sm:$0xff]   ;;  %v4522_v2 = vld [vmem:[%s5891_s1 + $0xe8] sm:$0xff]  }
  0x23   : > { %1929 = vmatpush1.bf16.msra.mxu0 %v4436_v7  ;;  %4219 = vmatpush1.bf16.msra.mxu1 %v4436_v7  ;;  %v4506_v4 = vld [vmem:[%s4830_s28 + $0x2d0] ss:$20 sps:$4 sm:$0xff]   ;;  %v4530_v8 = vld [vmem:[%s5891_s1 + $0xf8] sm:$0xff]  }
  0x24   : > { %1930 = vmatprep.subr.bf16.mxu0 %v4772_v1  ;;  %4204 = vmatprep.subr.bf16.mxu1 %v4772_v1  ;;  %v4509_v5 = vld [vmem:[%s4830_s28 + $0x144] ss:$20 sps:$4 sm:$0xff]   ;;  %v4511_v6 = vld [vmem:[%s4830_s28 + $0x2fc] ss:$20 sps:$4 sm:$0xff]  }
  0x25   : > { %v4523_v7 = vld [vmem:[%s5891_s1 + $0xf0] sm:$0xff]  }
  0x27   : > { %1931 = vmatpush1.bf16.msra.mxu0 %v4437_v9  ;;  %4220 = vmatpush1.bf16.msra.mxu1 %v4437_v9  ;;  %v4513_v9 = vld [vmem:[%s4830_s28 + $0x140] ss:$20 sps:$4 sm:$0xff]  }
  0x28   : > { %1932 = vmatprep.subr.bf16.mxu0 %v4772_v1  ;;  %4205 = vmatprep.subr.bf16.mxu1 %v4772_v1 }
  0x2b   : > { %1933 = vmatpush1.bf16.msra.mxu0 %v4438_v10  ;;  %4221 = vmatpush1.bf16.msra.mxu1 %v4438_v10  ;;  %v4514_v10 = vld [vmem:[%s4830_s28 + $0x2f8] ss:$20 sps:$4 sm:$0xff]  }
  0x2c   : > { %1934 = vmatprep.subr.bf16.mxu0 %v4772_v1  ;;  %4206 = vmatprep.subr.bf16.mxu1 %v4772_v1 }
  0x2f   : > { %1935 = vmatpush1.bf16.msra.mxu0 %v4439_v11  ;;  %4222 = vmatpush1.bf16.msra.mxu1 %v4439_v11  ;;  %v4516_v11 = vld [vmem:[%s4830_s28 + $0x16c] ss:$20 sps:$4 sm:$0xff]  }
  0x30   : > { %1936 = vmatprep.subr.bf16.mxu0 %v4772_v1  ;;  %4207 = vmatprep.subr.bf16.mxu1 %v4772_v1 }
  0x33   : > { %1937 = vmatpush1.bf16.msra.mxu0 %v4440_v12  ;;  %4223 = vmatpush1.bf16.msra.mxu1 %v4440_v12  ;;  %v4518_v12 = vld [vmem:[%s4830_s28 + $0x324] ss:$20 sps:$4 sm:$0xff]  }
  0x34   : > { %1938 = vmatprep.subr.bf16.mxu0 %v4772_v1  ;;  %4208 = vmatprep.subr.bf16.mxu1 %v4772_v1 }
  0x37   : > { %1939 = vmatpush1.bf16.msra.mxu0 %v4441_v13  ;;  %4224 = vmatpush1.bf16.msra.mxu1 %v4441_v13  ;;  %v4520_v13 = vld [vmem:[%s4830_s28 + $0x168] ss:$20 sps:$4 sm:$0xff]  }
  0x38   : > { %1940 = vmatprep.subr.bf16.mxu0 %v4772_v1  ;;  %4209 = vmatprep.subr.bf16.mxu1 %v4772_v1 }
  0x3b   : > { %1941 = vmatpush1.bf16.msra.mxu0 %v4442_v14  ;;  %4225 = vmatpush1.bf16.msra.mxu1 %v4442_v14  ;;  %v4521_v14 = vld [vmem:[%s4830_s28 + $0x320] ss:$20 sps:$4 sm:$0xff]  }
  0x3c   : > { %1942 = vmatprep.subr.bf16.mxu0 %v4772_v1  ;;  %4210 = vmatprep.subr.bf16.mxu1 %v4772_v1 }
  0x3f   : > { %1943 = vmatpush1.bf16.msra.mxu0 %v4443_v15  ;;  %4226 = vmatpush1.bf16.msra.mxu1 %v4443_v15  ;;  %v4524_v15 = vld [vmem:[%s4830_s28 + $0x194] ss:$20 sps:$4 sm:$0xff]  }
  0x40   : > { %1944 = vmatprep.subr.bf16.mxu0 %v4772_v1  ;;  %4211 = vmatprep.subr.bf16.mxu1 %v4772_v1 }
  0x43   : > { %1945 = vmatpush1.bf16.msra.mxu0 %v4444_v16  ;;  %4227 = vmatpush1.bf16.msra.mxu1 %v4444_v16  ;;  %v4526_v16 = vld [vmem:[%s4830_s28 + $0x34c] ss:$20 sps:$4 sm:$0xff]  }
  0x44   : > { %1946 = vmatprep.subr.bf16.mxu0 %v4772_v1  ;;  %4212 = vmatprep.subr.bf16.mxu1 %v4772_v1 }
  0x47   : > { %1947 = vmatpush1.bf16.msra.mxu0 %v4445_v17  ;;  %4228 = vmatpush1.bf16.msra.mxu1 %v4445_v17  ;;  %v4529_v17 = vld [vmem:[%s4830_s28 + $0x348] ss:$20 sps:$4 sm:$0xff]  }
  0x48   : > { %1948 = vmatprep.subr.bf16.mxu0 %v4772_v1  ;;  %4213 = vmatprep.subr.bf16.mxu1 %v4772_v1 }
  0x4b   : > { %1949 = vmatpush1.bf16.msra.mxu0 %v4446_v18  ;;  %4229 = vmatpush1.bf16.msra.mxu1 %v4446_v18  ;;  %v4531_v18 = vld [vmem:[%s4830_s28 + $0x374] ss:$20 sps:$4 sm:$0xff]  }
  0x4c   : > { %2287 = vmatprep.subr.bf16.mxu0 %v4772_v1  ;;  %4102 = vmatprep.subr.bf16.mxu1 %v4461_v19 }
  0x4e   : > { %1951 = vmatmul.mubr.bf16.vlgmr.msra.gmra.mrb[0].mxu0 %v4447_v20  ;;  %2039 = vmatmul.mubr.bf16.vlgmr.msra.gmra.mrb[0].mxu1 %v4450_v21  ;;  %v4533_v20 = vld [vmem:[%s4830_s28 + $0x8] ss:$20 sps:$4 sm:$0xff]   ;;  %v4536_v21 = vld [vmem:[%s4830_s28 + $0x370] ss:$20 sps:$4 sm:$0xff]  }
  0x4f   : > { %2288 = vmatpush1.bf16.msra.mxu0 %v4453_v22  ;;  %1958 = vmatprep.mubr.bf16.mxu0 %v4454_v23  ;;  %v4538_v22 = vld [vmem:[%s4830_s28 + $0x39c] ss:$20 sps:$4 sm:$0xff]   ;;  %v4540_v23 = vld [vmem:[%s4830_s28 + $0x34] ss:$20 sps:$4 sm:$0xff]  }
  0x50   : > { %2289 = vmatprep.subr.bf16.mxu0 %v4772_v1  ;;  %2046 = vmatprep.mubr.bf16.mxu1 %v4456_v24  ;;  %v4636_v24 = vld [vmem:[%s5891_s1 + $0x128] ss:$0 sps:$4 sm:$0xff]  }
  0x51   : > { %4103 = vmatpush3.bf16.msra.mxu1 %v4461_v19  ;;  %v4535_v19 = vld [vmem:[%s4830_s28 + $0xc] ss:$20 sps:$4 sm:$0xff]  }
  0x52   : > { %4104 = vmatprep.subr.bf16.mxu1 %v4500_v25 }
  0x53   : > { %2290 = vmatpush1.bf16.msra.mxu0 %v4458_v26  ;;  %v4543_v26 = vld [vmem:[%s4830_s28 + $0x30] ss:$20 sps:$4 sm:$0xff]  }
  0x54   : > { %2291 = vmatprep.subr.bf16.mxu0 %v4772_v1 }
  0x55   : > { %4105 = vmatpush3.bf16.msra.mxu1 %v4500_v25  ;;  %v4542_v25 = vld [vmem:[%s4830_s28 + $0x398] ss:$20 sps:$4 sm:$0xff]  }
  0x56   : > { %1959 = vmatmul.mubr.bf16.gmra.mrb[4].mxu0 %v4459_v27  ;;  %2047 = vmatmul.mubr.bf16.gmra.mrb[4].mxu1 %v4460_v28  ;;  %v1916_v27 = vsel %vm1914_vm0, %v4636_v24, 0  ;;  %v4544_v28 = vld [vmem:[%s4830_s28 + $0x3c4] ss:$20 sps:$4 sm:$0xff]  }
  0x57   : > { %2292 = vmatpush1.bf16.msra.mxu0 %v4462_v29  ;;  %1966 = vmatprep.mubr.bf16.mxu0 %v4463_v30  ;;  %v4546_v29 = vld [vmem:[%s4830_s28 + $0x5c] ss:$20 sps:$4 sm:$0xff]   ;;  %v4548_v30 = vld [vmem:[%s4830_s28 + $0x3c0] ss:$20 sps:$4 sm:$0xff]  }
  0x58   : > { %2054 = vmatprep.mubr.bf16.mxu1 %v4465_v31  ;;  %2293 = vmatprep.subr.bf16.mxu0 %v4772_v1  ;;  %v4549_v31 = vld [vmem:[%s4830_s28 + $0x58] ss:$20 sps:$4 sm:$0xff]  }
  0x59   : > { %4106 = vmatprep.subr.bf16.mxu1 %v4537_v32 }
  0x5a   : > { %4107 = vmatpush3.bf16.msra.mxu1 %v4537_v32  ;;  %v4550_v32 = vld [vmem:[%s4830_s28 + $0x3ec] ss:$20 sps:$4 sm:$0xff]  }
  0x5b   : > { %2294 = vmatpush1.bf16.msra.mxu0 %v4469_v33  ;;  %4108 = vmatprep.subr.bf16.mxu1 %v4568_v39  ;;  %v4552_v33 = vld [vmem:[%s4830_s28 + $0x84] ss:$20 sps:$4 sm:$0xff]  }
  0x5c   : > { %2295 = vmatprep.subr.bf16.mxu0 %v4772_v1 }
  0x5e   : > { %1967 = vmatmul.mubr.bf16.gmra.mrb[8].mxu0 %v4467_v34  ;;  %2055 = vmatmul.mubr.bf16.gmra.mrb[8].mxu1 %v4468_v35  ;;  %v4554_v34 = vld [vmem:[%s4830_s28 + $0x3e8] ss:$20 sps:$4 sm:$0xff]   ;;  %v4555_v35 = vld [vmem:[%s4830_s28 + $0x80] ss:$20 sps:$4 sm:$0xff]  }
  0x5f   : > { %1974 = vmatprep.mubr.bf16.mxu0 %v4470_v36  ;;  %2062 = vmatprep.mubr.bf16.mxu1 %v4472_v37  ;;  %v4556_v36 = vld [vmem:[%s4830_s28 + $0x414] ss:$20 sps:$4 sm:$0xff]   ;;  %v4558_v37 = vld [vmem:[%s4830_s28 + $0xac] ss:$20 sps:$4 sm:$0xff]  }
  0x60   : > { %2296 = vmatpush1.bf16.msra.mxu0 %v4474_v38  ;;  %4109 = vmatpush3.bf16.msra.mxu1 %v4568_v39  ;;  %v4560_v38 = vld [vmem:[%s4830_s28 + $0x410] ss:$20 sps:$4 sm:$0xff]   ;;  %v4561_v39 = vld [vmem:[%s4830_s28 + $0xa8] ss:$20 sps:$4 sm:$0xff]  }
  0x61   : > { %2297 = vmatprep.subr.bf16.mxu0 %v4772_v1  ;;  %4110 = vmatprep.subr.bf16.mxu1 %v4603_v59 }
  0x64   : > { %2298 = vmatpush1.bf16.msra.mxu0 %v4477_v40  ;;  %4111 = vmatpush3.bf16.msra.mxu1 %v4603_v59  ;;  %v4562_v40 = vld [vmem:[%s4830_s28 + $0x43c] ss:$20 sps:$4 sm:$0xff]  }
  0x65   : > { %2299 = vmatprep.subr.bf16.mxu0 %v4772_v1  ;;  %4420 = vmatprep.subr.msk.bf16.mxu1 %vm1914_vm0, %v4636_v24  ;;  %v4592_v59 = vld [vmem:[%s4830_s28 + $0x170] ss:$20 sps:$4 sm:$0xff]   ;;  %v4635_v24 = vld [vmem:[%s4830_s28 + $0x288] ss:$20 sps:$4 sm:$0xff]  }
  0x66   : > { %1975 = vmatmul.mubr.bf16.gmra.mrb[12].mxu0 %v4475_v41  ;;  %2063 = vmatmul.mubr.bf16.gmra.mrb[12].mxu1 %v4476_v42  ;;  %v4564_v41 = vld [vmem:[%s4830_s28 + $0xd4] ss:$20 sps:$4 sm:$0xff]   ;;  %v4566_v42 = vld [vmem:[%s4830_s28 + $0x438] ss:$20 sps:$4 sm:$0xff]  }
  0x67   : > { %1982 = vmatprep.mubr.bf16.mxu0 %v4478_v43  ;;  %2070 = vmatprep.mubr.bf16.mxu1 %v4480_v44  ;;  %v4567_v43 = vld [vmem:[%s4830_s28 + $0xd0] ss:$20 sps:$4 sm:$0xff]  }
  0x68   : > { %2300 = vmatpush1.bf16.msra.mxu0 %v4484_v45  ;;  %4113 = vmatpush3.bf16.msra.mxu1 %v1916_v27  ;;  %v4569_v44 = vld [vmem:[%s4830_s28 + $0x464] ss:$20 sps:$4 sm:$0xff]   ;;  %v4571_v45 = vld [vmem:[%s4830_s28 + $0xfc] ss:$20 sps:$4 sm:$0xff]  }
  0x69   : > { %2301 = vmatprep.subr.bf16.mxu0 %v4772_v1  ;;  %v4637_v27 = vld [vmem:[%s4830_s28 + $0x61c] ss:$20 sps:$4 sm:$0xff]  }
  0x6c   : > { %2302 = vmatpush1.bf16.msra.mxu0 %v4491_v48  ;;  %v4575_v48 = vld [vmem:[%s4830_s28 + $0x48c] ss:$20 sps:$4 sm:$0xff]  }
  0x6d   : > { %2303 = vmatprep.subr.bf16.mxu0 %v4772_v1 }
  0x6e   : > { %1983 = vmatmul.mubr.bf16.gmra.mrb[16].mxu0 %v4482_v46  ;;  %2071 = vmatmul.mubr.bf16.gmra.mrb[16].mxu1 %v4483_v47  ;;  %v4573_v46 = vld [vmem:[%s4830_s28 + $0x460] ss:$20 sps:$4 sm:$0xff]   ;;  %v4574_v47 = vld [vmem:[%s4830_s28 + $0xf8] ss:$20 sps:$4 sm:$0xff]  }
  0x6f   : > { %1990 = vmatprep.mubr.bf16.mxu0 %v4485_v49  ;;  %2078 = vmatprep.mubr.bf16.mxu1 %v4487_v50  ;;  %v4577_v49 = vld [vmem:[%s4830_s28 + $0x124] ss:$20 sps:$4 sm:$0xff]   ;;  %v4579_v50 = vld [vmem:[%s4830_s28 + $0x488] ss:$20 sps:$4 sm:$0xff]  }
  0x70   : > { %2304 = vmatpush1.bf16.msra.mxu0 %v4492_v51  ;;  %v4580_v51 = vld [vmem:[%s4830_s28 + $0x120] ss:$20 sps:$4 sm:$0xff]  }
  0x71   : > { %2305 = vmatprep.subr.bf16.mxu0 %v4772_v1 }
  0x74   : > { %2306 = vmatpush1.bf16.msra.mxu0 %v4499_v52  ;;  %v4581_v52 = vld [vmem:[%s4830_s28 + $0x4b4] ss:$20 sps:$4 sm:$0xff]  }
  0x75   : > { %2307 = vmatprep.subr.bf16.mxu0 %v4772_v1 }
  0x76   : > { %1991 = vmatmul.mubr.bf16.gmra.mrb[20].mxu0 %v4489_v53  ;;  %2079 = vmatmul.mubr.bf16.gmra.mrb[20].mxu1 %v4490_v54  ;;  %v4583_v53 = vld [vmem:[%s4830_s28 + $0x14c] ss:$20 sps:$4 sm:$0xff]   ;;  %v4585_v54 = vld [vmem:[%s4830_s28 + $0x4b0] ss:$20 sps:$4 sm:$0xff]  }
  0x77   : > { %1998 = vmatprep.mubr.bf16.mxu0 %v4493_v55  ;;  %2086 = vmatprep.mubr.bf16.mxu1 %v4495_v56  ;;  %v4586_v55 = vld [vmem:[%s4830_s28 + $0x148] ss:$20 sps:$4 sm:$0xff]  }
  0x78   : > { %2308 = vmatpush1.bf16.msra.mxu0 %v4507_v57  ;;  %v4587_v56 = vld [vmem:[%s4830_s28 + $0x4dc] ss:$20 sps:$4 sm:$0xff]   ;;  %v4589_v57 = vld [vmem:[%s4830_s28 + $0x174] ss:$20 sps:$4 sm:$0xff]  }
  0x79   : > { %2309 = vmatprep.subr.bf16.mxu0 %v4772_v1 }
  0x7c   : > { %2310 = vmatpush1.bf16.msra.mxu0 %v4508_v58  ;;  %v4591_v58 = vld [vmem:[%s4830_s28 + $0x4d8] ss:$20 sps:$4 sm:$0xff]  }
  0x7d   : > { %2311 = vmatprep.subr.bf16.mxu0 %v4772_v1 }
  0x7e   : > { %1999 = vmatmul.mubr.bf16.gmra.mrb[24].mxu0 %v4497_v60  ;;  %2087 = vmatmul.mubr.bf16.gmra.mrb[24].mxu1 %v4498_v61  ;;  %v4593_v60 = vld [vmem:[%s4830_s28 + $0x504] ss:$20 sps:$4 sm:$0xff]   ;;  %v4595_v61 = vld [vmem:[%s4830_s28 + $0x19c] ss:$20 sps:$4 sm:$0xff]  }
  0x7f   : > { %2006 = vmatprep.mubr.bf16.mxu0 %v4501_v62  ;;  %2094 = vmatprep.mubr.bf16.mxu1 %v4503_v63  ;;  %v4597_v62 = vld [vmem:[%s4830_s28 + $0x500] ss:$20 sps:$4 sm:$0xff]   ;;  %v4598_v63 = vld [vmem:[%s4830_s28 + $0x198] ss:$20 sps:$4 sm:$0xff]  }
  0x80   : > { %2312 = vmatpush1.bf16.msra.mxu0 %v4515_v0  ;;  %v4599_v0 = vld [vmem:[%s4830_s28 + $0x52c] ss:$20 sps:$4 sm:$0xff]  }
  0x81   : > { %2313 = vmatprep.subr.bf16.mxu0 %v4772_v1 }
  0x84   : > { %2314 = vmatpush1.bf16.msra.mxu0 %v4522_v2  ;;  %v4601_v2 = vld [vmem:[%s4830_s28 + $0x1c4] ss:$20 sps:$4 sm:$0xff]  }
  0x85   : > { %2315 = vmatprep.subr.bf16.mxu0 %v4772_v1 }
  0x86   : > { %2007 = vmatmul.mubr.bf16.gmra.mrb[28].mxu0 %v4505_v3  ;;  %2095 = vmatmul.mubr.bf16.gmra.mrb[28].mxu1 %v4506_v4  ;;  %v4604_v3 = vld [vmem:[%s4830_s28 + $0x528] ss:$20 sps:$4 sm:$0xff]   ;;  %v4605_v4 = vld [vmem:[%s4830_s28 + $0x1c0] ss:$20 sps:$4 sm:$0xff]  }
  0x87   : > { %2014 = vmatprep.mubr.bf16.mxu0 %v4509_v5  ;;  %2102 = vmatprep.mubr.bf16.mxu1 %v4511_v6  ;;  %v4606_v5 = vld [vmem:[%s4830_s28 + $0x554] ss:$20 sps:$4 sm:$0xff]   ;;  %v4608_v6 = vld [vmem:[%s4830_s28 + $0x1ec] ss:$20 sps:$4 sm:$0xff]  }
  0x88   : > { %2316 = vmatpush1.bf16.msra.mxu0 %v4523_v7  ;;  %v4610_v7 = vld [vmem:[%s4830_s28 + $0x550] ss:$20 sps:$4 sm:$0xff]  }
  0x89   : > { %2317 = vmatprep.subr.bf16.mxu0 %v4772_v1  ;;  %v4528_v1 = vld [vmem:[%s4830_s28 + $0x190] ss:$20 sps:$4 sm:$0xff]  }
  0x8c   : > { %2318 = vmatpush1.bf16.msra.mxu0 %v4530_v8  ;;  %v4611_v8 = vld [vmem:[%s4830_s28 + $0x1e8] ss:$20 sps:$4 sm:$0xff]  }
  0x8e   : > { %2015 = vmatmul.mubr.bf16.gmra.mrb[32].mxu0 %v4513_v9  ;;  %2103 = vmatmul.mubr.bf16.gmra.mrb[32].mxu1 %v4514_v10  ;;  %v4612_v9 = vld [vmem:[%s4830_s28 + $0x57c] ss:$20 sps:$4 sm:$0xff]   ;;  %v4614_v10 = vld [vmem:[%s4830_s28 + $0x214] ss:$20 sps:$4 sm:$0xff]  }
  0x8f   : > { %2022 = vmatprep.mubr.bf16.mxu0 %v4516_v11  ;;  %2110 = vmatprep.mubr.bf16.mxu1 %v4518_v12  ;;  %v4616_v11 = vld [vmem:[%s4830_s28 + $0x578] ss:$20 sps:$4 sm:$0xff]   ;;  %v4617_v12 = vld [vmem:[%s4830_s28 + $0x210] ss:$20 sps:$4 sm:$0xff]  }
  0x96   : > { %2023 = vmatmul.mubr.bf16.gmra.mrb[36].mxu0 %v4520_v13  ;;  %2111 = vmatmul.mubr.bf16.gmra.mrb[36].mxu1 %v4521_v14  ;;  %v4618_v13 = vld [vmem:[%s4830_s28 + $0x5a4] ss:$20 sps:$4 sm:$0xff]   ;;  %v4620_v14 = vld [vmem:[%s4830_s28 + $0x23c] ss:$20 sps:$4 sm:$0xff]  }
  0x97   : > { %2030 = vmatprep.mubr.bf16.mxu0 %v4524_v15  ;;  %2118 = vmatprep.mubr.bf16.mxu1 %v4526_v16  ;;  %v4622_v15 = vld [vmem:[%s4830_s28 + $0x5a0] ss:$20 sps:$4 sm:$0xff]   ;;  %v4623_v16 = vld [vmem:[%s4830_s28 + $0x238] ss:$20 sps:$4 sm:$0xff]  }
  0x9e   : > { %2031 = vmatmul.mubr.bf16.gmra.mrb[40].mxu0 %v4528_v1  ;;  %2119 = vmatmul.mubr.bf16.gmra.mrb[40].mxu1 %v4529_v17  ;;  %v4624_v1 = vld [vmem:[%s4830_s28 + $0x5cc] ss:$20 sps:$4 sm:$0xff]   ;;  %v4626_v17 = vld [vmem:[%s4830_s28 + $0x264] ss:$20 sps:$4 sm:$0xff]  }
  0x9f   : > { %2126 = vmatprep.mubr.bf16.mxu1 %v4531_v18  ;;  %2319 = vmatprep.mubr.bf16.mxu0 %v4535_v19  ;;  %v4628_v18 = vld [vmem:[%s4830_s28 + $0x5c8] ss:$20 sps:$4 sm:$0xff]   ;;  %v4629_v19 = vld [vmem:[%s4830_s28 + $0x260] ss:$20 sps:$4 sm:$0xff]  }
  0xa6   : > { %2127 = vmatmul.mubr.bf16.gmra.mrb[44].mxu1 %v4536_v21  ;;  %2320 = vmatmul.mubr.bf16.vlgmr.msra.gmra.mrb[0].mxu0 %v4533_v20  ;;  %v4630_v20 = vld [vmem:[%s4830_s28 + $0x5f4] ss:$20 sps:$4 sm:$0xff]   ;;  %v4632_v21 = vld [vmem:[%s4830_s28 + $0x28c] ss:$20 sps:$4 sm:$0xff]  }
  0xa7   : > { %2134 = vmatprep.mubr.bf16.mxu1 %v4538_v22  ;;  %2327 = vmatprep.mubr.bf16.mxu0 %v4540_v23  ;;  %v4634_v23 = vld [vmem:[%s4830_s28 + $0x5f0] ss:$20 sps:$4 sm:$0xff]  }
  0xae   : > { %2135 = vmatmul.mubr.bf16.gmra.mrb[48].mxu1 %v4542_v25  ;;  %2328 = vmatmul.mubr.bf16.gmra.mrb[4].mxu0 %v4543_v26 }
  0xaf   : > { %2142 = vmatprep.mubr.bf16.mxu1 %v4544_v28  ;;  %2335 = vmatprep.mubr.bf16.mxu0 %v4546_v29  ;;  %v4639_v28 = vld [vmem:[%s4830_s28 + $0x2b4] ss:$20 sps:$4 sm:$0xff]  }
  0xb6   : > { %2143 = vmatmul.mubr.bf16.gmra.mrb[52].mxu1 %v4548_v30  ;;  %2336 = vmatmul.mubr.bf16.gmra.mrb[8].mxu0 %v4549_v31  ;;  %v4641_v31 = vld [vmem:[%s4830_s28 + $0x618] ss:$20 sps:$4 sm:$0xff]  }
  0xb7   : > { %2150 = vmatprep.mubr.bf16.mxu1 %v4550_v32  ;;  %2343 = vmatprep.mubr.bf16.mxu0 %v4552_v33  ;;  %v4642_v32 = vld [vmem:[%s4830_s28 + $0x2b0] ss:$20 sps:$4 sm:$0xff]  }
  0xbe   : > { %2151 = vmatmul.mubr.bf16.gmra.mrb[56].mxu1 %v4554_v34  ;;  %2344 = vmatmul.mubr.bf16.gmra.mrb[12].mxu0 %v4555_v35  ;;  %v4643_v35 = vld [vmem:[%s4830_s28 + $0x644] ss:$20 sps:$4 sm:$0xff]  }
  0xbf   : > { %2158 = vmatprep.mubr.bf16.mxu1 %v4556_v36  ;;  %2351 = vmatprep.mubr.bf16.mxu0 %v4558_v37  ;;  %v4645_v36 = vld [vmem:[%s4830_s28 + $0x2dc] ss:$20 sps:$4 sm:$0xff]  }
  0xc6   : > { %2159 = vmatmul.mubr.bf16.gmra.mrb[60].mxu1 %v4560_v38  ;;  %2352 = vmatmul.mubr.bf16.gmra.mrb[16].mxu0 %v4561_v39  ;;  %v4647_v39 = vld [vmem:[%s4830_s28 + $0x640] ss:$20 sps:$4 sm:$0xff]  }
  0xc7   : > { %2166 = vmatprep.mubr.bf16.mxu1 %v4562_v40  ;;  %2359 = vmatprep.mubr.bf16.mxu0 %v4564_v41  ;;  %v4648_v40 = vld [vmem:[%s4830_s28 + $0x2d8] ss:$20 sps:$4 sm:$0xff]  }
  0xce   : > { %2167 = vmatmul.mubr.bf16.gmra.mrb[64].mxu1 %v4566_v42  ;;  %2360 = vmatmul.mubr.bf16.gmra.mrb[20].mxu0 %v4567_v43  ;;  %v4649_v43 = vld [vmem:[%s4830_s28 + $0x66c] ss:$20 sps:$4 sm:$0xff]  }
  0xcf   : > { %2174 = vmatprep.mubr.bf16.mxu1 %v4569_v44  ;;  %2367 = vmatprep.mubr.bf16.mxu0 %v4571_v45  ;;  %v4651_v44 = vld [vmem:[%s4830_s28 + $0x304] ss:$20 sps:$4 sm:$0xff]  }
  0xd6   : > { %2175 = vmatmul.mubr.bf16.gmra.mrb[68].mxu1 %v4573_v46  ;;  %2368 = vmatmul.mubr.bf16.gmra.mrb[24].mxu0 %v4574_v47  ;;  %v4653_v47 = vld [vmem:[%s4830_s28 + $0x668] ss:$20 sps:$4 sm:$0xff]  }
  0xd7   : > { %2182 = vmatprep.mubr.bf16.mxu1 %v4575_v48  ;;  %2375 = vmatprep.mubr.bf16.mxu0 %v4577_v49  ;;  %v4654_v48 = vld [vmem:[%s4830_s28 + $0x300] ss:$20 sps:$4 sm:$0xff]  }
  0xde   : > { %2183 = vmatmul.mubr.bf16.gmra.mrb[72].mxu1 %v4579_v50  ;;  %2376 = vmatmul.mubr.bf16.gmra.mrb[28].mxu0 %v4580_v51  ;;  %v4655_v51 = vld [vmem:[%s4830_s28 + $0x32c] ss:$20 sps:$4 sm:$0xff]  }
  0xdf   : > { %2190 = vmatprep.mubr.bf16.mxu1 %v4581_v52  ;;  %2383 = vmatprep.mubr.bf16.mxu0 %v4583_v53  ;;  %v4657_v52 = vld [vmem:[%s4830_s28 + $0x10] ss:$20 sps:$4 sm:$0xff]  }
  0xe6   : > { %2191 = vmatmul.mubr.bf16.gmra.mrb[76].mxu1 %v4585_v54  ;;  %2384 = vmatmul.mubr.bf16.gmra.mrb[32].mxu0 %v4586_v55  ;;  %v4658_v55 = vld [vmem:[%s4830_s28 + $0x328] ss:$20 sps:$4 sm:$0xff]  }
  0xe7   : > { %2198 = vmatprep.mubr.bf16.mxu1 %v4587_v56  ;;  %2391 = vmatprep.mubr.bf16.mxu0 %v4589_v57  ;;  %v4659_v56 = vld [vmem:[%s4830_s28 + $0x38] ss:$20 sps:$4 sm:$0xff]  }
  0xee   : > { %2199 = vmatmul.mubr.bf16.gmra.mrb[80].mxu1 %v4591_v58  ;;  %2392 = vmatmul.mubr.bf16.gmra.mrb[36].mxu0 %v4592_v59  ;;  %v4660_v59 = vld [vmem:[%s4830_s28 + $0x354] ss:$20 sps:$4 sm:$0xff]  }
  0xef   : > { %2206 = vmatprep.mubr.bf16.mxu1 %v4593_v60  ;;  %2399 = vmatprep.mubr.bf16.mxu0 %v4595_v61  ;;  %v4662_v60 = vld [vmem:[%s4830_s28 + $0x60] ss:$20 sps:$4 sm:$0xff]  }
  0xf6   : > { %2207 = vmatmul.mubr.bf16.gmra.mrb[84].mxu1 %v4597_v62  ;;  %2400 = vmatmul.mubr.bf16.gmra.mrb[40].mxu0 %v4598_v63  ;;  %v4663_v63 = vld [vmem:[%s4830_s28 + $0x350] ss:$20 sps:$4 sm:$0xff]  }
  0xf7   : > { %2214 = vmatprep.mubr.bf16.mxu1 %v4599_v0  ;;  %2407 = vmatprep.mubr.bf16.mxu0 %v4601_v2  ;;  %v4664_v0 = vld [vmem:[%s4830_s28 + $0x88] ss:$20 sps:$4 sm:$0xff]  }
  0xfe   : > { %2215 = vmatmul.mubr.bf16.gmra.mrb[88].mxu1 %v4604_v3  ;;  %2408 = vmatmul.mubr.bf16.gmra.mrb[44].mxu0 %v4605_v4  ;;  %v4665_v4 = vld [vmem:[%s4830_s28 + $0x37c] ss:$20 sps:$4 sm:$0xff]  }
  0xff   : > { %2222 = vmatprep.mubr.bf16.mxu1 %v4606_v5  ;;  %2415 = vmatprep.mubr.bf16.mxu0 %v4608_v6  ;;  %v4667_v5 = vld [vmem:[%s4830_s28 + $0xb0] ss:$20 sps:$4 sm:$0xff]  }
 0x106   : > { %2223 = vmatmul.mubr.bf16.gmra.mrb[92].mxu1 %v4610_v7  ;;  %2416 = vmatmul.mubr.bf16.gmra.mrb[48].mxu0 %v4611_v8  ;;  %v4668_v8 = vld [vmem:[%s4830_s28 + $0x378] ss:$20 sps:$4 sm:$0xff]  }
 0x107   : > { %2230 = vmatprep.mubr.bf16.mxu1 %v4612_v9  ;;  %2423 = vmatprep.mubr.bf16.mxu0 %v4614_v10  ;;  %v4669_v9 = vld [vmem:[%s4830_s28 + $0xd8] ss:$20 sps:$4 sm:$0xff]  }
 0x10e   : > { %2231 = vmatmul.mubr.bf16.gmra.mrb[96].mxu1 %v4616_v11  ;;  %2424 = vmatmul.mubr.bf16.gmra.mrb[52].mxu0 %v4617_v12  ;;  %v4670_v12 = vld [vmem:[%s4830_s28 + $0x3a4] ss:$20 sps:$4 sm:$0xff]  }
 0x10f   : > { %2238 = vmatprep.mubr.bf16.mxu1 %v4618_v13  ;;  %2431 = vmatprep.mubr.bf16.mxu0 %v4620_v14  ;;  %v4672_v13 = vld [vmem:[%s4830_s28 + $0x100] ss:$20 sps:$4 sm:$0xff]  }
 0x116   : > { %2239 = vmatmul.mubr.bf16.gmra.mrb[100].mxu1 %v4622_v15  ;;  %2432 = vmatmul.mubr.bf16.gmra.mrb[56].mxu0 %v4623_v16  ;;  %v4673_v16 = vld [vmem:[%s4830_s28 + $0x3a0] ss:$20 sps:$4 sm:$0xff]  }
 0x117   : > { %2246 = vmatprep.mubr.bf16.mxu1 %v4624_v1  ;;  %2439 = vmatprep.mubr.bf16.mxu0 %v4626_v17  ;;  %v4674_v1 = vld [vmem:[%s4830_s28 + $0x128] ss:$20 sps:$4 sm:$0xff]  }
 0x11e   : > { %2247 = vmatmul.mubr.bf16.gmra.mrb[104].mxu1 %v4628_v18  ;;  %2440 = vmatmul.mubr.bf16.gmra.mrb[60].mxu0 %v4629_v19  ;;  %v4675_v19 = vld [vmem:[%s4830_s28 + $0x3cc] ss:$20 sps:$4 sm:$0xff]  }
 0x11f   : > { %2254 = vmatprep.mubr.bf16.mxu1 %v4630_v20  ;;  %2447 = vmatprep.mubr.bf16.mxu0 %v4632_v21  ;;  %v4677_v20 = vld [vmem:[%s4830_s28 + $0x150] ss:$20 sps:$4 sm:$0xff]  }
 0x121   : > { %v5081_v22 = vpop.f32.mrb[0].mxu1 }
 0x122   : > { %v2042_v25 = vpop.f32.mrb[1].mxu1 }
 0x123   : > { %v5085_v26 = vpop.f32.mrb[2].mxu1  ;;  %v4679_v25 = vld [vmem:[%s4830_s28 + $0x178] ss:$20 sps:$4 sm:$0xff]  }
 0x124   : > { %v2045_v29 = vpop.f32.mrb[3].mxu1 }
 0x125   : > { %v4680_v29 = vld [vmem:[%s4830_s28 + $0x3f4] ss:$20 sps:$4 sm:$0xff]  }
 0x126   : > { %2255 = vmatmul.mubr.bf16.gmra.mrb[108].mxu1 %v4634_v23  ;;  %2448 = vmatmul.mubr.bf16.gmra.mrb[64].mxu0 %v4635_v24  ;;  %v4678_v24 = vld [vmem:[%s4830_s28 + $0x3c8] ss:$20 sps:$4 sm:$0xff]  }
 0x127   : > { %2262 = vmatprep.mubr.bf16.mxu1 %v4637_v27  ;;  %2455 = vmatprep.mubr.bf16.mxu0 %v4639_v28 }
 0x129   : > { %v5089_v30 = vpop.f32.mrb[4].mxu1 }
 0x12a   : > { %v2050_v33 = vpop.f32.mrb[5].mxu1 }
 0x12b   : > { %v5093_v34 = vpop.f32.mrb[6].mxu1 }
 0x12c   : > { %v2053_v37 = vpop.f32.mrb[7].mxu1 }
 0x12e   : > { %2263 = vmatmul.mubr.bf16.gmra.mrb[112].mxu1 %v4641_v31  ;;  %2456 = vmatmul.mubr.bf16.gmra.mrb[68].mxu0 %v4642_v32  ;;  %v4682_v31 = vld [vmem:[%s4830_s28 + $0x1a0] ss:$20 sps:$4 sm:$0xff]  }
 0x12f   : > { %2270 = vmatprep.mubr.bf16.mxu1 %v4643_v35  ;;  %2463 = vmatprep.mubr.bf16.mxu0 %v4645_v36  ;;  %v4683_v35 = vld [vmem:[%s4830_s28 + $0x3f0] ss:$20 sps:$4 sm:$0xff]   ;;  %v4684_v36 = vld [vmem:[%s4830_s28 + $0x1c8] ss:$20 sps:$4 sm:$0xff]  }
 0x131   : > { %v5097_v38 = vpop.f32.mrb[8].mxu1 }
 0x132   : > { %v2058_v41 = vpop.f32.mrb[9].mxu1 }
 0x133   : > { %v5101_v42 = vpop.f32.mrb[10].mxu1  ;;  %v4687_v41 = vld [vmem:[%s4830_s28 + $0x1f0] ss:$20 sps:$4 sm:$0xff]  }
 0x134   : > { %v2061_v45 = vpop.f32.mrb[11].mxu1 }
 0x135   : > { %v4688_v45 = vld [vmem:[%s4830_s28 + $0x418] ss:$20 sps:$4 sm:$0xff]  }
 0x136   : > { %2271 = vmatmul.mubr.bf16.gmra.mrb[116].mxu1 %v4647_v39  ;;  %2464 = vmatmul.mubr.bf16.gmra.mrb[72].mxu0 %v4648_v40  ;;  %v4685_v40 = vld [vmem:[%s4830_s28 + $0x41c] ss:$20 sps:$4 sm:$0xff]  }
 0x137   : > { %2278 = vmatprep.mubr.bf16.mxu1 %v4649_v43  ;;  %2471 = vmatprep.mubr.bf16.mxu0 %v4651_v44 }
 0x139   : > { %v5105_v46 = vpop.f32.mrb[12].mxu1 }
 0x13a   : > { %v2066_v49 = vpop.f32.mrb[13].mxu1 }
 0x13b   : > { %v5109_v50 = vpop.f32.mrb[14].mxu1 }
 0x13c   : > { %v2069_v53 = vpop.f32.mrb[15].mxu1 }
 0x13e   : > { %2279 = vmatmul.mubr.bf16.gmra.mrb[120].mxu1 %v4653_v47  ;;  %2472 = vmatmul.mubr.bf16.gmra.mrb[76].mxu0 %v4654_v48  ;;  %v4689_v47 = vld [vmem:[%s4830_s28 + $0x218] ss:$20 sps:$4 sm:$0xff]  }
 0x13f   : > { %2479 = vmatprep.mubr.bf16.mxu0 %v4655_v51  ;;  %4114 = vmatprep.mubr.msk.bf16.mxu1 %vm1787_vm1, %v4657_v52  ;;  %v4690_v51 = vld [vmem:[%s4830_s28 + $0x444] ss:$20 sps:$4 sm:$0xff]   ;;  %v4692_v52 = vld [vmem:[%s4830_s28 + $0x240] ss:$20 sps:$4 sm:$0xff]  }
 0x141   : > { %v5114_v54 = vpop.f32.mrb[16].mxu1 }
 0x142   : > { %v2074_v57 = vpop.f32.mrb[17].mxu1 }
 0x143   : > { %v5118_v58 = vpop.f32.mrb[18].mxu1 }
 0x144   : > { %v2077_v61 = vpop.f32.mrb[19].mxu1 }
 0x146   : > { %2480 = vmatmul.mubr.bf16.gmra.mrb[80].mxu0 %v4658_v55  ;;  %4115 = vmatmul.mubr.msk.bf16.vlgmr.msra.gmra.mrb[124].mxu1 %vm1787_vm1, %v4659_v56 }
 0x147   : > { %2487 = vmatprep.mubr.bf16.mxu0 %v4660_v59  ;;  %4118 = vmatprep.mubr.msk.bf16.mxu1 %vm1787_vm1, %v4662_v60  ;;  %v4693_v59 = vld [vmem:[%s4830_s28 + $0x440] ss:$20 sps:$4 sm:$0xff]   ;;  %v4694_v60 = vld [vmem:[%s4830_s28 + $0x268] ss:$20 sps:$4 sm:$0xff]  }
 0x149   : > { %v5124_v62 = vpop.f32.mrb[20].mxu1 }
 0x14a   : > { %v2082_v2 = vpop.f32.mrb[21].mxu1 }
 0x14b   : > { %v5128_v3 = vpop.f32.mrb[22].mxu1  ;;  %v4695_v2 = vld [vmem:[%s4830_s28 + $0x46c] ss:$20 sps:$4 sm:$0xff]  }
 0x14c   : > { %v2085_v6 = vpop.f32.mrb[23].mxu1 }
 0x14e   : > { %2488 = vmatmul.mubr.bf16.gmra.mrb[84].mxu0 %v4663_v63  ;;  %4119 = vmatmul.mubr.msk.bf16.gmra.mrb[128].mxu1 %vm1787_vm1, %v4664_v0 }
 0x14f   : > { %2495 = vmatprep.mubr.bf16.mxu0 %v4665_v4  ;;  %4122 = vmatprep.mubr.msk.bf16.mxu1 %vm1787_vm1, %v4667_v5  ;;  %v4697_v4 = vld [vmem:[%s4830_s28 + $0x290] ss:$20 sps:$4 sm:$0xff]  }
 0x151   : > { %v5134_v7 = vpop.f32.mrb[24].mxu1 }
 0x152   : > { %v2090_v10 = vpop.f32.mrb[25].mxu1 }
 0x153   : > { %v5138_v11 = vpop.f32.mrb[26].mxu1 }
 0x154   : > { %v2093_v14 = vpop.f32.mrb[27].mxu1 }
 0x156   : > { %2496 = vmatmul.mubr.bf16.gmra.mrb[88].mxu0 %v4668_v8  ;;  %4123 = vmatmul.mubr.msk.bf16.gmra.mrb[132].mxu1 %vm1787_vm1, %v4669_v9 }
 0x157   : > { %2503 = vmatprep.mubr.bf16.mxu0 %v4670_v12  ;;  %4126 = vmatprep.mubr.msk.bf16.mxu1 %vm1787_vm1, %v4672_v13  ;;  %v4698_v12 = vld [vmem:[%s4830_s28 + $0x468] ss:$20 sps:$4 sm:$0xff]   ;;  %v4699_v13 = vld [vmem:[%s4830_s28 + $0x2b8] ss:$20 sps:$4 sm:$0xff]  }
 0x159   : > { %v5144_v15 = vpop.f32.mrb[28].mxu1 }
 0x15a   : > { %v2098_v17 = vpop.f32.mrb[29].mxu1 }
 0x15b   : > { %v5148_v18 = vpop.f32.mrb[30].mxu1  ;;  %v4700_v17 = vld [vmem:[%s4830_s28 + $0x494] ss:$20 sps:$4 sm:$0xff]  }
 0x15c   : > { %v2101_v21 = vpop.f32.mrb[31].mxu1 }
 0x15e   : > { %2504 = vmatmul.mubr.bf16.gmra.mrb[92].mxu0 %v4673_v16  ;;  %4127 = vmatmul.mubr.msk.bf16.gmra.mrb[136].mxu1 %vm1787_vm1, %v4674_v1 }
 0x15f   : > { %2511 = vmatprep.mubr.bf16.mxu0 %v4675_v19  ;;  %4130 = vmatprep.mubr.msk.bf16.mxu1 %vm1787_vm1, %v4677_v20  ;;  %v4702_v19 = vld [vmem:[%s4830_s28 + $0x2e0] ss:$20 sps:$4 sm:$0xff]  }
 0x161   : > { %v5154_v23 = vpop.f32.mrb[32].mxu1 }
 0x162   : > { %v2106_v27 = vpop.f32.mrb[33].mxu1 }
 0x163   : > { %v5158_v28 = vpop.f32.mrb[34].mxu1 }
 0x164   : > { %v2109_v32 = vpop.f32.mrb[35].mxu1 }
 0x166   : > { %2512 = vmatmul.mubr.bf16.gmra.mrb[96].mxu0 %v4678_v24  ;;  %4131 = vmatmul.mubr.msk.bf16.gmra.mrb[140].mxu1 %vm1787_vm1, %v4679_v25 }
 0x167   : > { %2519 = vmatprep.mubr.bf16.mxu0 %v4680_v29  ;;  %4134 = vmatprep.mubr.msk.bf16.mxu1 %vm1787_vm1, %v4682_v31  ;;  %v4703_v29 = vld [vmem:[%s4830_s28 + $0x490] ss:$20 sps:$4 sm:$0xff]   ;;  %v4704_v31 = vld [vmem:[%s4830_s28 + $0x308] ss:$20 sps:$4 sm:$0xff]  }
 0x169   : > { %v5164_v33 = vpop.f32.mrb[36].mxu1 }
 0x16a   : > { %v2114_v37 = vpop.f32.mrb[37].mxu1 }
 0x16b   : > { %v5168_v39 = vpop.f32.mrb[38].mxu1  ;;  %v4705_v37 = vld [vmem:[%s4830_s28 + $0x4bc] ss:$20 sps:$4 sm:$0xff]  }
 0x16c   : > { %v2117_v43 = vpop.f32.mrb[39].mxu1 }
 0x16e   : > { %2520 = vmatmul.mubr.bf16.gmra.mrb[100].mxu0 %v4683_v35  ;;  %4135 = vmatmul.mubr.msk.bf16.gmra.mrb[144].mxu1 %vm1787_vm1, %v4684_v36 }
 0x16f   : > { %2527 = vmatprep.mubr.bf16.mxu0 %v4685_v40  ;;  %4138 = vmatprep.mubr.msk.bf16.mxu1 %vm1787_vm1, %v4687_v41  ;;  %v4707_v40 = vld [vmem:[%s4830_s28 + $0x330] ss:$20 sps:$4 sm:$0xff]  }
 0x171   : > { %v5174_v44 = vpop.f32.mrb[40].mxu1 }
 0x172   : > { %v2122_v48 = vpop.f32.mrb[41].mxu1 }
 0x173   : > { %v5178_v49 = vpop.f32.mrb[42].mxu1 }
 0x174   : > { %v2125_v53 = vpop.f32.mrb[43].mxu1 }
 0x176   : > { %2528 = vmatmul.mubr.bf16.gmra.mrb[104].mxu0 %v4688_v45  ;;  %4139 = vmatmul.mubr.msk.bf16.gmra.mrb[148].mxu1 %vm1787_vm1, %v4689_v47 }
 0x177   : > { %2535 = vmatprep.mubr.bf16.mxu0 %v4690_v51  ;;  %4142 = vmatprep.mubr.msk.bf16.mxu1 %vm1787_vm1, %v4692_v52  ;;  %v4708_v51 = vld [vmem:[%s4830_s28 + $0x4b8] ss:$20 sps:$4 sm:$0xff]  }
 0x178   : > { %v4709_v52 = vld [vmem:[%s4830_s28 + $0x358] ss:$20 sps:$4 sm:$0xff]  }
 0x179   : > { %v5184_v55 = vpop.f32.mrb[0].mxu0  ;;  %v5186_v56 = vpop.f32.mrb[44].mxu1 }
 0x17a   : > { %v2323_v57 = vpop.f32.mrb[1].mxu0  ;;  %v2130_v61 = vpop.f32.mrb[45].mxu1 }
 0x17b   : > { %v5190_v63 = vpop.f32.mrb[2].mxu0  ;;  %v5192_v0 = vpop.f32.mrb[46].mxu1  ;;  %v4712_v61 = vld [vmem:[%s4830_s28 + $0x380] ss:$20 sps:$4 sm:$0xff]  }
 0x17c   : > { %v2326_v5 = vpop.f32.mrb[3].mxu0  ;;  %v2133_v6 = vpop.f32.mrb[47].mxu1 }
 0x17e   : > { %2536 = vmatmul.mubr.bf16.gmra.mrb[108].mxu0 %v4693_v59  ;;  %4143 = vmatmul.mubr.msk.bf16.gmra.mrb[152].mxu1 %vm1787_vm1, %v4694_v60  ;;  %v4710_v60 = vld [vmem:[%s4830_s28 + $0x4e4] ss:$20 sps:$4 sm:$0xff]  }
 0x17f   : > { %2543 = vmatprep.mubr.bf16.mxu0 %v4695_v2  ;;  %4146 = vmatprep.mubr.msk.bf16.mxu1 %vm1787_vm1, %v4697_v4 }
 0x181   : > { %v5198_v8 = vpop.f32.mrb[4].mxu0  ;;  %v5200_v9 = vpop.f32.mrb[48].mxu1 }
 0x182   : > { %v2331_v10 = vpop.f32.mrb[5].mxu0  ;;  %v2138_v14 = vpop.f32.mrb[49].mxu1 }
 0x183   : > { %v5204_v16 = vpop.f32.mrb[6].mxu0  ;;  %v5206_v1 = vpop.f32.mrb[50].mxu1 }
 0x184   : > { %v2334_v20 = vpop.f32.mrb[7].mxu0  ;;  %v2141_v21 = vpop.f32.mrb[51].mxu1 }
 0x185   : > { %v4715_v20 = vld [vmem:[%s4830_s28 + $0x50c] ss:$20 sps:$4 sm:$0xff]   ;;  %v4717_v21 = vld [vmem:[%s4830_s28 + $0x3d0] ss:$20 sps:$4 sm:$0xff]  }
 0x186   : > { %2544 = vmatmul.mubr.bf16.gmra.mrb[112].mxu0 %v4698_v12  ;;  %4147 = vmatmul.mubr.msk.bf16.gmra.mrb[156].mxu1 %vm1787_vm1, %v4699_v13  ;;  %v4713_v12 = vld [vmem:[%s4830_s28 + $0x4e0] ss:$20 sps:$4 sm:$0xff]   ;;  %v4714_v13 = vld [vmem:[%s4830_s28 + $0x3a8] ss:$20 sps:$4 sm:$0xff]  }
 0x187   : > { %2551 = vmatprep.mubr.bf16.mxu0 %v4700_v17  ;;  %4150 = vmatprep.mubr.msk.bf16.mxu1 %vm1787_vm1, %v4702_v19 }
 0x189   : > { %v5212_v24 = vpop.f32.mrb[8].mxu0  ;;  %v5214_v25 = vpop.f32.mrb[52].mxu1 }
 0x18a   : > { %v2339_v27 = vpop.f32.mrb[9].mxu0  ;;  %v2146_v32 = vpop.f32.mrb[53].mxu1 }
 0x18b   : > { %v5218_v35 = vpop.f32.mrb[10].mxu0  ;;  %v5220_v36 = vpop.f32.mrb[54].mxu1 }
 0x18c   : > { %v2342_v41 = vpop.f32.mrb[11].mxu0  ;;  %v2149_v43 = vpop.f32.mrb[55].mxu1 }
 0x18d   : > { %v4719_v41 = vld [vmem:[%s4830_s28 + $0x3f8] ss:$20 sps:$4 sm:$0xff]  }
 0x18e   : > { %2552 = vmatmul.mubr.bf16.gmra.mrb[116].mxu0 %v4703_v29  ;;  %4151 = vmatmul.mubr.msk.bf16.gmra.mrb[160].mxu1 %vm1787_vm1, %v4704_v31 }
 0x18f   : > { %2559 = vmatprep.mubr.bf16.mxu0 %v4705_v37  ;;  %4154 = vmatprep.mubr.msk.bf16.mxu1 %vm1787_vm1, %v4707_v40  ;;  %v4718_v40 = vld [vmem:[%s4830_s28 + $0x508] ss:$20 sps:$4 sm:$0xff]  }
 0x191   : > { %v5226_v45 = vpop.f32.mrb[12].mxu0  ;;  %v5228_v47 = vpop.f32.mrb[56].mxu1 }
 0x192   : > { %v2347_v48 = vpop.f32.mrb[13].mxu0  ;;  %v2154_v53 = vpop.f32.mrb[57].mxu1 }
 0x193   : > { %v5232_v57 = vpop.f32.mrb[14].mxu0  ;;  %v5234_v59 = vpop.f32.mrb[58].mxu1  ;;  %v4722_v53 = vld [vmem:[%s4830_s28 + $0x420] ss:$20 sps:$4 sm:$0xff]  }
 0x194   : > { %5894 = vst [vmem:[#allocation2_spill] sm:$0xff] %v5234_v59  ;;  %v2350_v2 = vpop.f32.mrb[15].mxu0  ;;  %v2157_v4 = vpop.f32.mrb[59].mxu1 }
 0x196   : > { %2560 = vmatmul.mubr.bf16.gmra.mrb[120].mxu0 %v4708_v51  ;;  %4155 = vmatmul.mubr.msk.bf16.gmra.mrb[164].mxu1 %vm1787_vm1, %v4709_v52  ;;  %v4720_v52 = vld [vmem:[%s4830_s28 + $0x534] ss:$20 sps:$4 sm:$0xff]  }
 0x197   : > { %2567 = vmatprep.mubr.bf16.mxu0 %v4710_v60  ;;  %4158 = vmatprep.mubr.msk.bf16.mxu1 %vm1787_vm1, %v4712_v61 }
 0x199   : > { %v5240_v5 = vpop.f32.mrb[16].mxu0  ;;  %v5242_v6 = vpop.f32.mrb[60].mxu1 }
 0x19a   : > { %5895 = vst [vmem:[#allocation3_spill] sm:$0xff] %v5242_v6  ;;  %v2355_v10 = vpop.f32.mrb[17].mxu0  ;;  %v2162_v14 = vpop.f32.mrb[61].mxu1 }
 0x19b   : > { %v5246_v17 = vpop.f32.mrb[18].mxu0  ;;  %v5248_v19 = vpop.f32.mrb[62].mxu1 }
 0x19c   : > { %5896 = vst [vmem:[#allocation4_spill] sm:$0xff] %v5248_v19  ;;  %v2358_v27 = vpop.f32.mrb[19].mxu0  ;;  %v2165_v29 = vpop.f32.mrb[63].mxu1 }
 0x19d   : > { %v4725_v27 = vld [vmem:[%s4830_s28 + $0x55c] ss:$20 sps:$4 sm:$0xff]  }
 0x19e   : > { %2568 = vmatmul.mubr.bf16.gmra.mrb[124].mxu0 %v4713_v12  ;;  %4159 = vmatmul.mubr.msk.bf16.gmra.mrb[168].mxu1 %vm1787_vm1, %v4714_v13  ;;  %v4723_v12 = vld [vmem:[%s4830_s28 + $0x530] ss:$20 sps:$4 sm:$0xff]   ;;  %v4724_v13 = vld [vmem:[%s4830_s28 + $0x448] ss:$20 sps:$4 sm:$0xff]  }
 0x19f   : > { %2575 = vmatprep.mubr.bf16.mxu0 %v4715_v20  ;;  %4162 = vmatprep.mubr.msk.bf16.mxu1 %vm1787_vm1, %v4717_v21  ;;  %v4727_v29 = vld [vmem:[%s4830_s28 + $0x470] ss:$20 sps:$4 sm:$0xff]  }
 0x1a1   : > { %v5254_v31 = vpop.f32.mrb[20].mxu0  ;;  %v5256_v32 = vpop.f32.mrb[64].mxu1 }
 0x1a2   : > { %5897 = vst [vmem:[#allocation5_spill] sm:$0xff] %v5256_v32  ;;  %v2363_v37 = vpop.f32.mrb[21].mxu0  ;;  %v2170_v43 = vpop.f32.mrb[65].mxu1  ;;  %v4744_v32 = vld [vmem:[%s4830_s28 + $0x588] ss:$20 sps:$4 sm:$0xff]  }
 0x1a3   : > { %v5260_v48 = vpop.f32.mrb[22].mxu0  ;;  %v5262_v51 = vpop.f32.mrb[66].mxu1 }
 0x1a4   : > { %5898 = vst [vmem:[#allocation6_spill] sm:$0xff] %v5262_v51  ;;  %v2366_v60 = vpop.f32.mrb[23].mxu0  ;;  %v2173_v61 = vpop.f32.mrb[67].mxu1 }
 0x1a5   : > { %v4729_v60 = vld [vmem:[%s4830_s28 + $0x498] ss:$20 sps:$4 sm:$0xff]  }
 0x1a6   : > { %2576 = vmatmul.mubr.bf16.gmra.mrb[128].mxu0 %v4718_v40  ;;  %4163 = vmatmul.mubr.msk.bf16.gmra.mrb[172].mxu1 %vm1787_vm1, %v4719_v41 }
 0x1a7   : > { %2583 = vmatprep.mubr.bf16.mxu0 %v4720_v52  ;;  %4166 = vmatprep.mubr.msk.bf16.mxu1 %vm1787_vm1, %v4722_v53  ;;  %v4728_v53 = vld [vmem:[%s4830_s28 + $0x558] ss:$20 sps:$4 sm:$0xff]  }
 0x1a9   : > { %v5268_v2 = vpop.f32.mrb[24].mxu0  ;;  %v5270_v4 = vpop.f32.mrb[68].mxu1 }
 0x1aa   : > { %5899 = vst [vmem:[#allocation7_spill] sm:$0xff] %v5270_v4  ;;  %v2371_v10 = vpop.f32.mrb[25].mxu0  ;;  %v2178_v14 = vpop.f32.mrb[69].mxu1 }
 0x1ab   : > { %v5274_v20 = vpop.f32.mrb[26].mxu0  ;;  %v5276_v21 = vpop.f32.mrb[70].mxu1 }
 0x1ac   : > { %5900 = vst [vmem:[#allocation8_spill] sm:$0xff] %v5276_v21  ;;  %v2374_v37 = vpop.f32.mrb[27].mxu0  ;;  %v2181_v40 = vpop.f32.mrb[71].mxu1 }
 0x1ae   : > { %2584 = vmatmul.mubr.bf16.gmra.mrb[132].mxu0 %v4723_v12  ;;  %4167 = vmatmul.mubr.msk.bf16.gmra.mrb[176].mxu1 %vm1787_vm1, %v4724_v13  ;;  %v4730_v12 = vld [vmem:[%s4830_s28 + $0x584] ss:$20 sps:$4 sm:$0xff]   ;;  %v4732_v13 = vld [vmem:[%s4830_s28 + $0x4c0] ss:$20 sps:$4 sm:$0xff]  }
 0x1af   : > { %2591 = vmatprep.mubr.bf16.mxu0 %v4725_v27  ;;  %4170 = vmatprep.mubr.msk.bf16.mxu1 %vm1787_vm1, %v4727_v29 }
 0x1b1   : > { %v5282_v41 = vpop.f32.mrb[28].mxu0  ;;  %v5284_v43 = vpop.f32.mrb[72].mxu1 }
 0x1b2   : > { %5901 = vst [vmem:[#allocation9_spill] sm:$0xff] %v5284_v43  ;;  %v2379_v52 = vpop.f32.mrb[29].mxu0  ;;  %v2186_v61 = vpop.f32.mrb[73].mxu1 }
 0x1b3   : > { %v5288_v10 = vpop.f32.mrb[30].mxu0  ;;  %v5290_v14 = vpop.f32.mrb[74].mxu1  ;;  %v4733_v61 = vld [vmem:[%s4830_s28 + $0x580] ss:$20 sps:$4 sm:$0xff]  }
 0x1b4   : > { %5902 = vst [vmem:[#allocation10_spill] sm:$0xff] %v5290_v14  ;;  %v2382_v27 = vpop.f32.mrb[31].mxu0  ;;  %v2189_v29 = vpop.f32.mrb[75].mxu1  ;;  %v4734_v14 = vld [vmem:[%s4830_s28 + $0x4e8] ss:$20 sps:$4 sm:$0xff]  }
 0x1b6   : > { %2592 = vmatmul.mubr.bf16.gmra.mrb[136].mxu0 %v4728_v53  ;;  %4171 = vmatmul.mubr.msk.bf16.gmra.mrb[180].mxu1 %vm1787_vm1, %v4729_v60  ;;  %v4735_v53 = vld [vmem:[%s4830_s28 + $0x5ac] ss:$20 sps:$4 sm:$0xff]   ;;  %v4737_v60 = vld [vmem:[%s4830_s28 + $0x510] ss:$20 sps:$4 sm:$0xff]  }
 0x1b7   : > { %2599 = vmatprep.mubr.bf16.mxu0 %v4730_v12  ;;  %4174 = vmatprep.mubr.msk.bf16.mxu1 %vm1787_vm1, %v4732_v13 }
 0x1b9   : > { %v5296_v37 = vpop.f32.mrb[32].mxu0  ;;  %v5298_v40 = vpop.f32.mrb[76].mxu1 }
 0x1ba   : > { %5903 = vst [vmem:[#allocation11_spill] sm:$0xff] %v5298_v40  ;;  %v2387_v52 = vpop.f32.mrb[33].mxu0  ;;  %v2194_v43 = vpop.f32.mrb[77].mxu1  ;;  %v4738_v40 = vld [vmem:[%s4830_s28 + $0x5a8] ss:$20 sps:$4 sm:$0xff]  }
 0x1bb   : > { %v5302_v21 = vpop.f32.mrb[34].mxu0  ;;  %v5304_v27 = vpop.f32.mrb[78].mxu1 }
 0x1bc   : > { %5904 = vst [vmem:[#allocation12_spill] sm:$0xff] %v5304_v27  ;;  %v2390_v12 = vpop.f32.mrb[35].mxu0  ;;  %v2197_v13 = vpop.f32.mrb[79].mxu1  ;;  %v4739_v27 = vld [vmem:[%s4830_s28 + $0x538] ss:$20 sps:$4 sm:$0xff]  }
 0x1be   : > { %2600 = vmatmul.mubr.bf16.gmra.mrb[140].mxu0 %v4733_v61  ;;  %4175 = vmatmul.mubr.msk.bf16.gmra.mrb[184].mxu1 %vm1787_vm1, %v4734_v14  ;;  %v4740_v61 = vld [vmem:[%s4830_s28 + $0x5d4] ss:$20 sps:$4 sm:$0xff]  }
 0x1bf   : > { %2607 = vmatprep.mubr.bf16.mxu0 %v4735_v53  ;;  %4178 = vmatprep.mubr.msk.bf16.mxu1 %vm1787_vm1, %v4737_v60  ;;  %v4742_v14 = vld [vmem:[%s4830_s28 + $0x560] ss:$20 sps:$4 sm:$0xff]  }
 0x1c1   : > { %v5310_v29 = vpop.f32.mrb[36].mxu0  ;;  %v5312_v52 = vpop.f32.mrb[80].mxu1 }
 0x1c2   : > { %5905 = vst [vmem:[#allocation13_spill] sm:$0xff] %v5312_v52  ;;  %v2395_v43 = vpop.f32.mrb[37].mxu0  ;;  %v2202_v4 = vpop.f32.mrb[81].mxu1  ;;  %v4743_v52 = vld [vmem:[%s4830_s28 + $0x5d0] ss:$20 sps:$4 sm:$0xff]  }
 0x1c3   : > { %v5316_v51 = vpop.f32.mrb[38].mxu0  ;;  %v5318_v12 = vpop.f32.mrb[82].mxu1 }
 0x1c4   : > { %5906 = vst [vmem:[#allocation14_spill] sm:$0xff] %v5318_v12  ;;  %v2398_v53 = vpop.f32.mrb[39].mxu0  ;;  %v2205_v60 = vpop.f32.mrb[83].mxu1 }
 0x1c5   : > { %v4745_v53 = vld [vmem:[%s4830_s28 + $0x5fc] ss:$20 sps:$4 sm:$0xff]  }
 0x1c6   : > { %2608 = vmatmul.mubr.bf16.gmra.mrb[144].mxu0 %v4738_v40  ;;  %4179 = vmatmul.mubr.msk.bf16.gmra.mrb[188].mxu1 %vm1787_vm1, %v4739_v27  ;;  %v4747_v40 = vld [vmem:[%s4830_s28 + $0x5b0] ss:$20 sps:$4 sm:$0xff]  }
 0x1c7   : > { %2615 = vmatprep.mubr.bf16.mxu0 %v4740_v61  ;;  %4182 = vmatprep.mubr.msk.bf16.mxu1 %vm1787_vm1, %v4742_v14  ;;  %v5339_v14 = vld [vmem:[%s5892_s2] ss:$0 sm:$0xff] }
 0x1c9   : > { %v5324_v13 = vpop.f32.mrb[40].mxu0  ;;  %v5326_v43 = vpop.f32.mrb[84].mxu1 }
 0x1ca   : > { %5907 = vst [vmem:[#allocation15_spill] sm:$0xff] %v5324_v13  ;;  %5908 = vst [vmem:[#allocation16_spill] sm:$0xff] %v5326_v43  ;;  %v2403_v4 = vpop.f32.mrb[41].mxu0  ;;  %v2210_v12 = vpop.f32.mrb[85].mxu1  ;;  %v4748_v43 = vld [vmem:[%s4830_s28 + $0x5f8] ss:$20 sps:$4 sm:$0xff]  }
 0x1cb   : > { %v5330_v19 = vpop.f32.mrb[42].mxu0  ;;  %v5332_v6 = vpop.f32.mrb[86].mxu1  ;;  %v2041_v12 = vadd.f32 %v5339_v14, %v5081_v22 }
 0x1cc   : > { %5909 = vst [vmem:[#allocation17_spill] sm:$0xff] %v5330_v19  ;;  %5910 = vst [vmem:[#allocation18_spill] sm:$0xff] %v5332_v6  ;;  %v2406_v27 = vpop.f32.mrb[43].mxu0  ;;  %v2213_v61 = vpop.f32.mrb[87].mxu1 }
 0x1cd   : > { %v2044_v27 = vadd.f32 %v5339_v14, %v5085_v26  ;;  %v2049_v26 = vadd.f32 %v5339_v14, %v5089_v30 }
 0x1ce   : > { %2616 = vmatmul.mubr.bf16.gmra.mrb[148].mxu0 %v4743_v52  ;;  %4183 = vmatmul.mubr.msk.bf16.gmra.mrb[192].mxu1 %vm1787_vm1, %v4744_v32  ;;  %v4749_v52 = vld [vmem:[%s4830_s28 + $0x5d8] ss:$20 sps:$4 sm:$0xff]  }
 0x1cf   : > { %2623 = vmatprep.mubr.bf16.mxu0 %v4745_v53  ;;  %4186 = vmatprep.mubr.msk.bf16.mxu1 %vm1787_vm1, %v4747_v40  ;;  %v4750_v53 = vld [vmem:[%s4830_s28 + $0x624] ss:$20 sps:$4 sm:$0xff]   ;;  %v4752_v40 = vld [vmem:[%s4830_s28 + $0x600] ss:$20 sps:$4 sm:$0xff]  }
 0x1d1   : > { %v2409_v60 = vpop.f32.mrb[44].mxu0  ;;  %v5345_v4 = vpop.f32.mrb[88].mxu1 }
 0x1d2   : > { %5911 = vst [vmem:[#allocation19_spill] sm:$0xff] %v5345_v4  ;;  %v5349_v61 = vadd.f32 %v2409_v60, %v2041_v12  ;;  %v2411_v6 = vpop.f32.mrb[45].mxu0  ;;  %v2218_v19 = vpop.f32.mrb[89].mxu1  ;;  %v4753_v60 = vld [vmem:[%s4830_s28 + $0x620] ss:$20 sps:$4 sm:$0xff]  }
 0x1d3   : > { %v2412_v59 = vpop.f32.mrb[46].mxu0  ;;  %v5353_v32 = vpop.f32.mrb[90].mxu1 }
 0x1d4   : > { %5912 = vst [vmem:[#allocation20_spill] sm:$0xff] %v5353_v32  ;;  %v5357_v22 = vadd.f32 %v2412_v59, %v2044_v27  ;;  %v2414_v13 = vpop.f32.mrb[47].mxu0  ;;  %v2221_v4 = vpop.f32.mrb[91].mxu1  ;;  %v2052_v59 = vadd.f32 %v5339_v14, %v5093_v34  ;;  %v2057_v34 = vadd.f32 %v5339_v14, %v5097_v38 }
 0x1d6   : > { %2624 = vmatmul.mubr.bf16.gmra.mrb[152].mxu0 %v4748_v43  ;;  %4187 = vmatmul.mubr.msk.bf16.gmra.mrb[196].mxu1 %vm1787_vm1, %v4749_v52  ;;  %v4754_v43 = vld [vmem:[%s4830_s28 + $0x628] ss:$20 sps:$4 sm:$0xff]  }
 0x1d7   : > { %2631 = vmatprep.mubr.bf16.mxu0 %v4750_v53  ;;  %4190 = vmatprep.mubr.msk.bf16.mxu1 %vm1787_vm1, %v4752_v40  ;;  %v4755_v53 = vld [vmem:[%s4830_s28 + $0x64c] ss:$20 sps:$4 sm:$0xff]   ;;  %v4758_v40 = vld [vmem:[%s4830_s28 + $0x650] ss:$20 sps:$4 sm:$0xff]  }
 0x1d9   : > { %v2417_v6 = vpop.f32.mrb[48].mxu0  ;;  %v5363_v19 = vpop.f32.mrb[92].mxu1 }
 0x1da   : > { %5913 = vst [vmem:[#allocation21_spill] sm:$0xff] %v5363_v19  ;;  %v5367_v12 = vadd.f32 %v2417_v6, %v2049_v26  ;;  %v2419_v13 = vpop.f32.mrb[49].mxu0  ;;  %v2226_v4 = vpop.f32.mrb[93].mxu1 }
 0x1db   : > { %v2420_v27 = vpop.f32.mrb[50].mxu0  ;;  %v5371_v52 = vpop.f32.mrb[94].mxu1  ;;  %v2060_v13 = vadd.f32 %v5339_v14, %v5101_v42  ;;  %v4759_v4 = vld [vmem:[%s4830_s28 + $0x678] ss:$20 sps:$4 sm:$0xff]   ;;  %v2065_v42 = vadd.f32 %v5339_v14, %v5105_v46  ;;  %v2073_v46 = vadd.f32 %v5339_v14, %v5114_v54  ;;  %v2081_v54 = vadd.f32 %v5339_v14, %v5124_v62 }
 0x1dc   : > { %5914 = vst [vmem:[#allocation22_spill] sm:$0xff] %v5371_v52  ;;  %v5375_v30 = vadd.f32 %v2420_v27, %v2052_v59  ;;  %v2422_v32 = vpop.f32.mrb[51].mxu0  ;;  %v2229_v19 = vpop.f32.mrb[95].mxu1  ;;  %v2089_v62 = vadd.f32 %v5339_v14, %v5134_v7  ;;  %v2097_v7 = vadd.f32 %v5339_v14, %v5144_v15  ;;  %v2105_v15 = vadd.f32 %v5339_v14, %v5154_v23 }
 0x1dd   : > { %v4757_v19 = vld [vmem:[%s4830_s28 + $0x648] ss:$20 sps:$4 sm:$0xff]   ;;  %v2113_v23 = vadd.f32 %v5339_v14, %v5164_v33 }
 0x1de   : > { %2632 = vmatmul.mubr.bf16.gmra.mrb[156].mxu0 %v4753_v60  ;;  %4191 = vmatmul.mubr.msk.bf16.gmra.mrb[200].mxu1 %vm1787_vm1, %v4754_v43 }
 0x1df   : > { %2639 = vmatprep.mubr.bf16.mxu0 %v4755_v53  ;;  %4194 = vmatprep.mubr.msk.bf16.mxu1 %vm1787_vm1, %v4758_v40  ;;  %v4760_v53 = vld [vmem:[%s4830_s28 + $0x674] ss:$20 sps:$4 sm:$0xff]  }
 0x1e1   : > { %v2425_v26 = vpop.f32.mrb[52].mxu0  ;;  %v5381_v6 = vpop.f32.mrb[96].mxu1 }
 0x1e2   : > { %5915 = vst [vmem:[#allocation23_spill] sm:$0xff] %v5381_v6  ;;  %v5385_v59 = vadd.f32 %v2425_v26, %v2057_v34  ;;  %v2427_v32 = vpop.f32.mrb[53].mxu0  ;;  %v2234_v60 = vpop.f32.mrb[97].mxu1 }
 0x1e3   : > { %v2428_v43 = vpop.f32.mrb[54].mxu0  ;;  %v5389_v27 = vpop.f32.mrb[98].mxu1  ;;  %v2068_v32 = vadd.f32 %v5339_v14, %v5109_v50  ;;  %v2076_v50 = vadd.f32 %v5339_v14, %v5118_v58  ;;  %v2084_v58 = vadd.f32 %v5339_v14, %v5128_v3  ;;  %v2092_v3 = vadd.f32 %v5339_v14, %v5138_v11 }
 0x1e4   : > { %5916 = vst [vmem:[#allocation24_spill] sm:$0xff] %v5389_v27  ;;  %v5392_v40 = vadd.f32 %v2428_v43, %v2060_v13  ;;  %v2430_v38 = vpop.f32.mrb[55].mxu0  ;;  %v2237_v52 = vpop.f32.mrb[99].mxu1  ;;  %v4762_v13 = vld [vmem:[%s4830_s28 + $0x670] ss:$20 sps:$4 sm:$0xff]   ;;  %v2100_v11 = vadd.f32 %v5339_v14, %v5148_v18  ;;  %v2108_v18 = vadd.f32 %v5339_v14, %v5158_v28  ;;  %v4230_v28 = vadd.f32 %v5339_v14, %v5184_v55  ;;  %s3592_s28 = sshll.u32 %s5969_s16, 2 }
 0x1e5   : > { %s5488_s26 = scalar_lea.vmem %s5893_s3, %s3592_s28 }
 0x1e6   : > { %2640 = vmatmul.mubr.bf16.gmra.mrb[160].mxu0 %v4757_v19  ;;  %4195 = vmatmul.mubr.msk.bf16.gmra.mrb[204].mxu1 %vm1787_vm1, %v4759_v4 }
 0x1e7   : > { %2647 = vmatprep.mubr.bf16.mxu0 %v4760_v53 }
 0x1e9   : > { %v2433_v34 = vpop.f32.mrb[56].mxu0  ;;  %v5397_v26 = vpop.f32.mrb[100].mxu1 }
 0x1ea   : > { %5917 = vst [vmem:[#allocation25_spill] sm:$0xff] %v5397_v26  ;;  %v5401_v60 = vadd.f32 %v2433_v34, %v2065_v42  ;;  %v2435_v27 = vpop.f32.mrb[57].mxu0  ;;  %v2242_v43 = vpop.f32.mrb[101].mxu1 }
 0x1eb   : > { %v2436_v38 = vpop.f32.mrb[58].mxu0  ;;  %v5404_v52 = vpop.f32.mrb[102].mxu1 }
 0x1ec   : > { %5918 = vst [vmem:[#allocation26_spill] sm:$0xff] %v5404_v52  ;;  %v5406_v19 = vadd.f32 %v2436_v38, %v2068_v32  ;;  %v2438_v4 = vpop.f32.mrb[59].mxu0  ;;  %v2245_v53 = vpop.f32.mrb[103].mxu1 }
 0x1ee   : > { %2648 = vmatmul.mubr.bf16.gmra.mrb[164].mxu0 %v4762_v13 }
 0x1f1   : > { %v2441_v26 = vpop.f32.mrb[60].mxu0  ;;  %v5410_v6 = vpop.f32.mrb[104].mxu1 }
 0x1f2   : > { %5919 = vst [vmem:[#allocation27_spill] sm:$0xff] %v5410_v6  ;;  %v5414_v27 = vadd.f32 %v2441_v26, %v2073_v46  ;;  %v2443_v42 = vpop.f32.mrb[61].mxu0  ;;  %v2250_v34 = vpop.f32.mrb[105].mxu1 }
 0x1f3   : > { %v2444_v43 = vpop.f32.mrb[62].mxu0  ;;  %v5416_v52 = vpop.f32.mrb[106].mxu1 }
 0x1f4   : > { %5920 = vst [vmem:[#allocation28_spill] sm:$0xff] %v5416_v52  ;;  %v5418_v32 = vadd.f32 %v2444_v43, %v2076_v50  ;;  %v2446_v38 = vpop.f32.mrb[63].mxu0  ;;  %v2253_v13 = vpop.f32.mrb[107].mxu1 }
 0x1f9   : > { %v2449_v4 = vpop.f32.mrb[64].mxu0  ;;  %v5422_v53 = vpop.f32.mrb[108].mxu1 }
 0x1fa   : > { %5921 = vst [vmem:[#allocation29_spill] sm:$0xff] %v5422_v53  ;;  %v5426_v26 = vadd.f32 %v2449_v4, %v2081_v54  ;;  %v2451_v46 = vpop.f32.mrb[65].mxu0  ;;  %v2258_v42 = vpop.f32.mrb[109].mxu1 }
 0x1fb   : > { %v2452_v34 = vpop.f32.mrb[66].mxu0  ;;  %v5428_v6 = vpop.f32.mrb[110].mxu1 }
 0x1fc   : > { %5922 = vst [vmem:[#allocation30_spill] sm:$0xff] %v5428_v6  ;;  %v5430_v50 = vadd.f32 %v2452_v34, %v2084_v58  ;;  %v2454_v43 = vpop.f32.mrb[67].mxu0  ;;  %v2261_v38 = vpop.f32.mrb[111].mxu1 }
 0x201   : > { %v2457_v13 = vpop.f32.mrb[68].mxu0  ;;  %v5434_v52 = vpop.f32.mrb[112].mxu1 }
 0x202   : > { %5923 = vst [vmem:[#allocation31_spill] sm:$0xff] %v5434_v52  ;;  %v5438_v54 = vadd.f32 %v2457_v13, %v2089_v62  ;;  %v2459_v4 = vpop.f32.mrb[69].mxu0  ;;  %v2266_v46 = vpop.f32.mrb[113].mxu1 }
 0x203   : > { %v2460_v42 = vpop.f32.mrb[70].mxu0  ;;  %v5440_v53 = vpop.f32.mrb[114].mxu1 }
 0x204   : > { %5924 = vst [vmem:[#allocation32_spill] sm:$0xff] %v5440_v53  ;;  %v5442_v58 = vadd.f32 %v2460_v42, %v2092_v3  ;;  %v2462_v34 = vpop.f32.mrb[71].mxu0  ;;  %v2269_v43 = vpop.f32.mrb[115].mxu1 }
 0x209   : > { %v2465_v38 = vpop.f32.mrb[72].mxu0  ;;  %v5446_v6 = vpop.f32.mrb[116].mxu1 }
 0x20a   : > { %5925 = vst [vmem:[#allocation33_spill] sm:$0xff] %v5446_v6  ;;  %v5450_v62 = vadd.f32 %v2465_v38, %v2097_v7  ;;  %v2467_v13 = vpop.f32.mrb[73].mxu0  ;;  %v2274_v4 = vpop.f32.mrb[117].mxu1 }
 0x20b   : > { %v2468_v46 = vpop.f32.mrb[74].mxu0  ;;  %v5452_v52 = vpop.f32.mrb[118].mxu1 }
 0x20c   : > { %5926 = vst [vmem:[#allocation34_spill] sm:$0xff] %v5452_v52  ;;  %v5454_v3 = vadd.f32 %v2468_v46, %v2100_v11  ;;  %v2470_v42 = vpop.f32.mrb[75].mxu0  ;;  %v2277_v34 = vpop.f32.mrb[119].mxu1 }
 0x20d   : > { %v4232_v34 = vadd.f32 %v5339_v14, %v5198_v8  ;;  %v4231_v8 = vadd.f32 %v5339_v14, %v5190_v63 }
 0x20e   : > { %5927 = vst [vmem:[#allocation35_spill] sm:$0xff] %v5454_v3 }
 0x211   : > { %v2473_v43 = vpop.f32.mrb[76].mxu0  ;;  %v5458_v53 = vpop.f32.mrb[120].mxu1 }
 0x212   : > { %5928 = vst [vmem:[#allocation36_spill] sm:$0xff] %v5458_v53  ;;  %v5462_v7 = vadd.f32 %v2473_v43, %v2105_v15  ;;  %v2475_v38 = vpop.f32.mrb[77].mxu0  ;;  %v2282_v13 = vpop.f32.mrb[121].mxu1 }
 0x213   : > { %v2476_v4 = vpop.f32.mrb[78].mxu0  ;;  %v5464_v52 = vpop.f32.mrb[122].mxu1  ;;  %v2116_v38 = vadd.f32 %v5339_v14, %v5168_v39 }
 0x214   : > { %5929 = vst [vmem:[#allocation37_spill] sm:$0xff] %v5464_v52  ;;  %v5466_v11 = vadd.f32 %v2476_v4, %v2108_v18  ;;  %v2478_v46 = vpop.f32.mrb[79].mxu0  ;;  %v2285_v42 = vpop.f32.mrb[123].mxu1  ;;  %v4233_v18 = vadd.f32 %v5339_v14, %v5204_v16 }
 0x216   : > { %5930 = vst [vmem:[#allocation38_spill] sm:$0xff] %v5466_v11 }
 0x219   : > { %v2481_v15 = vpop.f32.mrb[80].mxu0  ;;  %v4116_v43 = vpop.f32.mrb[124].mxu1 }
 0x21a   : > { %v5478_v13 = vadd.f32 %v2481_v15, %v2113_v23  ;;  %v2699_v4 = vadd.f32 %v4232_v34, %v4116_v43  ;;  %v2483_v46 = vpop.f32.mrb[81].mxu0  ;;  %v2690_v33 = vpop.f32.mrb[125].mxu1  ;;  %v4236_v43 = vadd.f32 %v5339_v14, %v5226_v45 }
 0x21b   : > { %v2691_v42 = vadd.f32 %v4230_v28, %v2690_v33  ;;  %v2484_v52 = vpop.f32.mrb[82].mxu0  ;;  %v4117_v55 = vpop.f32.mrb[126].mxu1 }
 0x21c   : > { %v3027_v53 = vmax.f32 %v2699_v4, 0.0  ;;  %v5483_v6 = vadd.f32 %v2484_v52, %v2116_v38  ;;  %v2702_v3 = vadd.f32 %v4233_v18, %v4117_v55  ;;  %v2486_v39 = vpop.f32.mrb[83].mxu0  ;;  %v2693_v11 = vpop.f32.mrb[127].mxu1  ;;  %v2121_v52 = vadd.f32 %v5339_v14, %v5174_v44 }
 0x21d   : > { %v3025_v16 = vmax.f32 %v2691_v42, 0.0  ;;  %v2694_v23 = vadd.f32 %v4231_v8, %v2693_v11  ;;  %v4234_v18 = vadd.f32 %v5339_v14, %v5212_v24  ;;  %v2124_v4 = vadd.f32 %v5339_v14, %v5178_v49 }
 0x21e   : > { %v3972_v63 = vpack.c.bf16 %v3027_v53, %v3027_v53  ;;  %v3028_v34 = vmax.f32 %v2702_v3, 0.0  ;;  %v4237_v44 = vadd.f32 %v5339_v14, %v5232_v57  ;;  %v4235_v24 = vadd.f32 %v5339_v14, %v5218_v35 }
 0x21f   : > { %v3970_v28 = vpack.c.bf16 %v3025_v16, %v3025_v16  ;;  %v3026_v15 = vmax.f32 %v2694_v23, 0.0 }
 0x220   : > { %3448 = vst.msk [vmem:[%s5488_s26 + $0x8] sm:$0xf] %vm3445_vm2, %v3972_v63  ;;  %v3973_v38 = vpack.c.bf16 %v3028_v34, %v3028_v34 }
 0x221   : > { %3446 = vst.msk [vmem:[%s5488_s26] sm:$0xf] %vm3445_vm2, %v3970_v28  ;;  %v3971_v11 = vpack.c.bf16 %v3026_v15, %v3026_v15  ;;  %v2489_v53 = vpop.f32.mrb[84].mxu0  ;;  %v4120_v3 = vpop.f32.mrb[128].mxu1 }
 0x222   : > { %3449 = vst.msk [vmem:[%s5488_s26 + $0xc] sm:$0xf] %vm3445_vm2, %v3973_v38  ;;  %v5506_v45 = vadd.f32 %v2489_v53, %v2121_v52  ;;  %v2715_v46 = vadd.f32 %v4236_v43, %v4120_v3  ;;  %v2491_v33 = vpop.f32.mrb[85].mxu0  ;;  %v2706_v8 = vpop.f32.mrb[129].mxu1  ;;  %v2129_v38 = vadd.f32 %v5339_v14, %v5186_v56  ;;  %v4238_v53 = vadd.f32 %v5339_v14, %v5240_v5 }
 0x223   : > { %3447 = vst.msk [vmem:[%s5488_s26 + $0x4] sm:$0xf] %vm3445_vm2, %v3971_v11  ;;  %v2707_v42 = vadd.f32 %v4234_v18, %v2706_v8  ;;  %v2492_v55 = vpop.f32.mrb[86].mxu0  ;;  %v4121_v39 = vpop.f32.mrb[130].mxu1  ;;  %v4240_v18 = vadd.f32 %v5339_v14, %v5254_v31  ;;  %v4241_v56 = vadd.f32 %v5339_v14, %v5260_v48  ;;  %v4239_v5 = vadd.f32 %v5339_v14, %v5246_v17 }
 0x224   : > { %v3031_v49 = vmax.f32 %v2715_v46, 0.0  ;;  %v5512_v16 = vadd.f32 %v2492_v55, %v2124_v4  ;;  %v2718_v57 = vadd.f32 %v4237_v44, %v4121_v39  ;;  %v2494_v23 = vpop.f32.mrb[87].mxu0  ;;  %v2709_v63 = vpop.f32.mrb[131].mxu1  ;;  %v2132_v46 = vadd.f32 %v5339_v14, %v5192_v0 }
 0x225   : > { %v3029_v34 = vmax.f32 %v2707_v42, 0.0  ;;  %v2710_v28 = vadd.f32 %v4235_v24, %v2709_v63 }
 0x226   : > { %v3976_v15 = vpack.c.bf16 %v3031_v49, %v3031_v49  ;;  %v3032_v52 = vmax.f32 %v2718_v57, 0.0 }
 0x227   : > { %v3974_v43 = vpack.c.bf16 %v3029_v34, %v3029_v34  ;;  %v3030_v35 = vmax.f32 %v2710_v28, 0.0 }
 0x228   : > { %3452 = vst.msk [vmem:[%s5488_s26 + $0x18] sm:$0xf] %vm3445_vm2, %v3976_v15  ;;  %v3977_v11 = vpack.c.bf16 %v3032_v52, %v3032_v52 }
 0x229   : > { %3450 = vst.msk [vmem:[%s5488_s26 + $0x10] sm:$0xf] %vm3445_vm2, %v3974_v43  ;;  %v3975_v3 = vpack.c.bf16 %v3030_v35, %v3030_v35  ;;  %v2497_v4 = vpop.f32.mrb[88].mxu0  ;;  %v4124_v44 = vpop.f32.mrb[132].mxu1  ;;  %v2137_v43 = vadd.f32 %v5339_v14, %v5200_v9  ;;  %v4244_v35 = vadd.f32 %v5339_v14, %v5282_v41  ;;  %v4245_v9 = vadd.f32 %v5339_v14, %v5288_v10 }
 0x22a   : > { %3453 = vst.msk [vmem:[%s5488_s26 + $0x1c] sm:$0xf] %vm3445_vm2, %v3977_v11  ;;  %v5530_v31 = vadd.f32 %v2497_v4, %v2129_v38  ;;  %v2731_v33 = vadd.f32 %v4240_v18, %v4124_v44  ;;  %v2499_v8 = vpop.f32.mrb[89].mxu0  ;;  %v2722_v24 = vpop.f32.mrb[133].mxu1  ;;  %v4242_v18 = vadd.f32 %v5339_v14, %v5268_v2  ;;  %v2140_v4 = vadd.f32 %v5339_v14, %v5206_v1 }
 0x22b   : > { %3451 = vst.msk [vmem:[%s5488_s26 + $0x14] sm:$0xf] %vm3445_vm2, %v3975_v3  ;;  %v2723_v42 = vadd.f32 %v4238_v53, %v2722_v24  ;;  %v2500_v55 = vpop.f32.mrb[90].mxu0  ;;  %v4125_v39 = vpop.f32.mrb[134].mxu1  ;;  %v4243_v2 = vadd.f32 %v5339_v14, %v5274_v20 }
 0x22c   : > { %v3035_v0 = vmax.f32 %v2731_v33, 0.0  ;;  %v5536_v49 = vadd.f32 %v2500_v55, %v2132_v46  ;;  %v2734_v48 = vadd.f32 %v4241_v56, %v4125_v39  ;;  %v2502_v57 = vpop.f32.mrb[91].mxu0  ;;  %v2725_v23 = vpop.f32.mrb[135].mxu1 }
 0x22d   : > { %v3033_v63 = vmax.f32 %v2723_v42, 0.0  ;;  %v2726_v34 = vadd.f32 %v4239_v5, %v2725_v23 }
 0x22e   : > { %v3980_v28 = vpack.c.bf16 %v3035_v0, %v3035_v0  ;;  %v3036_v15 = vmax.f32 %v2734_v48, 0.0 }
 0x22f   : > { %v3978_v52 = vpack.c.bf16 %v3033_v63, %v3033_v63  ;;  %v3034_v17 = vmax.f32 %v2726_v34, 0.0  ;;  %v2145_v63 = vadd.f32 %v5339_v14, %v5214_v25  ;;  %v4248_v34 = vadd.f32 %v5339_v14, %v5310_v29 }
 0x230   : > { %3456 = vst.msk [vmem:[%s5488_s26 + $0x28] sm:$0xf] %vm3445_vm2, %v3980_v28  ;;  %v3981_v38 = vpack.c.bf16 %v3036_v15, %v3036_v15  ;;  %v4246_v15 = vadd.f32 %v5339_v14, %v5296_v37  ;;  %v4249_v25 = vadd.f32 %v5339_v14, %v5316_v51  ;;  %v4247_v37 = vadd.f32 %v5339_v14, %v5302_v21 }
 0x231   : > { %3454 = vst.msk [vmem:[%s5488_s26 + $0x20] sm:$0xf] %vm3445_vm2, %v3978_v52  ;;  %v3979_v11 = vpack.c.bf16 %v3034_v17, %v3034_v17  ;;  %v2505_v53 = vpop.f32.mrb[92].mxu0  ;;  %v4128_v3 = vpop.f32.mrb[136].mxu1 }
 0x232   : > { %3457 = vst.msk [vmem:[%s5488_s26 + $0x2c] sm:$0xf] %vm3445_vm2, %v3981_v38  ;;  %v5554_v41 = vadd.f32 %v2505_v53, %v2137_v43  ;;  %v2747_v44 = vadd.f32 %v4244_v35, %v4128_v3  ;;  %v2507_v46 = vpop.f32.mrb[93].mxu0  ;;  %v2738_v56 = vpop.f32.mrb[137].mxu1  ;;  %v2148_v35 = vadd.f32 %v5339_v14, %v5220_v36 }
 0x233   : > { %3455 = vst.msk [vmem:[%s5488_s26 + $0x24] sm:$0xf] %vm3445_vm2, %v3979_v11  ;;  %v2739_v33 = vadd.f32 %v4242_v18, %v2738_v56  ;;  %v2508_v8 = vpop.f32.mrb[94].mxu0  ;;  %v4129_v24 = vpop.f32.mrb[138].mxu1 }
 0x234   : > { %v3039_v1 = vmax.f32 %v2747_v44, 0.0  ;;  %v5560_v5 = vadd.f32 %v2508_v8, %v2140_v4  ;;  %v2750_v10 = vadd.f32 %v4245_v9, %v4129_v24  ;;  %v2510_v42 = vpop.f32.mrb[95].mxu0  ;;  %v2741_v55 = vpop.f32.mrb[139].mxu1 }
 0x235   : > { %v3037_v39 = vmax.f32 %v2739_v33, 0.0  ;;  %v2742_v0 = vadd.f32 %v4243_v2, %v2741_v55  ;;  %v5931_v42 = vld [vmem:[#allocation15_spill] sm:$0xff] }
 0x236   : > { %v3984_v48 = vpack.c.bf16 %v3039_v1, %v3039_v1  ;;  %v3040_v57 = vmax.f32 %v2750_v10, 0.0  ;;  %v2153_v1 = vadd.f32 %v5339_v14, %v5228_v47  ;;  %v4250_v55 = vadd.f32 %v5339_v14, %v5931_v42 }
 0x237   : > { %v3982_v23 = vpack.c.bf16 %v3037_v39, %v3037_v39  ;;  %v3038_v20 = vmax.f32 %v2742_v0, 0.0 }
 0x238   : > { %3460 = vst.msk [vmem:[%s5488_s26 + $0x38] sm:$0xf] %vm3445_vm2, %v3984_v48  ;;  %v3985_v28 = vpack.c.bf16 %v3040_v57, %v3040_v57  ;;  %v5932_v57 = vld [vmem:[#allocation2_spill] sm:$0xff] }
 0x239   : > { %3458 = vst.msk [vmem:[%s5488_s26 + $0x30] sm:$0xf] %vm3445_vm2, %v3982_v23  ;;  %v3983_v52 = vpack.c.bf16 %v3038_v20, %v3038_v20  ;;  %v2513_v17 = vpop.f32.mrb[96].mxu0  ;;  %v4132_v43 = vpop.f32.mrb[140].mxu1  ;;  %v2156_v23 = vadd.f32 %v5339_v14, %v5932_v57 }
 0x23a   : > { %3461 = vst.msk [vmem:[%s5488_s26 + $0x3c] sm:$0xf] %vm3445_vm2, %v3985_v28  ;;  %v5578_v29 = vadd.f32 %v2513_v17, %v2145_v63  ;;  %v2763_v38 = vadd.f32 %v4248_v34, %v4132_v43  ;;  %v2515_v18 = vpop.f32.mrb[97].mxu0  ;;  %v2754_v11 = vpop.f32.mrb[141].mxu1  ;;  %v5933_v28 = vld [vmem:[#allocation17_spill] sm:$0xff] }
 0x23b   : > { %3459 = vst.msk [vmem:[%s5488_s26 + $0x34] sm:$0xf] %vm3445_vm2, %v3983_v52  ;;  %v2755_v53 = vadd.f32 %v4246_v15, %v2754_v11  ;;  %v2516_v3 = vpop.f32.mrb[98].mxu0  ;;  %v4133_v4 = vpop.f32.mrb[142].mxu1  ;;  %v4251_v15 = vadd.f32 %v5339_v14, %v5933_v28 }
 0x23c   : > { %v3043_v36 = vmax.f32 %v2763_v38, 0.0  ;;  %v5584_v9 = vadd.f32 %v2516_v3, %v2148_v35  ;;  %v2766_v51 = vadd.f32 %v4249_v25, %v4133_v4  ;;  %v2518_v44 = vpop.f32.mrb[99].mxu0  ;;  %v2757_v46 = vpop.f32.mrb[143].mxu1 }
 0x23d   : > { %v3041_v56 = vmax.f32 %v2755_v53, 0.0  ;;  %v2758_v2 = vadd.f32 %v4247_v37, %v2757_v46 }
 0x23e   : > { %v3988_v33 = vpack.c.bf16 %v3043_v36, %v3043_v36  ;;  %v3044_v8 = vmax.f32 %v2766_v51, 0.0  ;;  %v5934_v51 = vld [vmem:[#allocation3_spill] sm:$0xff] }
 0x23f   : > { %v3986_v24 = vpack.c.bf16 %v3041_v56, %v3041_v56  ;;  %v3042_v21 = vmax.f32 %v2758_v2, 0.0  ;;  %v2161_v44 = vadd.f32 %v5339_v14, %v5934_v51 }
 0x240   : > { %3464 = vst.msk [vmem:[%s5488_s26 + $0x48] sm:$0xf] %vm3445_vm2, %v3988_v33  ;;  %v3989_v10 = vpack.c.bf16 %v3044_v8, %v3044_v8  ;;  %v5935_v33 = vld [vmem:[#allocation4_spill] sm:$0xff] }
 0x241   : > { %3462 = vst.msk [vmem:[%s5488_s26 + $0x40] sm:$0xf] %vm3445_vm2, %v3986_v24  ;;  %v3987_v39 = vpack.c.bf16 %v3042_v21, %v3042_v21  ;;  %v2521_v0 = vpop.f32.mrb[100].mxu0  ;;  %v4136_v48 = vpop.f32.mrb[144].mxu1  ;;  %v2164_v8 = vadd.f32 %v5339_v14, %v5935_v33 }
 0x242   : > { %3465 = vst.msk [vmem:[%s5488_s26 + $0x4c] sm:$0xf] %vm3445_vm2, %v3989_v10  ;;  %v5598_v20 = vadd.f32 %v2521_v0, %v2153_v1  ;;  %v2779_v47 = vadd.f32 %v4136_v48, %v5349_v61  ;;  %v2523_v63 = vpop.f32.mrb[101].mxu0  ;;  %v2770_v34 = vpop.f32.mrb[145].mxu1 }
 0x243   : > { %3463 = vst.msk [vmem:[%s5488_s26 + $0x44] sm:$0xf] %vm3445_vm2, %v3987_v39  ;;  %v2771_v52 = vadd.f32 %v4250_v55, %v2770_v34  ;;  %v2524_v17 = vpop.f32.mrb[102].mxu0  ;;  %v4137_v43 = vpop.f32.mrb[146].mxu1 }
 0x244   : > { %v3047_v35 = vmax.f32 %v2779_v47, 0.0  ;;  %v5605_v25 = vadd.f32 %v2524_v17, %v2156_v23  ;;  %v2782_v38 = vadd.f32 %v4137_v43, %v5357_v22  ;;  %v2526_v18 = vpop.f32.mrb[103].mxu0  ;;  %v2773_v61 = vpop.f32.mrb[147].mxu1 }
 0x245   : > { %v3045_v11 = vmax.f32 %v2771_v52, 0.0  ;;  %v2774_v37 = vadd.f32 %v4251_v15, %v2773_v61  ;;  %v5937_v18 = vld [vmem:[#allocation6_spill] sm:$0xff] }
 0x246   : > { %v3992_v53 = vpack.c.bf16 %v3047_v35, %v3047_v35  ;;  %v3048_v3 = vmax.f32 %v2782_v38, 0.0  ;;  %v2172_v61 = vadd.f32 %v5339_v14, %v5937_v18 }
 0x247   : > { %v3990_v4 = vpack.c.bf16 %v3045_v11, %v3045_v11  ;;  %v3046_v36 = vmax.f32 %v2774_v37, 0.0 }
 0x248   : > { %3468 = vst.msk [vmem:[%s5488_s26 + $0x58] sm:$0xf] %vm3445_vm2, %v3992_v53  ;;  %v3993_v46 = vpack.c.bf16 %v3048_v3, %v3048_v3 }
 0x249   : > { %3466 = vst.msk [vmem:[%s5488_s26 + $0x50] sm:$0xf] %vm3445_vm2, %v3990_v4  ;;  %v3991_v56 = vpack.c.bf16 %v3046_v36, %v3046_v36  ;;  %v2529_v22 = vpop.f32.mrb[104].mxu0  ;;  %v4140_v2 = vpop.f32.mrb[148].mxu1 }
 0x24a   : > { %3469 = vst.msk [vmem:[%s5488_s26 + $0x5c] sm:$0xf] %vm3445_vm2, %v3993_v46  ;;  %v5618_v24 = vadd.f32 %v2529_v22, %v2161_v44  ;;  %v2795_v21 = vadd.f32 %v4140_v2, %v5385_v59  ;;  %v2531_v1 = vpop.f32.mrb[105].mxu0  ;;  %v2786_v10 = vpop.f32.mrb[149].mxu1 }
 0x24b   : > { %3467 = vst.msk [vmem:[%s5488_s26 + $0x54] sm:$0xf] %vm3445_vm2, %v3991_v56  ;;  %v2787_v42 = vadd.f32 %v2786_v10, %v5367_v12  ;;  %v2532_v55 = vpop.f32.mrb[106].mxu0  ;;  %v4141_v39 = vpop.f32.mrb[150].mxu1  ;;  %v5936_v12 = vld [vmem:[#allocation5_spill] sm:$0xff] }
 0x24c   : > { %v3051_v0 = vmax.f32 %v2795_v21, 0.0  ;;  %v5624_v48 = vadd.f32 %v2532_v55, %v2164_v8  ;;  %v2798_v57 = vadd.f32 %v4141_v39, %v5392_v40  ;;  %v2534_v23 = vpop.f32.mrb[107].mxu0  ;;  %v2789_v47 = vpop.f32.mrb[151].mxu1  ;;  %v2169_v17 = vadd.f32 %v5339_v14, %v5936_v12 }
 0x24d   : > { %v3049_v63 = vmax.f32 %v2787_v42, 0.0  ;;  %v2790_v59 = vadd.f32 %v2789_v47, %v5375_v30 }
 0x24e   : > { %v3996_v34 = vpack.c.bf16 %v3051_v0, %v3051_v0  ;;  %v3052_v28 = vmax.f32 %v2798_v57, 0.0  ;;  %v5939_v0 = vld [vmem:[#allocation8_spill] sm:$0xff] }
 0x24f   : > { %v3994_v15 = vpack.c.bf16 %v3049_v63, %v3049_v63  ;;  %v3050_v52 = vmax.f32 %v2790_v59, 0.0  ;;  %v2180_v57 = vadd.f32 %v5339_v14, %v5939_v0 }
 0x250   : > { %3472 = vst.msk [vmem:[%s5488_s26 + $0x68] sm:$0xf] %vm3445_vm2, %v3996_v34  ;;  %v3997_v43 = vpack.c.bf16 %v3052_v28, %v3052_v28 }
 0x251   : > { %3470 = vst.msk [vmem:[%s5488_s26 + $0x60] sm:$0xf] %vm3445_vm2, %v3994_v15  ;;  %v3995_v40 = vpack.c.bf16 %v3050_v52, %v3050_v52  ;;  %v2537_v35 = vpop.f32.mrb[108].mxu0  ;;  %v4144_v38 = vpop.f32.mrb[152].mxu1 }
 0x252   : > { %3473 = vst.msk [vmem:[%s5488_s26 + $0x6c] sm:$0xf] %vm3445_vm2, %v3997_v43  ;;  %v5638_v30 = vadd.f32 %v2537_v35, %v2169_v17  ;;  %v2811_v11 = vadd.f32 %v4144_v38, %v5414_v27  ;;  %v2539_v37 = vpop.f32.mrb[109].mxu0  ;;  %v2802_v53 = vpop.f32.mrb[153].mxu1 }
 0x253   : > { %3471 = vst.msk [vmem:[%s5488_s26 + $0x64] sm:$0xf] %vm3445_vm2, %v3995_v40  ;;  %v2803_v3 = vadd.f32 %v2802_v53, %v5401_v60  ;;  %v2540_v4 = vpop.f32.mrb[110].mxu0  ;;  %v4145_v36 = vpop.f32.mrb[154].mxu1  ;;  %v5938_v60 = vld [vmem:[#allocation7_spill] sm:$0xff] }
 0x254   : > { %v3055_v51 = vmax.f32 %v2811_v11, 0.0  ;;  %v5644_v44 = vadd.f32 %v2540_v4, %v2172_v61  ;;  %v2814_v46 = vadd.f32 %v4145_v36, %v5418_v32  ;;  %v2542_v56 = vpop.f32.mrb[111].mxu0  ;;  %v2805_v22 = vpop.f32.mrb[155].mxu1  ;;  %v2177_v10 = vadd.f32 %v5339_v14, %v5938_v60  ;;  %v5941_v4 = vld [vmem:[#allocation10_spill] sm:$0xff] }
 0x255   : > { %v3053_v2 = vmax.f32 %v2803_v3, 0.0  ;;  %v2806_v27 = vadd.f32 %v2805_v22, %v5406_v19  ;;  %v2188_v36 = vadd.f32 %v5339_v14, %v5941_v4 }
 0x256   : > { %v4000_v33 = vpack.c.bf16 %v3055_v51, %v3055_v51  ;;  %v3056_v8 = vmax.f32 %v2814_v46, 0.0 }
 0x257   : > { %v3998_v21 = vpack.c.bf16 %v3053_v2, %v3053_v2  ;;  %v3054_v1 = vmax.f32 %v2806_v27, 0.0 }
 0x258   : > { %3476 = vst.msk [vmem:[%s5488_s26 + $0x78] sm:$0xf] %vm3445_vm2, %v4000_v33  ;;  %v4001_v42 = vpack.c.bf16 %v3056_v8, %v3056_v8 }
 0x259   : > { %3474 = vst.msk [vmem:[%s5488_s26 + $0x70] sm:$0xf] %vm3445_vm2, %v3998_v21  ;;  %v3999_v32 = vpack.c.bf16 %v3054_v1, %v3054_v1  ;;  %v2545_v55 = vpop.f32.mrb[112].mxu0  ;;  %v4148_v39 = vpop.f32.mrb[156].mxu1  ;;  %v5942_v21 = vld [vmem:[#allocation38_spill] sm:$0xff] }
 0x25a   : > { %3477 = vst.msk [vmem:[%s5488_s26 + $0x7c] sm:$0xf] %vm3445_vm2, %v4001_v42  ;;  %v5658_v19 = vadd.f32 %v2545_v55, %v2177_v10  ;;  %v2827_v23 = vadd.f32 %v4148_v39, %v5438_v54  ;;  %v2547_v47 = vpop.f32.mrb[113].mxu0  ;;  %v2818_v63 = vpop.f32.mrb[157].mxu1 }
 0x25b   : > { %3475 = vst.msk [vmem:[%s5488_s26 + $0x74] sm:$0xf] %vm3445_vm2, %v3999_v32  ;;  %v2819_v59 = vadd.f32 %v2818_v63, %v5426_v26  ;;  %v2548_v34 = vpop.f32.mrb[114].mxu0  ;;  %v4149_v28 = vpop.f32.mrb[158].mxu1  ;;  %v5940_v26 = vld [vmem:[#allocation9_spill] sm:$0xff] }
 0x25c   : > { %v3059_v15 = vmax.f32 %v2827_v23, 0.0  ;;  %v5664_v52 = vadd.f32 %v2548_v34, %v2180_v57  ;;  %v2830_v12 = vadd.f32 %v4149_v28, %v5442_v58  ;;  %v2550_v17 = vpop.f32.mrb[115].mxu0  ;;  %v2821_v43 = vpop.f32.mrb[159].mxu1  ;;  %v2185_v11 = vadd.f32 %v5339_v14, %v5940_v26  ;;  %v5945_v28 = vld [vmem:[#allocation12_spill] sm:$0xff] }
 0x25d   : > { %v3057_v40 = vmax.f32 %v2819_v59, 0.0  ;;  %v2822_v54 = vadd.f32 %v2821_v43, %v5430_v50 }
 0x25e   : > { %v4004_v35 = vpack.c.bf16 %v3059_v15, %v3059_v15  ;;  %v3060_v38 = vmax.f32 %v2830_v12, 0.0  ;;  %v2196_v15 = vadd.f32 %v5339_v14, %v5945_v28 }
 0x25f   : > { %v4002_v18 = vpack.c.bf16 %v3057_v40, %v3057_v40  ;;  %v3058_v61 = vmax.f32 %v2822_v54, 0.0 }
 0x260   : > { %3480 = vst.msk [vmem:[%s5488_s26 + $0x88] sm:$0xf] %vm3445_vm2, %v4004_v35  ;;  %v4005_v37 = vpack.c.bf16 %v3060_v38, %v3060_v38 }
 0x261   : > { %3478 = vst.msk [vmem:[%s5488_s26 + $0x80] sm:$0xf] %vm3445_vm2, %v4002_v18  ;;  %v4003_v58 = vpack.c.bf16 %v3058_v61, %v3058_v61  ;;  %v2553_v53 = vpop.f32.mrb[116].mxu0  ;;  %v4152_v3 = vpop.f32.mrb[160].mxu1 }
 0x262   : > { %3481 = vst.msk [vmem:[%s5488_s26 + $0x8c] sm:$0xf] %vm3445_vm2, %v4005_v37  ;;  %v5678_v50 = vadd.f32 %v2553_v53, %v2185_v11  ;;  %v2843_v51 = vadd.f32 %v4152_v3, %v5462_v7  ;;  %v2555_v46 = vpop.f32.mrb[117].mxu0  ;;  %v2834_v56 = vpop.f32.mrb[161].mxu1  ;;  %v5943_v7 = vld [vmem:[#allocation35_spill] sm:$0xff] }
 0x263   : > { %3479 = vst.msk [vmem:[%s5488_s26 + $0x84] sm:$0xf] %vm3445_vm2, %v4003_v58  ;;  %v2835_v22 = vadd.f32 %v2834_v56, %v5450_v62  ;;  %v2556_v2 = vpop.f32.mrb[118].mxu0  ;;  %v4153_v27 = vpop.f32.mrb[162].mxu1  ;;  %v5944_v62 = vld [vmem:[#allocation11_spill] sm:$0xff] }
 0x264   : > { %v3063_v33 = vmax.f32 %v2843_v51, 0.0  ;;  %v5684_v8 = vadd.f32 %v2556_v2, %v2188_v36  ;;  %v2846_v1 = vadd.f32 %v4153_v27, %v5942_v21  ;;  %v2558_v60 = vpop.f32.mrb[119].mxu0  ;;  %v2837_v10 = vpop.f32.mrb[163].mxu1  ;;  %v2193_v23 = vadd.f32 %v5339_v14, %v5944_v62  ;;  %v5947_v2 = vld [vmem:[#allocation14_spill] sm:$0xff] }
 0x265   : > { %v3061_v42 = vmax.f32 %v2835_v22, 0.0  ;;  %v2838_v32 = vadd.f32 %v2837_v10, %v5943_v7  ;;  %v2204_v27 = vadd.f32 %v5339_v14, %v5947_v2 }
 0x266   : > { %v4008_v55 = vpack.c.bf16 %v3063_v33, %v3063_v33  ;;  %v3064_v39 = vmax.f32 %v2846_v1, 0.0 }
 0x267   : > { %v4006_v0 = vpack.c.bf16 %v3061_v42, %v3061_v42  ;;  %v3062_v57 = vmax.f32 %v2838_v32, 0.0 }
 0x268   : > { %3484 = vst.msk [vmem:[%s5488_s26 + $0x98] sm:$0xf] %vm3445_vm2, %v4008_v55  ;;  %v4009_v47 = vpack.c.bf16 %v3064_v39, %v3064_v39 }
 0x269   : > { %3482 = vst.msk [vmem:[%s5488_s26 + $0x90] sm:$0xf] %vm3445_vm2, %v4006_v0  ;;  %v4007_v63 = vpack.c.bf16 %v3062_v57, %v3062_v57  ;;  %v2561_v59 = vpop.f32.mrb[120].mxu0  ;;  %v4156_v34 = vpop.f32.mrb[164].mxu1 }
 0x26a   : > { %3485 = vst.msk [vmem:[%s5488_s26 + $0x9c] sm:$0xf] %vm3445_vm2, %v4009_v47  ;;  %v5698_v12 = vadd.f32 %v2561_v59, %v2193_v23  ;;  %v2859_v17 = vadd.f32 %v4156_v34, %v5506_v45  ;;  %v2563_v43 = vpop.f32.mrb[121].mxu0  ;;  %v2850_v40 = vpop.f32.mrb[165].mxu1 }
 0x26b   : > { %3483 = vst.msk [vmem:[%s5488_s26 + $0x94] sm:$0xf] %vm3445_vm2, %v4007_v63  ;;  %v2851_v54 = vadd.f32 %v2850_v40, %v5478_v13  ;;  %v2564_v35 = vpop.f32.mrb[122].mxu0  ;;  %v4157_v38 = vpop.f32.mrb[166].mxu1  ;;  %v5946_v13 = vld [vmem:[#allocation13_spill] sm:$0xff] }
 0x26c   : > { %v3067_v18 = vmax.f32 %v2859_v17, 0.0  ;;  %v5704_v61 = vadd.f32 %v2564_v35, %v2196_v15  ;;  %v2862_v26 = vadd.f32 %v4157_v38, %v5512_v16  ;;  %v2566_v11 = vpop.f32.mrb[123].mxu0  ;;  %v2853_v37 = vpop.f32.mrb[167].mxu1  ;;  %v2201_v51 = vadd.f32 %v5339_v14, %v5946_v13  ;;  %v5949_v17 = vld [vmem:[#allocation18_spill] sm:$0xff] }
 0x26d   : > { %v3065_v58 = vmax.f32 %v2851_v54, 0.0  ;;  %v2854_v45 = vadd.f32 %v2853_v37, %v5483_v6  ;;  %v2212_v43 = vadd.f32 %v5339_v14, %v5949_v17  ;;  %v5751_v13 = vld [vmem:[%s5892_s2] ss:$0 sm:$0xff] }
 0x26e   : > { %v4012_v53 = vpack.c.bf16 %v3067_v18, %v3067_v18  ;;  %v3068_v3 = vmax.f32 %v2862_v26, 0.0 }
 0x26f   : > { %v4010_v4 = vpack.c.bf16 %v3065_v58, %v3065_v58  ;;  %v3066_v36 = vmax.f32 %v2854_v45, 0.0 }
 0x270   : > { %3488 = vst.msk [vmem:[%s5488_s26 + $0xa8] sm:$0xf] %vm3445_vm2, %v4012_v53  ;;  %v4013_v46 = vpack.c.bf16 %v3068_v3, %v3068_v3 }
 0x271   : > { %3486 = vst.msk [vmem:[%s5488_s26 + $0xa0] sm:$0xf] %vm3445_vm2, %v4010_v4  ;;  %v4011_v16 = vpack.c.bf16 %v3066_v36, %v3066_v36  ;;  %v2569_v56 = vpop.f32.mrb[124].mxu0  ;;  %v4160_v22 = vpop.f32.mrb[168].mxu1 }
 0x272   : > { %3489 = vst.msk [vmem:[%s5488_s26 + $0xac] sm:$0xf] %vm3445_vm2, %v4013_v46  ;;  %v5718_v6 = vadd.f32 %v2569_v56, %v2201_v51  ;;  %v2875_v33 = vadd.f32 %v4160_v22, %v5554_v41  ;;  %v2571_v21 = vpop.f32.mrb[125].mxu0  ;;  %v2866_v1 = vpop.f32.mrb[169].mxu1  ;;  %v5950_v51 = vld [vmem:[#allocation19_spill] sm:$0xff]  ;;  %v5951_v22 = vld [vmem:[#allocation20_spill] sm:$0xff] }
 0x273   : > { %3487 = vst.msk [vmem:[%s5488_s26 + $0xa4] sm:$0xf] %vm3445_vm2, %v4011_v16  ;;  %v2867_v60 = vadd.f32 %v2866_v1, %v5530_v31  ;;  %v2572_v10 = vpop.f32.mrb[126].mxu0  ;;  %v4161_v42 = vpop.f32.mrb[170].mxu1  ;;  %v5948_v31 = vld [vmem:[#allocation16_spill] sm:$0xff]  ;;  %v2217_v46 = vadd.f32 %v5751_v13, %v5950_v51  ;;  %v2220_v2 = vadd.f32 %v5751_v13, %v5951_v22 }
 0x274   : > { %v3071_v7 = vmax.f32 %v2875_v33, 0.0  ;;  %v5724_v32 = vadd.f32 %v2572_v10, %v2204_v27  ;;  %v2878_v55 = vadd.f32 %v4161_v42, %v5560_v5  ;;  %v2574_v39 = vpop.f32.mrb[127].mxu0  ;;  %v2869_v0 = vpop.f32.mrb[171].mxu1  ;;  %v2209_v59 = vadd.f32 %v5339_v14, %v5948_v31 }
 0x275   : > { %v3069_v57 = vmax.f32 %v2867_v60, 0.0  ;;  %v2870_v41 = vadd.f32 %v2869_v0, %v5536_v49 }
 0x276   : > { %v4016_v62 = vpack.c.bf16 %v3071_v7, %v3071_v7  ;;  %v3072_v23 = vmax.f32 %v2878_v55, 0.0 }
 0x277   : > { %v4014_v47 = vpack.c.bf16 %v3069_v57, %v3069_v57  ;;  %v3070_v63 = vmax.f32 %v2870_v41, 0.0 }
 0x278   : > { %3492 = vst.msk [vmem:[%s5488_s26 + $0xb8] sm:$0xf] %vm3445_vm2, %v4016_v62  ;;  %v4017_v34 = vpack.c.bf16 %v3072_v23, %v3072_v23 }
 0x279   : > { %3490 = vst.msk [vmem:[%s5488_s26 + $0xb0] sm:$0xf] %vm3445_vm2, %v4014_v47  ;;  %v4015_v5 = vpack.c.bf16 %v3070_v63, %v3070_v63  ;;  %v2577_v28 = vpop.f32.mrb[128].mxu0  ;;  %v4164_v15 = vpop.f32.mrb[172].mxu1 }
 0x27a   : > { %3493 = vst.msk [vmem:[%s5488_s26 + $0xbc] sm:$0xf] %vm3445_vm2, %v4017_v34  ;;  %v5738_v49 = vadd.f32 %v2577_v28, %v2209_v59  ;;  %v2891_v40 = vadd.f32 %v4164_v15, %v5598_v20  ;;  %v2579_v54 = vpop.f32.mrb[129].mxu0  ;;  %v2882_v35 = vpop.f32.mrb[173].mxu1  ;;  %v5953_v28 = vld [vmem:[#allocation22_spill] sm:$0xff] }
 0x27b   : > { %3491 = vst.msk [vmem:[%s5488_s26 + $0xb4] sm:$0xf] %vm3445_vm2, %v4015_v5  ;;  %v2883_v38 = vadd.f32 %v2882_v35, %v5578_v29  ;;  %v2580_v18 = vpop.f32.mrb[130].mxu0  ;;  %v4165_v26 = vpop.f32.mrb[174].mxu1  ;;  %v2228_v15 = vadd.f32 %v5751_v13, %v5953_v28 }
 0x27c   : > { %v3075_v11 = vmax.f32 %v2891_v40, 0.0  ;;  %v5744_v37 = vadd.f32 %v2580_v18, %v2212_v43  ;;  %v2894_v14 = vadd.f32 %v4165_v26, %v5605_v25  ;;  %v2582_v58 = vpop.f32.mrb[131].mxu0  ;;  %v2885_v45 = vpop.f32.mrb[175].mxu1 }
 0x27d   : > { %v3073_v53 = vmax.f32 %v2883_v38, 0.0  ;;  %v2886_v20 = vadd.f32 %v2885_v45, %v5584_v9 }
 0x27e   : > { %v4020_v3 = vpack.c.bf16 %v3075_v11, %v3075_v11  ;;  %v3076_v4 = vmax.f32 %v2894_v14, 0.0 }
 0x27f   : > { %v4018_v36 = vpack.c.bf16 %v3073_v53, %v3073_v53  ;;  %v3074_v29 = vmax.f32 %v2886_v20, 0.0 }
 0x280   : > { %3496 = vst.msk [vmem:[%s5488_s26 + $0xc8] sm:$0xf] %vm3445_vm2, %v4020_v3  ;;  %v4021_v25 = vpack.c.bf16 %v3076_v4, %v3076_v4 }
 0x281   : > { %3494 = vst.msk [vmem:[%s5488_s26 + $0xc0] sm:$0xf] %vm3445_vm2, %v4018_v36  ;;  %v4019_v16 = vpack.c.bf16 %v3074_v29, %v3074_v29  ;;  %v2585_v9 = vpop.f32.mrb[132].mxu0  ;;  %v4168_v56 = vpop.f32.mrb[176].mxu1 }
 0x282   : > { %3497 = vst.msk [vmem:[%s5488_s26 + $0xcc] sm:$0xf] %vm3445_vm2, %v4021_v25  ;;  %v5763_v27 = vadd.f32 %v2585_v9, %v2217_v46  ;;  %v2907_v33 = vadd.f32 %v4168_v56, %v5638_v30  ;;  %v2587_v21 = vpop.f32.mrb[133].mxu0  ;;  %v2898_v1 = vpop.f32.mrb[177].mxu1  ;;  %v5955_v25 = vld [vmem:[#allocation24_spill] sm:$0xff] }
 0x283   : > { %3495 = vst.msk [vmem:[%s5488_s26 + $0xc4] sm:$0xf] %vm3445_vm2, %v4019_v16  ;;  %v2899_v60 = vadd.f32 %v2898_v1, %v5618_v24  ;;  %v2588_v10 = vpop.f32.mrb[134].mxu0  ;;  %v4169_v42 = vpop.f32.mrb[178].mxu1  ;;  %v5952_v24 = vld [vmem:[#allocation21_spill] sm:$0xff]  ;;  %v2236_v16 = vadd.f32 %v5751_v13, %v5955_v25 }
 0x284   : > { %v3079_v7 = vmax.f32 %v2907_v33, 0.0  ;;  %v5769_v55 = vadd.f32 %v2588_v10, %v2220_v2  ;;  %v2910_v39 = vadd.f32 %v4169_v42, %v5644_v44  ;;  %v2590_v0 = vpop.f32.mrb[135].mxu0  ;;  %v2901_v57 = vpop.f32.mrb[179].mxu1  ;;  %v2225_v31 = vadd.f32 %v5751_v13, %v5952_v24  ;;  %v5957_v24 = vld [vmem:[#allocation26_spill] sm:$0xff] }
 0x285   : > { %v3077_v41 = vmax.f32 %v2899_v60, 0.0  ;;  %v2902_v30 = vadd.f32 %v2901_v57, %v5624_v48 }
 0x286   : > { %v4024_v62 = vpack.c.bf16 %v3079_v7, %v3079_v7  ;;  %v3080_v23 = vmax.f32 %v2910_v39, 0.0 }
 0x287   : > { %v4022_v47 = vpack.c.bf16 %v3077_v41, %v3077_v41  ;;  %v3078_v63 = vmax.f32 %v2902_v30, 0.0 }
 0x288   : > { %3500 = vst.msk [vmem:[%s5488_s26 + $0xd8] sm:$0xf] %vm3445_vm2, %v4024_v62  ;;  %v4025_v59 = vpack.c.bf16 %v3080_v23, %v3080_v23  ;;  %v5956_v62 = vld [vmem:[#allocation25_spill] sm:$0xff] }
 0x289   : > { %3498 = vst.msk [vmem:[%s5488_s26 + $0xd0] sm:$0xf] %vm3445_vm2, %v4022_v47  ;;  %v4023_v44 = vpack.c.bf16 %v3078_v63, %v3078_v63  ;;  %v2593_v34 = vpop.f32.mrb[136].mxu0  ;;  %v4172_v5 = vpop.f32.mrb[180].mxu1 }
 0x28a   : > { %3501 = vst.msk [vmem:[%s5488_s26 + $0xdc] sm:$0xf] %vm3445_vm2, %v4025_v59  ;;  %v5783_v48 = vadd.f32 %v2593_v34, %v2225_v31  ;;  %v2923_v17 = vadd.f32 %v4172_v5, %v5678_v50  ;;  %v2595_v43 = vpop.f32.mrb[137].mxu0  ;;  %v2914_v40 = vpop.f32.mrb[181].mxu1  ;;  %v2244_v31 = vadd.f32 %v5751_v13, %v5957_v24 }
 0x28b   : > { %3499 = vst.msk [vmem:[%s5488_s26 + $0xd4] sm:$0xf] %vm3445_vm2, %v4023_v44  ;;  %v2915_v54 = vadd.f32 %v2914_v40, %v5658_v19  ;;  %v2596_v35 = vpop.f32.mrb[138].mxu0  ;;  %v4173_v38 = vpop.f32.mrb[182].mxu1  ;;  %v5954_v19 = vld [vmem:[#allocation23_spill] sm:$0xff] }
 0x28c   : > { %v3083_v18 = vmax.f32 %v2923_v17, 0.0  ;;  %v5789_v26 = vadd.f32 %v2596_v35, %v2228_v15  ;;  %v2926_v11 = vadd.f32 %v4173_v38, %v5684_v8  ;;  %v2598_v14 = vpop.f32.mrb[139].mxu0  ;;  %v2917_v58 = vpop.f32.mrb[183].mxu1  ;;  %v2233_v36 = vadd.f32 %v5751_v13, %v5954_v19 }
 0x28d   : > { %v3081_v45 = vmax.f32 %v2915_v54, 0.0  ;;  %v2918_v50 = vadd.f32 %v2917_v58, %v5664_v52 }
 0x28e   : > { %v4028_v53 = vpack.c.bf16 %v3083_v18, %v3083_v18  ;;  %v3084_v20 = vmax.f32 %v2926_v11, 0.0 }
 0x28f   : > { %v4026_v3 = vpack.c.bf16 %v3081_v45, %v3081_v45  ;;  %v3082_v4 = vmax.f32 %v2918_v50, 0.0  ;;  %v5958_v45 = vld [vmem:[#allocation27_spill] sm:$0xff] }
 0x290   : > { %3504 = vst.msk [vmem:[%s5488_s26 + $0xe8] sm:$0xf] %vm3445_vm2, %v4028_v53  ;;  %v4029_v29 = vpack.c.bf16 %v3084_v20, %v3084_v20 }
 0x291   : > { %3502 = vst.msk [vmem:[%s5488_s26 + $0xe0] sm:$0xf] %vm3445_vm2, %v4026_v3  ;;  %v4027_v8 = vpack.c.bf16 %v3082_v4, %v3082_v4  ;;  %v2601_v51 = vpop.f32.mrb[140].mxu0  ;;  %v4176_v46 = vpop.f32.mrb[184].mxu1  ;;  %v5959_v3 = vld [vmem:[#allocation28_spill] sm:$0xff] }
 0x292   : > { %3505 = vst.msk [vmem:[%s5488_s26 + $0xec] sm:$0xf] %vm3445_vm2, %v4029_v29  ;;  %v2602_v52 = vadd.f32 %v2601_v51, %v2233_v36  ;;  %v2939_v9 = vadd.f32 %v4176_v46, %v5718_v6  ;;  %v2603_v56 = vpop.f32.mrb[141].mxu0  ;;  %v2930_v22 = vpop.f32.mrb[185].mxu1  ;;  %v2252_v4 = vadd.f32 %v5751_v13, %v5959_v3 }
 0x293   : > { %3503 = vst.msk [vmem:[%s5488_s26 + $0xe4] sm:$0xf] %vm3445_vm2, %v4027_v8  ;;  %v2931_v2 = vadd.f32 %v2930_v22, %v5698_v12  ;;  %v2604_v33 = vpop.f32.mrb[142].mxu0  ;;  %v4177_v21 = vpop.f32.mrb[186].mxu1  ;;  %v2241_v12 = vadd.f32 %v5751_v13, %v5956_v62 }
 0x294   : > { %v3087_v1 = vmax.f32 %v2939_v9, 0.0  ;;  %v2605_v60 = vadd.f32 %v2604_v33, %v2236_v16  ;;  %v2942_v10 = vadd.f32 %v4177_v21, %v5724_v32  ;;  %v2606_v42 = vpop.f32.mrb[143].mxu0  ;;  %v2933_v7 = vpop.f32.mrb[187].mxu1 }
 0x295   : > { %v3085_v39 = vmax.f32 %v2931_v2, 0.0  ;;  %v2934_v6 = vadd.f32 %v2933_v7, %v5704_v61  ;;  %v5960_v42 = vld [vmem:[#allocation29_spill] sm:$0xff] }
 0x296   : > { %v4032_v0 = vpack.c.bf16 %v3087_v1, %v3087_v1  ;;  %v3088_v57 = vmax.f32 %v2942_v10, 0.0 }
 0x297   : > { %v4030_v41 = vpack.c.bf16 %v3085_v39, %v3085_v39  ;;  %v3086_v30 = vmax.f32 %v2934_v6, 0.0 }
 0x298   : > { %3508 = vst.msk [vmem:[%s5488_s26 + $0xf8] sm:$0xf] %vm3445_vm2, %v4032_v0  ;;  %v4033_v23 = vpack.c.bf16 %v3088_v57, %v3088_v57  ;;  %v5961_v0 = vld [vmem:[#allocation30_spill] sm:$0xff] }
 0x299   : > { %3506 = vst.msk [vmem:[%s5488_s26 + $0xf0] sm:$0xf] %vm3445_vm2, %v4030_v41  ;;  %v4031_v32 = vpack.c.bf16 %v3086_v30, %v3086_v30  ;;  %v2609_v47 = vpop.f32.mrb[144].mxu0  ;;  %v4180_v63 = vpop.f32.mrb[188].mxu1  ;;  %v2260_v57 = vadd.f32 %v5751_v13, %v5961_v0 }
 0x29a   : > { %3509 = vst.msk [vmem:[%s5488_s26 + $0xfc] sm:$0xf] %vm3445_vm2, %v4033_v23  ;;  %v2610_v61 = vadd.f32 %v2609_v47, %v2241_v12  ;;  %v2955_v59 = vadd.f32 %v4180_v63, %v5763_v27  ;;  %v2611_v44 = vpop.f32.mrb[145].mxu0  ;;  %v2946_v34 = vpop.f32.mrb[189].mxu1 }
 0x29b   : > { %3507 = vst.msk [vmem:[%s5488_s26 + $0xf4] sm:$0xf] %vm3445_vm2, %v4031_v32  ;;  %v2947_v5 = vadd.f32 %v2946_v34, %v5738_v49  ;;  %v2612_v28 = vpop.f32.mrb[146].mxu0  ;;  %v4181_v15 = vpop.f32.mrb[190].mxu1  ;;  %v2249_v49 = vadd.f32 %v5751_v13, %v5958_v45 }
 0x29c   : > { %v3091_v17 = vmax.f32 %v2955_v59, 0.0  ;;  %v2613_v43 = vadd.f32 %v2612_v28, %v2244_v31  ;;  %v2958_v40 = vadd.f32 %v4181_v15, %v5769_v55  ;;  %v2614_v54 = vpop.f32.mrb[147].mxu0  ;;  %v2949_v35 = vpop.f32.mrb[191].mxu1 }
 0x29d   : > { %v3089_v38 = vmax.f32 %v2947_v5, 0.0  ;;  %v2950_v27 = vadd.f32 %v2949_v35, %v5744_v37 }
 0x29e   : > { %v4036_v18 = vpack.c.bf16 %v3091_v17, %v3091_v17  ;;  %v3092_v11 = vmax.f32 %v2958_v40, 0.0  ;;  %v5962_v40 = vld [vmem:[#allocation31_spill] sm:$0xff] }
 0x29f   : > { %v4034_v14 = vpack.c.bf16 %v3089_v38, %v3089_v38  ;;  %v3090_v58 = vmax.f32 %v2950_v27, 0.0  ;;  %v2265_v54 = vadd.f32 %v5751_v13, %v5962_v40 }
 0x2a0   : > { %3512 = vst.msk [vmem:[%s5488_s26 + $0x108] sm:$0xf] %vm3445_vm2, %v4036_v18  ;;  %v4037_v50 = vpack.c.bf16 %v3092_v11, %v3092_v11  ;;  %v5963_v18 = vld [vmem:[#allocation32_spill] sm:$0xff] }
 0x2a1   : > { %3510 = vst.msk [vmem:[%s5488_s26 + $0x100] sm:$0xf] %vm3445_vm2, %v4034_v14  ;;  %v4035_v55 = vpack.c.bf16 %v3090_v58, %v3090_v58  ;;  %v2617_v53 = vpop.f32.mrb[148].mxu0  ;;  %v4184_v20 = vpop.f32.mrb[192].mxu1  ;;  %v2268_v11 = vadd.f32 %v5751_v13, %v5963_v18 }
 0x2a2   : > { %3513 = vst.msk [vmem:[%s5488_s26 + $0x10c] sm:$0xf] %vm3445_vm2, %v4037_v50  ;;  %v2618_v37 = vadd.f32 %v2617_v53, %v2249_v49  ;;  %v2971_v19 = vadd.f32 %v4184_v20, %v2602_v52  ;;  %v2619_v36 = vpop.f32.mrb[149].mxu0  ;;  %v2962_v29 = vpop.f32.mrb[193].mxu1 }
 0x2a3   : > { %3511 = vst.msk [vmem:[%s5488_s26 + $0x104] sm:$0xf] %vm3445_vm2, %v4035_v55  ;;  %v2963_v8 = vadd.f32 %v2962_v29, %v5783_v48  ;;  %v2620_v51 = vpop.f32.mrb[150].mxu0  ;;  %v4185_v46 = vpop.f32.mrb[194].mxu1  ;;  %v2257_v48 = vadd.f32 %v5751_v13, %v5960_v42 }
 0x2a4   : > { %v3095_v25 = vmax.f32 %v2971_v19, 0.0  ;;  %v2621_v16 = vadd.f32 %v2620_v51, %v2252_v4  ;;  %v2974_v9 = vadd.f32 %v4185_v46, %v2605_v60  ;;  %v2622_v56 = vpop.f32.mrb[151].mxu0  ;;  %v2965_v22 = vpop.f32.mrb[195].mxu1  ;;  %v5964_v51 = vld [vmem:[#allocation33_spill] sm:$0xff] }
 0x2a5   : > { %v3093_v2 = vmax.f32 %v2963_v8, 0.0  ;;  %v2966_v33 = vadd.f32 %v2965_v22, %v5789_v26  ;;  %v2273_v46 = vadd.f32 %v5751_v13, %v5964_v51 }
 0x2a6   : > { %v4040_v52 = vpack.c.bf16 %v3095_v25, %v3095_v25  ;;  %v3096_v21 = vmax.f32 %v2974_v9, 0.0 }
 0x2a7   : > { %v4038_v1 = vpack.c.bf16 %v3093_v2, %v3093_v2  ;;  %v3094_v10 = vmax.f32 %v2966_v33, 0.0  ;;  %v5965_v2 = vld [vmem:[#allocation34_spill] sm:$0xff] }
 0x2a8   : > { %3516 = vst.msk [vmem:[%s5488_s26 + $0x118] sm:$0xf] %vm3445_vm2, %v4040_v52  ;;  %v4041_v7 = vpack.c.bf16 %v3096_v21, %v3096_v21  ;;  %v2276_v33 = vadd.f32 %v5751_v13, %v5965_v2 }
 0x2a9   : > { %3514 = vst.msk [vmem:[%s5488_s26 + $0x110] sm:$0xf] %vm3445_vm2, %v4038_v1  ;;  %v4039_v60 = vpack.c.bf16 %v3094_v10, %v3094_v10  ;;  %v2625_v39 = vpop.f32.mrb[152].mxu0  ;;  %v4188_v6 = vpop.f32.mrb[196].mxu1 }
 0x2aa   : > { %3517 = vst.msk [vmem:[%s5488_s26 + $0x11c] sm:$0xf] %vm3445_vm2, %v4041_v7  ;;  %v2626_v26 = vadd.f32 %v2625_v39, %v2257_v48  ;;  %v2987_v41 = vadd.f32 %v4188_v6, %v2618_v37  ;;  %v2627_v30 = vpop.f32.mrb[153].mxu0  ;;  %v2978_v62 = vpop.f32.mrb[197].mxu1 }
 0x2ab   : > { %3515 = vst.msk [vmem:[%s5488_s26 + $0x114] sm:$0xf] %vm3445_vm2, %v4039_v60  ;;  %v2979_v12 = vadd.f32 %v2978_v62, %v2610_v61  ;;  %v2628_v23 = vpop.f32.mrb[154].mxu0  ;;  %v4189_v32 = vpop.f32.mrb[198].mxu1 }
 0x2ac   : > { %v3099_v47 = vmax.f32 %v2987_v41, 0.0  ;;  %v2629_v63 = vadd.f32 %v2628_v23, %v2260_v57  ;;  %v2990_v24 = vadd.f32 %v4189_v32, %v2621_v16  ;;  %v2630_v31 = vpop.f32.mrb[155].mxu0  ;;  %v2981_v59 = vpop.f32.mrb[199].mxu1  ;;  %v5967_v23 = vld [vmem:[#allocation37_spill] sm:$0xff] }
 0x2ad   : > { %v3097_v44 = vmax.f32 %v2979_v12, 0.0  ;;  %v2982_v34 = vadd.f32 %v2981_v59, %v2613_v43  ;;  %v2284_v32 = vadd.f32 %v5751_v13, %v5967_v23 }
 0x2ae   : > { %v4044_v5 = vpack.c.bf16 %v3099_v47, %v3099_v47  ;;  %v3100_v28 = vmax.f32 %v2990_v24, 0.0 }
 0x2af   : > { %v4042_v15 = vpack.c.bf16 %v3097_v44, %v3097_v44  ;;  %v3098_v17 = vmax.f32 %v2982_v34, 0.0 }
 0x2b0   : > { %3520 = vst.msk [vmem:[%s5488_s26 + $0x128] sm:$0xf] %vm3445_vm2, %v4044_v5  ;;  %v4045_v61 = vpack.c.bf16 %v3100_v28, %v3100_v28 }
 0x2b1   : > { %3518 = vst.msk [vmem:[%s5488_s26 + $0x120] sm:$0xf] %vm3445_vm2, %v4042_v15  ;;  %v4043_v35 = vpack.c.bf16 %v3098_v17, %v3098_v17  ;;  %v2633_v38 = vpop.f32.mrb[156].mxu0  ;;  %v4192_v27 = vpop.f32.mrb[200].mxu1 }
 0x2b2   : > { %3521 = vst.msk [vmem:[%s5488_s26 + $0x12c] sm:$0xf] %vm3445_vm2, %v4045_v61  ;;  %v2634_v43 = vadd.f32 %v2633_v38, %v2265_v54  ;;  %v2635_v14 = vpop.f32.mrb[157].mxu0  ;;  %v2994_v58 = vpop.f32.mrb[201].mxu1 }
 0x2b3   : > { %3519 = vst.msk [vmem:[%s5488_s26 + $0x124] sm:$0xf] %vm3445_vm2, %v4043_v35  ;;  %v2995_v45 = vadd.f32 %v2994_v58, %v2626_v26  ;;  %v2636_v49 = vpop.f32.mrb[158].mxu0  ;;  %v4193_v50 = vpop.f32.mrb[202].mxu1  ;;  %v5966_v26 = vld [vmem:[#allocation36_spill] sm:$0xff] }
 0x2b4   : > { %v3003_v55 = vadd.f32 %v4192_v27, %v2634_v43  ;;  %v2637_v53 = vadd.f32 %v2636_v49, %v2268_v11  ;;  %v2638_v20 = vpop.f32.mrb[159].mxu0  ;;  %v2997_v3 = vpop.f32.mrb[203].mxu1  ;;  %v2281_v41 = vadd.f32 %v5751_v13, %v5966_v26 }
 0x2b5   : > { %v3101_v4 = vmax.f32 %v2995_v45, 0.0  ;;  %v2998_v37 = vadd.f32 %v2997_v3, %v2629_v63 }
 0x2b6   : > { %v3103_v19 = vmax.f32 %v3003_v55, 0.0  ;;  %v3006_v36 = vadd.f32 %v4193_v50, %v2637_v53 }
 0x2b7   : > { %v4046_v29 = vpack.c.bf16 %v3101_v4, %v3101_v4  ;;  %v3102_v8 = vmax.f32 %v2998_v37, 0.0 }
 0x2b8   : > { %v4048_v25 = vpack.c.bf16 %v3103_v19, %v3103_v19  ;;  %v3104_v16 = vmax.f32 %v3006_v36, 0.0 }
 0x2b9   : > { %3522 = vst.msk [vmem:[%s5488_s26 + $0x130] sm:$0xf] %vm3445_vm2, %v4046_v29  ;;  %v4047_v9 = vpack.c.bf16 %v3102_v8, %v3102_v8  ;;  %v2641_v56 = vpop.f32.mrb[160].mxu0  ;;  %v4196_v22 = vpop.f32.mrb[204].mxu1 }
 0x2ba   : > { %3524 = vst.msk [vmem:[%s5488_s26 + $0x138] sm:$0xf] %vm3445_vm2, %v4048_v25  ;;  %v4049_v52 = vpack.c.bf16 %v3104_v16, %v3104_v16  ;;  %v2642_v21 = vadd.f32 %v2641_v56, %v2273_v46  ;;  %v2643_v1 = vpop.f32.mrb[161].mxu0  ;;  %v3010_v10 = vpop.f32.mrb[205].mxu1 }
 0x2bb   : > { %3523 = vst.msk [vmem:[%s5488_s26 + $0x134] sm:$0xf] %vm3445_vm2, %v4047_v9  ;;  %v2644_v42 = vpop.f32.mrb[162].mxu0  ;;  %v4197_v48 = vpop.f32.mrb[206].mxu1 }
 0x2bc   : > { %3525 = vst.msk [vmem:[%s5488_s26 + $0x13c] sm:$0xf] %vm3445_vm2, %v4049_v52  ;;  %v2645_v7 = vadd.f32 %v2644_v42, %v2276_v33  ;;  %v3011_v60 = vadd.f32 %v3010_v10, %v2642_v21  ;;  %v2646_v39 = vpop.f32.mrb[163].mxu0  ;;  %v3013_v6 = vpop.f32.mrb[207].mxu1 }
 0x2be   : > { %v3105_v0 = vmax.f32 %v3011_v60, 0.0  ;;  %v3014_v57 = vadd.f32 %v3013_v6, %v2645_v7 }
 0x2c0   : > { %v4050_v30 = vpack.c.bf16 %v3105_v0, %v3105_v0  ;;  %v3106_v62 = vmax.f32 %v3014_v57, 0.0 }
 0x2c1   : > { %v2649_v12 = vpop.f32.mrb[164].mxu0 }
 0x2c2   : > { %3526 = vst.msk [vmem:[%s5488_s26 + $0x140] sm:$0xf] %vm3445_vm2, %v4050_v30  ;;  %v4051_v47 = vpack.c.bf16 %v3106_v62, %v3106_v62  ;;  %v2650_v63 = vadd.f32 %v2649_v12, %v2281_v41  ;;  %v2651_v24 = vpop.f32.mrb[165].mxu0 }
 0x2c3   : > { %v2652_v31 = vpop.f32.mrb[166].mxu0 }
 0x2c4   : > { %3527 = vst.msk [vmem:[%s5488_s26 + $0x144] sm:$0xf] %vm3445_vm2, %v4051_v47  ;;  %v3019_v59 = vadd.f32 %v4196_v22, %v2650_v63  ;;  %v2653_v44 = vadd.f32 %v2652_v31, %v2284_v32  ;;  %v2654_v34 = vpop.f32.mrb[167].mxu0 }
 0x2c6   : > { %v3107_v5 = vmax.f32 %v3019_v59, 0.0  ;;  %v3022_v28 = vadd.f32 %v4197_v48, %v2653_v44 }
 0x2c8   : > { %v4052_v15 = vpack.c.bf16 %v3107_v5, %v3107_v5  ;;  %v3108_v17 = vmax.f32 %v3022_v28, 0.0 }
 0x2ca   : > { %3528 = vst.msk [vmem:[%s5488_s26 + $0x148] sm:$0xf] %vm3445_vm2, %v4052_v15  ;;  %v4053_v40 = vpack.c.bf16 %v3108_v17, %v3108_v17 }
 0x2cc   : > { %3529 = vst.msk [vmem:[%s5488_s26 + $0x14c] sm:$0xf] %vm3445_vm2, %v4053_v40 }
 0x2cd PF: > { %s13_s12 = sadd.s32 1, %s4770_s12  }
 0x2ce   : > { %p10_p4 = scmp.ge.s32.totalorder %s13_s12, 4  }
 0x2d0   :  { %12 = sbr.rel (!%p10_p4) target bundleno = 1 (0x1), region = 62 }

// kernel: pilotnet_forward.5
= control target key start
LH: loop header
LB: loop body
LE: loop exit
PB: predicated region body
PF: predicated region fallthrough
CT: control target
= control target key end

     0   :  { %20 = vsyncpa [#allocation6], 0  ;;  %s11248_s0 = inlined_call_operand.vmem [shape: bf16[2,110,900], index: 0, kind: input, shape index: {}]   ;;  %s11249_s1 = inlined_call_operand.vmem [shape: bf16[900,48], index: 1, kind: input, shape index: {}]   ;;  %s11250_s2 = inlined_call_operand.vmem [shape: f32[1,48], index: 2, kind: input, shape index: {}]   ;;  %s11251_s3 = inlined_call_operand.vmem [shape: bf16[9,48,64], index: 3, kind: input, shape index: {}]   ;;  %s11252_s4 = inlined_call_operand.vmem [shape: f32[1,64], index: 4, kind: input, shape index: {}]   ;;  %s11253_s5 = inlined_call_operand.vmem [shape: bf16[9,64,64], index: 5, kind: input, shape index: {}]   ;;  %s11254_s6 = inlined_call_operand.vmem [shape: f32[1,64], index: 6, kind: input, shape index: {}]   ;;  %s11255_s7 = inlined_call_operand.vmem [shape: bf16[18,64,128], index: 7, kind: input, shape index: {}]   ;;  %s11256_s8 = inlined_call_operand.vmem [shape: f32[1,128], index: 8, kind: input, shape index: {}]   ;;  %s11257_s9 = inlined_call_operand.vmem [shape: bf16[128,128], index: 9, kind: input, shape index: {}]   ;;  %s11258_s10 = inlined_call_operand.vmem [shape: f32[1,128], index: 10, kind: input, shape index: {}]   ;;  %s11259_s11 = inlined_call_operand.vmem [shape: bf16[128,128], index: 11, kind: input, shape index: {}]   ;;  %s11260_s12 = inlined_call_operand.vmem [shape: f32[1,128], index: 12, kind: input, shape index: {}]   ;;  %s11261_s13 = inlined_call_operand.vmem [shape: bf16[128,128], index: 13, kind: input, shape index: {}]   ;;  %s11262_s14 = inlined_call_operand.vmem [shape: f32[1,128], index: 14, kind: input, shape index: {}]   ;;  %s11263_s15 = inlined_call_operand.hbm [shape: f32[2,1,128], index: 15, kind: output, shape index: {}]  }
   0x1   :  { %22 = vsyncpa [#allocation6 + $0x1], 0  ;;  %s9744_s18 = smov 0   ;;  %s9746_s19 = smov 0  }
   0x2   :  { %s9748_s20 = smov 0   ;;  %s9750_s21 = smov 0  }
   0x3 LB: > { %11269 = sst [smem:[#allocation8_spill]] %s9646_s18  ;;  %s9765_s22 = sadd.s32 4294967295, %s9658_s21   ;;  %s9658_s21 = sphi %s9750_s21, %s11278_s21   ;;  %s9654_s20 = sphi %s9748_s20, %s11280_s20   ;;  %s9650_s19 = sphi %s9746_s19, %s11282_s19   ;;  %s9646_s18 = sphi %s9744_s18, %s11281_s18  }
   0x4   : > { %11270 = sst [smem:[#allocation9_spill]] %s9654_s20  ;;  %s7197_s23 = sadd.s32 4294967294, %s9658_s21  }
   0x5   : > { %s9769_s24 = sadd.s32 1, %s9658_s21   ;;  %s355_s25 = sadd.s32 1, %s9654_s20 }
   0x6   : > { %11271 = sst [smem:[#allocation10_spill]] %s9769_s24  ;;  %s352_s26 = ssub.s32 %s9658_s21, %s9769_s24 }
   0x7   : > { %p365_p0 = scmp.ne.s32.totalorder %s9654_s20, %s9650_s19  ;;  %p353_p1 = scmp.eq.s32.totalorder %s352_s26, 0 }
   0x8   : > { %p366_p2 = scmp.eq.s32.totalorder %s9765_s22, 1  ;;  %p371_p3 = scmp.ne.s32.totalorder %s9650_s19, %s9646_s18 }
   0x9   : > { %p372_p4 = scmp.eq.s32.totalorder %s7197_s23, 1  ;;  %p7200_p7 = scmp.ge.s32.totalorder %s9658_s21, 1 }
   0xa   : > { %s9780_s27 = scalar_select %p353_p1, %s9654_s20, %s355_s25  }
   0xb   : > { %p9782_p5 = por %p366_p2, %p365_p0  ;;  %p9786_p6 = por %p372_p4, %p371_p3 }
   0xc   : > { %11272 = sst [smem:[#allocation11_spill]] %s9780_s27  ;;  %p440_p8 = scmp.lt.s32.totalorder %s9658_s21, 3 }
   0xd   : > { %s11274_s29 = scalar_select %p9786_p6, 1, 0 }
   0xe   : > { %p441_p9 = pnand %p7200_p7, %p440_p8 }
   0xf   : > { %11275 = sst [smem:[#allocation12_spill]] %s11274_s29  ;;  %v9267_v0 = vld [vmem:[%s11249_s1 + $0x40] sm:$0xff] (!%p441_p9)   ;;  %v9271_v4 = vld [vmem:[%s11249_s1 + $0x48] sm:$0xff] (!%p441_p9)   ;;  %v9275_v8 = vld [vmem:[%s11249_s1 + $0x50] sm:$0xff] (!%p441_p9)   ;;  %p487_p10 = scmp.lt.s32.totalorder (!%p441_p9), %s9765_s22, 1  ;;  %v9660_v42 = vmov (!%p441_p9), 0  }
  0x10   : > { %444 = sbr.rel (%p441_p9) target bundleno = 2005 (0x7d5), region = 80  ;;  %v9268_v1 = vld [vmem:[%s11249_s1] sm:$0xff] (!%p441_p9)   ;;  %8090 = vmatprep.subr.bf16.mxu0 (!%p441_p9), %v9267_v0  ;;  %v9272_v5 = vld [vmem:[%s11249_s1 + $0x8] sm:$0xff] (!%p441_p9)   ;;  %v9276_v9 = vld [vmem:[%s11249_s1 + $0x10] sm:$0xff] (!%p441_p9)   ;;  %vm1303_vm0 = vcmask (!%p441_p9), 1041408   ;;  %vm1281_vm1 = vcmask (!%p441_p9), 31744  }
  0x11   : > { %v9269_v2 = vld [vmem:[%s11249_s1 + $0xc0] sm:$0xff] (!%p441_p9)   ;;  %8091 = vmatpush3.bf16.msra.mxu0 (!%p441_p9), %v9268_v1  ;;  %v9273_v6 = vld [vmem:[%s11249_s1 + $0xc8] sm:$0xff] (!%p441_p9)   ;;  %v9277_v10 = vld [vmem:[%s11249_s1 + $0xd0] sm:$0xff] (!%p441_p9)   ;;  %vm1733_vm2 = vcmask (!%p441_p9), 388096   ;;  %vm1948_vm3 = vcmask (!%p441_p9), 1046528   ;;  %vm1808_vm4 = vcmask (!%p441_p9), 392192  }
  0x12   : > { %v9270_v3 = vld [vmem:[%s11249_s1 + $0x80] sm:$0xff] (!%p441_p9)   ;;  %8148 = vmatprep.subr.bf16.mxu1 (!%p441_p9), %v9269_v2  ;;  %8092 = vmatprep.subr.bf16.mxu0 (!%p441_p9), %v9271_v4  ;;  %v9274_v7 = vld [vmem:[%s11249_s1 + $0x88] sm:$0xff] (!%p441_p9)   ;;  %v9278_v11 = vld [vmem:[%s11249_s1 + $0x90] sm:$0xff] (!%p441_p9)   ;;  %vm1774_vm5 = vsmask.f32 (!%p441_p9), 7424  ;;  %vm2048_vm6 = vcmask (!%p441_p9), 1044480  }
  0x13   : > { %8149 = vmatpush3.bf16.msra.mxu1 (!%p441_p9), %v9270_v3  ;;  %v9279_v12 = vld [vmem:[%s11249_s1 + $0x58] sm:$0xff] (!%p441_p9)   ;;  %v9283_v16 = vld [vmem:[%s11249_s1 + $0x60] sm:$0xff] (!%p441_p9)   ;;  %v9287_v20 = vld [vmem:[%s11249_s1 + $0x68] sm:$0xff] (!%p441_p9)   ;;  %vm2138_vm7 = vsmask.f32 (!%p441_p9), 4352  ;;  %vm2333_vm8 = vcmask (!%p441_p9), 1045504  }
  0x14   : > { %8150 = vmatprep.subr.bf16.mxu1 (!%p441_p9), %v9273_v6  ;;  %v9280_v13 = vld [vmem:[%s11249_s1 + $0x18] sm:$0xff] (!%p441_p9)   ;;  %v9284_v17 = vld [vmem:[%s11249_s1 + $0x20] sm:$0xff] (!%p441_p9)   ;;  %v9288_v21 = vld [vmem:[%s11249_s1 + $0x28] sm:$0xff] (!%p441_p9)   ;;  %vm1747_vm9 = vcmask (!%p441_p9), 387072   ;;  %vm2433_vm10 = vsmask.f32 (!%p441_p9), 5376 }
  0x15   : > { %8093 = vmatpush3.bf16.msra.mxu0 (!%p441_p9), %v9272_v5  ;;  %v9281_v14 = vld [vmem:[%s11249_s1 + $0xd8] sm:$0xff] (!%p441_p9)   ;;  %v9285_v18 = vld [vmem:[%s11249_s1 + $0xe0] sm:$0xff] (!%p441_p9)   ;;  %v9289_v22 = vld [vmem:[%s11249_s1 + $0xe8] sm:$0xff] (!%p441_p9)   ;;  %vm3323_vm11 = vsmask.f32 (!%p441_p9), 6400  ;;  %vm2644_vm12 = vcmask (!%p441_p9), 517120  }
  0x16   : > { %8094 = vmatprep.subr.bf16.mxu0 (!%p441_p9), %v9275_v8  ;;  %v9282_v15 = vld [vmem:[%s11249_s1 + $0x98] sm:$0xff] (!%p441_p9)   ;;  %v9286_v19 = vld [vmem:[%s11249_s1 + $0xa0] sm:$0xff] (!%p441_p9)   ;;  %v9290_v23 = vld [vmem:[%s11249_s1 + $0xa8] sm:$0xff] (!%p441_p9)   ;;  %vm2641_vm13 = vcmask (!%p441_p9), 519168   ;;  %vm4473_vm14 = vcmask (!%p441_p9), 523264   ;;  %vm9662_vm15 = vmmov (!%p441_p9), 0  }
  0x17   : > { %8151 = vmatpush3.bf16.msra.mxu1 %v9274_v7  ;;  %s488_s17 = scalar_select %p487_p10, %s9765_s22, 1  ;;  %v9291_v24 = vld [vmem:[%s11249_s1 + $0x70] sm:$0xff]   ;;  %v9295_v28 = vld [vmem:[%s11249_s1 + $0x78] sm:$0xff]   ;;  %v9299_v36 = vld [vmem:[%s11249_s1 + $0x140] sm:$0xff]  }
  0x18   : > { %8152 = vmatprep.subr.bf16.mxu1 %v9277_v10  ;;  %v9292_v25 = vld [vmem:[%s11249_s1 + $0x30] sm:$0xff]   ;;  %v9296_v29 = vld [vmem:[%s11249_s1 + $0x38] sm:$0xff]   ;;  %v9300_v41 = vld [vmem:[%s11249_s1 + $0x100] sm:$0xff]   ;;  %s8061_s29 = sshll.u32 %s9765_s22, 4  ;;  %s9663_s20 = smov [#allocation5]  }
  0x19   : > { %8095 = vmatpush3.bf16.msra.mxu0 %v9276_v9  ;;  %s9224_s16 = smul.u32 448, %s488_s17  ;;  %v9293_v26 = vld [vmem:[%s11249_s1 + $0xf0] sm:$0xff]   ;;  %v9297_v30 = vld [vmem:[%s11249_s1 + $0xf8] sm:$0xff]   ;;  %v9301_v43 = vld [vmem:[%s11249_s1 + $0x180] sm:$0xff]   ;;  %s11206_s25 = scalar_lea.hbm %s11263_s15, %s8061_s29 }
  0x1a   : > { %8096 = vmatprep.subr.bf16.mxu0 %v9279_v12  ;;  %v9294_v27 = vld [vmem:[%s11249_s1 + $0xb0] sm:$0xff]   ;;  %v9298_v35 = vld [vmem:[%s11249_s1 + $0xb8] sm:$0xff]   ;;  %v9302_v47 = vld [vmem:[%s11249_s1 + $0x148] sm:$0xff]   ;;  %s9600_s27 = sshll.u32 %s9663_s20, 4  ;;  %s9601_s27 = int_to_ptr.vmem [resolvable:$false] %s9600_s27 }
  0x1b   : > { %8153 = vmatpush3.bf16.msra.mxu1 %v9278_v11  ;;  %s9884_s18 = scalar_lea.vmem %s11248_s0, %s9224_s16  ;;  %v9303_v48 = vld [vmem:[%s11249_s1 + $0x108] sm:$0xff]   ;;  %v9305_v54 = vld [vmem:[%s11249_s1 + $0x150] sm:$0xff]   ;;  %v9308_v0 = vld [vmem:[%s11249_s1 + $0x158] sm:$0xff]   ;;  %s485_s16 = sand.u32 1, %s9650_s19  }
  0x1c   : > { %8154 = vmatprep.subr.bf16.mxu1 %v9281_v14  ;;  %v493_v31 = vld [vmem:[%s9884_s18] sm:$0xff]  ;;  %v494_v37 = vld [vmem:[%s9884_s18 + $0x8] sm:$0xff]  ;;  %v9306_v59 = vld [vmem:[%s11249_s1 + $0x110] sm:$0xff]   ;;  %s7130_s26 = scalar_lea.sflag [#allocation6], %s485_s16  ;;  %s9602_s24 = scalar_lea.vmem %s9601_s27, 32 }
  0x1d   : > { %8097 = vmatpush3.bf16.msra.mxu0 %v9280_v13  ;;  %v497_v32 = vld [vmem:[%s9884_s18 + $0x20] sm:$0xff]  ;;  %v498_v38 = vld [vmem:[%s9884_s18 + $0x28] sm:$0xff]  ;;  %v9307_v63 = vld [vmem:[%s11249_s1 + $0x190] sm:$0xff]  }
  0x1e   : > { %8098 = vmatprep.subr.bf16.mxu0 %v9283_v16  ;;  %v7203_v33 = vcombine.low %v493_v31, %v497_v32  ;;  %v7204_v34 = vcombine.high %v493_v31, %v497_v32  ;;  %v7205_v39 = vcombine.low %v494_v37, %v498_v38  ;;  %v7206_v40 = vcombine.high %v494_v37, %v498_v38  ;;  %v501_v44 = vld [vmem:[%s9884_s18 + $0x40] sm:$0xff]  ;;  %v502_v50 = vld [vmem:[%s9884_s18 + $0x48] sm:$0xff]  ;;  %v9309_v1 = vld [vmem:[%s11249_s1 + $0x118] sm:$0xff]  }
  0x1f   : > { %8155 = vmatpush3.bf16.msra.mxu1 %v9282_v15  ;;  %v505_v45 = vld [vmem:[%s9884_s18 + $0x60] sm:$0xff]  ;;  %v506_v51 = vld [vmem:[%s9884_s18 + $0x68] sm:$0xff]  ;;  %v9310_v8 = vld [vmem:[%s11249_s1 + $0x198] sm:$0xff]  }
  0x20   : > { %8156 = vmatprep.subr.bf16.mxu1 %v9285_v18  ;;  %1339 = vmatprep.mubr.bf16.mxu0 %v7204_v34  ;;  %v7212_v46 = vcombine.high %v501_v44, %v505_v45  ;;  %v7211_v49 = vcombine.low %v501_v44, %v505_v45  ;;  %v7214_v52 = vcombine.high %v502_v50, %v506_v51  ;;  %v9304_v53 = vld [vmem:[%s11249_s1 + $0x188] sm:$0xff]   ;;  %v509_v55 = vld [vmem:[%s9884_s18 + $0x80] sm:$0xff] }
  0x21   : > { %8099 = vmatpush3.bf16.msra.mxu0 %v9284_v17  ;;  %1428 = vmatprep.mubr.bf16.mxu1 %v7206_v40  ;;  %v7213_v56 = vcombine.low %v502_v50, %v506_v51  ;;  %v513_v57 = vld [vmem:[%s9884_s18 + $0xa0] sm:$0xff]  ;;  %v510_v60 = vld [vmem:[%s9884_s18 + $0x88] sm:$0xff]  ;;  %v495_v50 = vld [vmem:[%s9884_s18 + $0x10] sm:$0xff] }
  0x22   : > { %8100 = vmatprep.subr.bf16.mxu0 %v9287_v20  ;;  %v7220_v58 = vcombine.high %v509_v55, %v513_v57  ;;  %v514_v61 = vld [vmem:[%s9884_s18 + $0xa8] sm:$0xff]  ;;  %v7219_v2 = vcombine.low %v509_v55, %v513_v57  ;;  %v517_v3 = vld [vmem:[%s9884_s18 + $0xc0] sm:$0xff]  ;;  %v499_v51 = vld [vmem:[%s9884_s18 + $0x30] sm:$0xff] }
  0x23   : > { %8157 = vmatpush3.bf16.msra.mxu1 %v9286_v19  ;;  %v7222_v62 = vcombine.high %v510_v60, %v514_v61  ;;  %v521_v4 = vld [vmem:[%s9884_s18 + $0xe0] sm:$0xff]  ;;  %v518_v5 = vld [vmem:[%s9884_s18 + $0xc8] sm:$0xff]  ;;  %v7221_v9 = vcombine.low %v510_v60, %v514_v61  ;;  %v503_v57 = vld [vmem:[%s9884_s18 + $0x50] sm:$0xff]  ;;  %v7207_v61 = vcombine.low %v495_v50, %v499_v51 }
  0x24   : > { %8158 = vmatprep.subr.bf16.mxu1 %v9289_v22  ;;  %v7228_v6 = vcombine.high %v517_v3, %v521_v4  ;;  %v522_v7 = vld [vmem:[%s9884_s18 + $0xe8] sm:$0xff]  ;;  %v9311_v10 = vld [vmem:[%s11249_s1 + $0x160] sm:$0xff]   ;;  %v7227_v18 = vcombine.low %v517_v3, %v521_v4  ;;  %v508_v60 = vld [vmem:[%s9884_s18 + $0x78] sm:$0xff] }
  0x25   : > { %8101 = vmatpush3.bf16.msra.mxu0 %v9288_v21  ;;  %v7230_v11 = vcombine.high %v518_v5, %v522_v7  ;;  %v9312_v12 = vld [vmem:[%s11249_s1 + $0x120] sm:$0xff]   ;;  %v526_v16 = vld [vmem:[%s9884_s18 + $0x108] sm:$0xff]  ;;  %v512_v3 = vld [vmem:[%s9884_s18 + $0x98] sm:$0xff] }
  0x26   : > { %8102 = vmatprep.subr.bf16.mxu0 %v9291_v24  ;;  %v9313_v13 = vld [vmem:[%s11249_s1 + $0x1a0] sm:$0xff]   ;;  %v9314_v17 = vld [vmem:[%s11249_s1 + $0x168] sm:$0xff]   ;;  %v9317_v24 = vld [vmem:[%s11249_s1 + $0x170] sm:$0xff]  }
  0x27   : > { %8159 = vmatpush3.bf16.msra.mxu1 %v9290_v23  ;;  %v525_v14 = vld [vmem:[%s9884_s18 + $0x100] sm:$0xff]  ;;  %v9315_v19 = vld [vmem:[%s11249_s1 + $0x128] sm:$0xff]   ;;  %v7229_v23 = vcombine.low %v518_v5, %v522_v7  ;;  %v516_v4 = vld [vmem:[%s9884_s18 + $0xb8] sm:$0xff] }
  0x28   : > { %8160 = vmatprep.subr.bf16.mxu1 %v9293_v26  ;;  %v529_v15 = vld [vmem:[%s9884_s18 + $0x120] sm:$0xff]  ;;  %v530_v21 = vld [vmem:[%s9884_s18 + $0x128] sm:$0xff]  ;;  %v9318_v26 = vld [vmem:[%s11249_s1 + $0x130] sm:$0xff]  }
  0x29   : > { %8103 = vmatpush3.bf16.msra.mxu0 %v9292_v25  ;;  %v7236_v20 = vcombine.high %v525_v14, %v529_v15  ;;  %v9316_v22 = vld [vmem:[%s11249_s1 + $0x1a8] sm:$0xff]   ;;  %v7238_v25 = vcombine.high %v526_v16, %v530_v21  ;;  %v7235_v32 = vcombine.low %v525_v14, %v529_v15  ;;  %v7237_v37 = vcombine.low %v526_v16, %v530_v21  ;;  %v9323_v38 = vld [vmem:[%s11249_s1 + $0x1c0] ss:$0 sps:$4 sm:$0x33]  }
  0x2a   : > { %8104 = vmatprep.subr.bf16.mxu0 %v9295_v28  ;;  %v533_v28 = vld [vmem:[%s9884_s18 + $0x140] sm:$0xff]  ;;  %v538_v31 = vld [vmem:[%s9884_s18 + $0x168] sm:$0xff]  ;;  %v1305_v40 = vsel %vm1303_vm0, %v9323_v38, 0  ;;  %v7225_v15 = vcombine.low %v512_v3, %v516_v4  ;;  %vm5345_vm0 = vcmask 516096  }
  0x2b   : > { %8161 = vmatpush3.bf16.msra.mxu1 %v9294_v27  ;;  %v9319_v27 = vld [vmem:[%s11249_s1 + $0x1b0] sm:$0xff]  }
  0x2c   : > { %8162 = vmatprep.subr.bf16.mxu1 %v9297_v30  ;;  %v534_v30 = vld [vmem:[%s9884_s18 + $0x148] sm:$0xff] }
  0x2d   : > { %8105 = vmatpush3.bf16.msra.mxu0 %v9296_v29  ;;  %v537_v29 = vld [vmem:[%s9884_s18 + $0x160] sm:$0xff] }
  0x2e   : > { %8206 = vmatprep.subr.bf16.mxu0 %v9299_v36  ;;  %v7244_v34 = vcombine.high %v533_v28, %v537_v29  ;;  %v9322_v36 = vld [vmem:[%s11249_s1 + $0x1b8] sm:$0xff]   ;;  %v7243_v44 = vcombine.low %v533_v28, %v537_v29 }
  0x2f   : > { %8163 = vmatpush3.bf16.msra.mxu1 %v9298_v35  ;;  %v9321_v35 = vld [vmem:[%s11249_s1 + $0x138] sm:$0xff]  }
  0x30   : > { %1340 = vmatmul.mubr.bf16.vlgmr.msra.gmra.mrb[0].mxu0 %v7203_v33  ;;  %1574 = vmatprep.subr.bf16.mxu1 %v9660_v42  ;;  %v9320_v33 = vld [vmem:[%s11249_s1 + $0x178] sm:$0xff]  }
  0x31   : > { %8207 = vmatpush3.bf16.msra.mxu0 %v9300_v41  ;;  %1347 = vmatprep.mubr.bf16.mxu0 %v7212_v46  ;;  %v541_v41 = vld [vmem:[%s9884_s18 + $0x180] sm:$0xff]  ;;  %v542_v46 = vld [vmem:[%s9884_s18 + $0x188] sm:$0xff]  ;;  %v540_v28 = vld [vmem:[%s9884_s18 + $0x178] sm:$0xff] }
  0x32   : > { %1429 = vmatmul.mubr.bf16.vlgmr.msra.gmra.mrb[0].mxu1 %v7205_v39  ;;  %8208 = vmatprep.subr.bf16.mxu0 %v9302_v47  ;;  %v7246_v39 = vcombine.high %v534_v30, %v538_v31  ;;  %v546_v47 = vld [vmem:[%s9884_s18 + $0x1a8] sm:$0x77] }
  0x33   : > { %1575 = vmatpush1.bf16.msra.mxu1 %v9301_v43  ;;  %1436 = vmatprep.mubr.bf16.mxu1 %v7214_v52  ;;  %v545_v43 = vld [vmem:[%s9884_s18 + $0x1a0] sm:$0x77]  ;;  %v500_v52 = vld [vmem:[%s9884_s18 + $0x38] sm:$0xff]  ;;  %v7253_v55 = vcombine.low %v542_v46, %v546_v47 }
  0x34   : > { %1576 = vmatprep.subr.bf16.mxu1 %v9660_v42  ;;  %v7252_v45 = vcombine.high %v541_v41, %v545_v43 }
  0x35   : > { %8209 = vmatpush3.bf16.msra.mxu0 %v9303_v48  ;;  %v7245_v48 = vcombine.low %v534_v30, %v538_v31 }
  0x36   : > { %8210 = vmatprep.subr.bf16.mxu0 %v9305_v54  ;;  %v7208_v54 = vcombine.high %v495_v50, %v499_v51  ;;  %v10063_v50 = vld [vmem:[%s11251_s3] sm:$0xff]  }
  0x37   : > { %1577 = vmatpush1.bf16.msra.mxu1 %v9304_v53  ;;  %v7251_v53 = vcombine.low %v541_v41, %v545_v43  ;;  %v10068_v51 = vld [vmem:[%s11251_s3 + $0x60] sm:$0xff]  }
  0x38   : > { %1348 = vmatmul.mubr.bf16.gmra.mrb[4].mxu0 %v7211_v49  ;;  %1578 = vmatprep.subr.bf16.mxu1 %v9660_v42  ;;  %v7254_v49 = vcombine.high %v542_v46, %v546_v47  ;;  %v9326_v46 = vld [vmem:[%s11251_s3 + $0x20] sm:$0xff]   ;;  %v9327_v47 = vld [vmem:[%s11251_s3 + $0x38] sm:$0xff]  }
  0x39   : > { %1355 = vmatprep.mubr.bf16.mxu0 %v7220_v58  ;;  %8211 = vmatpush3.bf16.msra.mxu0 %v9306_v59  ;;  %v507_v58 = vld [vmem:[%s9884_s18 + $0x70] sm:$0xff]  ;;  %v504_v59 = vld [vmem:[%s9884_s18 + $0x58] sm:$0xff] }
  0x3a   : > { %1437 = vmatmul.mubr.bf16.gmra.mrb[4].mxu1 %v7213_v56  ;;  %8212 = vmatprep.subr.bf16.mxu0 %v9308_v0  ;;  %v7218_v0 = vcombine.high %v504_v59, %v508_v60  ;;  %v7215_v5 = vcombine.low %v503_v57, %v507_v58  ;;  %v7217_v7 = vcombine.low %v504_v59, %v508_v60 }
  0x3b   : > { %1444 = vmatprep.mubr.bf16.mxu1 %v7222_v62  ;;  %1579 = vmatpush1.bf16.msra.mxu1 %v9307_v63  ;;  %v7216_v62 = vcombine.high %v503_v57, %v507_v58 }
  0x3c   : > { %1580 = vmatprep.subr.bf16.mxu1 %v9660_v42 }
  0x3d   : > { %8213 = vmatpush3.bf16.msra.mxu0 %v9309_v1  ;;  %v511_v1 = vld [vmem:[%s9884_s18 + $0x90] sm:$0xff] }
  0x3e   : > { %8214 = vmatprep.subr.bf16.mxu0 %v9311_v10  ;;  %v523_v10 = vld [vmem:[%s9884_s18 + $0xf0] sm:$0xff] }
  0x3f   : > { %1581 = vmatpush1.bf16.msra.mxu1 %v9310_v8  ;;  %v7226_v8 = vcombine.high %v512_v3, %v516_v4 }
  0x40   : > { %1356 = vmatmul.mubr.bf16.gmra.mrb[8].mxu0 %v7219_v2  ;;  %1582 = vmatprep.subr.bf16.mxu1 %v9660_v42  ;;  %v515_v2 = vld [vmem:[%s9884_s18 + $0xb0] sm:$0xff] }
  0x41   : > { %1363 = vmatprep.mubr.bf16.mxu0 %v7228_v6  ;;  %8215 = vmatpush3.bf16.msra.mxu0 %v9312_v12  ;;  %v7224_v6 = vcombine.high %v511_v1, %v515_v2  ;;  %v524_v12 = vld [vmem:[%s9884_s18 + $0xf8] sm:$0xff] }
  0x42   : > { %1445 = vmatmul.mubr.bf16.gmra.mrb[8].mxu1 %v7221_v9  ;;  %8216 = vmatprep.subr.bf16.mxu0 %v9314_v17  ;;  %v519_v9 = vld [vmem:[%s9884_s18 + $0xd0] sm:$0xff] }
  0x43   : > { %1452 = vmatprep.mubr.bf16.mxu1 %v7230_v11  ;;  %1583 = vmatpush1.bf16.msra.mxu1 %v9313_v13  ;;  %v520_v11 = vld [vmem:[%s9884_s18 + $0xd8] sm:$0xff]  ;;  %v7223_v13 = vcombine.low %v511_v1, %v515_v2  ;;  %v7232_v14 = vcombine.high %v519_v9, %v523_v10  ;;  %v527_v17 = vld [vmem:[%s9884_s18 + $0x110] sm:$0xff]  ;;  %v7231_v21 = vcombine.low %v519_v9, %v523_v10 }
  0x44   : > { %1584 = vmatprep.subr.bf16.mxu1 %v9660_v42  ;;  %v7234_v16 = vcombine.high %v520_v11, %v524_v12 }
  0x45   : > { %8217 = vmatpush3.bf16.msra.mxu0 %v9315_v19  ;;  %v528_v19 = vld [vmem:[%s9884_s18 + $0x118] sm:$0xff] }
  0x46   : > { %8218 = vmatprep.subr.bf16.mxu0 %v9317_v24 }
  0x47   : > { %1585 = vmatpush1.bf16.msra.mxu1 %v9316_v22 }
  0x48   : > { %1364 = vmatmul.mubr.bf16.gmra.mrb[12].mxu0 %v7227_v18  ;;  %1586 = vmatprep.subr.bf16.mxu1 %v9660_v42  ;;  %v531_v18 = vld [vmem:[%s9884_s18 + $0x130] sm:$0xff] }
  0x49   : > { %1371 = vmatprep.mubr.bf16.mxu0 %v7236_v20  ;;  %8219 = vmatpush3.bf16.msra.mxu0 %v9318_v26  ;;  %v532_v20 = vld [vmem:[%s9884_s18 + $0x138] sm:$0xff]  ;;  %v7240_v22 = vcombine.high %v527_v17, %v531_v18  ;;  %v539_v26 = vld [vmem:[%s9884_s18 + $0x170] sm:$0xff]  ;;  %v7239_v29 = vcombine.low %v527_v17, %v531_v18 }
  0x4a   : > { %1453 = vmatmul.mubr.bf16.gmra.mrb[12].mxu1 %v7229_v23  ;;  %8220 = vmatprep.subr.bf16.mxu0 %v9320_v33  ;;  %v7233_v23 = vcombine.low %v520_v11, %v524_v12  ;;  %v7242_v24 = vcombine.high %v528_v19, %v532_v20  ;;  %v7241_v31 = vcombine.low %v528_v19, %v532_v20  ;;  %v543_v33 = vld [vmem:[%s9884_s18 + $0x190] sm:$0xff] }
  0x4b   : > { %1460 = vmatprep.mubr.bf16.mxu1 %v7238_v25  ;;  %1587 = vmatpush1.bf16.msra.mxu1 %v9319_v27  ;;  %v535_v25 = vld [vmem:[%s9884_s18 + $0x150] sm:$0xff]  ;;  %v536_v27 = vld [vmem:[%s9884_s18 + $0x158] sm:$0xff] }
  0x4c   : > { %1588 = vmatprep.subr.bf16.mxu1 %v9660_v42  ;;  %v7248_v30 = vcombine.high %v535_v25, %v539_v26 }
  0x4d   : > { %8221 = vmatpush3.bf16.msra.mxu0 %v9321_v35  ;;  %v544_v35 = vld [vmem:[%s9884_s18 + $0x198] sm:$0xff] }
  0x4f   : > { %1589 = vmatpush1.bf16.msra.mxu1 %v9322_v36  ;;  %v548_v36 = vld [vmem:[%s9884_s18 + $0x1b8] sm:$0x77] }
  0x50   : > { %1372 = vmatmul.mubr.bf16.gmra.mrb[16].mxu0 %v7235_v32  ;;  %1590 = vmatprep.subr.bf16.mxu1 %v9660_v42  ;;  %v496_v42 = vld [vmem:[%s9884_s18 + $0x18] sm:$0xff]  ;;  %v7250_v32 = vcombine.high %v536_v27, %v540_v28  ;;  %v7257_v43 = vcombine.low %v544_v35, %v548_v36 }
  0x51   : > { %1379 = vmatprep.mubr.bf16.mxu0 %v7244_v34  ;;  %v7210_v56 = vcombine.high %v496_v42, %v500_v52  ;;  %v7209_v63 = vcombine.low %v496_v42, %v500_v52  ;;  %v547_v34 = vld [vmem:[%s9884_s18 + $0x1b0] sm:$0x77]  ;;  %v10075_v52 = vld [vmem:[%s11250_s2] ss:$0 sm:$0xff]  ;;  %s486_s18 = scalar_lea.vmem [#allocation5], %s485_s16 }
  0x52   : > { %1461 = vmatmul.mubr.bf16.gmra.mrb[16].mxu1 %v7237_v37  ;;  %v7247_v37 = vcombine.low %v535_v25, %v539_v26  ;;  %v7256_v38 = vcombine.high %v543_v33, %v547_v34  ;;  %v7255_v41 = vcombine.low %v543_v33, %v547_v34  ;;  %s7142_s17 = sshll.u32 %s486_s18, 4  ;;  %s11208_s17 = int_to_ptr.vmem [resolvable:$true] %s7142_s17 }
  0x53   : > { %1468 = vmatprep.mubr.bf16.mxu1 %v7246_v39  ;;  %1591 = vmatpush1.bf16.msra.mxu1 %v1305_v40  ;;  %v7249_v39 = vcombine.low %v536_v27, %v540_v28  ;;  %v7258_v40 = vcombine.high %v544_v35, %v548_v36  ;;  %s9596_s22 = scalar_lea.vmem %s11208_s17, 16  ;;  %p9603_p0 = scmp.lt.s32.totalorder %s11208_s17, %s9601_s27 }
  0x54   : > { %p9597_p11 = scmp.ne.s32.totalorder %s11208_s17, %s9596_s22  ;;  %p9604_p1 = scmp.lt.s32.totalorder %s9602_s24, %s9596_s22 }
  0x56   : > { %p9598_p12 = pnand %p9597_p11, %p9782_p5  ;;  %p9605_p2 = por %p9604_p1, %p9603_p0 }
  0x58   : > { %1380 = vmatmul.mubr.bf16.gmra.mrb[20].mxu0 %v7243_v44  ;;  %v9324_v44 = vld [vmem:[%s11251_s3 + $0x18] sm:$0xff]   ;;  %p9599_p13 = pneg %p9598_p12 }
  0x59   : > { %1387 = vmatprep.mubr.bf16.mxu0 %v7252_v45  ;;  %8570 = vmatprep.subr.bf16.mxu1 %v9324_v44  ;;  %v9325_v45 = vld [vmem:[%s11251_s3 + $0x30] sm:$0xff]  }
  0x5a   : > { %1469 = vmatmul.mubr.bf16.gmra.mrb[20].mxu1 %v7245_v48  ;;  %8590 = vmatprep.subr.bf16.mxu0 %v9325_v45  ;;  %v9328_v48 = vld [vmem:[%s11251_s3 + $0x28] sm:$0xff]   ;;  %p9606_p3 = pnand %p9605_p2, %p9599_p13 }
  0x5b   : > { %1476 = vmatprep.mubr.bf16.mxu1 %v7254_v49  ;;  %v9329_v49 = vld [vmem:[%s11251_s3 + $0x40] sm:$0xff]  }
  0x60   : > { %1388 = vmatmul.mubr.bf16.gmra.mrb[24].mxu0 %v7251_v53 }
  0x61   : > { %1517 = vmatprep.mubr.bf16.mxu0 %v7208_v54 }
  0x62   : > { %1477 = vmatmul.mubr.bf16.gmra.mrb[24].mxu1 %v7253_v55 }
  0x63   : > { %7316 = vmatprep.mubr.msk.bf16.mxu1 %vm1281_vm1, %v7210_v56 }
  0x68   : > { %1518 = vmatmul.mubr.bf16.vlgmr.msra.gmra.mrb[28].mxu0 %v7207_v61 }
  0x69   : > { %1525 = vmatprep.mubr.bf16.mxu0 %v7216_v62  ;;  %8591 = vmatpush3.bf16.msra.mxu0 %v9325_v45 }
  0x6a   : > { %1607 = vmatmul.mubr.bf16.vlgmr.msra.gmra.mrb[28].mxu1 %v7209_v63  ;;  %8592 = vmatprep.subr.bf16.mxu0 %v9327_v47 }
  0x6b   : > { %7317 = vmatprep.mubr.msk.bf16.mxu1 %vm1281_vm1, %v7218_v0  ;;  %8571 = vmatpush3.bf16.msra.mxu1 %v9324_v44 }
  0x6c   : > { %8572 = vmatprep.subr.bf16.mxu1 %v9326_v46 }
  0x6d   : > { %8593 = vmatpush3.bf16.msra.mxu0 %v9327_v47 }
  0x6e   : > { %8594 = vmatprep.subr.bf16.mxu0 %v9329_v49 }
  0x6f   : > { %8573 = vmatpush3.bf16.msra.mxu1 %v9326_v46 }
  0x70   : > { %1526 = vmatmul.mubr.bf16.gmra.mrb[32].mxu0 %v7215_v5  ;;  %8574 = vmatprep.subr.bf16.mxu1 %v9328_v48 }
  0x71   : > { %1533 = vmatprep.mubr.bf16.mxu0 %v7224_v6  ;;  %8595 = vmatpush3.bf16.msra.mxu0 %v9329_v49 }
  0x72   : > { %1615 = vmatmul.mubr.bf16.gmra.mrb[32].mxu1 %v7217_v7  ;;  %8610 = vmatprep.subr.bf16.mxu0 %v10068_v51 }
  0x73   : > { %7318 = vmatprep.mubr.msk.bf16.mxu1 %vm1281_vm1, %v7226_v8  ;;  %8575 = vmatpush3.bf16.msra.mxu1 %v9328_v48 }
  0x74   : > { %8580 = vmatprep.subr.bf16.mxu1 %v10063_v50 }
  0x78   : > { %1534 = vmatmul.mubr.bf16.gmra.mrb[36].mxu0 %v7223_v13 }
  0x79   : > { %1541 = vmatprep.mubr.bf16.mxu0 %v7232_v14 }
  0x7a   : > { %1623 = vmatmul.mubr.bf16.gmra.mrb[36].mxu1 %v7225_v15 }
  0x7b   : > { %7319 = vmatprep.mubr.msk.bf16.mxu1 %vm1281_vm1, %v7234_v16 }
  0x80   : > { %1542 = vmatmul.mubr.bf16.gmra.mrb[40].mxu0 %v7231_v21 }
  0x81   : > { %1549 = vmatprep.mubr.bf16.mxu0 %v7240_v22 }
  0x82   : > { %1631 = vmatmul.mubr.bf16.gmra.mrb[40].mxu1 %v7233_v23 }
  0x83   : > { %7320 = vmatprep.mubr.msk.bf16.mxu1 %vm1281_vm1, %v7242_v24 }
  0x88   : > { %1550 = vmatmul.mubr.bf16.gmra.mrb[44].mxu0 %v7239_v29 }
  0x89   : > { %1557 = vmatprep.mubr.bf16.mxu0 %v7248_v30 }
  0x8a   : > { %1639 = vmatmul.mubr.bf16.gmra.mrb[44].mxu1 %v7241_v31 }
  0x8b   : > { %7321 = vmatprep.mubr.msk.bf16.mxu1 %vm1281_vm1, %v7250_v32 }
  0x90   : > { %1558 = vmatmul.mubr.bf16.gmra.mrb[48].mxu0 %v7247_v37 }
  0x91   : > { %1565 = vmatprep.mubr.bf16.mxu0 %v7256_v38 }
  0x92   : > { %1647 = vmatmul.mubr.bf16.gmra.mrb[48].mxu1 %v7249_v39 }
  0x93   : > { %7322 = vmatprep.mubr.msk.bf16.mxu1 %vm1281_vm1, %v7258_v40 }
  0x98   : > { %1566 = vmatmul.mubr.bf16.gmra.mrb[52].mxu0 %v7255_v41 }
  0x9a   : > { %1655 = vmatmul.mubr.bf16.gmra.mrb[52].mxu1 %v7257_v43 }
 0x103   : > { %v8106_v42 = vpop.f32.mrb[0].mxu0 }
 0x104   : > { %v8107_v53 = vpop.f32.mrb[1].mxu0 }
 0x105   : > { %v8108_v54 = vadd.f32 %v8107_v53, %v8106_v42  ;;  %v8109_v55 = vpop.f32.mrb[2].mxu0  ;;  %v8164_v56 = vpop.f32.mrb[0].mxu1 }
 0x106   : > { %v8110_v57 = vpop.f32.mrb[3].mxu0  ;;  %v8165_v60 = vpop.f32.mrb[1].mxu1 }
 0x107   : > { %v1342_v58 = vadd.f32 %v8108_v54, %v10075_v52  ;;  %v8111_v59 = vadd.f32 %v8110_v57, %v8109_v55  ;;  %v8166_v61 = vadd.f32 %v8165_v60, %v8164_v56  ;;  %v8167_v62 = vpop.f32.mrb[2].mxu1 }
 0x108   : > { %v8168_v0 = vpop.f32.mrb[3].mxu1 }
 0x109   : > { %v1345_v63 = vadd.f32 %v8111_v59, %v10075_v52  ;;  %v10079_v1 = vadd.f32 %v8166_v61, %v1342_v58  ;;  %v8169_v2 = vadd.f32 %v8168_v0, %v8167_v62 }
 0x10b   : > { %v8112_v3 = vpop.f32.mrb[4].mxu0  ;;  %v10081_v4 = vadd.f32 %v8169_v2, %v1345_v63 }
 0x10c   : > { %v8113_v5 = vpop.f32.mrb[5].mxu0 }
 0x10d   : > { %v8114_v6 = vadd.f32 %v8113_v5, %v8112_v3  ;;  %v8115_v7 = vpop.f32.mrb[6].mxu0  ;;  %v8170_v8 = vpop.f32.mrb[4].mxu1 }
 0x10e   : > { %v8116_v9 = vpop.f32.mrb[7].mxu0  ;;  %v8171_v12 = vpop.f32.mrb[5].mxu1 }
 0x10f   : > { %v1350_v10 = vadd.f32 %v8114_v6, %v10075_v52  ;;  %v8117_v11 = vadd.f32 %v8116_v9, %v8115_v7  ;;  %v8172_v13 = vadd.f32 %v8171_v12, %v8170_v8  ;;  %v8173_v14 = vpop.f32.mrb[6].mxu1 }
 0x110   : > { %v8174_v16 = vpop.f32.mrb[7].mxu1 }
 0x111   : > { %v1353_v15 = vadd.f32 %v8117_v11, %v10075_v52  ;;  %v10085_v17 = vadd.f32 %v8172_v13, %v1350_v10  ;;  %v8175_v18 = vadd.f32 %v8174_v16, %v8173_v14 }
 0x113   : > { %v8118_v19 = vpop.f32.mrb[8].mxu0  ;;  %v10087_v20 = vadd.f32 %v8175_v18, %v1353_v15 }
 0x114   : > { %v8119_v21 = vpop.f32.mrb[9].mxu0 }
 0x115   : > { %v8120_v22 = vadd.f32 %v8119_v21, %v8118_v19  ;;  %v8121_v23 = vpop.f32.mrb[10].mxu0  ;;  %v8176_v24 = vpop.f32.mrb[8].mxu1 }
 0x116   : > { %v8122_v25 = vpop.f32.mrb[11].mxu0  ;;  %v8177_v28 = vpop.f32.mrb[9].mxu1 }
 0x117   : > { %v1358_v26 = vadd.f32 %v8120_v22, %v10075_v52  ;;  %v8123_v27 = vadd.f32 %v8122_v25, %v8121_v23  ;;  %v8178_v29 = vadd.f32 %v8177_v28, %v8176_v24  ;;  %v8179_v30 = vpop.f32.mrb[10].mxu1 }
 0x118   : > { %v8180_v32 = vpop.f32.mrb[11].mxu1 }
 0x119   : > { %v1361_v31 = vadd.f32 %v8123_v27, %v10075_v52  ;;  %v10091_v33 = vadd.f32 %v8178_v29, %v1358_v26  ;;  %v8181_v34 = vadd.f32 %v8180_v32, %v8179_v30 }
 0x11b   : > { %v8124_v35 = vpop.f32.mrb[12].mxu0  ;;  %v10093_v36 = vadd.f32 %v8181_v34, %v1361_v31 }
 0x11c   : > { %v8125_v37 = vpop.f32.mrb[13].mxu0 }
 0x11d   : > { %v8126_v38 = vadd.f32 %v8125_v37, %v8124_v35  ;;  %v8127_v39 = vpop.f32.mrb[14].mxu0  ;;  %v8182_v40 = vpop.f32.mrb[12].mxu1 }
 0x11e   : > { %v8128_v41 = vpop.f32.mrb[15].mxu0  ;;  %v8183_v45 = vpop.f32.mrb[13].mxu1 }
 0x11f   : > { %v1366_v43 = vadd.f32 %v8126_v38, %v10075_v52  ;;  %v8129_v44 = vadd.f32 %v8128_v41, %v8127_v39  ;;  %v8184_v46 = vadd.f32 %v8183_v45, %v8182_v40  ;;  %v8185_v47 = vpop.f32.mrb[14].mxu1 }
 0x120   : > { %v8186_v49 = vpop.f32.mrb[15].mxu1 }
 0x121   : > { %v1369_v48 = vadd.f32 %v8129_v44, %v10075_v52  ;;  %v10097_v42 = vadd.f32 %v8184_v46, %v1366_v43  ;;  %v8187_v53 = vadd.f32 %v8186_v49, %v8185_v47 }
 0x123   : > { %v8130_v54 = vpop.f32.mrb[16].mxu0  ;;  %v10099_v55 = vadd.f32 %v8187_v53, %v1369_v48 }
 0x124   : > { %v8131_v56 = vpop.f32.mrb[17].mxu0 }
 0x125   : > { %v8132_v57 = vadd.f32 %v8131_v56, %v8130_v54  ;;  %v8133_v58 = vpop.f32.mrb[18].mxu0  ;;  %v8188_v59 = vpop.f32.mrb[16].mxu1 }
 0x126   : > { %v8134_v60 = vpop.f32.mrb[19].mxu0  ;;  %v8189_v63 = vpop.f32.mrb[17].mxu1 }
 0x127   : > { %v1374_v61 = vadd.f32 %v8132_v57, %v10075_v52  ;;  %v8135_v62 = vadd.f32 %v8134_v60, %v8133_v58  ;;  %v8190_v0 = vadd.f32 %v8189_v63, %v8188_v59  ;;  %v8191_v2 = vpop.f32.mrb[18].mxu1 }
 0x128   : > { %v8192_v5 = vpop.f32.mrb[19].mxu1 }
 0x129   : > { %v1377_v3 = vadd.f32 %v8135_v62, %v10075_v52  ;;  %v10103_v6 = vadd.f32 %v8190_v0, %v1374_v61  ;;  %v8193_v7 = vadd.f32 %v8192_v5, %v8191_v2 }
 0x12b   : > { %v8136_v8 = vpop.f32.mrb[20].mxu0  ;;  %v10105_v9 = vadd.f32 %v8193_v7, %v1377_v3 }
 0x12c   : > { %v8137_v10 = vpop.f32.mrb[21].mxu0 }
 0x12d   : > { %v8138_v11 = vadd.f32 %v8137_v10, %v8136_v8  ;;  %v8139_v12 = vpop.f32.mrb[22].mxu0  ;;  %v8194_v13 = vpop.f32.mrb[20].mxu1 }
 0x12e   : > { %v8140_v14 = vpop.f32.mrb[23].mxu0  ;;  %v8195_v18 = vpop.f32.mrb[21].mxu1 }
 0x12f   : > { %v1382_v15 = vadd.f32 %v8138_v11, %v10075_v52  ;;  %v8141_v16 = vadd.f32 %v8140_v14, %v8139_v12  ;;  %v8196_v19 = vadd.f32 %v8195_v18, %v8194_v13  ;;  %v8197_v21 = vpop.f32.mrb[22].mxu1 }
 0x130   : > { %v8198_v23 = vpop.f32.mrb[23].mxu1 }
 0x131   : > { %v1385_v22 = vadd.f32 %v8141_v16, %v10075_v52  ;;  %v10109_v24 = vadd.f32 %v8196_v19, %v1382_v15  ;;  %v8199_v25 = vadd.f32 %v8198_v23, %v8197_v21 }
 0x133   : > { %v8142_v26 = vpop.f32.mrb[24].mxu0  ;;  %v10111_v27 = vadd.f32 %v8199_v25, %v1385_v22 }
 0x134   : > { %v8143_v28 = vpop.f32.mrb[25].mxu0 }
 0x135   : > { %v8144_v29 = vadd.f32 %v8143_v28, %v8142_v26  ;;  %v8145_v30 = vpop.f32.mrb[26].mxu0  ;;  %v8200_v31 = vpop.f32.mrb[24].mxu1 }
 0x136   : > { %v8146_v32 = vpop.f32.mrb[27].mxu0  ;;  %v8201_v37 = vpop.f32.mrb[25].mxu1 }
 0x137   : > { %v1390_v34 = vadd.f32 %v8144_v29, %v10075_v52  ;;  %v8147_v35 = vadd.f32 %v8146_v32, %v8145_v30  ;;  %v8202_v38 = vadd.f32 %v8201_v37, %v8200_v31  ;;  %v8203_v39 = vpop.f32.mrb[26].mxu1 }
 0x138   : > { %v8204_v41 = vpop.f32.mrb[27].mxu1 }
 0x139   : > { %v1393_v40 = vadd.f32 %v8147_v35, %v10075_v52  ;;  %v10115_v43 = vadd.f32 %v8202_v38, %v1390_v34  ;;  %v8205_v44 = vadd.f32 %v8204_v41, %v8203_v39 }
 0x13b   : > { %v8222_v45 = vpop.f32.mrb[28].mxu0  ;;  %v10117_v46 = vadd.f32 %v8205_v44, %v1393_v40 }
 0x13c   : > { %v8223_v47 = vpop.f32.mrb[29].mxu0 }
 0x13d   : > { %v8224_v48 = vadd.f32 %v8223_v47, %v8222_v45  ;;  %v8225_v49 = vpop.f32.mrb[30].mxu0  ;;  %v1608_v54 = vpop.f32.mrb[28].mxu1 }
 0x13e   : > { %v8226_v53 = vpop.f32.mrb[31].mxu0  ;;  %v1610_v58 = vpop.f32.mrb[29].mxu1 }
 0x13f   : > { %v8227_v56 = vadd.f32 %v8226_v53, %v8225_v49  ;;  %v1520_v57 = vadd.f32 %v8224_v48, %v10079_v1  ;;  %v1611_v59 = vpop.f32.mrb[30].mxu1 }
 0x140   : > { %v1613_v61 = vpop.f32.mrb[31].mxu1 }
 0x141   : > { %v1609_v60 = vadd.f32 %v1608_v54, %v1520_v57  ;;  %v1523_v52 = vadd.f32 %v8227_v56, %v10081_v4 }
 0x143   : > { %v1663_v62 = vmax.f32 %v1609_v60, 0.0  ;;  %v1612_v63 = vadd.f32 %v1611_v59, %v1523_v52  ;;  %v8228_v0 = vpop.f32.mrb[32].mxu0 }
 0x144   : > { %v8229_v2 = vpop.f32.mrb[33].mxu0 }
 0x145   : > { %v8064_v3 = vpack.c.bf16 %v1663_v62, %v1663_v62  ;;  %v1664_v5 = vmax.f32 %v1612_v63, 0.0  ;;  %v8230_v7 = vadd.f32 %v8229_v2, %v8228_v0  ;;  %v8231_v8 = vpop.f32.mrb[34].mxu0  ;;  %v1616_v11 = vpop.f32.mrb[32].mxu1 }
 0x146   : > { %v8232_v10 = vpop.f32.mrb[35].mxu0  ;;  %v1618_v14 = vpop.f32.mrb[33].mxu1 }
 0x147   : > { %1734 = vst.msk [vmem:[#allocation2] sm:$0xf] %vm1733_vm2, %v8064_v3  ;;  %v8065_v1 = vpack.c.bf16 %v1664_v5, %v1664_v5  ;;  %v8233_v12 = vadd.f32 %v8232_v10, %v8231_v8  ;;  %v1528_v13 = vadd.f32 %v8230_v7, %v10085_v17  ;;  %v1619_v4 = vpop.f32.mrb[34].mxu1 }
 0x148   : > { %v1621_v18 = vpop.f32.mrb[35].mxu1 }
 0x149   : > { %1735 = vst.msk [vmem:[#allocation2 + $0x4] sm:$0xf] %vm1733_vm2, %v8065_v1  ;;  %v1617_v15 = vadd.f32 %v1616_v11, %v1528_v13  ;;  %v1531_v16 = vadd.f32 %v8233_v12, %v10087_v20 }
 0x14b   : > { %v1665_v19 = vmax.f32 %v1617_v15, 0.0  ;;  %v1620_v21 = vadd.f32 %v1619_v4, %v1531_v16  ;;  %v8234_v22 = vpop.f32.mrb[36].mxu0 }
 0x14c   : > { %v8235_v23 = vpop.f32.mrb[37].mxu0 }
 0x14d   : > { %v8066_v25 = vpack.c.bf16 %v1665_v19, %v1665_v19  ;;  %v1666_v26 = vmax.f32 %v1620_v21, 0.0  ;;  %v8236_v28 = vadd.f32 %v8235_v23, %v8234_v22  ;;  %v8237_v29 = vpop.f32.mrb[38].mxu0  ;;  %v1624_v31 = vpop.f32.mrb[36].mxu1 }
 0x14e   : > { %v8238_v30 = vpop.f32.mrb[39].mxu0  ;;  %v1626_v35 = vpop.f32.mrb[37].mxu1  ;;  %v1749_v20 = vld [vmem:[#allocation2] sm:$0xf] }
 0x14f   : > { %1736 = vst.msk [vmem:[#allocation2 + $0x8] sm:$0xf] %vm1733_vm2, %v8066_v25  ;;  %v8067_v17 = vpack.c.bf16 %v1666_v26, %v1666_v26  ;;  %v8239_v32 = vadd.f32 %v8238_v30, %v8237_v29  ;;  %v1536_v34 = vadd.f32 %v8236_v28, %v10091_v33  ;;  %v1627_v37 = vpop.f32.mrb[38].mxu1  ;;  %v1937_v49 = vld [vmem:[#allocation2] sm:$0xe] }
 0x150   : > { %v1750_v38 = vld [vmem:[#allocation2 + $0x4] sm:$0xf]  ;;  %v1629_v41 = vpop.f32.mrb[39].mxu1 }
 0x151   : > { %1737 = vst.msk [vmem:[#allocation2 + $0xc] sm:$0xf] %vm1733_vm2, %v8067_v17  ;;  %v1625_v39 = vadd.f32 %v1624_v31, %v1536_v34  ;;  %v1539_v40 = vadd.f32 %v8239_v32, %v10093_v36  ;;  %v10129_v44 = vcombine.low %v1749_v20, %v1750_v38  ;;  %v7362_v54 = vcombine.low %v1937_v49, %v1750_v38  ;;  %v9335_v34 = vld [vmem:[%s11251_s3 + $0x8] sm:$0xff]  }
 0x153   : > { %v1667_v45 = vmax.f32 %v1625_v39, 0.0  ;;  %v1628_v47 = vadd.f32 %v1627_v37, %v1539_v40  ;;  %v8240_v48 = vpop.f32.mrb[40].mxu0  ;;  %v1778_v33 = vshll.u32 %v10129_v44, 16  ;;  %v1949_v5 = vrot.slane %v7362_v54, 1  ;;  %v9338_v39 = vld [vmem:[%s11251_s3 + $0x70] sm:$0xff]  }
 0x154   : > { %v8241_v53 = vpop.f32.mrb[41].mxu0  ;;  %v1776_v7 = vshrl.u32 %v10129_v44, 16 }
 0x155   : > { %v8068_v56 = vpack.c.bf16 %v1667_v45, %v1667_v45  ;;  %v1668_v57 = vmax.f32 %v1628_v47, 0.0  ;;  %v8242_v58 = vadd.f32 %v8241_v53, %v8240_v48  ;;  %v8243_v59 = vpop.f32.mrb[42].mxu0  ;;  %v1632_v52 = vpop.f32.mrb[40].mxu1  ;;  %v1780_v61 = vrot.slane %v1778_v33, 1  ;;  %v9337_v33 = vld [vmem:[%s11251_s3 + $0x10] sm:$0xff]  }
 0x156   : > { %v8244_v60 = vpop.f32.mrb[43].mxu0  ;;  %v1634_v0 = vpop.f32.mrb[41].mxu1  ;;  %v9331_v2 = vld [vmem:[#allocation2 + $0x8] ss:$0 sps:$4 sm:$0x77]  }
 0x157   : > { %1738 = vst.msk [vmem:[#allocation2 + $0x10] sm:$0xf] %vm1733_vm2, %v8068_v56  ;;  %v8069_v36 = vpack.c.bf16 %v1668_v57, %v1668_v57  ;;  %v8245_v62 = vadd.f32 %v8244_v60, %v8243_v59  ;;  %v1544_v63 = vadd.f32 %v8242_v58, %v10097_v42  ;;  %v1635_v3 = vpop.f32.mrb[42].mxu1  ;;  %v2027_v8 = vld [vmem:[#allocation2 + $0x8] sm:$0x8]  ;;  %v1950_v1 = vrot.slane %v9331_v2, 1 }
 0x158   : > { %v1783_v12 = vshll.u32 %v9331_v2, 16  ;;  %v1637_v13 = vpop.f32.mrb[43].mxu1  ;;  %v10137_v14 = vld [vmem:[#allocation2 + $0xc] sm:$0xf]  ;;  %v1781_v42 = vor.u32 %v1780_v61, %v1776_v7  ;;  %v1787_v23 = vshrl.u32 %v9331_v2, 16 }
 0x159   : > { %1739 = vst.msk [vmem:[#allocation2 + $0x14] sm:$0xf] %vm1733_vm2, %v8069_v36  ;;  %v1633_v10 = vadd.f32 %v1632_v52, %v1544_v63  ;;  %v1547_v11 = vadd.f32 %v8245_v62, %v10099_v55  ;;  %v10140_v4 = vcombine.low %v2027_v8, %v10137_v14  ;;  %v1951_v19 = vsel %vm1948_vm3, %v1949_v5, %v1950_v1  ;;  %v9336_v55 = vld [vmem:[%s11251_s3 + $0x68] sm:$0xff]  }
 0x15a   : > { %v1785_v21 = vrot.slane %v1783_v12, 1  ;;  %8596 = vmatprep.mubr.msk.bf16.mxu0 %vm1808_vm4, %v1951_v19  ;;  %v9340_v7 = vld [vmem:[%s11251_s3 + $0x48] sm:$0xff]  }
 0x15b   : > { %v1669_v15 = vmax.f32 %v1633_v10, 0.0  ;;  %v1636_v16 = vadd.f32 %v1635_v3, %v1547_v11  ;;  %v8246_v18 = vpop.f32.mrb[44].mxu0  ;;  %8597 = vmatmul.mubr.msk.bf16.vlgmr.msra.gmra.mrb[56].mxu0 %vm1808_vm4, %v1950_v1  ;;  %v2140_v40 = vshrl.u32 %v10140_v4, 16  ;;  %v2143_v47 = vshll.u32 %v10140_v4, 16 }
 0x15c   : > { %v8247_v22 = vpop.f32.mrb[45].mxu0  ;;  %v1786_v30 = vsel %vm1774_vm5, %v1781_v42, %v1785_v21  ;;  %v1789_v17 = vor.u32 %v1787_v23, %v1785_v21  ;;  %8611 = vmatpush3.bf16.msra.mxu0 %v10068_v51 }
 0x15d   : > { %v8070_v25 = vpack.c.bf16 %v1669_v15, %v1669_v15  ;;  %v1670_v26 = vmax.f32 %v1636_v16, 0.0  ;;  %v8248_v28 = vadd.f32 %v8247_v22, %v8246_v18  ;;  %v8249_v29 = vpop.f32.mrb[46].mxu0  ;;  %8576 = vmatprep.mubr.msk.bf16.mxu1 %vm1808_vm4, %v1786_v30  ;;  %v1640_v32 = vpop.f32.mrb[44].mxu1  ;;  %8612 = vmatprep.subr.bf16.mxu0 %v9336_v55  ;;  %v2142_v60 = vrot.slane %v2140_v40, 3 }
 0x15e   : > { %v8250_v31 = vpop.f32.mrb[47].mxu0  ;;  %v1642_v38 = vpop.f32.mrb[45].mxu1  ;;  %8577 = vmatmul.mubr.msk.bf16.vlgmr.msra.gmra.mrb[56].mxu1 %vm1808_vm4, %v1789_v17  ;;  %v10161_v41 = vld [vmem:[#allocation2 + $0x10] sm:$0xf]  ;;  %v2145_v52 = vrot.slane %v2143_v47, 4 }
 0x15f   : > { %1740 = vst.msk [vmem:[#allocation2 + $0x18] sm:$0xf] %vm1733_vm2, %v8070_v25  ;;  %v8071_v35 = vpack.c.bf16 %v1670_v26, %v1670_v26  ;;  %v8251_v37 = vadd.f32 %v8250_v31, %v8249_v29  ;;  %v1552_v20 = vadd.f32 %v8248_v28, %v10103_v6  ;;  %v1643_v51 = vpop.f32.mrb[46].mxu1  ;;  %8581 = vmatpush3.bf16.msra.mxu1 %v10063_v50  ;;  %v10179_v50 = vld [vmem:[%s11251_s3 + $0x90] sm:$0xff]   ;;  %v2049_v25 = vrot.slane %v10140_v4, 3 }
 0x160   : > { %v10163_v45 = vld [vmem:[#allocation2 + $0x14] sm:$0x3]  ;;  %8586 = vmatprep.mubr.msk.bf16.mxu1 %vm1808_vm4, %v10129_v44  ;;  %v1645_v49 = vpop.f32.mrb[47].mxu1  ;;  %8582 = vmatprep.subr.bf16.mxu1 %v9335_v34  ;;  %v2146_v15 = vor.u32 %v2145_v52, %v2142_v60  ;;  %v9339_v22 = vld [vmem:[#allocation2 + $0x8] ss:$0 sps:$4 sm:$0x33]  }
 0x161   : > { %1741 = vst.msk [vmem:[#allocation2 + $0x1c] sm:$0xf] %vm1733_vm2, %v8071_v35  ;;  %v1641_v6 = vadd.f32 %v1640_v32, %v1552_v20  ;;  %v1555_v48 = vadd.f32 %v8251_v37, %v10105_v9  ;;  %v7387_v53 = vcombine.low %v10161_v41, %v10163_v45  ;;  %v2030_v54 = vld [vmem:[#allocation2 + $0x14] sm:$0x1]  ;;  %8613 = vmatpush3.bf16.msra.mxu0 %v9336_v55  ;;  %v2526_v60 = vld [vmem:[#allocation2 + $0x14] sm:$0x8] }
 0x162   : > { %8614 = vmatprep.subr.bf16.mxu0 %v9338_v39  ;;  %v7375_v61 = vcombine.low %v10161_v41, %v2030_v54  ;;  %v9345_v26 = vld [vmem:[%s11251_s3 + $0x50] sm:$0xff]  }
 0x163   : > { %v1671_v44 = vmax.f32 %v1641_v6, 0.0  ;;  %v1644_v56 = vadd.f32 %v1643_v51, %v1555_v48  ;;  %v8252_v9 = vpop.f32.mrb[48].mxu0  ;;  %v2148_v57 = vshrl.u32 %v7387_v53, 16  ;;  %v2151_v58 = vshll.u32 %v7387_v53, 16  ;;  %8583 = vmatpush3.bf16.msra.mxu1 %v9335_v34  ;;  %v9349_v51 = vld [vmem:[%s11251_s3 + $0x58] sm:$0xff]   ;;  %v9350_v53 = vld [vmem:[%s11251_s3 + $0xa0] sm:$0xff]  }
 0x164   : > { %v8253_v59 = vpop.f32.mrb[49].mxu0  ;;  %8584 = vmatprep.subr.bf16.mxu1 %v9337_v33  ;;  %v10188_v18 = vrot.slane %v7375_v61, 3 }
 0x165   : > { %v8072_v36 = vpack.c.bf16 %v1671_v44, %v1671_v44  ;;  %v1672_v62 = vmax.f32 %v1644_v56, 0.0  ;;  %v8254_v63 = vadd.f32 %v8253_v59, %v8252_v9  ;;  %v8255_v0 = vpop.f32.mrb[50].mxu0  ;;  %v2150_v2 = vrot.slane %v2148_v57, 3  ;;  %8615 = vmatpush3.bf16.msra.mxu0 %v9338_v39  ;;  %v1648_v5 = vpop.f32.mrb[48].mxu1  ;;  %v9351_v56 = vld [vmem:[%s11251_s3 + $0x78] sm:$0xff]   ;;  %v9352_v59 = vld [vmem:[%s11251_s3 + $0xc0] sm:$0xff]  }
 0x166   : > { %v8256_v3 = vpop.f32.mrb[51].mxu0  ;;  %v2153_v8 = vrot.slane %v2151_v58, 4  ;;  %v1650_v12 = vpop.f32.mrb[49].mxu1  ;;  %8630 = vmatprep.subr.bf16.mxu0 %v10179_v50  ;;  %v9347_v13 = vld [vmem:[#allocation2 + $0x14] sm:$0xfc]   ;;  %v2051_v4 = vsel %vm2048_vm6, %v2049_v25, %v10188_v18 }
 0x167   : > { %1742 = vst.msk [vmem:[#allocation2 + $0x20] sm:$0xf] %vm1733_vm2, %v8072_v36  ;;  %v8073_v10 = vpack.c.bf16 %v1672_v62, %v1672_v62  ;;  %v8257_v11 = vadd.f32 %v8256_v3, %v8255_v0  ;;  %v1560_v1 = vadd.f32 %v8254_v63, %v10109_v24  ;;  %v1651_v42 = vpop.f32.mrb[50].mxu1  ;;  %8585 = vmatpush3.bf16.msra.mxu1 %v9337_v33  ;;  %v2334_v28 = vrot.slane %v9347_v13, 2  ;;  %v2413_v44 = vld [vmem:[#allocation2 + $0x18] sm:$0xf] }
 0x168   : > { %v2154_v16 = vor.u32 %v2153_v8, %v2150_v2  ;;  %v10190_v19 = vld [vmem:[#allocation2 + $0x1c] ss:$0 sps:$4 sm:$0xff]   ;;  %v1653_v24 = vpop.f32.mrb[51].mxu1  ;;  %8600 = vmatprep.subr.bf16.mxu1 %v9340_v7  ;;  %v7438_v52 = vcombine.low %v2526_v60, %v2413_v44  ;;  %v2412_v36 = vld [vmem:[#allocation2 + $0x14] sm:$0xc]  ;;  %v9356_v2 = vld [vmem:[%s11251_s3 + $0x80] sm:$0xff]   ;;  %v7399_v3 = vcombine.low %v10137_v14, %v10161_v41 }
 0x169   : > { %1743 = vst.msk [vmem:[#allocation2 + $0x24] sm:$0xf] %vm1733_vm2, %v8073_v10  ;;  %v1649_v21 = vadd.f32 %v1648_v5, %v1560_v1  ;;  %v1563_v55 = vadd.f32 %v8257_v11, %v10111_v27  ;;  %v2335_v29 = vrot.slane %v10190_v19, 2  ;;  %v9346_v27 = vld [vmem:[%s11251_s3 + $0x98] sm:$0xff]   ;;  %v7425_v0 = vcombine.low %v2412_v36, %v2413_v44  ;;  %v9358_v41 = vld [vmem:[%s11251_s3 + $0x88] sm:$0xff]   ;;  %v9359_v11 = vld [vmem:[%s11251_s3 + $0xd0] sm:$0xff]  }
 0x16a   : > { %v2155_v23 = vsel %vm2138_vm7, %v2146_v15, %v2154_v16  ;;  %8587 = vmatmul.mubr.msk.bf16.vlgmr.msra.gmra.mrb[60].mxu1 %vm1808_vm4, %v9339_v22  ;;  %v2537_v5 = vrot.slane %v7438_v52, 3  ;;  %v2649_v13 = vld [vmem:[#allocation2 + $0x14] sm:$0x1]  ;;  %v9360_v19 = vld [vmem:[%s11251_s3 + $0xa8] sm:$0xff]   ;;  %v9361_v22 = vld [vmem:[%s11251_s3] sm:$0xff]  }
 0x16b   : > { %v1673_v30 = vmax.f32 %v1649_v21, 0.0  ;;  %v1652_v31 = vadd.f32 %v1651_v42, %v1563_v55  ;;  %8616 = vmatprep.mubr.msk.bf16.mxu0 %vm1808_vm4, %v2155_v23  ;;  %v8258_v17 = vpop.f32.mrb[52].mxu0  ;;  %v2336_v34 = vsel %vm2333_vm8, %v2334_v28, %v2335_v29  ;;  %8601 = vmatpush3.bf16.msra.mxu1 %v9340_v7  ;;  %v9357_v7 = vld [vmem:[%s11251_s3 + $0xc8] sm:$0xff]   ;;  %v2435_v1 = vshrl.u32 %v7425_v0, 16  ;;  %v10266_v55 = vld [vmem:[#allocation2 + $0x14] sm:$0x3] }
 0x16c   : > { %8617 = vmatmul.mubr.msk.bf16.vlgmr.msra.gmra.mrb[60].mxu0 %vm1808_vm4, %v2154_v16  ;;  %v8259_v32 = vpop.f32.mrb[53].mxu0  ;;  %8606 = vmatprep.mubr.msk.bf16.mxu1 %vm1808_vm4, %v2051_v4  ;;  %v2438_v12 = vshll.u32 %v7425_v0, 16  ;;  %v10258_v16 = vld [vmem:[#allocation2 + $0xc] sm:$0xf]  ;;  %v2646_v25 = vld [vmem:[#allocation2 + $0x8] sm:$0x8] }
 0x16d   : > { %v8074_v35 = vpack.c.bf16 %v1673_v30, %v1673_v30  ;;  %v1674_v37 = vmax.f32 %v1652_v31, 0.0  ;;  %v8260_v20 = vadd.f32 %v8259_v32, %v8258_v17  ;;  %v8261_v38 = vpop.f32.mrb[54].mxu0  ;;  %8631 = vmatpush3.bf16.msra.mxu0 %v10179_v50  ;;  %8602 = vmatprep.subr.bf16.mxu1 %v9345_v26  ;;  %v1656_v40 = vpop.f32.mrb[52].mxu1  ;;  %v2437_v24 = vrot.slane %v2435_v1, 2  ;;  %v9365_v32 = vld [vmem:[%s11251_s3 + $0x8] sm:$0xff]   ;;  %v9376_v52 = vld [vmem:[%s11251_s3 + $0x58] sm:$0xff]  }
 0x16e   : > { %v8262_v39 = vpop.f32.mrb[55].mxu0  ;;  %8632 = vmatprep.subr.bf16.mxu0 %v9346_v27  ;;  %8636 = vmatprep.mubr.msk.bf16.mxu0 %vm1808_vm4, %v2336_v34  ;;  %v1658_v49 = vpop.f32.mrb[53].mxu1  ;;  %v2440_v23 = vrot.slane %v2438_v12, 3  ;;  %v7400_v30 = vcombine.low %v10163_v45, %v10163_v45  ;;  %v9375_v60 = vld [vmem:[%s11251_s3 + $0x28] sm:$0xff]   ;;  %v10321_v36 = vld [vmem:[#allocation2 + $0x1c] sm:$0x1f]  }
 0x16f   : > { %1744 = vst.msk [vmem:[#allocation2 + $0x28] sm:$0xf] %vm1733_vm2, %v8074_v35  ;;  %v8075_v47 = vpack.c.bf16 %v1674_v37, %v1674_v37  ;;  %v8263_v6 = vadd.f32 %v8262_v39, %v8261_v38  ;;  %v1568_v48 = vadd.f32 %v8260_v20, %v10115_v43  ;;  %v1659_v54 = vpop.f32.mrb[54].mxu1  ;;  %8603 = vmatpush3.bf16.msra.mxu1 %v9345_v26  ;;  %v10227_v43 = vld [vmem:[#allocation2 + $0x1c] sm:$0x1f]   ;;  %v9367_v38 = vld [vmem:[%s11251_s3 + $0x10] sm:$0xff]  }
 0x170   : > { %8604 = vmatprep.subr.bf16.mxu1 %v9349_v51  ;;  %v1661_v9 = vpop.f32.mrb[55].mxu1  ;;  %v2538_v62 = vrot.slane %v10227_v43, 3  ;;  %v2443_v8 = vshrl.u32 %v10227_v43, 16  ;;  %v2446_v10 = vshll.u32 %v10227_v43, 16  ;;  %v7454_v26 = vcombine.low %v2646_v25, %v10258_v16  ;;  %v9366_v20 = vld [vmem:[%s11251_s3 + $0xb8] sm:$0xff]   ;;  %v9369_v49 = vld [vmem:[%s11251_s3 + $0x48] sm:$0xff]  }
 0x171   : > { %1745 = vst.msk [vmem:[#allocation2 + $0x2c] sm:$0xf] %vm1733_vm2, %v8075_v47  ;;  %v1657_v33 = vadd.f32 %v1656_v40, %v1568_v48  ;;  %v1571_v50 = vadd.f32 %v8263_v6, %v10117_v46  ;;  %8633 = vmatpush3.bf16.msra.mxu0 %v9346_v27  ;;  %v2441_v17 = vor.u32 %v2440_v23, %v2437_v24  ;;  %v9364_v27 = vld [vmem:[%s11251_s3 + $0xb0] sm:$0xff]   ;;  %v9368_v6 = vld [vmem:[%s11251_s3 + $0x18] sm:$0xff]   ;;  %v9373_v43 = vld [vmem:[%s11251_s3 + $0x20] sm:$0xff]  }
 0x172   : > { %8634 = vmatprep.subr.bf16.mxu0 %v9350_v53  ;;  %v2539_v14 = vsel %vm2048_vm6, %v2537_v5, %v2538_v62  ;;  %v2445_v42 = vrot.slane %v2443_v8, 2  ;;  %v2448_v15 = vrot.slane %v2446_v10, 3  ;;  %v2765_v4 = vrot.slane %v7454_v26, 3  ;;  %v9372_v48 = vld [vmem:[#allocation2 + $0x1c] ss:$0 sps:$4 sm:$0xff]   ;;  %v9384_v1 = vld [vmem:[%s11251_s3 + $0x80] sm:$0xff]  }
 0x173   : > { %v1675_v57 = vmax.f32 %v1657_v33, 0.0  ;;  %v1660_v58 = vadd.f32 %v1659_v54, %v1571_v50  ;;  %8605 = vmatpush3.bf16.msra.mxu1 %v9349_v51  ;;  %v2674_v39 = vshrl.u32 %v7454_v26, 16  ;;  %v2677_v40 = vshll.u32 %v7454_v26, 16  ;;  %v9371_v33 = vld [vmem:[#allocation2 + $0x14] sm:$0xfc]  }
 0x174   : > { %8620 = vmatprep.subr.bf16.mxu1 %v9351_v56  ;;  %v2449_v28 = vor.u32 %v2448_v15, %v2445_v42  ;;  %v2941_v44 = vrot.slane %v9372_v48, 2  ;;  %v2940_v9 = vrot.slane %v9371_v33, 2  ;;  %v3141_v5 = vrot.slane %v10321_v36, 3  ;;  %v9383_v10 = vld [vmem:[%s11251_s3 + $0x38] sm:$0xff]   ;;  %v9394_v33 = vld [vmem:[%s11251_s3 + $0x70] sm:$0xff]  }
 0x175   : > { %v8076_v46 = vpack.c.bf16 %v1675_v57, %v1675_v57  ;;  %v1676_v61 = vmax.f32 %v1660_v58, 0.0  ;;  %8635 = vmatpush3.bf16.msra.mxu0 %v9350_v53  ;;  %v2676_v53 = vrot.slane %v2674_v39, 3  ;;  %v2679_v54 = vrot.slane %v2677_v40, 4  ;;  %v9374_v57 = vld [vmem:[%s11251_s3 + $0x50] sm:$0xff]  }
 0x176   : > { %8650 = vmatprep.subr.bf16.mxu0 %v9352_v59  ;;  %8607 = vmatmul.mubr.msk.bf16.vlgmr.msra.gmra.mrb[64].mxu1 %vm1808_vm4, %v10188_v18  ;;  %v10260_v18 = vld [vmem:[#allocation2 + $0x10] sm:$0xf]  ;;  %v2450_v45 = vsel %vm2433_vm10, %v2441_v17, %v2449_v28  ;;  %v3050_v42 = vshll.u32 %v10321_v36, 16  ;;  %v9389_v17 = vld [vmem:[%s11251_s3 + $0xa8] sm:$0xff]  }
 0x177   : > { %1746 = vst.msk [vmem:[#allocation2 + $0x30] sm:$0xf] %vm1733_vm2, %v8076_v46  ;;  %v8077_v63 = vpack.c.bf16 %v1676_v61, %v1676_v61  ;;  %8621 = vmatpush3.bf16.msra.mxu1 %v9351_v56  ;;  %8626 = vmatprep.mubr.msk.bf16.mxu1 %vm1808_vm4, %v7399_v3  ;;  %v7461_v21 = vcombine.low %v10260_v18, %v2649_v13  ;;  %v3019_v46 = vld [vmem:[#allocation2 + $0x18] sm:$0xf]  ;;  %v9377_v61 = vld [vmem:[%s11251_s3 + $0x30] sm:$0xff]   ;;  %v3047_v13 = vshrl.u32 %v10321_v36, 16 }
 0x178   : > { %8637 = vmatmul.mubr.msk.bf16.vlgmr.msra.gmra.mrb[64].mxu0 %vm1808_vm4, %v2335_v29  ;;  %8622 = vmatprep.subr.bf16.mxu1 %v9356_v2  ;;  %v7455_v29 = vcombine.low %v10260_v18, %v10266_v55  ;;  %v2680_v56 = vor.u32 %v2679_v54, %v2676_v53  ;;  %v3018_v3 = vld [vmem:[#allocation2 + $0x14] sm:$0xc] }
 0x179   : > { %1748 = vst.msk [vmem:[#allocation2 + $0x34] sm:$0x7] %vm1747_vm9, %v8077_v63  ;;  %8651 = vmatpush3.bf16.msra.mxu0 %v9352_v59  ;;  %8656 = vmatprep.mubr.msk.bf16.mxu0 %vm1808_vm4, %v2539_v14  ;;  %v2766_v31 = vrot.slane %v7461_v21, 3  ;;  %v2942_v59 = vsel %vm2333_vm8, %v2940_v9, %v2941_v44  ;;  %v3130_v63 = vld [vmem:[#allocation2 + $0x14] sm:$0x8]  ;;  %v7499_v8 = vcombine.low %v3018_v3, %v3019_v46  ;;  %v9386_v21 = vld [vmem:[%s11251_s3 + $0x88] sm:$0xff]  }
 0x17a   : > { %8652 = vmatprep.subr.bf16.mxu0 %v9357_v7  ;;  %v2682_v34 = vshrl.u32 %v7455_v29, 16  ;;  %v2685_v35 = vshll.u32 %v7455_v29, 16  ;;  %v7512_v0 = vcombine.low %v3130_v63, %v3019_v46  ;;  %v3218_v14 = vld [vmem:[#allocation2 + $0x20] sm:$0xe]  ;;  %v3049_v26 = vrot.slane %v3047_v13, 2 }
 0x17b   : > { %8623 = vmatpush3.bf16.msra.mxu1 %v9356_v2  ;;  %v2767_v37 = vsel %vm2048_vm6, %v2765_v4, %v2766_v31  ;;  %v10326_v2 = vld [vmem:[#allocation2 + $0x24] sm:$0xf]  ;;  %v3042_v24 = vshll.u32 %v7499_v8, 16 }
 0x17c   : > { %8624 = vmatprep.subr.bf16.mxu1 %v9358_v41  ;;  %v2684_v51 = vrot.slane %v2682_v34, 3  ;;  %v2687_v47 = vrot.slane %v2685_v35, 4  ;;  %v10341_v12 = vcombine.low %v3218_v14, %v10326_v2  ;;  %v9388_v29 = vld [vmem:[%s11251_s3 + $0x60] sm:$0xff]  }
 0x17d   : > { %8653 = vmatpush3.bf16.msra.mxu0 %v9357_v7  ;;  %v10329_v7 = vld [vmem:[#allocation2 + $0x28] ss:$0 sps:$4 sm:$0xff]   ;;  %v3044_v4 = vrot.slane %v3042_v24, 3  ;;  %v9403_v14 = vld [vmem:[%s11251_s3 + $0xa0] sm:$0xff]  }
 0x17e   : > { %8654 = vmatprep.subr.bf16.mxu0 %v9359_v11  ;;  %v2688_v50 = vor.u32 %v2687_v47, %v2684_v51  ;;  %v3325_v23 = vshrl.u32 %v10341_v12, 16  ;;  %v3328_v25 = vshll.u32 %v10341_v12, 16  ;;  %v9392_v47 = vld [vmem:[%s11251_s3 + $0x68] sm:$0xff]   ;;  %v3235_v63 = vrot.slane %v10341_v12, 1  ;;  %v9406_v12 = vld [vmem:[%s11251_s3 + $0x30] sm:$0xff]  }
 0x17f   : > { %8625 = vmatpush3.bf16.msra.mxu1 %v9358_v41  ;;  %v7473_v41 = vcombine.low %v10258_v16, %v10260_v18  ;;  %v9385_v16 = vld [vmem:[%s11251_s3 + $0x40] sm:$0xff]   ;;  %v3333_v18 = vshrl.u32 %v10329_v7, 16 }
 0x180   : > { %8640 = vmatprep.subr.bf16.mxu1 %v9360_v19  ;;  %v2689_v58 = vsel %vm2138_vm7, %v2680_v56, %v2688_v50  ;;  %v3330_v34 = vrot.slane %v3328_v25, 2  ;;  %v9395_v56 = vld [vmem:[%s11251_s3 + $0xb8] sm:$0xff]   ;;  %v3812_v24 = vld [vmem:[#allocation2 + $0x20] sm:$0xe] }
 0x181   : > { %8655 = vmatpush3.bf16.msra.mxu0 %v9359_v11  ;;  %v3140_v11 = vrot.slane %v7512_v0, 3  ;;  %v9401_v0 = vld [vmem:[%s11251_s3 + $0x98] sm:$0xff]  }
 0x182   : > { %8670 = vmatprep.subr.bf16.mxu0 %v9361_v22  ;;  %8627 = vmatmul.mubr.msk.bf16.vlgmr.msra.gmra.mrb[68].mxu1 %vm1808_vm4, %v7400_v30  ;;  %v3335_v30 = vrot.slane %v3333_v18, 1  ;;  %v10433_v18 = vld [vmem:[#allocation2 + $0x24] sm:$0xf] }
 0x183   : > { %8641 = vmatpush3.bf16.msra.mxu1 %v9360_v19  ;;  %8646 = vmatprep.mubr.msk.bf16.mxu1 %vm1808_vm4, %v2450_v45  ;;  %v3142_v15 = vsel %vm2048_vm6, %v3140_v11, %v3141_v5  ;;  %v3336_v19 = vshll.u32 %v10329_v7, 16  ;;  %v3327_v45 = vrot.slane %v3325_v23, 1  ;;  %v9405_v11 = vld [vmem:[%s11251_s3 + $0xc0] sm:$0xff]   ;;  %v10446_v25 = vcombine.low %v3812_v24, %v10433_v18 }
 0x184   : > { %8657 = vmatmul.mubr.msk.bf16.vlgmr.msra.gmra.mrb[68].mxu0 %vm1808_vm4, %v2538_v62  ;;  %8642 = vmatprep.subr.bf16.mxu1 %v9364_v27  ;;  %v9378_v62 = vld [vmem:[%s11251_s3 + $0x78] sm:$0xff]  }
 0x185   : > { %8671 = vmatpush3.bf16.msra.mxu0 %v9361_v22  ;;  %8676 = vmatprep.mubr.msk.bf16.mxu0 %vm1808_vm4, %v2767_v37  ;;  %v3039_v22 = vshrl.u32 %v7499_v8, 16  ;;  %v10365_v37 = vld [vmem:[#allocation2 + $0x18] sm:$0xf]  ;;  %v3331_v48 = vor.u32 %v3330_v34, %v3327_v45  ;;  %v9413_v45 = vld [vmem:[%s11251_s3] sm:$0xff]  }
 0x186   : > { %8672 = vmatprep.subr.bf16.mxu0 %v9365_v32 }
 0x187   : > { %8643 = vmatpush3.bf16.msra.mxu1 %v9364_v27  ;;  %v3041_v27 = vrot.slane %v3039_v22, 2 }
 0x188   : > { %8644 = vmatprep.subr.bf16.mxu1 %v9366_v20 }
 0x189   : > { %8673 = vmatpush3.bf16.msra.mxu0 %v9365_v32  ;;  %v3542_v32 = vld [vmem:[#allocation2 + $0x20] sm:$0x1]  ;;  %v3045_v51 = vor.u32 %v3044_v4, %v3041_v27  ;;  %v3918_v27 = vshrl.u32 %v10446_v25, 16  ;;  %v3921_v4 = vshll.u32 %v10446_v25, 16 }
 0x18a   : > { %8674 = vmatprep.subr.bf16.mxu0 %v9367_v38 }
 0x18b   : > { %8645 = vmatpush3.bf16.msra.mxu1 %v9366_v20  ;;  %v10367_v20 = vld [vmem:[#allocation2 + $0x1c] sm:$0xf] }
 0x18c   : > { %8660 = vmatprep.subr.bf16.mxu1 %v9368_v6  ;;  %v10372_v40 = vcombine.low %v10367_v20, %v3542_v32  ;;  %v7572_v32 = vcombine.low %v10367_v20, %v10367_v20 }
 0x18d   : > { %8675 = vmatpush3.bf16.msra.mxu0 %v9367_v38  ;;  %v7474_v38 = vcombine.low %v10266_v55, %v10266_v55  ;;  %v9393_v55 = vld [vmem:[%s11251_s3 + $0xb0] sm:$0xff]  }
 0x18e   : > { %8690 = vmatprep.subr.bf16.mxu0 %v9369_v49  ;;  %8647 = vmatmul.mubr.msk.bf16.vlgmr.msra.gmra.mrb[72].mxu1 %vm1808_vm4, %v2449_v28  ;;  %v3052_v28 = vrot.slane %v3050_v42, 3  ;;  %v3724_v42 = vld [vmem:[#allocation2 + $0x14] sm:$0x8] }
 0x18f   : > { %8661 = vmatpush3.bf16.msra.mxu1 %v9368_v6  ;;  %8666 = vmatprep.mubr.msk.bf16.mxu1 %vm1808_vm4, %v2689_v58  ;;  %v3533_v6 = vld [vmem:[#allocation2 + $0x14] sm:$0xc] }
 0x190   : > { %8677 = vmatmul.mubr.msk.bf16.vlgmr.msra.gmra.mrb[72].mxu0 %vm1808_vm4, %v2766_v31  ;;  %8662 = vmatprep.subr.bf16.mxu1 %v9373_v43  ;;  %v3338_v31 = vrot.slane %v3336_v19, 2  ;;  %v3053_v35 = vor.u32 %v3052_v28, %v3049_v26  ;;  %v9396_v58 = vld [vmem:[%s11251_s3 + $0x90] sm:$0xff]   ;;  %v3735_v19 = vrot.slane %v10372_v40, 3 }
 0x191   : > { %8691 = vmatpush3.bf16.msra.mxu0 %v9369_v49  ;;  %8696 = vmatprep.mubr.msk.bf16.mxu0 %vm1808_vm4, %v2942_v59  ;;  %v10382_v49 = vcombine.low %v3533_v6, %v10365_v37 }
 0x192   : > { %8692 = vmatprep.subr.bf16.mxu0 %v9374_v57  ;;  %v3339_v39 = vor.u32 %v3338_v31, %v3335_v30  ;;  %v3054_v53 = vsel %vm2433_vm10, %v3045_v51, %v3053_v35 }
 0x193   : > { %8663 = vmatpush3.bf16.msra.mxu1 %v9373_v43  ;;  %v3560_v43 = vshrl.u32 %v10382_v49, 16  ;;  %v3563_v9 = vshll.u32 %v10382_v49, 16  ;;  %v3649_v51 = vrot.slane %v10382_v49, 2 }
 0x194   : > { %8664 = vmatprep.subr.bf16.mxu1 %v9375_v60  ;;  %v3340_v54 = vsel %vm3323_vm11, %v3331_v48, %v3339_v39  ;;  %v9419_v48 = vld [vmem:[%s11251_s3 + $0x68] sm:$0xff]  }
 0x195   : > { %8693 = vmatpush3.bf16.msra.mxu0 %v9374_v57  ;;  %v9398_v57 = vld [vmem:[#allocation2 + $0x28] ss:$0 sps:$4 sm:$0x77]   ;;  %v3562_v46 = vrot.slane %v3560_v43, 2  ;;  %v4098_v43 = vld [vmem:[#allocation2 + $0x30] sm:$0xf] }
 0x196   : > { %8694 = vmatprep.subr.bf16.mxu0 %v9376_v52  ;;  %v3236_v36 = vrot.slane %v9398_v57, 1  ;;  %v9426_v57 = vld [vmem:[%s11251_s3 + $0x50] sm:$0xff]  }
 0x197   : > { %8665 = vmatpush3.bf16.msra.mxu1 %v9375_v60 }
 0x198   : > { %8680 = vmatprep.subr.bf16.mxu1 %v9377_v61  ;;  %v3237_v8 = vsel %vm1948_vm3, %v3235_v63, %v3236_v36  ;;  %v4009_v63 = vld [vmem:[#allocation2 + $0x20] sm:$0xc] }
 0x199   : > { %8695 = vmatpush3.bf16.msra.mxu0 %v9376_v52  ;;  %v9397_v52 = vld [vmem:[%s11251_s3 + $0x18] sm:$0xff]  }
 0x19a   : > { %8710 = vmatprep.subr.bf16.mxu0 %v9378_v62  ;;  %8667 = vmatmul.mubr.msk.bf16.vlgmr.msra.gmra.mrb[76].mxu1 %vm1808_vm4, %v2688_v50  ;;  %v3568_v50 = vshrl.u32 %v10372_v40, 16 }
 0x19b   : > { %8681 = vmatpush3.bf16.msra.mxu1 %v9377_v61  ;;  %8686 = vmatprep.mubr.msk.bf16.mxu1 %vm1808_vm4, %v7473_v41  ;;  %v3565_v61 = vrot.slane %v3563_v9, 3  ;;  %v9404_v41 = vld [vmem:[%s11251_s3 + $0x28] sm:$0xff]   ;;  %v3829_v9 = vrot.slane %v10446_v25, 1  ;;  %v9441_v25 = vld [vmem:[%s11251_s3 + $0xb0] sm:$0xff]  }
 0x19c   : > { %8697 = vmatmul.mubr.msk.bf16.vlgmr.msra.gmra.mrb[76].mxu0 %vm1808_vm4, %v2941_v44  ;;  %8682 = vmatprep.subr.bf16.mxu1 %v9383_v10  ;;  %v3571_v44 = vshll.u32 %v10372_v40, 16  ;;  %v3570_v59 = vrot.slane %v3568_v50, 2  ;;  %v3650_v40 = vrot.slane %v7572_v32, 2  ;;  %v9422_v50 = vld [vmem:[%s11251_s3 + $0x48] sm:$0xff]  }
 0x19d   : > { %8711 = vmatpush3.bf16.msra.mxu0 %v9378_v62  ;;  %8716 = vmatprep.mubr.msk.bf16.mxu0 %vm1808_vm4, %v3142_v15  ;;  %v3566_v3 = vor.u32 %v3565_v61, %v3562_v46  ;;  %v7584_v15 = vcombine.low %v3724_v42, %v10365_v37  ;;  %v9414_v37 = vld [vmem:[%s11251_s3 + $0x60] sm:$0xff]   ;;  %v9428_v46 = vld [vmem:[%s11251_s3 + $0x58] sm:$0xff]  }
 0x19e   : > { %8712 = vmatprep.subr.bf16.mxu0 %v9384_v1  ;;  %v3573_v60 = vrot.slane %v3571_v44, 3  ;;  %v9423_v44 = vld [vmem:[%s11251_s3 + $0x90] sm:$0xff]   ;;  %v9429_v61 = vld [vmem:[%s11251_s3 + $0xa0] sm:$0xff]  }
 0x19f   : > { %8683 = vmatpush3.bf16.msra.mxu1 %v9383_v10  ;;  %v3734_v23 = vrot.slane %v7584_v15, 3 }
 0x1a0   : > { %8684 = vmatprep.subr.bf16.mxu1 %v9385_v16  ;;  %v3574_v62 = vor.u32 %v3573_v60, %v3570_v59  ;;  %v9427_v59 = vld [vmem:[%s11251_s3 + $0x98] sm:$0xff]  }
 0x1a1   : > { %8713 = vmatpush3.bf16.msra.mxu0 %v9384_v1  ;;  %v3416_v1 = vld [vmem:[#allocation2 + $0x20] sm:$0xc]  ;;  %v3736_v28 = vsel %vm2048_vm6, %v3734_v23, %v3735_v19 }
 0x1a2   : > { %8714 = vmatprep.subr.bf16.mxu0 %v9386_v21  ;;  %v3575_v10 = vsel %vm2433_vm10, %v3566_v3, %v3574_v62  ;;  %v7549_v13 = vcombine.low %v3416_v1, %v10326_v2  ;;  %v9409_v2 = vld [vmem:[%s11251_s3 + $0xc8] sm:$0xff]  }
 0x1a3   : > { %8685 = vmatpush3.bf16.msra.mxu1 %v9385_v16  ;;  %v3427_v16 = vrot.slane %v10329_v7, 2  ;;  %v9410_v7 = vld [vmem:[%s11251_s3 + $0x38] sm:$0xff]  }
 0x1a4   : > { %8700 = vmatprep.subr.bf16.mxu1 %v9388_v29  ;;  %v3426_v22 = vrot.slane %v7549_v13, 2  ;;  %v9437_v13 = vld [vmem:[%s11251_s3 + $0xc8] sm:$0xff]  }
 0x1a5   : > { %8715 = vmatpush3.bf16.msra.mxu0 %v9386_v21  ;;  %v10436_v21 = vld [vmem:[#allocation2 + $0x28] ss:$0 sps:$4 sm:$0xff]  }
 0x1a6   : > { %8730 = vmatprep.subr.bf16.mxu0 %v9389_v17  ;;  %8687 = vmatmul.mubr.msk.bf16.vlgmr.msra.gmra.mrb[80].mxu1 %vm1808_vm4, %v7474_v38  ;;  %v3428_v26 = vsel %vm2333_vm8, %v3426_v22, %v3427_v16  ;;  %v3926_v30 = vshrl.u32 %v10436_v21, 16  ;;  %v3929_v31 = vshll.u32 %v10436_v21, 16  ;;  %v3920_v38 = vrot.slane %v3918_v27, 1 }
 0x1a7   : > { %8701 = vmatpush3.bf16.msra.mxu1 %v9388_v29  ;;  %8706 = vmatprep.mubr.msk.bf16.mxu1 %vm1808_vm4, %v3054_v53  ;;  %v9411_v29 = vld [vmem:[%s11251_s3 + $0xd0] sm:$0xff]  }
 0x1a8   : > { %8717 = vmatmul.mubr.msk.bf16.vlgmr.msra.gmra.mrb[80].mxu0 %vm1808_vm4, %v3141_v5  ;;  %8702 = vmatprep.subr.bf16.mxu1 %v9392_v47  ;;  %v9402_v5 = vld [vmem:[%s11251_s3 + $0x20] sm:$0xff]   ;;  %v3928_v34 = vrot.slane %v3926_v30, 1  ;;  %v9420_v53 = vld [vmem:[%s11251_s3 + $0x10] sm:$0xff]   ;;  %v9442_v30 = vld [vmem:[%s11251_s3 + $0xb8] sm:$0xff]  }
 0x1a9   : > { %8731 = vmatpush3.bf16.msra.mxu0 %v9389_v17  ;;  %8736 = vmatprep.mubr.msk.bf16.mxu0 %vm1808_vm4, %v3340_v54  ;;  %v9412_v17 = vld [vmem:[%s11251_s3 + $0x40] sm:$0xff]   ;;  %v9421_v54 = vld [vmem:[%s11251_s3 + $0x70] sm:$0xff]  }
 0x1aa   : > { %8732 = vmatprep.subr.bf16.mxu0 %v9393_v55 }
 0x1ab   : > { %8703 = vmatpush3.bf16.msra.mxu1 %v9392_v47  ;;  %v9418_v47 = vld [vmem:[%s11251_s3 + $0x8] sm:$0xff]  }
 0x1ac   : > { %8704 = vmatprep.subr.bf16.mxu1 %v9394_v33 }
 0x1ad   : > { %8733 = vmatpush3.bf16.msra.mxu0 %v9393_v55  ;;  %v3651_v55 = vsel %vm2333_vm8, %v3649_v51, %v3650_v40 }
 0x1ae   : > { %8734 = vmatprep.subr.bf16.mxu0 %v9395_v56 }
 0x1af   : > { %8705 = vmatpush3.bf16.msra.mxu1 %v9394_v33  ;;  %v9424_v33 = vld [vmem:[#allocation2 + $0x28] ss:$0 sps:$4 sm:$0x77]  }
 0x1b0   : > { %8720 = vmatprep.subr.bf16.mxu1 %v9396_v58 }
 0x1b1   : > { %8735 = vmatpush3.bf16.msra.mxu0 %v9395_v56  ;;  %v3830_v56 = vrot.slane %v9424_v33, 1 }
 0x1b2   : > { %8750 = vmatprep.subr.bf16.mxu0 %v9397_v52  ;;  %8707 = vmatmul.mubr.msk.bf16.vlgmr.msra.gmra.mrb[84].mxu1 %vm1808_vm4, %v3053_v35  ;;  %v3931_v35 = vrot.slane %v3929_v31, 2  ;;  %v9446_v31 = vld [vmem:[%s11253_s5 + $0x10] sm:$0xff]  }
 0x1b3   : > { %8721 = vmatpush3.bf16.msra.mxu1 %v9396_v58  ;;  %8726 = vmatprep.mubr.msk.bf16.mxu1 %vm1808_vm4, %v3237_v8  ;;  %v4097_v58 = vld [vmem:[#allocation2 + $0x2c] sm:$0xf]  ;;  %v3831_v60 = vsel %vm1948_vm3, %v3829_v9, %v3830_v56  ;;  %v7621_v8 = vcombine.low %v4009_v63, %v10433_v18 }
 0x1b4   : > { %8737 = vmatmul.mubr.msk.bf16.vlgmr.msra.gmra.mrb[84].mxu0 %vm1808_vm4, %v3339_v39  ;;  %8722 = vmatprep.subr.bf16.mxu1 %v9401_v0  ;;  %v3923_v39 = vrot.slane %v3921_v4, 2  ;;  %v3932_v20 = vor.u32 %v3931_v35, %v3928_v34  ;;  %v9438_v18 = vld [vmem:[%s11251_s3 + $0x88] sm:$0xff]   ;;  %v9448_v4 = vld [vmem:[%s11253_s5 + $0x18] sm:$0xff]   ;;  %v9449_v34 = vld [vmem:[%s11253_s5 + $0x30] sm:$0xff]  }
 0x1b5   : > { %8751 = vmatpush3.bf16.msra.mxu0 %v9397_v52  ;;  %8756 = vmatprep.mubr.msk.bf16.mxu0 %vm1808_vm4, %v3575_v10  ;;  %v7633_v52 = vcombine.low %v4097_v58, %v4098_v43  ;;  %v4020_v10 = vrot.slane %v10436_v21, 2  ;;  %v4019_v1 = vrot.slane %v7621_v8, 2  ;;  %v9452_v35 = vld [vmem:[%s11253_s5 + $0x38] sm:$0xff]  }
 0x1b6   : > { %8752 = vmatprep.subr.bf16.mxu0 %v9402_v5  ;;  %v3924_v6 = vor.u32 %v3923_v39, %v3920_v38  ;;  %v10592_v38 = vld [vmem:[%s11253_s5 + $0x60] sm:$0xff]  }
 0x1b7   : > { %8723 = vmatpush3.bf16.msra.mxu1 %v9401_v0  ;;  %v10517_v0 = vld [vmem:[#allocation2 + $0x34] ss:$0 sps:$4 sm:$0x77]   ;;  %v4021_v42 = vsel %vm2333_vm8, %v4019_v1, %v4020_v10  ;;  %v4201_v15 = vshll.u32 %v7633_v52, 16  ;;  %v4199_v24 = vshrl.u32 %v7633_v52, 16 }
 0x1b8   : > { %8724 = vmatprep.subr.bf16.mxu1 %v9403_v14  ;;  %v3933_v49 = vsel %vm3323_vm11, %v3924_v6, %v3932_v20  ;;  %v4206_v22 = vshll.u32 %v10517_v0, 16  ;;  %v4210_v27 = vshrl.u32 %v10517_v0, 16 }
 0x1b9   : > { %8753 = vmatpush3.bf16.msra.mxu0 %v9402_v5  ;;  %v9432_v5 = vld [vmem:[%s11251_s3 + $0xc0] sm:$0xff]   ;;  %v4203_v21 = vrot.slane %v4201_v15, 1 }
 0x1ba   : > { %8754 = vmatprep.subr.bf16.mxu0 %v9404_v41 }
 0x1bb   : > { %8725 = vmatpush3.bf16.msra.mxu1 %v9403_v14  ;;  %v4204_v23 = vor.u32 %v4203_v21, %v4199_v24 }
 0x1bc   : > { %8740 = vmatprep.subr.bf16.mxu1 %v9405_v11 }
 0x1bd   : > { %8755 = vmatpush3.bf16.msra.mxu0 %v9404_v41  ;;  %v4299_v41 = vrot.slane %v10517_v0, 1 }
 0x1be   : > { %8770 = vmatprep.subr.bf16.mxu0 %v9406_v12  ;;  %8727 = vmatmul.mubr.msk.bf16.vlgmr.msra.gmra.mrb[88].mxu1 %vm1808_vm4, %v3236_v36  ;;  %v4288_v36 = vld [vmem:[#allocation2 + $0x2c] sm:$0xe] }
 0x1bf   : > { %8741 = vmatpush3.bf16.msra.mxu1 %v9405_v11  ;;  %8746 = vmatprep.mubr.msk.bf16.mxu1 %vm1808_vm4, %v3428_v26  ;;  %v7658_v3 = vcombine.low %v4288_v36, %v4098_v43  ;;  %v9431_v11 = vld [vmem:[#allocation2 + $0x34] ss:$0 sps:$4 sm:$0x33]  }
 0x1c0   : > { %8757 = vmatmul.mubr.msk.bf16.vlgmr.msra.gmra.mrb[88].mxu0 %vm1808_vm4, %v3574_v62  ;;  %8742 = vmatprep.subr.bf16.mxu1 %v9409_v2  ;;  %v9430_v62 = vld [vmem:[%s11251_s3 + $0x78] sm:$0xff]  }
 0x1c1   : > { %8771 = vmatpush3.bf16.msra.mxu0 %v9406_v12  ;;  %8776 = vmatprep.mubr.msk.bf16.mxu0 %vm1808_vm4, %v3736_v28  ;;  %v4298_v14 = vrot.slane %v7658_v3, 1  ;;  %v9436_v12 = vld [vmem:[%s11251_s3 + $0x80] sm:$0xff]  }
 0x1c2   : > { %8772 = vmatprep.subr.bf16.mxu0 %v9410_v7  ;;  %v9443_v28 = vld [vmem:[%s11253_s5] sm:$0xff]  }
 0x1c3   : > { %8743 = vmatpush3.bf16.msra.mxu1 %v9409_v2  ;;  %v9440_v2 = vld [vmem:[%s11251_s3 + $0xa8] sm:$0xff]  }
 0x1c4   : > { %8744 = vmatprep.subr.bf16.mxu1 %v9411_v29 }
 0x1c5   : > { %8773 = vmatpush3.bf16.msra.mxu0 %v9410_v7  ;;  %v4208_v7 = vrot.slane %v4206_v22, 1 }
 0x1c6   : > { %8774 = vmatprep.subr.bf16.mxu0 %v9412_v17 }
 0x1c7   : > { %8745 = vmatpush3.bf16.msra.mxu1 %v9411_v29  ;;  %v4209_v26 = vsel %vm1774_vm5, %v4204_v23, %v4208_v7  ;;  %v9444_v29 = vld [vmem:[%s11253_s5 + $0x8] sm:$0xff]   ;;  %v4212_v32 = vor.u32 %v4210_v27, %v4208_v7 }
 0x1c8   : > { %8760 = vmatprep.subr.bf16.mxu1 %v9413_v45 }
 0x1c9   : > { %8775 = vmatpush3.bf16.msra.mxu0 %v9412_v17  ;;  %v9445_v17 = vld [vmem:[%s11253_s5 + $0x20] sm:$0xff]  }
 0x1ca   : > { %8790 = vmatprep.subr.bf16.mxu0 %v9414_v37  ;;  %8747 = vmatmul.mubr.msk.bf16.vlgmr.msra.gmra.mrb[92].mxu1 %vm1808_vm4, %v3427_v16  ;;  %v4300_v16 = vsel %vm1948_vm3, %v4298_v14, %v4299_v41 }
 0x1cb   : > { %8761 = vmatpush3.bf16.msra.mxu1 %v9413_v45  ;;  %8766 = vmatprep.mubr.msk.bf16.mxu1 %vm1808_vm4, %v3651_v55  ;;  %v9447_v45 = vld [vmem:[%s11253_s5 + $0x28] sm:$0xff]  }
 0x1cc   : > { %8777 = vmatmul.mubr.msk.bf16.vlgmr.msra.gmra.mrb[92].mxu0 %vm1808_vm4, %v3735_v19  ;;  %8762 = vmatprep.subr.bf16.mxu1 %v9418_v47  ;;  %v9439_v19 = vld [vmem:[%s11251_s3 + $0xd0] sm:$0xff]  }
 0x1cd   : > { %8791 = vmatpush3.bf16.msra.mxu0 %v9414_v37  ;;  %8796 = vmatprep.mubr.msk.bf16.mxu0 %vm1808_vm4, %v3933_v49  ;;  %v10586_v37 = vld [vmem:[%s11253_s5 + $0x40] sm:$0xff]  }
 0x1ce   : > { %8792 = vmatprep.subr.bf16.mxu0 %v9419_v48 }
 0x1cf   : > { %8763 = vmatpush3.bf16.msra.mxu1 %v9418_v47 }
 0x1d0   : > { %8764 = vmatprep.subr.bf16.mxu1 %v9420_v53 }
 0x1d1   : > { %8793 = vmatpush3.bf16.msra.mxu0 %v9419_v48 }
 0x1d2   : > { %8794 = vmatprep.subr.bf16.mxu0 %v9421_v54 }
 0x1d3   : > { %8765 = vmatpush3.bf16.msra.mxu1 %v9420_v53 }
 0x1d4   : > { %8780 = vmatprep.subr.bf16.mxu1 %v9422_v50 }
 0x1d5   : > { %8795 = vmatpush3.bf16.msra.mxu0 %v9421_v54 }
 0x1d6   : > { %8810 = vmatprep.subr.bf16.mxu0 %v9423_v44  ;;  %8767 = vmatmul.mubr.msk.bf16.vlgmr.msra.gmra.mrb[96].mxu1 %vm1808_vm4, %v3650_v40 }
 0x1d7   : > { %8781 = vmatpush3.bf16.msra.mxu1 %v9422_v50  ;;  %8786 = vmatprep.mubr.msk.bf16.mxu1 %vm1808_vm4, %v3831_v60 }
 0x1d8   : > { %8797 = vmatmul.mubr.msk.bf16.vlgmr.msra.gmra.mrb[96].mxu0 %vm1808_vm4, %v3932_v20  ;;  %8782 = vmatprep.subr.bf16.mxu1 %v9426_v57 }
 0x1d9   : > { %8811 = vmatpush3.bf16.msra.mxu0 %v9423_v44  ;;  %8816 = vmatprep.mubr.msk.bf16.mxu0 %vm1808_vm4, %v7633_v52 }
 0x1da   : > { %8812 = vmatprep.subr.bf16.mxu0 %v9427_v59 }
 0x1db   : > { %8783 = vmatpush3.bf16.msra.mxu1 %v9426_v57 }
 0x1dc   : > { %8784 = vmatprep.subr.bf16.mxu1 %v9428_v46 }
 0x1dd   : > { %8813 = vmatpush3.bf16.msra.mxu0 %v9427_v59 }
 0x1de   : > { %8814 = vmatprep.subr.bf16.mxu0 %v9429_v61 }
 0x1df   : > { %8785 = vmatpush3.bf16.msra.mxu1 %v9428_v46 }
 0x1e0   : > { %8800 = vmatprep.subr.bf16.mxu1 %v9430_v62 }
 0x1e1   : > { %8815 = vmatpush3.bf16.msra.mxu0 %v9429_v61 }
 0x1e2   : > { %8830 = vmatprep.subr.bf16.mxu0 %v9432_v5  ;;  %8787 = vmatmul.mubr.msk.bf16.vlgmr.msra.gmra.mrb[100].mxu1 %vm1808_vm4, %v3830_v56 }
 0x1e3   : > { %8801 = vmatpush3.bf16.msra.mxu1 %v9430_v62  ;;  %8806 = vmatprep.mubr.msk.bf16.mxu1 %vm1808_vm4, %v4021_v42 }
 0x1e4   : > { %8817 = vmatmul.mubr.msk.bf16.vlgmr.msra.gmra.mrb[100].mxu0 %vm1808_vm4, %v9431_v11  ;;  %8802 = vmatprep.subr.bf16.mxu1 %v9436_v12 }
 0x1e5   : > { %8831 = vmatpush3.bf16.msra.mxu0 %v9432_v5  ;;  %8836 = vmatprep.mubr.msk.bf16.mxu0 %vm1808_vm4, %v4300_v16 }
 0x1e6   : > { %8832 = vmatprep.subr.bf16.mxu0 %v9437_v13 }
 0x1e7   : > { %8803 = vmatpush3.bf16.msra.mxu1 %v9436_v12 }
 0x1e8   : > { %8804 = vmatprep.subr.bf16.mxu1 %v9438_v18 }
 0x1e9   : > { %8833 = vmatpush3.bf16.msra.mxu0 %v9437_v13 }
 0x1ea   : > { %8834 = vmatprep.subr.bf16.mxu0 %v9439_v19 }
 0x1eb   : > { %8805 = vmatpush3.bf16.msra.mxu1 %v9438_v18 }
 0x1ec   : > { %8820 = vmatprep.subr.bf16.mxu1 %v9440_v2 }
 0x1ed   : > { %8835 = vmatpush3.bf16.msra.mxu0 %v9439_v19 }
 0x1ee   : > { %8807 = vmatmul.mubr.msk.bf16.vlgmr.msra.gmra.mrb[104].mxu1 %vm1808_vm4, %v4020_v10  ;;  %8852 = vmatprep.subr.bf16.mxu0 %v9443_v28 }
 0x1ef   : > { %8821 = vmatpush3.bf16.msra.mxu1 %v9440_v2  ;;  %8826 = vmatprep.mubr.msk.bf16.mxu1 %vm1808_vm4, %v4209_v26 }
 0x1f0   : > { %8837 = vmatmul.mubr.msk.bf16.vlgmr.msra.gmra.mrb[104].mxu0 %vm1808_vm4, %v4299_v41  ;;  %8822 = vmatprep.subr.bf16.mxu1 %v9441_v25 }
 0x1f1   : > { %8853 = vmatpush3.bf16.msra.mxu0 %v9443_v28 }
 0x1f2   : > { %8854 = vmatprep.subr.bf16.mxu0 %v9444_v29 }
 0x1f3   : > { %8823 = vmatpush3.bf16.msra.mxu1 %v9441_v25 }
 0x1f4   : > { %8824 = vmatprep.subr.bf16.mxu1 %v9442_v30 }
 0x1f5   : > { %8855 = vmatpush3.bf16.msra.mxu0 %v9444_v29 }
 0x1f6   : > { %8856 = vmatprep.subr.bf16.mxu0 %v9446_v31 }
 0x1f7   : > { %8825 = vmatpush3.bf16.msra.mxu1 %v9442_v30 }
 0x1f8   : > { %8840 = vmatprep.subr.bf16.mxu1 %v9445_v17 }
 0x1f9   : > { %8857 = vmatpush3.bf16.msra.mxu0 %v9446_v31  ;;  %v10598_v31 = vld [vmem:[%s11252_s4] ss:$0 sm:$0xff] }
 0x1fa   : > { %8827 = vmatmul.mubr.msk.bf16.vlgmr.msra.gmra.mrb[108].mxu1 %vm1808_vm4, %v4212_v32  ;;  %8858 = vmatprep.subr.bf16.mxu0 %v9448_v4 }
 0x1fb   : > { %8841 = vmatpush3.bf16.msra.mxu1 %v9445_v17 }
 0x1fc   : > { %8842 = vmatprep.subr.bf16.mxu1 %v9447_v45 }
 0x1fd   : > { %8859 = vmatpush3.bf16.msra.mxu0 %v9448_v4 }
 0x1fe   : > { %8876 = vmatprep.subr.bf16.mxu0 %v10592_v38 }
 0x1ff   : > { %8843 = vmatpush3.bf16.msra.mxu1 %v9447_v45 }
 0x200   : > { %8844 = vmatprep.subr.bf16.mxu1 %v9449_v34 }
 0x203   : > { %8845 = vmatpush3.bf16.msra.mxu1 %v9449_v34 }
 0x204   : > { %8846 = vmatprep.subr.bf16.mxu1 %v9452_v35 }
 0x207   : > { %8847 = vmatpush3.bf16.msra.mxu1 %v9452_v35 }
 0x208   : > { %8864 = vmatprep.subr.bf16.mxu1 %v10586_v37 }
 0x22e   : > { %v8598_v39 = vpop.f32.mrb[56].mxu0 }
 0x22f   : > { %v2010_v40 = vpop.f32.mrb[57].mxu0 }
 0x230   : > { %v8599_v20 = vpop.f32.mrb[58].mxu0 }
 0x231   : > { %v8578_v51 = vpop.f32.mrb[56].mxu1  ;;  %v2013_v47 = vpop.f32.mrb[59].mxu0 }
 0x232   : > { %v1849_v6 = vpop.f32.mrb[57].mxu1 }
 0x233   : > { %v8579_v48 = vpop.f32.mrb[58].mxu1 }
 0x234   : > { %v1852_v55 = vpop.f32.mrb[59].mxu1 }
 0x23d   : > { %v8588_v49 = vpop.f32.mrb[60].mxu1 }
 0x23e   : > { %v1932_v54 = vadd.f32 %v8588_v49, %v8578_v51  ;;  %v1923_v33 = vpop.f32.mrb[61].mxu1 }
 0x23f   : > { %v8618_v53 = vpop.f32.mrb[60].mxu0  ;;  %v1924_v44 = vadd.f32 %v1923_v33, %v1849_v6  ;;  %v8589_v56 = vpop.f32.mrb[62].mxu1 }
 0x240   : > { %v2214_v50 = vpop.f32.mrb[61].mxu0  ;;  %v1926_v9 = vpop.f32.mrb[63].mxu1  ;;  %v2026_v58 = vadd.f32 %v8598_v39, %v1932_v54 }
 0x241   : > { %v8619_v43 = vpop.f32.mrb[62].mxu0  ;;  %v1927_v59 = vadd.f32 %v1926_v9, %v1852_v55  ;;  %v2024_v60 = vadd.f32 %v2010_v40, %v1924_v44 }
 0x242   : > { %v2217_v57 = vpop.f32.mrb[63].mxu0 }
 0x243   : > { %v2025_v52 = vadd.f32 %v2013_v47, %v1927_v59 }
 0x249   : > { %v8608_v46 = vpop.f32.mrb[64].mxu1 }
 0x24a   : > { %v2126_v61 = vadd.f32 %v8608_v46, %v2026_v58  ;;  %v2110_v62 = vpop.f32.mrb[65].mxu1 }
 0x24b   : > { %v8638_v36 = vpop.f32.mrb[64].mxu0  ;;  %v2124_v63 = vadd.f32 %v2110_v62, %v2024_v60  ;;  %v8609_v3 = vpop.f32.mrb[66].mxu1 }
 0x24c   : > { %v2395_v0 = vpop.f32.mrb[65].mxu0  ;;  %v2113_v8 = vpop.f32.mrb[67].mxu1  ;;  %v2230_v10 = vadd.f32 %v8618_v53, %v2126_v61 }
 0x24d   : > { %v8639_v5 = vpop.f32.mrb[66].mxu0  ;;  %v2125_v14 = vadd.f32 %v2113_v8, %v2025_v52  ;;  %v2228_v11 = vadd.f32 %v2214_v50, %v2124_v63  ;;  %v9460_v8 = vld [vmem:[%s11253_s5 + $0x68] sm:$0xff]  }
 0x24e   : > { %v2398_v41 = vpop.f32.mrb[67].mxu0 }
 0x24f   : > { %v2229_v1 = vadd.f32 %v2217_v57, %v2125_v14 }
 0x255   : > { %v8628_v12 = vpop.f32.mrb[68].mxu1 }
 0x256   : > { %v2314_v13 = vadd.f32 %v8628_v12, %v2230_v10  ;;  %v2298_v15 = vpop.f32.mrb[69].mxu1 }
 0x257   : > { %v8658_v42 = vpop.f32.mrb[68].mxu0  ;;  %v2312_v16 = vadd.f32 %v2298_v15, %v2228_v11  ;;  %v8629_v19 = vpop.f32.mrb[70].mxu1 }
 0x258   : > { %v2598_v18 = vpop.f32.mrb[69].mxu0  ;;  %v2301_v22 = vpop.f32.mrb[71].mxu1  ;;  %v2411_v2 = vadd.f32 %v8638_v36, %v2314_v13 }
 0x259   : > { %v8659_v21 = vpop.f32.mrb[70].mxu0  ;;  %v2313_v24 = vadd.f32 %v2301_v22, %v2229_v1  ;;  %v2409_v7 = vadd.f32 %v2395_v0, %v2312_v16 }
 0x25a   : > { %v2601_v23 = vpop.f32.mrb[71].mxu0 }
 0x25b   : > { %v2410_v25 = vadd.f32 %v2398_v41, %v2313_v24 }
 0x261   : > { %v8648_v26 = vpop.f32.mrb[72].mxu1 }
 0x262   : > { %v2525_v28 = vadd.f32 %v8648_v26, %v2411_v2  ;;  %v2509_v30 = vpop.f32.mrb[73].mxu1 }
 0x263   : > { %v8678_v29 = vpop.f32.mrb[72].mxu0  ;;  %v2523_v17 = vadd.f32 %v2509_v30, %v2409_v7  ;;  %v8649_v4 = vpop.f32.mrb[74].mxu1 }
 0x264   : > { %v2826_v27 = vpop.f32.mrb[73].mxu0  ;;  %v2614_v32 = vadd.f32 %v8658_v42, %v2525_v28  ;;  %v2512_v34 = vpop.f32.mrb[75].mxu1 }
 0x265   : > { %v8679_v45 = vpop.f32.mrb[74].mxu0  ;;  %v2612_v35 = vadd.f32 %v2598_v18, %v2523_v17  ;;  %v2524_v39 = vadd.f32 %v2512_v34, %v2410_v25  ;;  %v9457_v34 = vld [vmem:[%s11253_s5 + $0x50] sm:$0xff]  }
 0x266   : > { %v2829_v40 = vpop.f32.mrb[75].mxu0  ;;  %v2624_v20 = vadd.f32 %v10598_v31, %v2614_v32  ;;  %v9463_v32 = vld [vmem:[%s11253_s5 + $0x78] sm:$0xff]  }
 0x267   : > { %v2622_v51 = vadd.f32 %v10598_v31, %v2612_v35  ;;  %v2613_v47 = vadd.f32 %v2601_v23, %v2524_v39  ;;  %v9461_v23 = vld [vmem:[%s11253_s5 + $0x70] sm:$0xff]   ;;  %v10638_v35 = vld [vmem:[%s11253_s5 + $0xa0] sm:$0xff]  }
 0x268   : > { %v2627_v6 = vmax.f32 %v2624_v20, 0.0 }
 0x269   : > { %v2625_v48 = vmax.f32 %v2622_v51, 0.0  ;;  %v2623_v55 = vadd.f32 %v10598_v31, %v2613_v47 }
 0x26a   : > { %v8080_v49 = vpack.c.bf16 %v2627_v6, %v2627_v6 }
 0x26b   : > { %v8078_v53 = vpack.c.bf16 %v2625_v48, %v2625_v48  ;;  %v2626_v54 = vmax.f32 %v2623_v55, 0.0  ;;  %v9458_v48 = vld [vmem:[%s11253_s5 + $0x58] sm:$0xff]  }
 0x26c   : > { %2645 = vst.msk [vmem:[#allocation3 + $0x8] sm:$0x3] %vm2644_vm12, %v8080_v49 }
 0x26d   : > { %2642 = vst.msk [vmem:[#allocation3] sm:$0xf] %vm2641_vm13, %v8078_v53  ;;  %v8079_v33 = vpack.c.bf16 %v2626_v54, %v2626_v54  ;;  %v8668_v50 = vpop.f32.mrb[76].mxu1 }
 0x26e   : > { %v2835_v44 = vadd.f32 %v8678_v29, %v8668_v50  ;;  %v2748_v43 = vpop.f32.mrb[77].mxu1 }
 0x26f   : > { %v8698_v56 = vpop.f32.mrb[76].mxu0  ;;  %2643 = vst.msk [vmem:[#allocation3 + $0x4] sm:$0xf] %vm2641_vm13, %v8079_v33  ;;  %v2827_v9 = vadd.f32 %v2826_v27, %v2748_v43  ;;  %v8669_v58 = vpop.f32.mrb[78].mxu1  ;;  %v9456_v27 = vld [vmem:[%s11253_s5 + $0x48] sm:$0xff]  }
 0x270   : > { %v3001_v57 = vpop.f32.mrb[77].mxu0  ;;  %v2751_v60 = vpop.f32.mrb[79].mxu1  ;;  %v9464_v43 = vld [vmem:[%s11253_s5 + $0x88] sm:$0xff]  }
 0x271   : > { %v8699_v59 = vpop.f32.mrb[78].mxu0  ;;  %v2830_v52 = vadd.f32 %v2829_v40, %v2751_v60 }
 0x272   : > { %v3004_v46 = vpop.f32.mrb[79].mxu0 }
 0x273   : > { %v10606_v61 = vld [vmem:[#allocation3 + $0x8] ss:$0 sps:$4 sm:$0x33]  }
 0x274   : > { %v4405_v36 = vld [vmem:[#allocation3] sm:$0xf]  ;;  %v4442_v0 = vshll.u32 %v10606_v61, 16  ;;  %v9451_v3 = vld [vmem:[#allocation3 + $0x8] ss:$0 sps:$4 sm:$0x11]  }
 0x275   : > { %v4608_v5 = vld [vmem:[#allocation3] sm:$0xe]  ;;  %v4446_v2 = vshrl.u32 %v10606_v61, 16 }
 0x276   : > { %v4406_v62 = vld [vmem:[#allocation3 + $0x4] sm:$0xf]  ;;  %v4444_v19 = vrot.slane %v4442_v0, 1 }
 0x277   : > { %v7676_v63 = vcombine.low %v4405_v36, %v4406_v62  ;;  %v7699_v41 = vcombine.low %v4608_v5, %v4406_v62 }
 0x278   : > { %v4448_v17 = vor.u32 %v4446_v2, %v4444_v19 }
 0x279   : > { %v8688_v10 = vpop.f32.mrb[80].mxu1  ;;  %8860 = vmatprep.mubr.msk.bf16.mxu0 %vm4473_vm14, %v7676_v63  ;;  %v4437_v14 = vshll.u32 %v7676_v63, 16  ;;  %v4435_v16 = vshrl.u32 %v7676_v63, 16  ;;  %v4621_v28 = vrot.slane %v7699_v41, 1 }
 0x27a   : > { %v2922_v11 = vadd.f32 %v8688_v10, %v2835_v44  ;;  %v2906_v12 = vpop.f32.mrb[81].mxu1  ;;  %8861 = vmatmul.mubr.msk.bf16.vlgmr.msra.gmra.mrb[108].mxu0 %vm4473_vm14, %v9451_v3  ;;  %v9471_v10 = vld [vmem:[%s11253_s5 + $0x98] sm:$0xff]  }
 0x27b   : > { %v8718_v1 = vpop.f32.mrb[80].mxu0  ;;  %v2920_v13 = vadd.f32 %v2906_v12, %v2827_v9  ;;  %v8689_v15 = vpop.f32.mrb[82].mxu1  ;;  %v4439_v18 = vrot.slane %v4437_v14, 1  ;;  %8877 = vmatpush3.bf16.msra.mxu0 %v10592_v38  ;;  %v4622_v38 = vrot.slane %v10606_v61, 1  ;;  %v9466_v61 = vld [vmem:[%s11253_s5 + $0x90] sm:$0xff]   ;;  %v10660_v14 = vld [vmem:[%s11253_s5 + $0xc0] sm:$0xff]  }
 0x27c   : > { %v3201_v42 = vpop.f32.mrb[81].mxu0  ;;  %v2909_v22 = vpop.f32.mrb[83].mxu1  ;;  %v3017_v24 = vadd.f32 %v8698_v56, %v2922_v11  ;;  %8878 = vmatprep.subr.bf16.mxu0 %v9460_v8  ;;  %v9462_v56 = vld [vmem:[%s11253_s5 + $0x80] sm:$0xff]  }
 0x27d   : > { %v8719_v21 = vpop.f32.mrb[82].mxu0  ;;  %v2921_v7 = vadd.f32 %v2909_v22, %v2830_v52  ;;  %v4440_v26 = vor.u32 %v4439_v18, %v4435_v16  ;;  %v3015_v29 = vadd.f32 %v3001_v57, %v2920_v13  ;;  %v4623_v45 = vsel %vm1948_vm3, %v4621_v28, %v4622_v38 }
 0x27e   : > { %v3204_v25 = vpop.f32.mrb[83].mxu0 }
 0x27f   : > { %v4445_v30 = vsel %vm1774_vm5, %v4440_v26, %v4444_v19  ;;  %v3016_v4 = vadd.f32 %v3004_v46, %v2921_v7  ;;  %8879 = vmatpush3.bf16.msra.mxu0 %v9460_v8 }
 0x280   : > { %8848 = vmatprep.mubr.msk.bf16.mxu1 %vm4473_vm14, %v4445_v30  ;;  %8880 = vmatprep.subr.bf16.mxu0 %v9461_v23 }
 0x281   : > { %8849 = vmatmul.mubr.msk.bf16.vlgmr.msra.gmra.mrb[112].mxu1 %vm4473_vm14, %v4448_v17 }
 0x282   : > { %8865 = vmatpush3.bf16.msra.mxu1 %v10586_v37  ;;  %8872 = vmatprep.mubr.msk.bf16.mxu1 %vm4473_vm14, %v4623_v45 }
 0x283   : > { %8866 = vmatprep.subr.bf16.mxu1 %v9456_v27  ;;  %8881 = vmatpush3.bf16.msra.mxu0 %v9461_v23 }
 0x284   : > { %8882 = vmatprep.subr.bf16.mxu0 %v9463_v32 }
 0x285   : > { %v8708_v39 = vpop.f32.mrb[84].mxu1 }
 0x286   : > { %v3129_v40 = vadd.f32 %v8708_v39, %v3017_v24  ;;  %8867 = vmatpush3.bf16.msra.mxu1 %v9456_v27  ;;  %v3113_v51 = vpop.f32.mrb[85].mxu1 }
 0x287   : > { %v8738_v20 = vpop.f32.mrb[84].mxu0  ;;  %v3127_v37 = vadd.f32 %v3113_v51, %v3015_v29  ;;  %v8709_v6 = vpop.f32.mrb[86].mxu1  ;;  %8868 = vmatprep.subr.bf16.mxu1 %v9457_v34  ;;  %8883 = vmatpush3.bf16.msra.mxu0 %v9463_v32 }
 0x288   : > { %v3399_v47 = vpop.f32.mrb[85].mxu0  ;;  %v3116_v49 = vpop.f32.mrb[87].mxu1  ;;  %v3217_v53 = vadd.f32 %v8718_v1, %v3129_v40  ;;  %8900 = vmatprep.subr.bf16.mxu0 %v10638_v35 }
 0x289   : > { %v8739_v55 = vpop.f32.mrb[86].mxu0  ;;  %v3128_v54 = vadd.f32 %v3116_v49, %v3016_v4  ;;  %v3215_v50 = vadd.f32 %v3201_v42, %v3127_v37 }
 0x28a   : > { %v3402_v33 = vpop.f32.mrb[87].mxu0  ;;  %8869 = vmatpush3.bf16.msra.mxu1 %v9457_v34 }
 0x28b   : > { %8870 = vmatprep.subr.bf16.mxu1 %v9458_v48  ;;  %v3216_v44 = vadd.f32 %v3204_v25, %v3128_v54 }
 0x28e   : > { %8871 = vmatpush3.bf16.msra.mxu1 %v9458_v48 }
 0x28f   : > { %8888 = vmatprep.subr.bf16.mxu1 %v9462_v56 }
 0x291   : > { %8873 = vmatmul.mubr.msk.bf16.vlgmr.msra.gmra.mrb[116].mxu1 %vm4473_vm14, %v4622_v38  ;;  %v8728_v9 = vpop.f32.mrb[88].mxu1 }
 0x292   : > { %v3312_v57 = vadd.f32 %v8728_v9, %v3217_v53  ;;  %v3296_v59 = vpop.f32.mrb[89].mxu1  ;;  %8889 = vmatpush3.bf16.msra.mxu1 %v9462_v56 }
 0x293   : > { %v8758_v58 = vpop.f32.mrb[88].mxu0  ;;  %v3310_v60 = vadd.f32 %v3296_v59, %v3215_v50  ;;  %v8729_v46 = vpop.f32.mrb[90].mxu1  ;;  %8890 = vmatprep.subr.bf16.mxu1 %v9464_v43 }
 0x294   : > { %v3634_v52 = vpop.f32.mrb[89].mxu0  ;;  %v3299_v62 = vpop.f32.mrb[91].mxu1  ;;  %v3415_v63 = vadd.f32 %v8738_v20, %v3312_v57 }
 0x295   : > { %v8759_v36 = vpop.f32.mrb[90].mxu0  ;;  %v3311_v0 = vadd.f32 %v3299_v62, %v3216_v44  ;;  %v3413_v5 = vadd.f32 %v3399_v47, %v3310_v60  ;;  %v9472_v44 = vld [vmem:[%s11253_s5 + $0xa8] sm:$0xff]   ;;  %v9473_v62 = vld [vmem:[%s11253_s5 + $0xb0] sm:$0xff]  }
 0x296   : > { %v3637_v3 = vpop.f32.mrb[91].mxu0  ;;  %8891 = vmatpush3.bf16.msra.mxu1 %v9464_v43 }
 0x297   : > { %v3414_v8 = vadd.f32 %v3402_v33, %v3311_v0  ;;  %8892 = vmatprep.subr.bf16.mxu1 %v9466_v61 }
 0x29a   : > { %8893 = vmatpush3.bf16.msra.mxu1 %v9466_v61 }
 0x29b   : > { %8894 = vmatprep.subr.bf16.mxu1 %v9471_v10 }
 0x29d   : > { %v8748_v41 = vpop.f32.mrb[92].mxu1 }
 0x29e   : > { %v3503_v11 = vadd.f32 %v8748_v41, %v3415_v63  ;;  %v3487_v12 = vpop.f32.mrb[93].mxu1  ;;  %8895 = vmatpush3.bf16.msra.mxu1 %v9471_v10 }
 0x29f   : > { %v8778_v1 = vpop.f32.mrb[92].mxu0  ;;  %v3501_v13 = vadd.f32 %v3487_v12, %v3413_v5  ;;  %v8749_v15 = vpop.f32.mrb[94].mxu1  ;;  %8912 = vmatprep.subr.bf16.mxu1 %v10660_v14 }
 0x2a0   : > { %v3795_v42 = vpop.f32.mrb[93].mxu0  ;;  %v3513_v16 = vadd.f32 %v10598_v31, %v3503_v11  ;;  %v3490_v19 = vpop.f32.mrb[95].mxu1  ;;  %v9476_v15 = vld [vmem:[%s11253_s5 + $0xc8] sm:$0xff]  }
 0x2a1   : > { %v8779_v18 = vpop.f32.mrb[94].mxu0  ;;  %v3511_v21 = vadd.f32 %v10598_v31, %v3501_v13  ;;  %v3502_v22 = vadd.f32 %v3490_v19, %v3414_v8  ;;  %v9477_v19 = vld [vmem:[%s11253_s5 + $0xd0] sm:$0xff]  }
 0x2a2   : > { %v3798_v2 = vpop.f32.mrb[95].mxu0  ;;  %v3516_v24 = vmax.f32 %v3513_v16, 0.0  ;;  %v9474_v16 = vld [vmem:[%s11253_s5 + $0xb8] sm:$0xff]  }
 0x2a3   : > { %v3514_v23 = vmax.f32 %v3511_v21, 0.0  ;;  %v3512_v7 = vadd.f32 %v10598_v31, %v3502_v22  ;;  %v9478_v21 = vld [vmem:[%s11253_s5 + $0xe0] sm:$0xff]  }
 0x2a4   : > { %v8083_v25 = vpack.c.bf16 %v3516_v24, %v3516_v24 }
 0x2a5   : > { %v8081_v26 = vpack.c.bf16 %v3514_v23, %v3514_v23  ;;  %v3515_v28 = vmax.f32 %v3512_v7, 0.0  ;;  %v9480_v7 = vld [vmem:[%s11253_s5 + $0xe8] sm:$0xff]  }
 0x2a6   : > { %3532 = vst.msk [vmem:[#allocation3 + $0x14] sm:$0x3] %vm2644_vm12, %v8083_v25 }
 0x2a7   : > { %3530 = vst.msk [vmem:[#allocation3 + $0xc] sm:$0xf] %vm2641_vm13, %v8081_v26  ;;  %v8082_v29 = vpack.c.bf16 %v3515_v28, %v3515_v28 }
 0x2a9   : > { %3531 = vst.msk [vmem:[#allocation3 + $0x10] sm:$0xf] %vm2641_vm13, %v8082_v29  ;;  %v8768_v30 = vpop.f32.mrb[96].mxu1 }
 0x2aa   : > { %v3719_v17 = vadd.f32 %v8768_v30, %v8758_v58  ;;  %v3710_v27 = vpop.f32.mrb[97].mxu1 }
 0x2ab   : > { %v8798_v38 = vpop.f32.mrb[96].mxu0  ;;  %v3711_v4 = vadd.f32 %v3710_v27, %v3634_v52  ;;  %v8769_v45 = vpop.f32.mrb[98].mxu1 }
 0x2ac   : > { %v3992_v32 = vpop.f32.mrb[97].mxu0  ;;  %v3713_v39 = vpop.f32.mrb[99].mxu1  ;;  %v3811_v40 = vadd.f32 %v8778_v1, %v3719_v17  ;;  %v9482_v45 = vld [vmem:[%s11253_s5 + $0xf0] sm:$0xff]  }
 0x2ad   : > { %v8799_v34 = vpop.f32.mrb[98].mxu0  ;;  %v3714_v20 = vadd.f32 %v3713_v39, %v3637_v3  ;;  %v3809_v37 = vadd.f32 %v3795_v42, %v3711_v4  ;;  %v10669_v47 = vld [vmem:[#allocation3 + $0x14] ss:$0 sps:$4 sm:$0x33]   ;;  %v9487_v39 = vld [vmem:[%s11253_s5 + $0xf8] sm:$0xff]  }
 0x2ae   : > { %v3995_v51 = vpop.f32.mrb[99].mxu0  ;;  %v4705_v48 = vld [vmem:[#allocation3 + $0xc] sm:$0xf]  ;;  %v4826_v33 = vshll.u32 %v10669_v47, 16  ;;  %v4928_v43 = vrot.slane %v10669_v47, 1  ;;  %v4830_v5 = vshrl.u32 %v10669_v47, 16 }
 0x2af   : > { %v3810_v6 = vadd.f32 %v3798_v2, %v3714_v20  ;;  %v4914_v49 = vld [vmem:[#allocation3 + $0xc] sm:$0xe]  ;;  %v9468_v50 = vld [vmem:[#allocation3 + $0x14] ss:$0 sps:$4 sm:$0x11]   ;;  %v9479_v2 = vld [vmem:[%s11253_s5 + $0xd8] sm:$0xff]  }
 0x2b0   : > { %v4706_v55 = vld [vmem:[#allocation3 + $0x10] sm:$0xf]  ;;  %v4828_v52 = vrot.slane %v4826_v33, 1 }
 0x2b1   : > { %v7714_v53 = vcombine.low %v4705_v48, %v4706_v55  ;;  %v7745_v54 = vcombine.low %v4914_v49, %v4706_v55 }
 0x2b2   : > { %v4832_v13 = vor.u32 %v4830_v5, %v4828_v52 }
 0x2b3   : > { %8884 = vmatprep.mubr.msk.bf16.mxu0 %vm4473_vm14, %v7714_v53  ;;  %v4927_v56 = vrot.slane %v7745_v54, 1  ;;  %v4821_v9 = vshll.u32 %v7714_v53, 16  ;;  %v4819_v59 = vshrl.u32 %v7714_v53, 16 }
 0x2b4   : > { %8885 = vmatmul.mubr.msk.bf16.vlgmr.msra.gmra.mrb[112].mxu0 %vm4473_vm14, %v9468_v50 }
 0x2b5   : > { %8901 = vmatpush3.bf16.msra.mxu0 %v10638_v35  ;;  %v8788_v57 = vpop.f32.mrb[100].mxu1  ;;  %v4929_v58 = vsel %vm1948_vm3, %v4927_v56, %v4928_v43  ;;  %v4823_v60 = vrot.slane %v4821_v9, 1 }
 0x2b6   : > { %v3906_v46 = vadd.f32 %v8788_v57, %v3811_v40  ;;  %v3890_v36 = vpop.f32.mrb[101].mxu1  ;;  %8908 = vmatprep.mubr.msk.bf16.mxu0 %vm4473_vm14, %v4929_v58  ;;  %8902 = vmatprep.subr.bf16.mxu0 %v9472_v44 }
 0x2b7   : > { %v8818_v61 = vpop.f32.mrb[100].mxu0  ;;  %v3904_v63 = vadd.f32 %v3890_v36, %v3809_v37  ;;  %v8789_v3 = vpop.f32.mrb[102].mxu1  ;;  %v4824_v35 = vor.u32 %v4823_v60, %v4819_v59 }
 0x2b8   : > { %v4172_v0 = vpop.f32.mrb[101].mxu0  ;;  %v3893_v10 = vpop.f32.mrb[103].mxu1  ;;  %v4008_v41 = vadd.f32 %v8798_v38, %v3906_v46 }
 0x2b9   : > { %v8819_v8 = vpop.f32.mrb[102].mxu0  ;;  %v3905_v11 = vadd.f32 %v3893_v10, %v3810_v6  ;;  %8903 = vmatpush3.bf16.msra.mxu0 %v9472_v44  ;;  %v4829_v12 = vsel %vm1774_vm5, %v4824_v35, %v4828_v52  ;;  %v4006_v42 = vadd.f32 %v3992_v32, %v3904_v63  ;;  %v9483_v32 = vld [vmem:[%s11253_s5 + $0x100] sm:$0xff]  }
 0x2ba   : > { %v4175_v1 = vpop.f32.mrb[103].mxu0  ;;  %8896 = vmatprep.mubr.msk.bf16.mxu1 %vm4473_vm14, %v4829_v12  ;;  %8904 = vmatprep.subr.bf16.mxu0 %v9473_v62 }
 0x2bb   : > { %8897 = vmatmul.mubr.msk.bf16.vlgmr.msra.gmra.mrb[120].mxu1 %vm4473_vm14, %v4832_v13  ;;  %v4007_v18 = vadd.f32 %v3995_v51, %v3905_v11  ;;  %v9489_v11 = vld [vmem:[%s11253_s5 + $0x110] sm:$0xff]  }
 0x2bc   : > { %8913 = vmatpush3.bf16.msra.mxu1 %v10660_v14 }
 0x2bd   : > { %8905 = vmatpush3.bf16.msra.mxu0 %v9473_v62  ;;  %8914 = vmatprep.subr.bf16.mxu1 %v9476_v15 }
 0x2be   : > { %8906 = vmatprep.subr.bf16.mxu0 %v9474_v16 }
 0x2c0   : > { %8915 = vmatpush3.bf16.msra.mxu1 %v9476_v15  ;;  %v9490_v15 = vld [vmem:[%s11253_s5 + $0x118] sm:$0xff]  }
 0x2c1   : > { %8907 = vmatpush3.bf16.msra.mxu0 %v9474_v16  ;;  %v8808_v22 = vpop.f32.mrb[104].mxu1  ;;  %8916 = vmatprep.subr.bf16.mxu1 %v9477_v19 }
 0x2c2   : > { %v4096_v14 = vadd.f32 %v8808_v22, %v4008_v41  ;;  %v4080_v23 = vpop.f32.mrb[105].mxu1  ;;  %8924 = vmatprep.subr.bf16.mxu0 %v9478_v21  ;;  %v9491_v22 = vld [vmem:[%s11255_s7] sm:$0xff]  }
 0x2c3   : > { %v8838_v24 = vpop.f32.mrb[104].mxu0  ;;  %v4094_v25 = vadd.f32 %v4080_v23, %v4006_v42  ;;  %v8809_v28 = vpop.f32.mrb[106].mxu1 }
 0x2c4   : > { %v4359_v26 = vpop.f32.mrb[105].mxu0  ;;  %8909 = vmatmul.mubr.msk.bf16.vlgmr.msra.gmra.mrb[116].mxu0 %vm4473_vm14, %v4928_v43  ;;  %v4083_v30 = vpop.f32.mrb[107].mxu1  ;;  %v4188_v17 = vadd.f32 %v8818_v61, %v4096_v14  ;;  %8917 = vmatpush3.bf16.msra.mxu1 %v9477_v19  ;;  %v9661_v14 = vmov 0.0  }
 0x2c5   : > { %v8839_v29 = vpop.f32.mrb[106].mxu0  ;;  %v4095_v38 = vadd.f32 %v4083_v30, %v4007_v18  ;;  %v4186_v4 = vadd.f32 %v4172_v0, %v4094_v25  ;;  %8925 = vmatpush3.bf16.msra.mxu0 %v9478_v21  ;;  %8918 = vmatprep.subr.bf16.mxu1 %v9479_v2  ;;  %v9493_v25 = vld [vmem:[%s11255_s7 + $0x8] sm:$0xff]  }
 0x2c6   : > { %v4362_v27 = vpop.f32.mrb[107].mxu0  ;;  %8926 = vmatprep.subr.bf16.mxu0 %v9480_v7  ;;  %v9494_v30 = vld [vmem:[%s11255_s7 + $0x28] sm:$0xff]  }
 0x2c7   : > { %v4187_v34 = vadd.f32 %v4175_v1, %v4095_v38  ;;  %v9495_v38 = vld [vmem:[%s11255_s7 + $0x10] sm:$0xff]  }
 0x2c8   : > { %8919 = vmatpush3.bf16.msra.mxu1 %v9479_v2 }
 0x2c9   : > { %8927 = vmatpush3.bf16.msra.mxu0 %v9480_v7  ;;  %8936 = vmatprep.subr.bf16.mxu1 %v9483_v32  ;;  %v9492_v7 = vld [vmem:[%s11255_s7 + $0x20] sm:$0xff]  }
 0x2ca   : > { %8928 = vmatprep.subr.bf16.mxu0 %v9482_v45 }
 0x2cd   : > { %v8828_v40 = vpop.f32.mrb[108].mxu1  ;;  %8929 = vmatpush3.bf16.msra.mxu0 %v9482_v45 }
 0x2ce   : > { %v4287_v20 = vadd.f32 %v8828_v40, %v4188_v17  ;;  %v4271_v51 = vpop.f32.mrb[109].mxu1  ;;  %8930 = vmatprep.subr.bf16.mxu0 %v9487_v39 }
 0x2cf   : > { %v4285_v37 = vadd.f32 %v4271_v51, %v4186_v4  ;;  %v8829_v47 = vpop.f32.mrb[110].mxu1  ;;  %v9497_v4 = vld [vmem:[%s11255_s7 + $0x18] sm:$0xff]  }
 0x2d0   : > { %v4375_v6 = vadd.f32 %v8838_v24, %v4287_v20  ;;  %v4274_v48 = vpop.f32.mrb[111].mxu1 }
 0x2d1   : > { %v4373_v55 = vadd.f32 %v4359_v26, %v4285_v37  ;;  %v4286_v49 = vadd.f32 %v4274_v48, %v4187_v34  ;;  %8931 = vmatpush3.bf16.msra.mxu0 %v9487_v39 }
 0x2d2   : > { %v4385_v53 = vadd.f32 %v10598_v31, %v4375_v6  ;;  %8948 = vmatprep.subr.bf16.mxu0 %v9661_v14 }
 0x2d3   : > { %v4383_v54 = vadd.f32 %v10598_v31, %v4373_v55  ;;  %v4374_v33 = vadd.f32 %v4362_v27, %v4286_v49  ;;  %v9496_v27 = vld [vmem:[%s11255_s7 + $0x30] sm:$0xff]  }
 0x2d4   : > { %v4388_v50 = vmax.f32 %v4385_v53, 0.0 }
 0x2d5   : > { %v4386_v44 = vmax.f32 %v4383_v54, 0.0  ;;  %v4384_v56 = vadd.f32 %v10598_v31, %v4374_v33  ;;  %v9488_v31 = vld [vmem:[%s11253_s5 + $0x108] sm:$0xff]  }
 0x2d6   : > { %v8086_v43 = vpack.c.bf16 %v4388_v50, %v4388_v50 }
 0x2d7   : > { %v8084_v9 = vpack.c.bf16 %v4386_v44, %v4386_v44  ;;  %v4387_v57 = vmax.f32 %v4384_v56, 0.0 }
 0x2d8   : > { %4404 = vst.msk [vmem:[#allocation3 + $0x20] sm:$0x3] %vm2644_vm12, %v8086_v43 }
 0x2d9   : > { %4402 = vst.msk [vmem:[#allocation3 + $0x18] sm:$0xf] %vm2641_vm13, %v8084_v9  ;;  %v8085_v58 = vpack.c.bf16 %v4387_v57, %v4387_v57 }
 0x2db   : > { %4403 = vst.msk [vmem:[#allocation3 + $0x1c] sm:$0xf] %vm2641_vm13, %v8085_v58 }
 0x2df   : > { %v9485_v59 = vld [vmem:[#allocation3 + $0x20] ss:$0 sps:$4 sm:$0x33]  }
 0x2e0   : > { %v5011_v60 = vld [vmem:[#allocation3 + $0x18] sm:$0xf]  ;;  %v5132_v62 = vshll.u32 %v9485_v59, 16  ;;  %v9484_v63 = vld [vmem:[#allocation3 + $0x20] ss:$0 sps:$4 sm:$0x11]  }
 0x2e1   : > { %v5220_v46 = vld [vmem:[#allocation3 + $0x18] sm:$0xe]  ;;  %v5234_v3 = vrot.slane %v9485_v59, 1  ;;  %v5136_v12 = vshrl.u32 %v9485_v59, 16 }
 0x2e2   : > { %v5012_v52 = vld [vmem:[#allocation3 + $0x1c] sm:$0xf]  ;;  %v5134_v41 = vrot.slane %v5132_v62, 1 }
 0x2e3   : > { %v7760_v61 = vcombine.low %v5011_v60, %v5012_v52  ;;  %v7791_v36 = vcombine.low %v5220_v46, %v5012_v52 }
 0x2e4   : > { %v5138_v42 = vor.u32 %v5136_v12, %v5134_v41 }
 0x2e5   : > { %8920 = vmatprep.mubr.msk.bf16.mxu1 %vm4473_vm14, %v7760_v61  ;;  %v5233_v0 = vrot.slane %v7791_v36, 1  ;;  %v5127_v35 = vshll.u32 %v7760_v61, 16  ;;  %v5125_v8 = vshrl.u32 %v7760_v61, 16 }
 0x2e6   : > { %8921 = vmatmul.mubr.msk.bf16.vlgmr.msra.gmra.mrb[124].mxu1 %vm4473_vm14, %v9484_v63 }
 0x2e7   : > { %8937 = vmatpush3.bf16.msra.mxu1 %v9483_v32  ;;  %v5235_v5 = vsel %vm1948_vm3, %v5233_v0, %v5234_v3  ;;  %v5129_v10 = vrot.slane %v5127_v35, 1  ;;  %v9498_v32 = vld [vmem:[%s11255_s7 + $0x38] sm:$0xff]  }
 0x2e8   : > { %8944 = vmatprep.mubr.msk.bf16.mxu1 %vm4473_vm14, %v5235_v5  ;;  %8938 = vmatprep.subr.bf16.mxu1 %v9488_v31 }
 0x2e9   : > { %v5130_v1 = vor.u32 %v5129_v10, %v5125_v8 }
 0x2eb   : > { %8939 = vmatpush3.bf16.msra.mxu1 %v9488_v31  ;;  %v5135_v13 = vsel %vm1774_vm5, %v5130_v1, %v5134_v41 }
 0x2ec   : > { %8932 = vmatprep.mubr.msk.bf16.mxu0 %vm4473_vm14, %v5135_v13  ;;  %8940 = vmatprep.subr.bf16.mxu1 %v9489_v11 }
 0x2ed   : > { %8933 = vmatmul.mubr.msk.bf16.vlgmr.msra.gmra.mrb[120].mxu0 %vm4473_vm14, %v5138_v42 }
 0x2ee   : > { %8949 = vmatpush3.bf16.msra.mxu0 %v9492_v7  ;;  %8956 = vmatprep.mubr.msk.bf16.mxu0 %vm9662_vm15, %v9661_v14 }
 0x2ef   : > { %8941 = vmatpush3.bf16.msra.mxu1 %v9489_v11  ;;  %8950 = vmatprep.subr.bf16.mxu0 %v9661_v14 }
 0x2f0   : > { %8942 = vmatprep.subr.bf16.mxu1 %v9490_v15 }
 0x2f2   : > { %8951 = vmatpush3.bf16.msra.mxu0 %v9494_v30 }
 0x2f3   : > { %8943 = vmatpush3.bf16.msra.mxu1 %v9490_v15  ;;  %8952 = vmatprep.subr.bf16.mxu0 %v9661_v14  ;;  %v7798_v15 = vld [vmem:[%s11254_s6] ss:$0 sm:$0xff] }
 0x2f4   : > { %8960 = vmatprep.subr.bf16.mxu1 %v9661_v14 }
 0x2f6   : > { %8945 = vmatmul.mubr.msk.bf16.vlgmr.msra.gmra.mrb[128].mxu1 %vm4473_vm14, %v5234_v3  ;;  %8953 = vmatpush3.bf16.msra.mxu0 %v9496_v27 }
 0x2f7   : > { %8961 = vmatpush3.bf16.msra.mxu1 %v9491_v22  ;;  %8968 = vmatprep.mubr.msk.bf16.mxu1 %vm9662_vm15, %v9661_v14 }
 0x2f8   : > { %8962 = vmatprep.subr.bf16.mxu1 %v9661_v14  ;;  %8954 = vmatprep.subr.bf16.mxu0 %v9661_v14 }
 0x2fa   : > { %8955 = vmatpush3.bf16.msra.mxu0 %v9498_v32  ;;  %v9501_v32 = vld [vmem:[%s11255_s7 + $0x40] sm:$0xff]  }
 0x2fb   : > { %8963 = vmatpush3.bf16.msra.mxu1 %v9493_v25  ;;  %8972 = vmatprep.subr.bf16.mxu0 %v9661_v14 }
 0x2fc   : > { %8964 = vmatprep.subr.bf16.mxu1 %v9661_v14 }
 0x2ff   : > { %8965 = vmatpush3.bf16.msra.mxu1 %v9495_v38  ;;  %v9500_v38 = vld [vmem:[%s11255_s7 + $0x60] sm:$0xff]  }
 0x300   : > { %8966 = vmatprep.subr.bf16.mxu1 %v9661_v14 }
 0x303   : > { %8967 = vmatpush3.bf16.msra.mxu1 %v9497_v4 }
 0x304   : > { %8984 = vmatprep.subr.bf16.mxu1 %v9661_v14 }
 0x34d   : > { %v8862_v16 = vpop.f32.mrb[108].mxu0 }
 0x34e   : > { %v4594_v18 = vpop.f32.mrb[109].mxu0 }
 0x34f   : > { %v8863_v19 = vpop.f32.mrb[110].mxu0 }
 0x350   : > { %v4597_v21 = vpop.f32.mrb[111].mxu0 }
 0x354   : > { %v8850_v2 = vpop.f32.mrb[112].mxu1 }
 0x355   : > { %v4603_v24 = vadd.f32 %v8862_v16, %v8850_v2  ;;  %v4514_v23 = vpop.f32.mrb[113].mxu1 }
 0x356   : > { %v4595_v26 = vadd.f32 %v4594_v18, %v4514_v23  ;;  %v8851_v28 = vpop.f32.mrb[114].mxu1 }
 0x357   : > { %v4517_v29 = vpop.f32.mrb[115].mxu1 }
 0x358   : > { %v4598_v17 = vadd.f32 %v4597_v21, %v4517_v29 }
 0x364   : > { %v8874_v45 = vpop.f32.mrb[116].mxu1 }
 0x365   : > { %v4704_v34 = vadd.f32 %v8874_v45, %v4603_v24  ;;  %v4688_v39 = vpop.f32.mrb[117].mxu1  ;;  %v9502_v45 = vld [vmem:[%s11255_s7 + $0x68] sm:$0xff]  }
 0x366   : > { %v4702_v40 = vadd.f32 %v4688_v39, %v4595_v26  ;;  %v8875_v20 = vpop.f32.mrb[118].mxu1  ;;  %v9503_v39 = vld [vmem:[%s11255_s7 + $0x48] sm:$0xff]  }
 0x367   : > { %v4691_v51 = vpop.f32.mrb[119].mxu1 }
 0x368   : > { %v4703_v37 = vadd.f32 %v4691_v51, %v4598_v17  ;;  %v9505_v51 = vld [vmem:[%s11255_s7 + $0x50] sm:$0xff]  }
 0x387   : > { %v8886_v47 = vpop.f32.mrb[112].mxu0 }
 0x388   : > { %v4805_v6 = vadd.f32 %v8886_v47, %v4704_v34  ;;  %v4789_v48 = vpop.f32.mrb[113].mxu0 }
 0x389   : > { %v4803_v55 = vadd.f32 %v4789_v48, %v4702_v40  ;;  %v8887_v49 = vpop.f32.mrb[114].mxu0  ;;  %v9504_v40 = vld [vmem:[%s11255_s7 + $0x70] sm:$0xff]   ;;  %v9509_v48 = vld [vmem:[%s11255_s7 + $0xa0] sm:$0xff]  }
 0x38a   : > { %v4792_v53 = vpop.f32.mrb[115].mxu0  ;;  %v9510_v49 = vld [vmem:[%s11255_s7 + $0x80] sm:$0xff]  }
 0x38b   : > { %v4804_v54 = vadd.f32 %v4792_v53, %v4703_v37  ;;  %v9506_v37 = vld [vmem:[%s11255_s7 + $0x78] sm:$0xff]   ;;  %v9511_v53 = vld [vmem:[%s11255_s7 + $0xa8] sm:$0xff]  }
 0x38e   : > { %v8898_v33 = vpop.f32.mrb[120].mxu1 }
 0x38f   : > { %v4913_v50 = vadd.f32 %v8898_v33, %v4805_v6  ;;  %v4897_v44 = vpop.f32.mrb[121].mxu1  ;;  %v9508_v6 = vld [vmem:[%s11255_s7 + $0x58] sm:$0xff]   ;;  %v9512_v33 = vld [vmem:[%s11255_s7 + $0x88] sm:$0xff]  }
 0x390   : > { %v4911_v56 = vadd.f32 %v4897_v44, %v4803_v55  ;;  %v8899_v43 = vpop.f32.mrb[122].mxu1 }
 0x391   : > { %v4900_v9 = vpop.f32.mrb[123].mxu1  ;;  %v9515_v43 = vld [vmem:[%s11255_s7 + $0xb8] sm:$0xff]  }
 0x392   : > { %v4912_v57 = vadd.f32 %v4900_v9, %v4804_v54 }
 0x397   : > { %v8910_v58 = vpop.f32.mrb[116].mxu0 }
 0x398   : > { %v5010_v59 = vadd.f32 %v8910_v58, %v4913_v50  ;;  %v4994_v60 = vpop.f32.mrb[117].mxu0  ;;  %v9513_v50 = vld [vmem:[%s11255_s7 + $0xb0] sm:$0xff]   ;;  %v9518_v58 = vld [vmem:[%s11255_s7 + $0xe0] sm:$0xff]  }
 0x399   : > { %v5008_v52 = vadd.f32 %v4994_v60, %v4911_v56  ;;  %v8911_v46 = vpop.f32.mrb[118].mxu0  ;;  %v9514_v56 = vld [vmem:[%s11255_s7 + $0x90] sm:$0xff]   ;;  %v9519_v60 = vld [vmem:[%s11255_s7 + $0xc0] sm:$0xff]  }
 0x39a   : > { %v4997_v61 = vpop.f32.mrb[119].mxu0 }
 0x39b   : > { %v5009_v36 = vadd.f32 %v4997_v61, %v4912_v57  ;;  %v9517_v57 = vld [vmem:[%s11255_s7 + $0x98] sm:$0xff]   ;;  %v9521_v61 = vld [vmem:[%s11255_s7 + $0xc8] sm:$0xff]  }
 0x3b9   : > { %v8922_v62 = vpop.f32.mrb[124].mxu1 }
 0x3ba   : > { %v5111_v63 = vadd.f32 %v8922_v62, %v5010_v59  ;;  %v5095_v31 = vpop.f32.mrb[125].mxu1 }
 0x3bb   : > { %v5109_v0 = vadd.f32 %v5095_v31, %v5008_v52  ;;  %v8923_v3 = vpop.f32.mrb[126].mxu1  ;;  %v9520_v52 = vld [vmem:[%s11255_s7 + $0xe8] sm:$0xff]   ;;  %v9524_v31 = vld [vmem:[%s11255_s7 + $0xf8] sm:$0xff]  }
 0x3bc   : > { %v5098_v35 = vpop.f32.mrb[127].mxu1  ;;  %v9526_v3 = vld [vmem:[%s11255_s7 + $0xd8] sm:$0xff]  }
 0x3bd   : > { %v5110_v5 = vadd.f32 %v5098_v35, %v5009_v36  ;;  %v9522_v36 = vld [vmem:[%s11255_s7 + $0xf0] sm:$0xff]   ;;  %v9527_v35 = vld [vmem:[%s11255_s7 + $0x120] sm:$0xff]  }
 0x3c0   : > { %v8934_v8 = vpop.f32.mrb[120].mxu0 }
 0x3c1   : > { %v5219_v10 = vadd.f32 %v8934_v8, %v5111_v63  ;;  %v5203_v41 = vpop.f32.mrb[121].mxu0  ;;  %v9523_v63 = vld [vmem:[%s11255_s7 + $0xd0] sm:$0xff]   ;;  %v9528_v8 = vld [vmem:[%s11255_s7 + $0x100] sm:$0xff]  }
 0x3c2   : > { %v5217_v11 = vadd.f32 %v5203_v41, %v5109_v0  ;;  %v8935_v1 = vpop.f32.mrb[122].mxu0 }
 0x3c3   : > { %v5206_v12 = vpop.f32.mrb[123].mxu0  ;;  %v9531_v1 = vld [vmem:[%s11255_s7 + $0x130] sm:$0xff]  }
 0x3c4   : > { %v5218_v13 = vadd.f32 %v5206_v12, %v5110_v5 }
 0x3c9   : > { %v8946_v42 = vpop.f32.mrb[128].mxu1 }
 0x3ca   : > { %v5316_v16 = vadd.f32 %v8946_v42, %v5219_v10  ;;  %v5300_v18 = vpop.f32.mrb[129].mxu1  ;;  %v9529_v10 = vld [vmem:[%s11255_s7 + $0x128] sm:$0xff]   ;;  %v9533_v42 = vld [vmem:[%s11255_s7 + $0x138] sm:$0xff]  }
 0x3cb   : > { %v5314_v19 = vadd.f32 %v5300_v18, %v5217_v11  ;;  %v8947_v21 = vpop.f32.mrb[130].mxu1  ;;  %v9530_v11 = vld [vmem:[%s11255_s7 + $0x108] sm:$0xff]   ;;  %v9536_v18 = vld [vmem:[%s11255_s7 + $0x160] sm:$0xff]  }
 0x3cc   : > { %v5326_v22 = vadd.f32 %v7798_v15, %v5316_v16  ;;  %v5303_v2 = vpop.f32.mrb[131].mxu1  ;;  %v9535_v16 = vld [vmem:[%s11255_s7 + $0x118] sm:$0xff]   ;;  %v9537_v21 = vld [vmem:[%s11255_s7 + $0x140] sm:$0xff]  }
 0x3cd   : > { %v5324_v24 = vadd.f32 %v7798_v15, %v5314_v19  ;;  %v5315_v23 = vadd.f32 %v5303_v2, %v5218_v13  ;;  %v9532_v13 = vld [vmem:[%s11255_s7 + $0x110] sm:$0xff]   ;;  %v9539_v2 = vld [vmem:[%s11255_s7 + $0x148] sm:$0xff]  }
 0x3ce   : > { %v5329_v7 = vmax.f32 %v5326_v22, 0.0  ;;  %v9538_v22 = vld [vmem:[%s11255_s7 + $0x168] sm:$0xff]  }
 0x3cf   : > { %v5327_v25 = vmax.f32 %v5324_v24, 0.0  ;;  %v5325_v26 = vadd.f32 %v7798_v15, %v5315_v23  ;;  %v9540_v24 = vld [vmem:[%s11255_s7 + $0x170] sm:$0xff]  }
 0x3d0   : > { %v8089_v28 = vpack.c.bf16 %v5329_v7, %v5329_v7  ;;  %v9541_v7 = vld [vmem:[%s11255_s7 + $0x150] sm:$0xff]  }
 0x3d1   : > { %v8087_v29 = vpack.c.bf16 %v5327_v25, %v5327_v25  ;;  %v5328_v30 = vmax.f32 %v5325_v26, 0.0  ;;  %v9542_v25 = vld [vmem:[%s11255_s7 + $0x178] sm:$0xff]  }
 0x3d2   : > { %5346 = vst.msk [vmem:[#allocation4 + $0x8] sm:$0x1] %vm5345_vm0, %v8089_v28  ;;  %v9544_v28 = vld [vmem:[%s11255_s7 + $0x158] sm:$0xff]  }
 0x3d3   : > { %5343 = vst.msk [vmem:[#allocation4] sm:$0xf] %vm2641_vm13, %v8087_v29  ;;  %v8088_v17 = vpack.c.bf16 %v5328_v30, %v5328_v30  ;;  %v9545_v29 = vld [vmem:[%s11255_s7 + $0x1a0] sm:$0xff]  }
 0x3d5   : > { %5344 = vst.msk [vmem:[#allocation4 + $0x4] sm:$0xf] %vm2641_vm13, %v8088_v17  ;;  %v9546_v17 = vld [vmem:[%s11255_s7 + $0x180] sm:$0xff]  }
 0x3da   : > { %v5347_v27 = vld [vmem:[#allocation4] sm:$0x1] }
 0x3db   : > { %v7810_v4 = vcombine.low %v5347_v27, %v5347_v27  ;;  %8969 = vmatmul.mubr.msk.bf16.vlgmr.msra.gmra.mrb[132].mxu1 %vm4473_vm14, %v5347_v27  ;;  %v9507_v20 = vld [vmem:[#allocation4] ss:$0 sps:$4 sm:$0x22]  }
 0x3dc   : > { %8985 = vmatpush3.bf16.msra.mxu1 %v9500_v38  ;;  %8992 = vmatprep.mubr.msk.bf16.mxu1 %vm9662_vm15, %v9661_v14  ;;  %v5597_v47 = vshrl.u32 %v9507_v20, 16  ;;  %v5518_v54 = vrot.slane %v9507_v20, 1  ;;  %v9516_v44 = vld [vmem:[#allocation4] ss:$0 sps:$4 sm:$0x44]   ;;  %v9547_v38 = vld [vmem:[%s11255_s7 + $0x1a8] sm:$0xff]  }
 0x3dd   : > { %v5369_v34 = vshrl.u32 %v7810_v4, 16  ;;  %8986 = vmatprep.subr.bf16.mxu1 %v9661_v14  ;;  %v5760_v9 = vshrl.u32 %v9516_v44, 16  ;;  %v5681_v46 = vrot.slane %v9516_v44, 2  ;;  %v9525_v62 = vld [vmem:[#allocation4] ss:$0 sps:$4 sm:$0x88]  }
 0x3de   : > { %v5599_v55 = vrot.slane %v5597_v47, 1  ;;  %v5923_v0 = vshrl.u32 %v9525_v62, 16  ;;  %v5844_v41 = vrot.slane %v9525_v62, 3  ;;  %v5994_v12 = vld [vmem:[#allocation4 + $0x4] sm:$0x1]  ;;  %v9548_v4 = vld [vmem:[%s11255_s7 + $0x188] sm:$0xff]  }
 0x3df   : > { %8957 = vmatmul.mubr.msk.bf16.vlgmr.msra.gmra.mrb[124].mxu0 %vm4473_vm14, %v5369_v34  ;;  %v5762_v59 = vrot.slane %v5760_v9, 2  ;;  %v7923_v15 = vcombine.low %v5994_v12, %v5994_v12  ;;  %v9543_v23 = vld [vmem:[#allocation4 + $0x4] ss:$0 sps:$4 sm:$0x22]   ;;  %v9550_v34 = vld [vmem:[%s11255_s7 + $0x190] sm:$0xff]   ;;  %v9553_v20 = vld [vmem:[%s11255_s7 + $0x198] sm:$0xff]  }
 0x3e0   : > { %8973 = vmatpush3.bf16.msra.mxu0 %v9501_v32  ;;  %8987 = vmatpush3.bf16.msra.mxu1 %v9502_v45  ;;  %v5925_v5 = vrot.slane %v5923_v0, 3  ;;  %v6247_v26 = vshrl.u32 %v9543_v23, 16  ;;  %v6168_v27 = vrot.slane %v9543_v23, 1  ;;  %v9549_v32 = vld [vmem:[%s11255_s7 + $0x1b0] sm:$0xff]   ;;  %v9555_v47 = vld [vmem:[%s11255_s7 + $0x1c0] sm:$0xff]   ;;  %v9562_v44 = vld [vmem:[%s11255_s7 + $0x1d8] sm:$0xff]  }
 0x3e1   : > { %8974 = vmatprep.subr.bf16.mxu0 %v9661_v14  ;;  %8988 = vmatprep.subr.bf16.mxu1 %v9661_v14  ;;  %v6085_v19 = vshrl.u32 %v7923_v15, 16  ;;  %v9552_v45 = vld [vmem:[#allocation4 + $0x4] ss:$0 sps:$4 sm:$0x44]   ;;  %v9571_v62 = vld [vmem:[%s11255_s7 + $0x218] sm:$0xff]   ;;  %v9573_v0 = vld [vmem:[%s11257_s9 + $0x8] sm:$0xff]  }
 0x3e2   : > { %8980 = vmatprep.mubr.msk.bf16.mxu0 %vm9662_vm15, %v9661_v14  ;;  %v6249_v30 = vrot.slane %v6247_v26, 1  ;;  %v9564_v9 = vld [vmem:[%s11255_s7 + $0x200] sm:$0xff]  }
 0x3e4   : > { %8975 = vmatpush3.bf16.msra.mxu0 %v9503_v39  ;;  %8989 = vmatpush3.bf16.msra.mxu1 %v9504_v40  ;;  %v9551_v39 = vld [vmem:[%s11255_s7 + $0x1b8] sm:$0xff]   ;;  %v6410_v40 = vshrl.u32 %v9552_v45, 16 }
 0x3e5   : > { %8976 = vmatprep.subr.bf16.mxu0 %v9661_v14  ;;  %8990 = vmatprep.subr.bf16.mxu1 %v9661_v14 }
 0x3e8   : > { %8977 = vmatpush3.bf16.msra.mxu0 %v9505_v51  ;;  %8991 = vmatpush3.bf16.msra.mxu1 %v9506_v37  ;;  %v9554_v51 = vld [vmem:[%s11255_s7 + $0x1e0] sm:$0xff]   ;;  %v6412_v37 = vrot.slane %v6410_v40, 2 }
 0x3e9   : > { %8978 = vmatprep.subr.bf16.mxu0 %v9661_v14  ;;  %9008 = vmatprep.subr.bf16.mxu1 %v9661_v14 }
 0x3eb   : > { %8993 = vmatmul.mubr.msk.bf16.vlgmr.msra.gmra.mrb[136].mxu1 %vm4473_vm14, %v5599_v55  ;;  %v9557_v55 = vld [vmem:[%s11255_s7 + $0x1c8] sm:$0xff]  }
 0x3ec   : > { %8979 = vmatpush3.bf16.msra.mxu0 %v9508_v6  ;;  %9009 = vmatpush3.bf16.msra.mxu1 %v9509_v48  ;;  %v9556_v6 = vld [vmem:[%s11255_s7 + $0x1e8] sm:$0xff]   ;;  %v6331_v48 = vrot.slane %v9552_v45, 2 }
 0x3ed   : > { %8996 = vmatprep.subr.bf16.mxu0 %v9661_v14  ;;  %9010 = vmatprep.subr.bf16.mxu1 %v9661_v14 }
 0x3ee   : > { %9016 = vmatprep.mubr.msk.bf16.mxu1 %vm9662_vm15, %v9661_v14 }
 0x3ef   : > { %8981 = vmatmul.mubr.msk.bf16.vlgmr.msra.gmra.mrb[128].mxu0 %vm4473_vm14, %v5518_v54  ;;  %v9559_v54 = vld [vmem:[%s11255_s7 + $0x1d0] sm:$0xff]  }
 0x3f0   : > { %8997 = vmatpush3.bf16.msra.mxu0 %v9510_v49  ;;  %9011 = vmatpush3.bf16.msra.mxu1 %v9511_v53  ;;  %v9558_v49 = vld [vmem:[%s11255_s7 + $0x1f0] sm:$0xff]   ;;  %v9561_v53 = vld [vmem:[#allocation4 + $0x4] ss:$0 sps:$4 sm:$0x88]  }
 0x3f1   : > { %8998 = vmatprep.subr.bf16.mxu0 %v9661_v14  ;;  %9012 = vmatprep.subr.bf16.mxu1 %v9661_v14 }
 0x3f2   : > { %9004 = vmatprep.mubr.msk.bf16.mxu0 %vm9662_vm15, %v9661_v14 }
 0x3f4   : > { %8999 = vmatpush3.bf16.msra.mxu0 %v9512_v33  ;;  %9013 = vmatpush3.bf16.msra.mxu1 %v9513_v50  ;;  %v9560_v33 = vld [vmem:[%s11255_s7 + $0x1f8] sm:$0xff]   ;;  %v6573_v50 = vshrl.u32 %v9561_v53, 16 }
 0x3f5   : > { %9000 = vmatprep.subr.bf16.mxu0 %v9661_v14  ;;  %9014 = vmatprep.subr.bf16.mxu1 %v9661_v14 }
 0x3f8   : > { %9001 = vmatpush3.bf16.msra.mxu0 %v9514_v56  ;;  %9015 = vmatpush3.bf16.msra.mxu1 %v9515_v43  ;;  %v9563_v56 = vld [vmem:[%s11255_s7 + $0x220] sm:$0xff]   ;;  %v6575_v43 = vrot.slane %v6573_v50, 3 }
 0x3f9   : > { %9002 = vmatprep.subr.bf16.mxu0 %v9661_v14  ;;  %9032 = vmatprep.subr.bf16.mxu1 %v9661_v14 }
 0x3fb   : > { %9017 = vmatmul.mubr.msk.bf16.vlgmr.msra.gmra.mrb[140].mxu1 %vm4473_vm14, %v5762_v59  ;;  %v9566_v59 = vld [vmem:[%s11255_s7 + $0x208] sm:$0xff]  }
 0x3fc   : > { %9003 = vmatpush3.bf16.msra.mxu0 %v9517_v57  ;;  %9033 = vmatpush3.bf16.msra.mxu1 %v9518_v58  ;;  %v9565_v57 = vld [vmem:[%s11255_s7 + $0x228] sm:$0xff]   ;;  %v6494_v58 = vrot.slane %v9561_v53, 3 }
 0x3fd   : > { %9020 = vmatprep.subr.bf16.mxu0 %v9661_v14  ;;  %9034 = vmatprep.subr.bf16.mxu1 %v9661_v14 }
 0x3fe   : > { %9040 = vmatprep.mubr.msk.bf16.mxu1 %vm9662_vm15, %v9661_v14 }
 0x3ff   : > { %9005 = vmatmul.mubr.msk.bf16.vlgmr.msra.gmra.mrb[132].mxu0 %vm4473_vm14, %v5681_v46  ;;  %v9568_v46 = vld [vmem:[%s11255_s7 + $0x210] sm:$0xff]  }
 0x400   : > { %9021 = vmatpush3.bf16.msra.mxu0 %v9519_v60  ;;  %9035 = vmatpush3.bf16.msra.mxu1 %v9520_v52  ;;  %v9567_v60 = vld [vmem:[%s11255_s7 + $0x230] sm:$0xff]   ;;  %v6644_v52 = vld [vmem:[#allocation4 + $0x8] sm:$0x1] }
 0x401   : > { %9022 = vmatprep.subr.bf16.mxu0 %v9661_v14  ;;  %9036 = vmatprep.subr.bf16.mxu1 %v9661_v14 }
 0x402   : > { %9028 = vmatprep.mubr.msk.bf16.mxu0 %vm9662_vm15, %v9661_v14 }
 0x404   : > { %9023 = vmatpush3.bf16.msra.mxu0 %v9521_v61  ;;  %9037 = vmatpush3.bf16.msra.mxu1 %v9522_v36  ;;  %v9569_v61 = vld [vmem:[%s11255_s7 + $0x238] sm:$0xff]   ;;  %v8031_v36 = vcombine.low %v6644_v52, %v6644_v52 }
 0x405   : > { %9024 = vmatprep.subr.bf16.mxu0 %v9661_v14  ;;  %9038 = vmatprep.subr.bf16.mxu1 %v9661_v14 }
 0x408   : > { %9025 = vmatpush3.bf16.msra.mxu0 %v9523_v63  ;;  %9039 = vmatpush3.bf16.msra.mxu1 %v9524_v31  ;;  %v6735_v63 = vshrl.u32 %v8031_v36, 16  ;;  %v9572_v31 = vld [vmem:[%s11257_s9] sm:$0xff]  }
 0x409   : > { %9026 = vmatprep.subr.bf16.mxu0 %v9661_v14  ;;  %9056 = vmatprep.subr.bf16.mxu1 %v9661_v14 }
 0x40b   : > { %9041 = vmatmul.mubr.msk.bf16.vlgmr.msra.gmra.mrb[144].mxu1 %vm4473_vm14, %v5925_v5 }
 0x40c   : > { %9027 = vmatpush3.bf16.msra.mxu0 %v9526_v3  ;;  %9057 = vmatpush3.bf16.msra.mxu1 %v9527_v35  ;;  %v9574_v3 = vld [vmem:[%s11257_s9 + $0x10] sm:$0xff]   ;;  %v9575_v35 = vld [vmem:[%s11257_s9 + $0x18] sm:$0xff]  }
 0x40d   : > { %9044 = vmatprep.subr.bf16.mxu0 %v9661_v14  ;;  %9058 = vmatprep.subr.bf16.mxu1 %v9661_v14 }
 0x40e   : > { %9064 = vmatprep.mubr.msk.bf16.mxu1 %vm9662_vm15, %v9661_v14 }
 0x40f   : > { %9029 = vmatmul.mubr.msk.bf16.vlgmr.msra.gmra.mrb[136].mxu0 %vm4473_vm14, %v5844_v41 }
 0x410   : > { %9045 = vmatpush3.bf16.msra.mxu0 %v9528_v8  ;;  %9059 = vmatpush3.bf16.msra.mxu1 %v9529_v10  ;;  %v9576_v8 = vld [vmem:[%s11257_s9 + $0x20] sm:$0xff]  }
 0x411   : > { %9046 = vmatprep.subr.bf16.mxu0 %v9661_v14  ;;  %9060 = vmatprep.subr.bf16.mxu1 %v9661_v14 }
 0x412   : > { %9052 = vmatprep.mubr.msk.bf16.mxu0 %vm9662_vm15, %v9661_v14 }
 0x414   : > { %9047 = vmatpush3.bf16.msra.mxu0 %v9530_v11  ;;  %9061 = vmatpush3.bf16.msra.mxu1 %v9531_v1 }
 0x415   : > { %9048 = vmatprep.subr.bf16.mxu0 %v9661_v14  ;;  %9062 = vmatprep.subr.bf16.mxu1 %v9661_v14 }
 0x418   : > { %9049 = vmatpush3.bf16.msra.mxu0 %v9532_v13  ;;  %9063 = vmatpush3.bf16.msra.mxu1 %v9533_v42 }
 0x419   : > { %9050 = vmatprep.subr.bf16.mxu0 %v9661_v14  ;;  %9080 = vmatprep.subr.bf16.mxu1 %v9661_v14 }
 0x41b   : > { %9065 = vmatmul.mubr.msk.bf16.vlgmr.msra.gmra.mrb[148].mxu1 %vm4473_vm14, %v6085_v19  ;;  %v9580_v19 = vld [vmem:[%s11259_s11] sm:$0xff]  }
 0x41c   : > { %9051 = vmatpush3.bf16.msra.mxu0 %v9535_v16  ;;  %9081 = vmatpush3.bf16.msra.mxu1 %v9536_v18  ;;  %v9577_v16 = vld [vmem:[%s11257_s9 + $0x28] sm:$0xff]   ;;  %v9578_v18 = vld [vmem:[%s11257_s9 + $0x30] sm:$0xff]  }
 0x41d   : > { %9068 = vmatprep.subr.bf16.mxu0 %v9661_v14  ;;  %9082 = vmatprep.subr.bf16.mxu1 %v9661_v14 }
 0x41e   : > { %9088 = vmatprep.mubr.msk.bf16.mxu1 %vm9662_vm15, %v9661_v14 }
 0x41f   : > { %9053 = vmatmul.mubr.msk.bf16.vlgmr.msra.gmra.mrb[140].mxu0 %vm4473_vm14, %v5994_v12 }
 0x420   : > { %9069 = vmatpush3.bf16.msra.mxu0 %v9537_v21  ;;  %9083 = vmatpush3.bf16.msra.mxu1 %v9538_v22 }
 0x421   : > { %9070 = vmatprep.subr.bf16.mxu0 %v9661_v14  ;;  %9084 = vmatprep.subr.bf16.mxu1 %v9661_v14 }
 0x422   : > { %9076 = vmatprep.mubr.msk.bf16.mxu0 %vm9662_vm15, %v9661_v14 }
 0x424   : > { %9071 = vmatpush3.bf16.msra.mxu0 %v9539_v2  ;;  %9085 = vmatpush3.bf16.msra.mxu1 %v9540_v24  ;;  %v9581_v2 = vld [vmem:[%s11259_s11 + $0x8] sm:$0xff]  }
 0x425   : > { %9072 = vmatprep.subr.bf16.mxu0 %v9661_v14  ;;  %9086 = vmatprep.subr.bf16.mxu1 %v9661_v14 }
 0x428   : > { %9073 = vmatpush3.bf16.msra.mxu0 %v9541_v7  ;;  %9087 = vmatpush3.bf16.msra.mxu1 %v9542_v25  ;;  %v9579_v7 = vld [vmem:[%s11257_s9 + $0x38] sm:$0xff]  }
 0x429   : > { %9074 = vmatprep.subr.bf16.mxu0 %v9661_v14  ;;  %9104 = vmatprep.subr.bf16.mxu1 %v9661_v14 }
 0x42b   : > { %9089 = vmatmul.mubr.msk.bf16.vlgmr.msra.gmra.mrb[152].mxu1 %vm4473_vm14, %v6249_v30 }
 0x42c   : > { %9075 = vmatpush3.bf16.msra.mxu0 %v9544_v28  ;;  %9105 = vmatpush3.bf16.msra.mxu1 %v9545_v29  ;;  %v9582_v29 = vld [vmem:[%s11259_s11 + $0x10] sm:$0xff]  }
 0x42d   : > { %9092 = vmatprep.subr.bf16.mxu0 %v9661_v14  ;;  %9106 = vmatprep.subr.bf16.mxu1 %v9661_v14 }
 0x42e   : > { %9112 = vmatprep.mubr.msk.bf16.mxu1 %vm9662_vm15, %v9661_v14 }
 0x42f   : > { %9077 = vmatmul.mubr.msk.bf16.vlgmr.msra.gmra.mrb[144].mxu0 %vm4473_vm14, %v6168_v27  ;;  %v9583_v27 = vld [vmem:[%s11259_s11 + $0x18] sm:$0xff]  }
 0x430   : > { %9093 = vmatpush3.bf16.msra.mxu0 %v9546_v17  ;;  %9107 = vmatpush3.bf16.msra.mxu1 %v9547_v38 }
 0x431   : > { %9094 = vmatprep.subr.bf16.mxu0 %v9661_v14  ;;  %9108 = vmatprep.subr.bf16.mxu1 %v9661_v14 }
 0x432   : > { %9100 = vmatprep.mubr.msk.bf16.mxu0 %vm9662_vm15, %v9661_v14 }
 0x434   : > { %9095 = vmatpush3.bf16.msra.mxu0 %v9548_v4  ;;  %9109 = vmatpush3.bf16.msra.mxu1 %v9549_v32  ;;  %v9584_v4 = vld [vmem:[%s11259_s11 + $0x20] sm:$0xff]  }
 0x435   : > { %9096 = vmatprep.subr.bf16.mxu0 %v9661_v14  ;;  %9110 = vmatprep.subr.bf16.mxu1 %v9661_v14 }
 0x438   : > { %9097 = vmatpush3.bf16.msra.mxu0 %v9550_v34  ;;  %9111 = vmatpush3.bf16.msra.mxu1 %v9551_v39  ;;  %v9585_v34 = vld [vmem:[%s11259_s11 + $0x28] sm:$0xff]  }
 0x439   : > { %9098 = vmatprep.subr.bf16.mxu0 %v9661_v14  ;;  %9128 = vmatprep.subr.bf16.mxu1 %v9661_v14 }
 0x43b   : > { %9113 = vmatmul.mubr.msk.bf16.vlgmr.msra.gmra.mrb[156].mxu1 %vm4473_vm14, %v6412_v37 }
 0x43c   : > { %9099 = vmatpush3.bf16.msra.mxu0 %v9553_v20  ;;  %9129 = vmatpush3.bf16.msra.mxu1 %v9554_v51 }
 0x43d   : > { %9116 = vmatprep.subr.bf16.mxu0 %v9661_v14  ;;  %9130 = vmatprep.subr.bf16.mxu1 %v9661_v14 }
 0x43e   : > { %9136 = vmatprep.mubr.msk.bf16.mxu1 %vm9662_vm15, %v9661_v14 }
 0x43f   : > { %9101 = vmatmul.mubr.msk.bf16.vlgmr.msra.gmra.mrb[148].mxu0 %vm4473_vm14, %v6331_v48 }
 0x440   : > { %9117 = vmatpush3.bf16.msra.mxu0 %v9555_v47  ;;  %9131 = vmatpush3.bf16.msra.mxu1 %v9556_v6 }
 0x441   : > { %9118 = vmatprep.subr.bf16.mxu0 %v9661_v14  ;;  %9132 = vmatprep.subr.bf16.mxu1 %v9661_v14 }
 0x442   : > { %9124 = vmatprep.mubr.msk.bf16.mxu0 %vm9662_vm15, %v9661_v14 }
 0x444   : > { %9119 = vmatpush3.bf16.msra.mxu0 %v9557_v55  ;;  %9133 = vmatpush3.bf16.msra.mxu1 %v9558_v49 }
 0x445   : > { %9120 = vmatprep.subr.bf16.mxu0 %v9661_v14  ;;  %9134 = vmatprep.subr.bf16.mxu1 %v9661_v14 }
 0x448   : > { %9121 = vmatpush3.bf16.msra.mxu0 %v9559_v54  ;;  %9135 = vmatpush3.bf16.msra.mxu1 %v9560_v33 }
 0x449   : > { %9122 = vmatprep.subr.bf16.mxu0 %v9661_v14  ;;  %9152 = vmatprep.subr.bf16.mxu1 %v9661_v14 }
 0x44b   : > { %9137 = vmatmul.mubr.msk.bf16.vlgmr.msra.gmra.mrb[160].mxu1 %vm4473_vm14, %v6575_v43 }
 0x44c   : > { %9123 = vmatpush3.bf16.msra.mxu0 %v9562_v44  ;;  %9153 = vmatpush3.bf16.msra.mxu1 %v9563_v56 }
 0x44d   : > { %9140 = vmatprep.subr.bf16.mxu0 %v9661_v14  ;;  %9154 = vmatprep.subr.bf16.mxu1 %v9661_v14 }
 0x44e   : > { %9160 = vmatprep.mubr.msk.bf16.mxu1 %vm9662_vm15, %v9661_v14 }
 0x44f   : > { %9125 = vmatmul.mubr.msk.bf16.vlgmr.msra.gmra.mrb[152].mxu0 %vm4473_vm14, %v6494_v58 }
 0x450   : > { %9141 = vmatpush3.bf16.msra.mxu0 %v9564_v9  ;;  %9155 = vmatpush3.bf16.msra.mxu1 %v9565_v57 }
 0x451   : > { %9142 = vmatprep.subr.bf16.mxu0 %v9661_v14  ;;  %9156 = vmatprep.subr.bf16.mxu1 %v9661_v14 }
 0x452   : > { %9148 = vmatprep.mubr.msk.bf16.mxu0 %vm9662_vm15, %v9661_v14 }
 0x454   : > { %9143 = vmatpush3.bf16.msra.mxu0 %v9566_v59  ;;  %9157 = vmatpush3.bf16.msra.mxu1 %v9567_v60 }
 0x455   : > { %9144 = vmatprep.subr.bf16.mxu0 %v9661_v14  ;;  %9158 = vmatprep.subr.bf16.mxu1 %v9661_v14 }
 0x458   : > { %9145 = vmatpush3.bf16.msra.mxu0 %v9568_v46  ;;  %9159 = vmatpush3.bf16.msra.mxu1 %v9569_v61 }
 0x459   : > { %9146 = vmatprep.subr.bf16.mxu0 %v9661_v14  ;;  %9184 = vmatprep.subr.bf16.mxu1 %v9661_v14 }
 0x45b   : > { %9161 = vmatmul.mubr.msk.bf16.vlgmr.msra.gmra.mrb[164].mxu1 %vm4473_vm14, %v6735_v63 }
 0x45c   : > { %9147 = vmatpush3.bf16.msra.mxu0 %v9571_v62  ;;  %9200 = vmatprep.mubr.msk.bf16.mxu1 %vm9662_vm15, %v9661_v14 }
 0x45d   : > { %9164 = vmatprep.subr.bf16.mxu0 %v9661_v14  ;;  %9185 = vmatpush3.bf16.msra.mxu1 %v9580_v19 }
 0x45e   : > { %9186 = vmatprep.subr.bf16.mxu1 %v9661_v14 }
 0x45f   : > { %9149 = vmatmul.mubr.msk.bf16.vlgmr.msra.gmra.mrb[156].mxu0 %vm4473_vm14, %v6644_v52 }
 0x460   : > { %9180 = vmatprep.mubr.msk.bf16.mxu0 %vm9662_vm15, %v9661_v14  ;;  %9165 = vmatpush3.bf16.msra.mxu0 %v9572_v31 }
 0x461   : > { %9166 = vmatprep.subr.bf16.mxu0 %v9661_v14  ;;  %9187 = vmatpush3.bf16.msra.mxu1 %v9581_v2 }
 0x462   : > { %9188 = vmatprep.subr.bf16.mxu1 %v9661_v14 }
 0x464   : > { %9167 = vmatpush3.bf16.msra.mxu0 %v9573_v0 }
 0x465   : > { %9168 = vmatprep.subr.bf16.mxu0 %v9661_v14  ;;  %9189 = vmatpush3.bf16.msra.mxu1 %v9582_v29 }
 0x466   : > { %9190 = vmatprep.subr.bf16.mxu1 %v9661_v14 }
 0x468   : > { %9169 = vmatpush3.bf16.msra.mxu0 %v9574_v3 }
 0x469   : > { %9170 = vmatprep.subr.bf16.mxu0 %v9661_v14  ;;  %9191 = vmatpush3.bf16.msra.mxu1 %v9583_v27 }
 0x46a   : > { %9192 = vmatprep.subr.bf16.mxu1 %v9661_v14 }
 0x46c   : > { %9171 = vmatpush3.bf16.msra.mxu0 %v9575_v35 }
 0x46d   : > { %9172 = vmatprep.subr.bf16.mxu0 %v9661_v14  ;;  %9193 = vmatpush3.bf16.msra.mxu1 %v9584_v4 }
 0x46e   : > { %9194 = vmatprep.subr.bf16.mxu1 %v9661_v14 }
 0x470   : > { %9173 = vmatpush3.bf16.msra.mxu0 %v9576_v8 }
 0x471   : > { %9174 = vmatprep.subr.bf16.mxu0 %v9661_v14  ;;  %9195 = vmatpush3.bf16.msra.mxu1 %v9585_v34 }
 0x472   : > { %9196 = vmatprep.subr.bf16.mxu1 %v9661_v14 }
 0x474   : > { %9175 = vmatpush3.bf16.msra.mxu0 %v9577_v16 }
 0x475   : > { %9176 = vmatprep.subr.bf16.mxu0 %v9661_v14 }
 0x478   : > { %9177 = vmatpush3.bf16.msra.mxu0 %v9578_v18 }
 0x479   : > { %9178 = vmatprep.subr.bf16.mxu0 %v9661_v14 }
 0x47c   : > { %9179 = vmatpush3.bf16.msra.mxu0 %v9579_v7 }
 0x47d   : > { %9204 = vmatprep.subr.bf16.mxu0 %v9661_v14 }
 0x4ae   : > { %v5499_v5 = vpop.f32.mrb[132].mxu1 }
 0x4af   : > { %v8970_v10 = vpop.f32.mrb[133].mxu1 }
 0x4b0   : > { %v5502_v41 = vpop.f32.mrb[134].mxu1 }
 0x4b1   : > { %v8971_v11 = vpop.f32.mrb[135].mxu1 }
 0x4b2   : > { %v5432_v1 = vpop.f32.mrb[124].mxu0 }
 0x4b3   : > { %v5500_v12 = vadd.f32 %v5499_v5, %v5432_v1  ;;  %v8958_v13 = vpop.f32.mrb[125].mxu0 }
 0x4b4   : > { %v5435_v42 = vpop.f32.mrb[126].mxu0 }
 0x4b5   : > { %v8959_v15 = vpop.f32.mrb[127].mxu0 }
 0x4be   : > { %v5661_v21 = vpop.f32.mrb[136].mxu1 }
 0x4bf   : > { %v8994_v22 = vpop.f32.mrb[137].mxu1 }
 0x4c0   : > { %v5664_v24 = vpop.f32.mrb[138].mxu1 }
 0x4c1   : > { %v8995_v23 = vpop.f32.mrb[139].mxu1 }
 0x4c2   : > { %v5580_v25 = vpop.f32.mrb[128].mxu0 }
 0x4c3   : > { %v5586_v26 = vadd.f32 %v5580_v25, %v5500_v12  ;;  %v8982_v28 = vpop.f32.mrb[129].mxu0 }
 0x4c4   : > { %v5583_v30 = vpop.f32.mrb[130].mxu0 }
 0x4c5   : > { %v8983_v17 = vpop.f32.mrb[131].mxu0  ;;  %v5667_v38 = vadd.f32 %v5661_v21, %v5586_v26 }
 0x4ce   : > { %v5824_v32 = vpop.f32.mrb[140].mxu1 }
 0x4cf   : > { %v9018_v45 = vpop.f32.mrb[141].mxu1 }
 0x4d0   : > { %v5827_v39 = vpop.f32.mrb[142].mxu1 }
 0x4d1   : > { %v9019_v40 = vpop.f32.mrb[143].mxu1 }
 0x4d2   : > { %v5743_v20 = vpop.f32.mrb[132].mxu0 }
 0x4d3   : > { %v5749_v51 = vadd.f32 %v5743_v20, %v5667_v38  ;;  %v9006_v37 = vpop.f32.mrb[133].mxu0  ;;  %v6805_v20 = vld [vmem:[%s11256_s8] sm:$0x1] }
 0x4d4   : > { %v5746_v47 = vpop.f32.mrb[134].mxu0 }
 0x4d5   : > { %v9007_v6 = vpop.f32.mrb[135].mxu0  ;;  %v5830_v48 = vadd.f32 %v5824_v32, %v5749_v51 }
 0x4de   : > { %v5987_v55 = vpop.f32.mrb[144].mxu1 }
 0x4df   : > { %v9042_v49 = vpop.f32.mrb[145].mxu1 }
 0x4e0   : > { %v5990_v53 = vpop.f32.mrb[146].mxu1  ;;  %v9586_v49 = vld [vmem:[%s11259_s11 + $0x30] sm:$0xff]  }
 0x4e1   : > { %v9043_v54 = vpop.f32.mrb[147].mxu1  ;;  %9197 = vmatpush3.bf16.msra.mxu1 %v9586_v49  ;;  %v9587_v53 = vld [vmem:[%s11259_s11 + $0x38] sm:$0xff]  }
 0x4e2   : > { %v5906_v33 = vpop.f32.mrb[136].mxu0  ;;  %v9588_v54 = vld [vmem:[%s11261_s13] sm:$0xff]   ;;  %9198 = vmatprep.subr.bf16.mxu1 %v9661_v14 }
 0x4e3   : > { %v5912_v50 = vadd.f32 %v5906_v33, %v5830_v48  ;;  %v9030_v44 = vpop.f32.mrb[137].mxu0  ;;  %v9589_v33 = vld [vmem:[%s11261_s13 + $0x8] sm:$0xff]  }
 0x4e4   : > { %v5909_v56 = vpop.f32.mrb[138].mxu0  ;;  %v9591_v44 = vld [vmem:[%s11261_s13 + $0x18] sm:$0xff]  }
 0x4e5   : > { %v9031_v43 = vpop.f32.mrb[139].mxu0  ;;  %v5993_v9 = vadd.f32 %v5987_v55, %v5912_v50  ;;  %9199 = vmatpush3.bf16.msra.mxu1 %v9587_v53  ;;  %v9590_v50 = vld [vmem:[%s11261_s13 + $0x10] sm:$0xff]   ;;  %v9592_v56 = vld [vmem:[%s11261_s13 + $0x20] sm:$0xff]  }
 0x4e6   : > { %v9593_v43 = vld [vmem:[%s11261_s13 + $0x28] sm:$0xff]  }
 0x4ee   : > { %v6148_v57 = vpop.f32.mrb[148].mxu1 }
 0x4ef   : > { %v9066_v58 = vpop.f32.mrb[149].mxu1 }
 0x4f0   : > { %v6151_v59 = vpop.f32.mrb[150].mxu1 }
 0x4f1   : > { %v9067_v60 = vpop.f32.mrb[151].mxu1 }
 0x4f2   : > { %v6065_v52 = vpop.f32.mrb[140].mxu0 }
 0x4f3   : > { %v6071_v46 = vadd.f32 %v6065_v52, %v5993_v9  ;;  %v9054_v61 = vpop.f32.mrb[141].mxu0  ;;  %v6825_v9 = vld [vmem:[%s11258_s10] sm:$0x1] }
 0x4f4   : > { %v6068_v36 = vpop.f32.mrb[142].mxu0 }
 0x4f5   : > { %v9055_v62 = vpop.f32.mrb[143].mxu0  ;;  %v6154_v63 = vadd.f32 %v6148_v57, %v6071_v46  ;;  %v9594_v36 = vld [vmem:[%s11261_s13 + $0x30] sm:$0xff]  }
 0x4f6   : > { %v9595_v62 = vld [vmem:[%s11261_s13 + $0x38] sm:$0xff]  }
 0x4fe   : > { %v6311_v31 = vpop.f32.mrb[152].mxu1 }
 0x4ff   : > { %v9090_v0 = vpop.f32.mrb[153].mxu1 }
 0x500   : > { %v6314_v3 = vpop.f32.mrb[154].mxu1 }
 0x501   : > { %v9091_v35 = vpop.f32.mrb[155].mxu1 }
 0x502   : > { %v6230_v5 = vpop.f32.mrb[144].mxu0 }
 0x503   : > { %v6236_v8 = vadd.f32 %v6230_v5, %v6154_v63  ;;  %v9078_v10 = vpop.f32.mrb[145].mxu0  ;;  %v6932_v63 = vld [vmem:[%s11260_s12] sm:$0x1] }
 0x504   : > { %v6233_v41 = vpop.f32.mrb[146].mxu0 }
 0x505   : > { %v9079_v11 = vpop.f32.mrb[147].mxu0  ;;  %v6317_v1 = vadd.f32 %v6311_v31, %v6236_v8  ;;  %v7039_v41 = vld [vmem:[%s11262_s14] sm:$0x1] }
 0x50e   : > { %v6474_v12 = vpop.f32.mrb[156].mxu1 }
 0x50f   : > { %v9114_v13 = vpop.f32.mrb[157].mxu1 }
 0x510   : > { %v6477_v42 = vpop.f32.mrb[158].mxu1 }
 0x511   : > { %v9115_v15 = vpop.f32.mrb[159].mxu1 }
 0x512   : > { %v6393_v16 = vpop.f32.mrb[148].mxu0 }
 0x513   : > { %v6399_v18 = vadd.f32 %v6393_v16, %v6317_v1  ;;  %v9102_v19 = vpop.f32.mrb[149].mxu0 }
 0x514   : > { %v6396_v21 = vpop.f32.mrb[150].mxu0 }
 0x515   : > { %v9103_v22 = vpop.f32.mrb[151].mxu0  ;;  %v6480_v2 = vadd.f32 %v6474_v12, %v6399_v18 }
 0x51e   : > { %v6637_v24 = vpop.f32.mrb[160].mxu1 }
 0x51f   : > { %v9138_v23 = vpop.f32.mrb[161].mxu1 }
 0x520   : > { %v6640_v7 = vpop.f32.mrb[162].mxu1 }
 0x521   : > { %v9139_v25 = vpop.f32.mrb[163].mxu1 }
 0x522   : > { %v6556_v26 = vpop.f32.mrb[152].mxu0 }
 0x523   : > { %v6562_v28 = vadd.f32 %v6556_v26, %v6480_v2  ;;  %v9126_v29 = vpop.f32.mrb[153].mxu0 }
 0x524   : > { %v6559_v30 = vpop.f32.mrb[154].mxu0 }
 0x525   : > { %v9127_v17 = vpop.f32.mrb[155].mxu0  ;;  %v6643_v38 = vadd.f32 %v6637_v24, %v6562_v28 }
 0x52e   : > { %v6798_v27 = vpop.f32.mrb[164].mxu1 }
 0x52f   : > { %v9162_v4 = vpop.f32.mrb[165].mxu1 }
 0x530   : > { %v6801_v32 = vpop.f32.mrb[166].mxu1 }
 0x531   : > { %v9163_v45 = vpop.f32.mrb[167].mxu1 }
 0x532   : > { %v6715_v34 = vpop.f32.mrb[156].mxu0 }
 0x533   : > { %v6721_v39 = vadd.f32 %v6715_v34, %v6643_v38  ;;  %v9150_v40 = vpop.f32.mrb[157].mxu0 }
 0x534   : > { %v6718_v51 = vpop.f32.mrb[158].mxu0 }
 0x535   : > { %v6804_v37 = vadd.f32 %v6798_v27, %v6721_v39  ;;  %v9151_v47 = vpop.f32.mrb[159].mxu0 }
 0x537   : > { %v6806_v6 = vadd.f32 %v6805_v20, %v6804_v37 }
 0x539   : > { %v6807_v48 = vmax.f32 %v6806_v6, 0.0 }
 0x53b   : > { %v6808_v55 = vpack.c.bf16 %v6807_v48, %v6807_v48 }
 0x53d   : > { %9181 = vmatmul.mubr.bf16.vlgmr.msra.gmra.mrb[160].mxu0 %v6808_v55 }
 0x53e   : > { %9220 = vmatprep.mubr.msk.bf16.mxu0 %vm9662_vm15, %v9661_v14  ;;  %9205 = vmatpush3.bf16.msra.mxu0 %v9588_v54 }
 0x53f   : > { %9206 = vmatprep.subr.bf16.mxu0 %v9661_v14 }
 0x542   : > { %9207 = vmatpush3.bf16.msra.mxu0 %v9589_v33 }
 0x543   : > { %9208 = vmatprep.subr.bf16.mxu0 %v9661_v14 }
 0x546   : > { %9209 = vmatpush3.bf16.msra.mxu0 %v9590_v50 }
 0x547   : > { %9210 = vmatprep.subr.bf16.mxu0 %v9661_v14 }
 0x54a   : > { %9211 = vmatpush3.bf16.msra.mxu0 %v9591_v44 }
 0x54b   : > { %9212 = vmatprep.subr.bf16.mxu0 %v9661_v14 }
 0x54e   : > { %9213 = vmatpush3.bf16.msra.mxu0 %v9592_v56 }
 0x54f   : > { %9214 = vmatprep.subr.bf16.mxu0 %v9661_v14 }
 0x552   : > { %9215 = vmatpush3.bf16.msra.mxu0 %v9593_v43 }
 0x553   : > { %9216 = vmatprep.subr.bf16.mxu0 %v9661_v14 }
 0x556   : > { %9217 = vmatpush3.bf16.msra.mxu0 %v9594_v36 }
 0x557   : > { %9218 = vmatprep.subr.bf16.mxu0 %v9661_v14 }
 0x55a   : > { %9219 = vmatpush3.bf16.msra.mxu0 %v9595_v62 }
 0x610   : > { %v6908_v57 = vpop.f32.mrb[160].mxu0 }
 0x611   : > { %v6909_v58 = vadd.f32 %v6908_v57, %v6825_v9  ;;  %v9182_v59 = vpop.f32.mrb[161].mxu0 }
 0x612   : > { %v6911_v60 = vpop.f32.mrb[162].mxu0 }
 0x613   : > { %v6914_v52 = vmax.f32 %v6909_v58, 0.0  ;;  %v9183_v46 = vpop.f32.mrb[163].mxu0 }
 0x615   : > { %v6915_v61 = vpack.c.bf16 %v6914_v52, %v6914_v52 }
 0x617   : > { %9201 = vmatmul.mubr.bf16.vlgmr.msra.gmra.mrb[168].mxu1 %v6915_v61 }
 0x6ea   : > { %v7015_v31 = vpop.f32.mrb[168].mxu1 }
 0x6eb   : > { %v7016_v0 = vadd.f32 %v7015_v31, %v6932_v63  ;;  %v9202_v3 = vpop.f32.mrb[169].mxu1 }
 0x6ec   : > { %v7018_v35 = vpop.f32.mrb[170].mxu1 }
 0x6ed   : > { %v7021_v5 = vmax.f32 %v7016_v0, 0.0  ;;  %v9203_v8 = vpop.f32.mrb[171].mxu1 }
 0x6ef   : > { %v7022_v10 = vpack.c.bf16 %v7021_v5, %v7021_v5 }
 0x6f1   : > { %9221 = vmatmul.mubr.bf16.vlgmr.msra.gmra.mrb[164].mxu0 %v7022_v10 }
 0x7c4   : > { %v7122_v14 = vpop.f32.mrb[164].mxu0 }
 0x7c5   : > { %v7123_v11 = vadd.f32 %v7122_v14, %v7039_v41  ;;  %v9222_v1 = vpop.f32.mrb[165].mxu0 }
 0x7c6   : > { %v7125_v12 = vpop.f32.mrb[166].mxu0 }
 0x7c7   : > { %7128 = vst [vmem:[%s486_s18] sm:$0x1] %v7123_v11  ;;  %v9223_v13 = vpop.f32.mrb[167].mxu0 }
 0x7c8   : > { %9609 = shalt.err (!%p9606_p3)
}
 0x7c9   : > { %s9610_s16 = scalar_lea.hbm %s11206_s25, 16  ;;  %s9614_s30 = scalar_lea.hbm %s11263_s15, 32 }
 0x7ca   : > { %p9611_p4 = scmp.ne.s32.totalorder %s11206_s25, %s9610_s16  ;;  %p9615_p9 = scmp.lt.u32.totalorder %s11206_s25, %s11263_s15 }
 0x7cb   : > { %p9616_p10 = scmp.lt.u32.totalorder %s9614_s30, %s9610_s16  ;;  %p9618_p12 = scmp.lt.u32.totalorder %s9610_s16, %s11206_s25 }
 0x7cc   : > { %p9612_p7 = pnand %p9611_p4, %p9782_p5 }
 0x7cd   : > { %p9617_p11 = por %p9616_p10, %p9615_p9 }
 0x7ce   : > { %p9613_p8 = pneg %p9612_p7 }
 0x7cf   : > { %p9619_p13 = por %p9618_p12, %p9617_p11 }
 0x7d1   : > { %p9620_p0 = pnand %p9619_p13, %p9613_p8 }
 0x7d3   : > { %9623 = shalt.err (!%p9620_p0)
}
 0x7d4   : > { %9225 = dma.vmem_to_hbm [thread:$0]  (%p9782_p5), %s11208_s17, 16, %s11206_s25, %s7130_s26  }
 0x7d5 PF: > { %s11276_s22 = sld [smem:[#allocation8_spill]]  ;;  %p9231_p1 = scmp.ge.s32.totalorder %s9658_s21, 2 }
 0x7d7   : > { %p9228_p2 = pnand %p9231_p1, %p9786_p6 }
 0x7db   : > { %s7154_s24 = sand.u32 1, %s11276_s22  }
 0x7dc   : > { %s7155_s29 = scalar_lea.sflag [#allocation6], %s7154_s24 }
 0x7dd   : > { %9641 = dma.done.wait (!%p9228_p2), %s7155_s29, 16  }
 0x7de   : > { %9643 = vsyncadd (!%p9228_p2), %s7155_s29, 4294967280  ;;  %s11278_s21 = sld [smem:[#allocation10_spill]]  ;;  %s11279_s16 = sld [smem:[#allocation9_spill]] }
 0x7df   : > { %s11280_s20 = sld [smem:[#allocation11_spill]]  ;;  %s11281_s18 = smov %s9650_s19 }
 0x7e4   : > { %p25_p3 = scmp.ge.s32.totalorder %s11278_s21, 4   ;;  %s11282_s19 = smov %s11279_s16 }
 0x7e6   :  { %27 = sbr.rel (!%p25_p3) target bundleno = 3 (0x3), region = 148 }
 0x7ed   :  { %7159 = vsyncpa [#allocation6], 1 }
 0x7ee   :  { %7161 = vsyncpa [#allocation6 + $0x1], 1 }

</bundles_post_ra>
